<compile_context>
chip_gen: v7x
topology: tpu7x:2x2x1
jax: 0.10.0
libtpu: 0.0.40
codegen_flags: <defaults>
</compile_context>

<pallas_src>
import functools

import jax
import jax.numpy as jnp
from jax import lax
from jax.experimental import pallas as pl
from jax.experimental.pallas import tpu as pltpu

_VMEM_SPEC = pl.BlockSpec(memory_space=pltpu.MemorySpace.VMEM)
_LANE = 128
_SUBLANE = 8


def _round_up(x, m):
    return ((x + m - 1) // m) * m


@functools.lru_cache(maxsize=None)
def _vmem_limit_bytes():
    # v7x has only 64 MiB physical VMEM; derive the scoped limit per generation instead of
    # hard-coding 100 MiB. If the query fails we simply don't raise the limit (tiles fit the
    # default scoped limit anyway).
    try:
        cap = int(pltpu.get_tpu_info().vmem_capacity_bytes)
        return int(min((cap * 3) // 4, 96 * 1024 * 1024))
    except Exception:
        return None


def _compiler_params(dimension_semantics=None):
    kwargs = {}
    if dimension_semantics is not None:
        kwargs["dimension_semantics"] = dimension_semantics
    limit = _vmem_limit_bytes()
    if limit is not None:
        kwargs["vmem_limit_bytes"] = limit
    return pltpu.CompilerParams(**kwargs)


# ----------------------------------------------------------------------------
# Fused tiled matmul kernel: conv-as-matmul + folded BN (+residual) (+ReLU)
# ----------------------------------------------------------------------------
def _fused_matmul_kernel(x_ref, w_ref, scale_ref, shift_ref, *rest, relu, has_res):
    if has_res:
        res_ref, o_ref, acc_ref = rest
    else:
        o_ref, acc_ref = rest
    k = pl.program_id(2)

    @pl.when(k == 0)
    def _init():
        acc_ref[...] = jnp.zeros_like(acc_ref)

    acc_ref[...] += jnp.dot(x_ref[...], w_ref[...], preferred_element_type=jnp.float32)

    @pl.when(k == pl.num_programs(2) - 1)
    def _epilogue():
        # f32 epilogue (v5e has no bf16 VPU); folded eval-mode BN scale/shift.
        y = acc_ref[...] * scale_ref[...] + shift_ref[...]
        if has_res:
            y = y + res_ref[...].astype(jnp.float32)       # fused residual add
        if relu:
            y = jnp.maximum(y, 0.0)
        o_ref[...] = y.astype(o_ref.dtype)


def _pick_tk(kp, cap=512):
    """Largest multiple of 128 that divides kp (kp is a multiple of 128) and is <= cap."""
    best = _LANE
    t = _LANE
    while t <= min(cap, kp):
        if kp % t == 0:
            best = t
        t += _LANE
    return best


def fused_matmul(x, w, scale, shift, residual=None, relu=False,
                 out_dtype=jnp.bfloat16, tm_cap=512, tn_cap=256, tk_cap=512):
    """(M, K) @ (Kp, Np) on the MXU in bf16 with an f32 accumulator and a fused
    scale/shift (+residual, +ReLU) epilogue.  K is the last (arbitrary) grid axis."""
    m, k_act = x.shape
    kp, np_ = w.shape                       # weights are pre-padded: kp, np_ multiples of 128
    tm = min(tm_cap, _round_up(m, _SUBLANE))
    mp = _round_up(m, tm)
    tn = min(tn_cap, np_)
    tk = _pick_tk(kp, tk_cap)

    x = jnp.pad(x.astype(jnp.bfloat16), ((0, mp - m), (0, kp - k_act)))

    args = [x, w, scale, shift]
    in_specs = [
        pl.BlockSpec((tm, tk), lambda i, j, k: (i, k)),
        pl.BlockSpec((tk, tn), lambda i, j, k: (k, j)),
        pl.BlockSpec((1, tn), lambda i, j, k: (0, j)),
        pl.BlockSpec((1, tn), lambda i, j, k: (0, j)),
    ]
    has_res = residual is not None
    if has_res:
        res = jnp.pad(residual.astype(jnp.bfloat16), ((0, mp - m), (0, 0)))
        args.append(res)
        in_specs.append(pl.BlockSpec((tm, tn), lambda i, j, k: (i, j)))

    out = pl.pallas_call(
        functools.partial(_fused_matmul_kernel, relu=relu, has_res=has_res),
        out_shape=jax.ShapeDtypeStruct((mp, np_), out_dtype),
        grid_spec=pltpu.PrefetchScalarGridSpec(
            num_scalar_prefetch=0,
            grid=(mp // tm, np_ // tn, kp // tk),
            in_specs=in_specs,
            out_specs=pl.BlockSpec((tm, tn), lambda i, j, k: (i, j)),
            scratch_shapes=[pltpu.VMEM((tm, tn), jnp.float32)],
        ),
        compiler_params=_compiler_params(("parallel", "parallel", "arbitrary")),
    )(*args)
    return out[:m] if mp != m else out


# ----------------------------------------------------------------------------
# Fused tail kernel: global avg-pool -> fc(512->256) -> linear(256->H) -> BN1d
# ----------------------------------------------------------------------------
def _tail_kernel(x_ref, fcw_ref, fcb_ref, lw_ref, lb_ref, g_ref, b_ref, o_ref):
    # AdaptiveAvgPool2d((1,1)) over spatial, then resnet.fc, then self.linear, then
    # BatchNorm1d in training mode (batch statistics, biased variance, eps=1e-5).
    feats = jnp.mean(x_ref[...].astype(jnp.float32), axis=1)                 # (B, 512)
    f1 = jnp.dot(feats.astype(jnp.bfloat16), fcw_ref[...],
                 preferred_element_type=jnp.float32) + fcb_ref[...]          # (B, 256)
    y = jnp.dot(f1.astype(jnp.bfloat16), lw_ref[...],
                preferred_element_type=jnp.float32) + lb_ref[...]            # (B, Hpad)
    mean = jnp.mean(y, axis=0, keepdims=True)
    var = jnp.mean(jnp.square(y - mean), axis=0, keepdims=True)
    o_ref[...] = g_ref[...] * ((y - mean) * lax.rsqrt(var + 1e-5)) + b_ref[...]


def pallas_tail(x, fc_w, fc_b, lin_w, lin_b, gamma, beta):
    b = x.shape[0]
    hp = lin_w.shape[1]
    return pl.pallas_call(
        _tail_kernel,
        out_shape=jax.ShapeDtypeStruct((b, hp), jnp.float32),
        in_specs=[_VMEM_SPEC] * 7,
        out_specs=_VMEM_SPEC,
        compiler_params=_compiler_params(),
    )(x, fc_w, fc_b, lin_w, lin_b, gamma, beta)


# ----------------------------------------------------------------------------
# Conv / ResNet plumbing (im2col + pooling glue in JAX; matmuls in Pallas)
# ----------------------------------------------------------------------------
def _im2col(x, kh, kw, stride, pad):
    # x: (B, H, W, C) -> (B, Ho, Wo, C*kh*kw), feature order (c, i, j) matching
    # PyTorch's weight.reshape(O, C*kh*kw).
    if pad:
        x = jnp.pad(x, ((0, 0), (pad, pad), (pad, pad), (0, 0)))
    b, h, w, c = x.shape
    ho = (h - kh) // stride + 1
    wo = (w - kw) // stride + 1
    cols = []
    for i in range(kh):
        for j in range(kw):
            cols.append(x[:, i:i + stride * ho:stride, j:j + stride * wo:stride, :])
    patches = jnp.stack(cols, axis=-1)                  # (B, Ho, Wo, C, kh*kw)
    return patches.reshape(b, ho, wo, c * kh * kw), ho, wo


def conv_bn(x, cp, kh, kw, stride, pad, relu=False, residual=None):
    """x: (B, H, W, Cs) bf16 NHWC (channel-padded).  cp: packed conv params.
    Returns (B, Ho, Wo, Np) bf16 with BN/residual/ReLU fused into the matmul epilogue."""
    b = x.shape[0]
    patches, ho, wo = _im2col(x, kh, kw, stride, pad)
    m = b * ho * wo
    xm = patches.reshape(m, patches.shape[-1])
    np_ = cp["w"].shape[1]
    res = None if residual is None else residual.reshape(m, np_)
    y = fused_matmul(xm, cp["w"], cp["scale"], cp["shift"], residual=res, relu=relu)
    return y.reshape(b, ho, wo, np_)


def basic_block(x, blk, stride):
    out = conv_bn(x, blk["conv1"], 3, 3, stride, 1, relu=True)
    if "down" in blk:
        identity = conv_bn(x, blk["down"], 1, 1, stride, 0, relu=False)
    else:
        identity = x
    # conv2 + BN + residual add + ReLU fused into a single kernel epilogue.
    return conv_bn(out, blk["conv2"], 3, 3, 1, 1, relu=True, residual=identity)


def resnet18_features(images_nchw, P):
    x = jnp.transpose(images_nchw, (0, 2, 3, 1)).astype(jnp.bfloat16)     # NCHW -> NHWC, bf16
    x = conv_bn(x, P["stem"], 7, 7, stride=2, pad=3, relu=True)           # (B,16,16,128)
    # TODO(synk): 3x3/s2/p1 max-pool kept as plain-JAX reduce_window glue (small-window pooling).
    x = lax.reduce_window(x, jnp.asarray(-jnp.inf, dtype=x.dtype), lax.max,
                          (1, 3, 3, 1), (1, 2, 2, 1), ((0, 0), (1, 1), (1, 1), (0, 0)))
    for name, stride in (("layer1", 1), ("layer2", 2), ("layer3", 2), ("layer4", 2)):
        blocks = P[name]
        x = basic_block(x, blocks[0], stride)
        x = basic_block(x, blocks[1], 1)
    return x                                                              # (B, 1, 1, 512)


def encoder_cnn_forward(images_nchw, P, hidden_size):
    # torch.no_grad() only disables autodiff; forward values are unchanged.
    x = resnet18_features(images_nchw, P)
    b, h, w, c = x.shape
    x = x.reshape(b, h * w, c)
    out = pallas_tail(x, P["fc_w"], P["fc_b"], P["lin_w"], P["lin_b"],
                      P["bn_gamma"], P["bn_beta"])                        # (B, Hpad) lane-dense
    return out[:, :hidden_size]


# ----------------------------------------------------------------------------
# Deterministic synthetic parameters + one-time weight packing
# (loading icon_image_classifier.pkl is untranslatable)
# ----------------------------------------------------------------------------
def _he_conv(key, o, c, kh, kw):
    std = (2.0 / (c * kh * kw)) ** 0.5
    return jax.random.normal(key, (o, c, kh, kw), jnp.float32) * std


def _linear_init(key, fan_in, fan_out):
    kw_, kb = jax.random.split(key)
    bound = 1.0 / (fan_in ** 0.5)
    w = jax.random.uniform(kw_, (fan_in, fan_out), jnp.float32, -bound, bound)
    b = jax.random.uniform(kb, (fan_out,), jnp.float32, -bound, bound)
    return w, b


def _bn_fold_identity(c, eps=1e-5):
    # eval-mode BN folded: gamma=1, beta=0, running_mean=0, running_var=1
    scale = jnp.ones((c,), jnp.float32) / jnp.sqrt(jnp.ones((c,), jnp.float32) + eps)
    shift = jnp.zeros((c,), jnp.float32)
    return scale, shift


def _make_raw_block(key, c_in, c_out, stride):
    k1, k2, k3 = jax.random.split(key, 3)
    blk = {"c_in": c_in, "c_out": c_out, "stride": stride,
           "conv1_w": _he_conv(k1, c_out, c_in, 3, 3), "bn1": _bn_fold_identity(c_out),
           "conv2_w": _he_conv(k2, c_out, c_out, 3, 3), "bn2": _bn_fold_identity(c_out)}
    if stride != 1 or c_in != c_out:
        blk["down_w"] = _he_conv(k3, c_out, c_in, 1, 1)
        blk["dbn"] = _bn_fold_identity(c_out)
    return blk


def init_raw_params(key, hidden_size):
    keys = jax.random.split(key, 12)
    raw = {"conv1_w": _he_conv(keys[0], 64, 3, 7, 7), "bn1": _bn_fold_identity(64)}
    cfg = [("layer1", 64, 64, 1), ("layer2", 64, 128, 2),
           ("layer3", 128, 256, 2), ("layer4", 256, 512, 2)]
    ki = 1
    for name, c_in, c_out, stride in cfg:
        raw[name] = [_make_raw_block(keys[ki], c_in, c_out, stride),
                     _make_raw_block(keys[ki + 1], c_out, c_out, 1)]
        ki += 2
    raw["fc"] = _linear_init(keys[9], 512, 256)            # resnet.fc -> Linear(512, 256)
    raw["lin"] = _linear_init(keys[10], 256, hidden_size)  # self.linear
    raw["bn_gamma"] = jnp.ones((hidden_size,), jnp.float32)
    raw["bn_beta"] = jnp.zeros((hidden_size,), jnp.float32)
    return raw


def _prep_conv(w, scale, shift, cin_stored):
    """One-time packing: PyTorch (O,C,kh,kw) conv weight + folded BN -> lane-padded,
    matmul-ready (Kpad, Npad) bf16 matrix and (1, Npad) f32 scale/shift."""
    o, c, kh, kw = w.shape
    if cin_stored > c:  # match channel-padded activations (extra channels are zero)
        w = jnp.pad(w, ((0, 0), (0, cin_stored - c), (0, 0), (0, 0)))
    wm = w.reshape(o, -1).T                              # (Cs*kh*kw, O), feature order (c, i, j)
    k = wm.shape[0]
    kp = _round_up(k, _LANE)
    np_ = _round_up(o, _LANE)
    wm = jnp.pad(wm, ((0, kp - k), (0, np_ - o))).astype(jnp.bfloat16)
    sc = jnp.pad(scale, (0, np_ - o)).reshape(1, np_).astype(jnp.float32)
    sh = jnp.pad(shift, (0, np_ - o)).reshape(1, np_).astype(jnp.float32)
    return {"w": wm, "scale": sc, "shift": sh}


def prepare_params(raw, hidden_size):
    """Pack everything once (arrays only -> safe to pass through jit)."""
    P = {"stem": _prep_conv(raw["conv1_w"], *raw["bn1"], cin_stored=3)}
    for name in ("layer1", "layer2", "layer3", "layer4"):
        blocks = []
        for blk in raw[name]:
            cin_s = _round_up(blk["c_in"], _LANE)
            cmid_s = _round_up(blk["c_out"], _LANE)
            pb = {"conv1": _prep_conv(blk["conv1_w"], *blk["bn1"], cin_stored=cin_s),
                  "conv2": _prep_conv(blk["conv2_w"], *blk["bn2"], cin_stored=cmid_s)}
            if "down_w" in blk:
                pb["down"] = _prep_conv(blk["down_w"], *blk["dbn"], cin_stored=cin_s)
            blocks.append(pb)
        P[name] = blocks
    fc_w, fc_b = raw["fc"]
    P["fc_w"] = fc_w.astype(jnp.bfloat16)                           # (512, 256) lane-aligned
    P["fc_b"] = fc_b.reshape(1, -1).astype(jnp.float32)
    lin_w, lin_b = raw["lin"]
    hp = _round_up(hidden_size, _LANE)
    P["lin_w"] = jnp.pad(lin_w, ((0, 0), (0, hp - hidden_size))).astype(jnp.bfloat16)
    P["lin_b"] = jnp.pad(lin_b, (0, hp - hidden_size)).reshape(1, hp).astype(jnp.float32)
    P["bn_gamma"] = jnp.pad(raw["bn_gamma"], (0, hp - hidden_size)).reshape(1, hp).astype(jnp.float32)
    P["bn_beta"] = jnp.pad(raw["bn_beta"], (0, hp - hidden_size)).reshape(1, hp).astype(jnp.float32)
    return P


if __name__ == "__main__":
    key = jax.random.PRNGKey(0)
    pkey, xkey = jax.random.split(key)

    hidden_size = 32
    raw = init_raw_params(pkey, hidden_size)
    params = prepare_params(raw, hidden_size)      # one-time weight packing (not per forward)

    # NCHW images, 32x32 spatial survives ResNet-18's /32 downsampling.
    images = jax.random.normal(xkey, (2, 3, 32, 32), jnp.float32)

    fwd = jax.jit(lambda imgs, prm: encoder_cnn_forward(imgs, prm, hidden_size))
    out = jax.block_until_ready(fwd(images, params))

    assert out.shape == (2, hidden_size), out.shape
    assert bool(jnp.all(jnp.isfinite(out)))
    print("KERNEL_OK")
</pallas_src>

<mosaic_0001>
module attributes {stable_mosaic.version = 11 : i64} {
  func.func @_fused_matmul_kernel(%arg0: i32, %arg1: i32, %arg2: i32, %arg3: memref<512x256xbf16, #tpu.memory_space<vmem>>, %arg4: memref<256x128xbf16, #tpu.memory_space<vmem>>, %arg5: memref<1x128xf32, #tpu.memory_space<vmem>>, %arg6: memref<1x128xf32, #tpu.memory_space<vmem>>, %arg7: memref<512x128xbf16, #tpu.memory_space<vmem>>, %arg8: memref<512x128xf32, #tpu.memory_space<vmem>>) attributes {dimension_semantics = [#tpu.dimension_semantics<parallel>, #tpu.dimension_semantics<parallel>, #tpu.dimension_semantics<arbitrary>], iteration_bounds = array<i64: 1, 1, 1>, scalar_prefetch = 0 : i64, scratch_operands = 1 : i64, tpu.core_type = #tpu.core_type<tc>, window_params = [{transform_indices = @transform_0, window_bounds = array<i64: 512, 256>}, {transform_indices = @transform_1, window_bounds = array<i64: 256, 128>}, {transform_indices = @transform_2, window_bounds = array<i64: 1, 128>}, {transform_indices = @transform_3, window_bounds = array<i64: 1, 128>}, {transform_indices = @transform_4, window_bounds = array<i64: 512, 128>}]} {
    %c0_i32 = arith.constant 0 : i32
    %0 = arith.cmpi eq, %arg2, %c0_i32 : i32
    %1 = arith.extui %0 : i1 to i32
    %c0_i32_0 = arith.constant 0 : i32
    %2 = arith.cmpi ne, %1, %c0_i32_0 : i32
    scf.if %2 {
      %cst_10 = arith.constant 0.000000e+00 : f32
      %12 = vector.broadcast %cst_10 : f32 to vector<512x128xf32>
      %c0_11 = arith.constant 0 : index
      %c0_12 = arith.constant 0 : index
      %13 = vector.load %arg8[%c0_11, %c0_12] : memref<512x128xf32, #tpu.memory_space<vmem>>, vector<512x128xf32>
      tpu.vector_store %arg8[%c0_11, %c0_12], %12 {strides = array<i32>} : memref<512x128xf32, #tpu.memory_space<vmem>>, vector<512x128xf32>,
    } else {
    }
    %c0 = arith.constant 0 : index
    %c0_1 = arith.constant 0 : index
    %3 = vector.load %arg8[%c0, %c0_1] : memref<512x128xf32, #tpu.memory_space<vmem>>, vector<512x128xf32>
    %c0_2 = arith.constant 0 : index
    %c0_3 = arith.constant 0 : index
    %4 = vector.load %arg3[%c0_2, %c0_3] : memref<512x256xbf16, #tpu.memory_space<vmem>>, vector<512x256xbf16>
    %c0_4 = arith.constant 0 : index
    %c0_5 = arith.constant 0 : index
    %5 = vector.load %arg4[%c0_4, %c0_5] : memref<256x128xbf16, #tpu.memory_space<vmem>>, vector<256x128xbf16>
    %cst = arith.constant dense<0.000000e+00> : vector<512x128xf32>
    %6 = tpu.matmul %4, %5, %cst {dimension_numbers = #tpu.dot_dimension_numbers<[1], [0], [0], [1], [0, 0, 1, 1], [], []>} : vector<512x256xbf16>, vector<256x128xbf16>, vector<512x128xf32> -> vector<512x128xf32>
    %7 = arith.addf %3, %6 : vector<512x128xf32>
    %c0_6 = arith.constant 0 : index
    %c0_7 = arith.constant 0 : index
    %8 = vector.load %arg8[%c0_6, %c0_7] : memref<512x128xf32, #tpu.memory_space<vmem>>, vector<512x128xf32>
    tpu.vector_store %arg8[%c0_6, %c0_7], %7 {strides = array<i32>} : memref<512x128xf32, #tpu.memory_space<vmem>>, vector<512x128xf32>,
    %c0_i32_8 = arith.constant 0 : i32
    %9 = arith.cmpi eq, %arg2, %c0_i32_8 : i32
    %10 = arith.extui %9 : i1 to i32
    %c0_i32_9 = arith.constant 0 : i32
    %11 = arith.cmpi ne, %10, %c0_i32_9 : i32
    scf.if %11 {
      %c0_10 = arith.constant 0 : index
      %c0_11 = arith.constant 0 : index
      %12 = vector.load %arg8[%c0_10, %c0_11] : memref<512x128xf32, #tpu.memory_space<vmem>>, vector<512x128xf32>
      %c0_12 = arith.constant 0 : index
      %c0_13 = arith.constant 0 : index
      %13 = vector.load %arg5[%c0_12, %c0_13] : memref<1x128xf32, #tpu.memory_space<vmem>>, vector<1x128xf32>
      %14 = vector.broadcast %13 : vector<1x128xf32> to vector<512x128xf32>
      %15 = arith.mulf %12, %14 : vector<512x128xf32>
      %c0_14 = arith.constant 0 : index
      %c0_15 = arith.constant 0 : index
      %16 = vector.load %arg6[%c0_14, %c0_15] : memref<1x128xf32, #tpu.memory_space<vmem>>, vector<1x128xf32>
      %17 = vector.broadcast %16 : vector<1x128xf32> to vector<512x128xf32>
      %18 = arith.addf %15, %17 : vector<512x128xf32>
      %cst_16 = arith.constant 0.000000e+00 : f32
      %19 = vector.broadcast %cst_16 : f32 to vector<512x128xf32>
      %20 = arith.maximumf %18, %19 : vector<512x128xf32>
      %21 = arith.truncf %20 : vector<512x128xf32> to vector<512x128xbf16>
      %c0_17 = arith.constant 0 : index
      %c0_18 = arith.constant 0 : index
      %22 = vector.load %arg7[%c0_17, %c0_18] : memref<512x128xbf16, #tpu.memory_space<vmem>>, vector<512x128xbf16>
      tpu.vector_store %arg7[%c0_17, %c0_18], %21 {strides = array<i32>} : memref<512x128xbf16, #tpu.memory_space<vmem>>, vector<512x128xbf16>,
    } else {
    }
    return
  }
  func.func @transform_0(%arg0: i32, %arg1: i32, %arg2: i32) -> (i32, i32) {
    %c0_i32 = arith.constant 0 : i32
    return %arg0, %arg2 : i32, i32
  }
  func.func @transform_1(%arg0: i32, %arg1: i32, %arg2: i32) -> (i32, i32) {
    %c0_i32 = arith.constant 0 : i32
    return %arg2, %arg1 : i32, i32
  }
  func.func @transform_2(%arg0: i32, %arg1: i32, %arg2: i32) -> (i32, i32) {
    %c0_i32 = arith.constant 0 : i32
    %c0_i32_0 = arith.constant 0 : i32
    return %c0_i32, %arg1 : i32, i32
  }
  func.func @transform_3(%arg0: i32, %arg1: i32, %arg2: i32) -> (i32, i32) {
    %c0_i32 = arith.constant 0 : i32
    %c0_i32_0 = arith.constant 0 : i32
    return %c0_i32, %arg1 : i32, i32
  }
  func.func @transform_4(%arg0: i32, %arg1: i32, %arg2: i32) -> (i32, i32) {
    %c0_i32 = arith.constant 0 : i32
    return %arg0, %arg1 : i32, i32
  }
}

module attributes {stable_mosaic.version = 11 : i64} {
  func.func @_fused_matmul_kernel(%arg0: i32, %arg1: i32, %arg2: i32, %arg3: memref<128x384xbf16, #tpu.memory_space<vmem>>, %arg4: memref<384x128xbf16, #tpu.memory_space<vmem>>, %arg5: memref<1x128xf32, #tpu.memory_space<vmem>>, %arg6: memref<1x128xf32, #tpu.memory_space<vmem>>, %arg7: memref<128x128xbf16, #tpu.memory_space<vmem>>, %arg8: memref<128x128xf32, #tpu.memory_space<vmem>>) attributes {dimension_semantics = [#tpu.dimension_semantics<parallel>, #tpu.dimension_semantics<parallel>, #tpu.dimension_semantics<arbitrary>], iteration_bounds = array<i64: 1, 1, 3>, scalar_prefetch = 0 : i64, scratch_operands = 1 : i64, tpu.core_type = #tpu.core_type<tc>, window_params = [{transform_indices = @transform_0, window_bounds = array<i64: 128, 384>}, {transform_indices = @transform_1, window_bounds = array<i64: 384, 128>}, {transform_indices = @transform_2, window_bounds = array<i64: 1, 128>}, {transform_indices = @transform_3, window_bounds = array<i64: 1, 128>}, {transform_indices = @transform_4, window_bounds = array<i64: 128, 128>}]} {
    %c0_i32 = arith.constant 0 : i32
    %0 = arith.cmpi eq, %arg2, %c0_i32 : i32
    %1 = arith.extui %0 : i1 to i32
    %c0_i32_0 = arith.constant 0 : i32
    %2 = arith.cmpi ne, %1, %c0_i32_0 : i32
    scf.if %2 {
      %cst_9 = arith.constant 0.000000e+00 : f32
      %12 = vector.broadcast %cst_9 : f32 to vector<128x128xf32>
      %c0_10 = arith.constant 0 : index
      %c0_11 = arith.constant 0 : index
      %13 = vector.load %arg8[%c0_10, %c0_11] : memref<128x128xf32, #tpu.memory_space<vmem>>, vector<128x128xf32>
      tpu.vector_store %arg8[%c0_10, %c0_11], %12 {strides = array<i32>} : memref<128x128xf32, #tpu.memory_space<vmem>>, vector<128x128xf32>,
    } else {
    }
    %c0 = arith.constant 0 : index
    %c0_1 = arith.constant 0 : index
    %3 = vector.load %arg8[%c0, %c0_1] : memref<128x128xf32, #tpu.memory_space<vmem>>, vector<128x128xf32>
    %c0_2 = arith.constant 0 : index
    %c0_3 = arith.constant 0 : index
    %4 = vector.load %arg3[%c0_2, %c0_3] : memref<128x384xbf16, #tpu.memory_space<vmem>>, vector<128x384xbf16>
    %c0_4 = arith.constant 0 : index
    %c0_5 = arith.constant 0 : index
    %5 = vector.load %arg4[%c0_4, %c0_5] : memref<384x128xbf16, #tpu.memory_space<vmem>>, vector<384x128xbf16>
    %cst = arith.constant dense<0.000000e+00> : vector<128x128xf32>
    %6 = tpu.matmul %4, %5, %cst {dimension_numbers = #tpu.dot_dimension_numbers<[1], [0], [0], [1], [0, 0, 1, 1], [], []>} : vector<128x384xbf16>, vector<384x128xbf16>, vector<128x128xf32> -> vector<128x128xf32>
    %7 = arith.addf %3, %6 : vector<128x128xf32>
    %c0_6 = arith.constant 0 : index
    %c0_7 = arith.constant 0 : index
    %8 = vector.load %arg8[%c0_6, %c0_7] : memref<128x128xf32, #tpu.memory_space<vmem>>, vector<128x128xf32>
    tpu.vector_store %arg8[%c0_6, %c0_7], %7 {strides = array<i32>} : memref<128x128xf32, #tpu.memory_space<vmem>>, vector<128x128xf32>,
    %c2_i32 = arith.constant 2 : i32
    %9 = arith.cmpi eq, %arg2, %c2_i32 : i32
    %10 = arith.extui %9 : i1 to i32
    %c0_i32_8 = arith.constant 0 : i32
    %11 = arith.cmpi ne, %10, %c0_i32_8 : i32
    scf.if %11 {
      %c0_9 = arith.constant 0 : index
      %c0_10 = arith.constant 0 : index
      %12 = vector.load %arg8[%c0_9, %c0_10] : memref<128x128xf32, #tpu.memory_space<vmem>>, vector<128x128xf32>
      %c0_11 = arith.constant 0 : index
      %c0_12 = arith.constant 0 : index
      %13 = vector.load %arg5[%c0_11, %c0_12] : memref<1x128xf32, #tpu.memory_space<vmem>>, vector<1x128xf32>
      %14 = vector.broadcast %13 : vector<1x128xf32> to vector<128x128xf32>
      %15 = arith.mulf %12, %14 : vector<128x128xf32>
      %c0_13 = arith.constant 0 : index
      %c0_14 = arith.constant 0 : index
      %16 = vector.load %arg6[%c0_13, %c0_14] : memref<1x128xf32, #tpu.memory_space<vmem>>, vector<1x128xf32>
      %17 = vector.broadcast %16 : vector<1x128xf32> to vector<128x128xf32>
      %18 = arith.addf %15, %17 : vector<128x128xf32>
      %cst_15 = arith.constant 0.000000e+00 : f32
      %19 = vector.broadcast %cst_15 : f32 to vector<128x128xf32>
      %20 = arith.maximumf %18, %19 : vector<128x128xf32>
      %21 = arith.truncf %20 : vector<128x128xf32> to vector<128x128xbf16>
      %c0_16 = arith.constant 0 : index
      %c0_17 = arith.constant 0 : index
      %22 = vector.load %arg7[%c0_16, %c0_17] : memref<128x128xbf16, #tpu.memory_space<vmem>>, vector<128x128xbf16>
      tpu.vector_store %arg7[%c0_16, %c0_17], %21 {strides = array<i32>} : memref<128x128xbf16, #tpu.memory_space<vmem>>, vector<128x128xbf16>,
    } else {
    }
    return
  }
  func.func @transform_0(%arg0: i32, %arg1: i32, %arg2: i32) -> (i32, i32) {
    %c0_i32 = arith.constant 0 : i32
    return %arg0, %arg2 : i32, i32
  }
  func.func @transform_1(%arg0: i32, %arg1: i32, %arg2: i32) -> (i32, i32) {
    %c0_i32 = arith.constant 0 : i32
    return %arg2, %arg1 : i32, i32
  }
  func.func @transform_2(%arg0: i32, %arg1: i32, %arg2: i32) -> (i32, i32) {
    %c0_i32 = arith.constant 0 : i32
    %c0_i32_0 = arith.constant 0 : i32
    return %c0_i32, %arg1 : i32, i32
  }
  func.func @transform_3(%arg0: i32, %arg1: i32, %arg2: i32) -> (i32, i32) {
    %c0_i32 = arith.constant 0 : i32
    %c0_i32_0 = arith.constant 0 : i32
    return %c0_i32, %arg1 : i32, i32
  }
  func.func @transform_4(%arg0: i32, %arg1: i32, %arg2: i32) -> (i32, i32) {
    %c0_i32 = arith.constant 0 : i32
    return %arg0, %arg1 : i32, i32
  }
}

module attributes {stable_mosaic.version = 11 : i64} {
  func.func @_fused_matmul_kernel(%arg0: i32, %arg1: i32, %arg2: i32, %arg3: memref<128x384xbf16, #tpu.memory_space<vmem>>, %arg4: memref<384x128xbf16, #tpu.memory_space<vmem>>, %arg5: memref<1x128xf32, #tpu.memory_space<vmem>>, %arg6: memref<1x128xf32, #tpu.memory_space<vmem>>, %arg7: memref<128x128xbf16, #tpu.memory_space<vmem>>, %arg8: memref<128x128xbf16, #tpu.memory_space<vmem>>, %arg9: memref<128x128xf32, #tpu.memory_space<vmem>>) attributes {dimension_semantics = [#tpu.dimension_semantics<parallel>, #tpu.dimension_semantics<parallel>, #tpu.dimension_semantics<arbitrary>], iteration_bounds = array<i64: 1, 1, 3>, scalar_prefetch = 0 : i64, scratch_operands = 1 : i64, tpu.core_type = #tpu.core_type<tc>, window_params = [{transform_indices = @transform_0, window_bounds = array<i64: 128, 384>}, {transform_indices = @transform_1, window_bounds = array<i64: 384, 128>}, {transform_indices = @transform_2, window_bounds = array<i64: 1, 128>}, {transform_indices = @transform_3, window_bounds = array<i64: 1, 128>}, {transform_indices = @transform_4, window_bounds = array<i64: 128, 128>}, {transform_indices = @transform_5, window_bounds = array<i64: 128, 128>}]} {
    %c0_i32 = arith.constant 0 : i32
    %0 = arith.cmpi eq, %arg2, %c0_i32 : i32
    %1 = arith.extui %0 : i1 to i32
    %c0_i32_0 = arith.constant 0 : i32
    %2 = arith.cmpi ne, %1, %c0_i32_0 : i32
    scf.if %2 {
      %cst_9 = arith.constant 0.000000e+00 : f32
      %12 = vector.broadcast %cst_9 : f32 to vector<128x128xf32>
      %c0_10 = arith.constant 0 : index
      %c0_11 = arith.constant 0 : index
      %13 = vector.load %arg9[%c0_10, %c0_11] : memref<128x128xf32, #tpu.memory_space<vmem>>, vector<128x128xf32>
      tpu.vector_store %arg9[%c0_10, %c0_11], %12 {strides = array<i32>} : memref<128x128xf32, #tpu.memory_space<vmem>>, vector<128x128xf32>,
    } else {
    }
    %c0 = arith.constant 0 : index
    %c0_1 = arith.constant 0 : index
    %3 = vector.load %arg9[%c0, %c0_1] : memref<128x128xf32, #tpu.memory_space<vmem>>, vector<128x128xf32>
    %c0_2 = arith.constant 0 : index
    %c0_3 = arith.constant 0 : index
    %4 = vector.load %arg3[%c0_2, %c0_3] : memref<128x384xbf16, #tpu.memory_space<vmem>>, vector<128x384xbf16>
    %c0_4 = arith.constant 0 : index
    %c0_5 = arith.constant 0 : index
    %5 = vector.load %arg4[%c0_4, %c0_5] : memref<384x128xbf16, #tpu.memory_space<vmem>>, vector<384x128xbf16>
    %cst = arith.constant dense<0.000000e+00> : vector<128x128xf32>
    %6 = tpu.matmul %4, %5, %cst {dimension_numbers = #tpu.dot_dimension_numbers<[1], [0], [0], [1], [0, 0, 1, 1], [], []>} : vector<128x384xbf16>, vector<384x128xbf16>, vector<128x128xf32> -> vector<128x128xf32>
    %7 = arith.addf %3, %6 : vector<128x128xf32>
    %c0_6 = arith.constant 0 : index
    %c0_7 = arith.constant 0 : index
    %8 = vector.load %arg9[%c0_6, %c0_7] : memref<128x128xf32, #tpu.memory_space<vmem>>, vector<128x128xf32>
    tpu.vector_store %arg9[%c0_6, %c0_7], %7 {strides = array<i32>} : memref<128x128xf32, #tpu.memory_space<vmem>>, vector<128x128xf32>,
    %c2_i32 = arith.constant 2 : i32
    %9 = arith.cmpi eq, %arg2, %c2_i32 : i32
    %10 = arith.extui %9 : i1 to i32
    %c0_i32_8 = arith.constant 0 : i32
    %11 = arith.cmpi ne, %10, %c0_i32_8 : i32
    scf.if %11 {
      %c0_9 = arith.constant 0 : index
      %c0_10 = arith.constant 0 : index
      %12 = vector.load %arg9[%c0_9, %c0_10] : memref<128x128xf32, #tpu.memory_space<vmem>>, vector<128x128xf32>
      %c0_11 = arith.constant 0 : index
      %c0_12 = arith.constant 0 : index
      %13 = vector.load %arg5[%c0_11, %c0_12] : memref<1x128xf32, #tpu.memory_space<vmem>>, vector<1x128xf32>
      %14 = vector.broadcast %13 : vector<1x128xf32> to vector<128x128xf32>
      %15 = arith.mulf %12, %14 : vector<128x128xf32>
      %c0_13 = arith.constant 0 : index
      %c0_14 = arith.constant 0 : index
      %16 = vector.load %arg6[%c0_13, %c0_14] : memref<1x128xf32, #tpu.memory_space<vmem>>, vector<1x128xf32>
      %17 = vector.broadcast %16 : vector<1x128xf32> to vector<128x128xf32>
      %18 = arith.addf %15, %17 : vector<128x128xf32>
      %c0_15 = arith.constant 0 : index
      %c0_16 = arith.constant 0 : index
      %19 = vector.load %arg7[%c0_15, %c0_16] : memref<128x128xbf16, #tpu.memory_space<vmem>>, vector<128x128xbf16>
      %20 = arith.extf %19 : vector<128x128xbf16> to vector<128x128xf32>
      %21 = arith.addf %18, %20 : vector<128x128xf32>
      %cst_17 = arith.constant 0.000000e+00 : f32
      %22 = vector.broadcast %cst_17 : f32 to vector<128x128xf32>
      %23 = arith.maximumf %21, %22 : vector<128x128xf32>
      %24 = arith.truncf %23 : vector<128x128xf32> to vector<128x128xbf16>
      %c0_18 = arith.constant 0 : index
      %c0_19 = arith.constant 0 : index
      %25 = vector.load %arg8[%c0_18, %c0_19] : memref<128x128xbf16, #tpu.memory_space<vmem>>, vector<128x128xbf16>
      tpu.vector_store %arg8[%c0_18, %c0_19], %24 {strides = array<i32>} : memref<128x128xbf16, #tpu.memory_space<vmem>>, vector<128x128xbf16>,
    } else {
    }
    return
  }
  func.func @transform_0(%arg0: i32, %arg1: i32, %arg2: i32) -> (i32, i32) {
    %c0_i32 = arith.constant 0 : i32
    return %arg0, %arg2 : i32, i32
  }
  func.func @transform_1(%arg0: i32, %arg1: i32, %arg2: i32) -> (i32, i32) {
    %c0_i32 = arith.constant 0 : i32
    return %arg2, %arg1 : i32, i32
  }
  func.func @transform_2(%arg0: i32, %arg1: i32, %arg2: i32) -> (i32, i32) {
    %c0_i32 = arith.constant 0 : i32
    %c0_i32_0 = arith.constant 0 : i32
    return %c0_i32, %arg1 : i32, i32
  }
  func.func @transform_3(%arg0: i32, %arg1: i32, %arg2: i32) -> (i32, i32) {
    %c0_i32 = arith.constant 0 : i32
    %c0_i32_0 = arith.constant 0 : i32
    return %c0_i32, %arg1 : i32, i32
  }
  func.func @transform_4(%arg0: i32, %arg1: i32, %arg2: i32) -> (i32, i32) {
    %c0_i32 = arith.constant 0 : i32
    return %arg0, %arg1 : i32, i32
  }
  func.func @transform_5(%arg0: i32, %arg1: i32, %arg2: i32) -> (i32, i32) {
    %c0_i32 = arith.constant 0 : i32
    return %arg0, %arg1 : i32, i32
  }
}

module attributes {stable_mosaic.version = 11 : i64} {
  func.func @_fused_matmul_kernel(%arg0: i32, %arg1: i32, %arg2: i32, %arg3: memref<32x384xbf16, #tpu.memory_space<vmem>>, %arg4: memref<384x128xbf16, #tpu.memory_space<vmem>>, %arg5: memref<1x128xf32, #tpu.memory_space<vmem>>, %arg6: memref<1x128xf32, #tpu.memory_space<vmem>>, %arg7: memref<32x128xbf16, #tpu.memory_space<vmem>>, %arg8: memref<32x128xf32, #tpu.memory_space<vmem>>) attributes {dimension_semantics = [#tpu.dimension_semantics<parallel>, #tpu.dimension_semantics<parallel>, #tpu.dimension_semantics<arbitrary>], iteration_bounds = array<i64: 1, 1, 3>, scalar_prefetch = 0 : i64, scratch_operands = 1 : i64, tpu.core_type = #tpu.core_type<tc>, window_params = [{transform_indices = @transform_0, window_bounds = array<i64: 32, 384>}, {transform_indices = @transform_1, window_bounds = array<i64: 384, 128>}, {transform_indices = @transform_2, window_bounds = array<i64: 1, 128>}, {transform_indices = @transform_3, window_bounds = array<i64: 1, 128>}, {transform_indices = @transform_4, window_bounds = array<i64: 32, 128>}]} {
    %c0_i32 = arith.constant 0 : i32
    %0 = arith.cmpi eq, %arg2, %c0_i32 : i32
    %1 = arith.extui %0 : i1 to i32
    %c0_i32_0 = arith.constant 0 : i32
    %2 = arith.cmpi ne, %1, %c0_i32_0 : i32
    scf.if %2 {
      %cst_9 = arith.constant 0.000000e+00 : f32
      %12 = vector.broadcast %cst_9 : f32 to vector<32x128xf32>
      %c0_10 = arith.constant 0 : index
      %c0_11 = arith.constant 0 : index
      %13 = vector.load %arg8[%c0_10, %c0_11] : memref<32x128xf32, #tpu.memory_space<vmem>>, vector<32x128xf32>
      tpu.vector_store %arg8[%c0_10, %c0_11], %12 {strides = array<i32>} : memref<32x128xf32, #tpu.memory_space<vmem>>, vector<32x128xf32>,
    } else {
    }
    %c0 = arith.constant 0 : index
    %c0_1 = arith.constant 0 : index
    %3 = vector.load %arg8[%c0, %c0_1] : memref<32x128xf32, #tpu.memory_space<vmem>>, vector<32x128xf32>
    %c0_2 = arith.constant 0 : index
    %c0_3 = arith.constant 0 : index
    %4 = vector.load %arg3[%c0_2, %c0_3] : memref<32x384xbf16, #tpu.memory_space<vmem>>, vector<32x384xbf16>
    %c0_4 = arith.constant 0 : index
    %c0_5 = arith.constant 0 : index
    %5 = vector.load %arg4[%c0_4, %c0_5] : memref<384x128xbf16, #tpu.memory_space<vmem>>, vector<384x128xbf16>
    %cst = arith.constant dense<0.000000e+00> : vector<32x128xf32>
    %6 = tpu.matmul %4, %5, %cst {dimension_numbers = #tpu.dot_dimension_numbers<[1], [0], [0], [1], [0, 0, 1, 1], [], []>} : vector<32x384xbf16>, vector<384x128xbf16>, vector<32x128xf32> -> vector<32x128xf32>
    %7 = arith.addf %3, %6 : vector<32x128xf32>
    %c0_6 = arith.constant 0 : index
    %c0_7 = arith.constant 0 : index
    %8 = vector.load %arg8[%c0_6, %c0_7] : memref<32x128xf32, #tpu.memory_space<vmem>>, vector<32x128xf32>
    tpu.vector_store %arg8[%c0_6, %c0_7], %7 {strides = array<i32>} : memref<32x128xf32, #tpu.memory_space<vmem>>, vector<32x128xf32>,
    %c2_i32 = arith.constant 2 : i32
    %9 = arith.cmpi eq, %arg2, %c2_i32 : i32
    %10 = arith.extui %9 : i1 to i32
    %c0_i32_8 = arith.constant 0 : i32
    %11 = arith.cmpi ne, %10, %c0_i32_8 : i32
    scf.if %11 {
      %c0_9 = arith.constant 0 : index
      %c0_10 = arith.constant 0 : index
      %12 = vector.load %arg8[%c0_9, %c0_10] : memref<32x128xf32, #tpu.memory_space<vmem>>, vector<32x128xf32>
      %c0_11 = arith.constant 0 : index
      %c0_12 = arith.constant 0 : index
      %13 = vector.load %arg5[%c0_11, %c0_12] : memref<1x128xf32, #tpu.memory_space<vmem>>, vector<1x128xf32>
      %14 = vector.broadcast %13 : vector<1x128xf32> to vector<32x128xf32>
      %15 = arith.mulf %12, %14 : vector<32x128xf32>
      %c0_13 = arith.constant 0 : index
      %c0_14 = arith.constant 0 : index
      %16 = vector.load %arg6[%c0_13, %c0_14] : memref<1x128xf32, #tpu.memory_space<vmem>>, vector<1x128xf32>
      %17 = vector.broadcast %16 : vector<1x128xf32> to vector<32x128xf32>
      %18 = arith.addf %15, %17 : vector<32x128xf32>
      %cst_15 = arith.constant 0.000000e+00 : f32
      %19 = vector.broadcast %cst_15 : f32 to vector<32x128xf32>
      %20 = arith.maximumf %18, %19 : vector<32x128xf32>
      %21 = arith.truncf %20 : vector<32x128xf32> to vector<32x128xbf16>
      %c0_16 = arith.constant 0 : index
      %c0_17 = arith.constant 0 : index
      %22 = vector.load %arg7[%c0_16, %c0_17] : memref<32x128xbf16, #tpu.memory_space<vmem>>, vector<32x128xbf16>
      tpu.vector_store %arg7[%c0_16, %c0_17], %21 {strides = array<i32>} : memref<32x128xbf16, #tpu.memory_space<vmem>>, vector<32x128xbf16>,
    } else {
    }
    return
  }
  func.func @transform_0(%arg0: i32, %arg1: i32, %arg2: i32) -> (i32, i32) {
    %c0_i32 = arith.constant 0 : i32
    return %arg0, %arg2 : i32, i32
  }
  func.func @transform_1(%arg0: i32, %arg1: i32, %arg2: i32) -> (i32, i32) {
    %c0_i32 = arith.constant 0 : i32
    return %arg2, %arg1 : i32, i32
  }
  func.func @transform_2(%arg0: i32, %arg1: i32, %arg2: i32) -> (i32, i32) {
    %c0_i32 = arith.constant 0 : i32
    %c0_i32_0 = arith.constant 0 : i32
    return %c0_i32, %arg1 : i32, i32
  }
  func.func @transform_3(%arg0: i32, %arg1: i32, %arg2: i32) -> (i32, i32) {
    %c0_i32 = arith.constant 0 : i32
    %c0_i32_0 = arith.constant 0 : i32
    return %c0_i32, %arg1 : i32, i32
  }
  func.func @transform_4(%arg0: i32, %arg1: i32, %arg2: i32) -> (i32, i32) {
    %c0_i32 = arith.constant 0 : i32
    return %arg0, %arg1 : i32, i32
  }
}

module attributes {stable_mosaic.version = 11 : i64} {
  func.func @_fused_matmul_kernel(%arg0: i32, %arg1: i32, %arg2: i32, %arg3: memref<32x128xbf16, #tpu.memory_space<vmem>>, %arg4: memref<128x128xbf16, #tpu.memory_space<vmem>>, %arg5: memref<1x128xf32, #tpu.memory_space<vmem>>, %arg6: memref<1x128xf32, #tpu.memory_space<vmem>>, %arg7: memref<32x128xbf16, #tpu.memory_space<vmem>>, %arg8: memref<32x128xf32, #tpu.memory_space<vmem>>) attributes {dimension_semantics = [#tpu.dimension_semantics<parallel>, #tpu.dimension_semantics<parallel>, #tpu.dimension_semantics<arbitrary>], iteration_bounds = array<i64: 1, 1, 1>, scalar_prefetch = 0 : i64, scratch_operands = 1 : i64, tpu.core_type = #tpu.core_type<tc>, window_params = [{transform_indices = @transform_0, window_bounds = array<i64: 32, 128>}, {transform_indices = @transform_1, window_bounds = array<i64: 128, 128>}, {transform_indices = @transform_2, window_bounds = array<i64: 1, 128>}, {transform_indices = @transform_3, window_bounds = array<i64: 1, 128>}, {transform_indices = @transform_4, window_bounds = array<i64: 32, 128>}]} {
    %c0_i32 = arith.constant 0 : i32
    %0 = arith.cmpi eq, %arg2, %c0_i32 : i32
    %1 = arith.extui %0 : i1 to i32
    %c0_i32_0 = arith.constant 0 : i32
    %2 = arith.cmpi ne, %1, %c0_i32_0 : i32
    scf.if %2 {
      %cst_10 = arith.constant 0.000000e+00 : f32
      %12 = vector.broadcast %cst_10 : f32 to vector<32x128xf32>
      %c0_11 = arith.constant 0 : index
      %c0_12 = arith.constant 0 : index
      %13 = vector.load %arg8[%c0_11, %c0_12] : memref<32x128xf32, #tpu.memory_space<vmem>>, vector<32x128xf32>
      tpu.vector_store %arg8[%c0_11, %c0_12], %12 {strides = array<i32>} : memref<32x128xf32, #tpu.memory_space<vmem>>, vector<32x128xf32>,
    } else {
    }
    %c0 = arith.constant 0 : index
    %c0_1 = arith.constant 0 : index
    %3 = vector.load %arg8[%c0, %c0_1] : memref<32x128xf32, #tpu.memory_space<vmem>>, vector<32x128xf32>
    %c0_2 = arith.constant 0 : index
    %c0_3 = arith.constant 0 : index
    %4 = vector.load %arg3[%c0_2, %c0_3] : memref<32x128xbf16, #tpu.memory_space<vmem>>, vector<32x128xbf16>
    %c0_4 = arith.constant 0 : index
    %c0_5 = arith.constant 0 : index
    %5 = vector.load %arg4[%c0_4, %c0_5] : memref<128x128xbf16, #tpu.memory_space<vmem>>, vector<128x128xbf16>
    %cst = arith.constant dense<0.000000e+00> : vector<32x128xf32>
    %6 = tpu.matmul %4, %5, %cst {dimension_numbers = #tpu.dot_dimension_numbers<[1], [0], [0], [1], [0, 0, 1, 1], [], []>} : vector<32x128xbf16>, vector<128x128xbf16>, vector<32x128xf32> -> vector<32x128xf32>
    %7 = arith.addf %3, %6 : vector<32x128xf32>
    %c0_6 = arith.constant 0 : index
    %c0_7 = arith.constant 0 : index
    %8 = vector.load %arg8[%c0_6, %c0_7] : memref<32x128xf32, #tpu.memory_space<vmem>>, vector<32x128xf32>
    tpu.vector_store %arg8[%c0_6, %c0_7], %7 {strides = array<i32>} : memref<32x128xf32, #tpu.memory_space<vmem>>, vector<32x128xf32>,
    %c0_i32_8 = arith.constant 0 : i32
    %9 = arith.cmpi eq, %arg2, %c0_i32_8 : i32
    %10 = arith.extui %9 : i1 to i32
    %c0_i32_9 = arith.constant 0 : i32
    %11 = arith.cmpi ne, %10, %c0_i32_9 : i32
    scf.if %11 {
      %c0_10 = arith.constant 0 : index
      %c0_11 = arith.constant 0 : index
      %12 = vector.load %arg8[%c0_10, %c0_11] : memref<32x128xf32, #tpu.memory_space<vmem>>, vector<32x128xf32>
      %c0_12 = arith.constant 0 : index
      %c0_13 = arith.constant 0 : index
      %13 = vector.load %arg5[%c0_12, %c0_13] : memref<1x128xf32, #tpu.memory_space<vmem>>, vector<1x128xf32>
      %14 = vector.broadcast %13 : vector<1x128xf32> to vector<32x128xf32>
      %15 = arith.mulf %12, %14 : vector<32x128xf32>
      %c0_14 = arith.constant 0 : index
      %c0_15 = arith.constant 0 : index
      %16 = vector.load %arg6[%c0_14, %c0_15] : memref<1x128xf32, #tpu.memory_space<vmem>>, vector<1x128xf32>
      %17 = vector.broadcast %16 : vector<1x128xf32> to vector<32x128xf32>
      %18 = arith.addf %15, %17 : vector<32x128xf32>
      %19 = arith.truncf %18 : vector<32x128xf32> to vector<32x128xbf16>
      %c0_16 = arith.constant 0 : index
      %c0_17 = arith.constant 0 : index
      %20 = vector.load %arg7[%c0_16, %c0_17] : memref<32x128xbf16, #tpu.memory_space<vmem>>, vector<32x128xbf16>
      tpu.vector_store %arg7[%c0_16, %c0_17], %19 {strides = array<i32>} : memref<32x128xbf16, #tpu.memory_space<vmem>>, vector<32x128xbf16>,
    } else {
    }
    return
  }
  func.func @transform_0(%arg0: i32, %arg1: i32, %arg2: i32) -> (i32, i32) {
    %c0_i32 = arith.constant 0 : i32
    return %arg0, %arg2 : i32, i32
  }
  func.func @transform_1(%arg0: i32, %arg1: i32, %arg2: i32) -> (i32, i32) {
    %c0_i32 = arith.constant 0 : i32
    return %arg2, %arg1 : i32, i32
  }
  func.func @transform_2(%arg0: i32, %arg1: i32, %arg2: i32) -> (i32, i32) {
    %c0_i32 = arith.constant 0 : i32
    %c0_i32_0 = arith.constant 0 : i32
    return %c0_i32, %arg1 : i32, i32
  }
  func.func @transform_3(%arg0: i32, %arg1: i32, %arg2: i32) -> (i32, i32) {
    %c0_i32 = arith.constant 0 : i32
    %c0_i32_0 = arith.constant 0 : i32
    return %c0_i32, %arg1 : i32, i32
  }
  func.func @transform_4(%arg0: i32, %arg1: i32, %arg2: i32) -> (i32, i32) {
    %c0_i32 = arith.constant 0 : i32
    return %arg0, %arg1 : i32, i32
  }
}

module attributes {stable_mosaic.version = 11 : i64} {
  func.func @_fused_matmul_kernel(%arg0: i32, %arg1: i32, %arg2: i32, %arg3: memref<32x384xbf16, #tpu.memory_space<vmem>>, %arg4: memref<384x128xbf16, #tpu.memory_space<vmem>>, %arg5: memref<1x128xf32, #tpu.memory_space<vmem>>, %arg6: memref<1x128xf32, #tpu.memory_space<vmem>>, %arg7: memref<32x128xbf16, #tpu.memory_space<vmem>>, %arg8: memref<32x128xbf16, #tpu.memory_space<vmem>>, %arg9: memref<32x128xf32, #tpu.memory_space<vmem>>) attributes {dimension_semantics = [#tpu.dimension_semantics<parallel>, #tpu.dimension_semantics<parallel>, #tpu.dimension_semantics<arbitrary>], iteration_bounds = array<i64: 1, 1, 3>, scalar_prefetch = 0 : i64, scratch_operands = 1 : i64, tpu.core_type = #tpu.core_type<tc>, window_params = [{transform_indices = @transform_0, window_bounds = array<i64: 32, 384>}, {transform_indices = @transform_1, window_bounds = array<i64: 384, 128>}, {transform_indices = @transform_2, window_bounds = array<i64: 1, 128>}, {transform_indices = @transform_3, window_bounds = array<i64: 1, 128>}, {transform_indices = @transform_4, window_bounds = array<i64: 32, 128>}, {transform_indices = @transform_5, window_bounds = array<i64: 32, 128>}]} {
    %c0_i32 = arith.constant 0 : i32
    %0 = arith.cmpi eq, %arg2, %c0_i32 : i32
    %1 = arith.extui %0 : i1 to i32
    %c0_i32_0 = arith.constant 0 : i32
    %2 = arith.cmpi ne, %1, %c0_i32_0 : i32
    scf.if %2 {
      %cst_9 = arith.constant 0.000000e+00 : f32
      %12 = vector.broadcast %cst_9 : f32 to vector<32x128xf32>
      %c0_10 = arith.constant 0 : index
      %c0_11 = arith.constant 0 : index
      %13 = vector.load %arg9[%c0_10, %c0_11] : memref<32x128xf32, #tpu.memory_space<vmem>>, vector<32x128xf32>
      tpu.vector_store %arg9[%c0_10, %c0_11], %12 {strides = array<i32>} : memref<32x128xf32, #tpu.memory_space<vmem>>, vector<32x128xf32>,
    } else {
    }
    %c0 = arith.constant 0 : index
    %c0_1 = arith.constant 0 : index
    %3 = vector.load %arg9[%c0, %c0_1] : memref<32x128xf32, #tpu.memory_space<vmem>>, vector<32x128xf32>
    %c0_2 = arith.constant 0 : index
    %c0_3 = arith.constant 0 : index
    %4 = vector.load %arg3[%c0_2, %c0_3] : memref<32x384xbf16, #tpu.memory_space<vmem>>, vector<32x384xbf16>
    %c0_4 = arith.constant 0 : index
    %c0_5 = arith.constant 0 : index
    %5 = vector.load %arg4[%c0_4, %c0_5] : memref<384x128xbf16, #tpu.memory_space<vmem>>, vector<384x128xbf16>
    %cst = arith.constant dense<0.000000e+00> : vector<32x128xf32>
    %6 = tpu.matmul %4, %5, %cst {dimension_numbers = #tpu.dot_dimension_numbers<[1], [0], [0], [1], [0, 0, 1, 1], [], []>} : vector<32x384xbf16>, vector<384x128xbf16>, vector<32x128xf32> -> vector<32x128xf32>
    %7 = arith.addf %3, %6 : vector<32x128xf32>
    %c0_6 = arith.constant 0 : index
    %c0_7 = arith.constant 0 : index
    %8 = vector.load %arg9[%c0_6, %c0_7] : memref<32x128xf32, #tpu.memory_space<vmem>>, vector<32x128xf32>
    tpu.vector_store %arg9[%c0_6, %c0_7], %7 {strides = array<i32>} : memref<32x128xf32, #tpu.memory_space<vmem>>, vector<32x128xf32>,
    %c2_i32 = arith.constant 2 : i32
    %9 = arith.cmpi eq, %arg2, %c2_i32 : i32
    %10 = arith.extui %9 : i1 to i32
    %c0_i32_8 = arith.constant 0 : i32
    %11 = arith.cmpi ne, %10, %c0_i32_8 : i32
    scf.if %11 {
      %c0_9 = arith.constant 0 : index
      %c0_10 = arith.constant 0 : index
      %12 = vector.load %arg9[%c0_9, %c0_10] : memref<32x128xf32, #tpu.memory_space<vmem>>, vector<32x128xf32>
      %c0_11 = arith.constant 0 : index
      %c0_12 = arith.constant 0 : index
      %13 = vector.load %arg5[%c0_11, %c0_12] : memref<1x128xf32, #tpu.memory_space<vmem>>, vector<1x128xf32>
      %14 = vector.broadcast %13 : vector<1x128xf32> to vector<32x128xf32>
      %15 = arith.mulf %12, %14 : vector<32x128xf32>
      %c0_13 = arith.constant 0 : index
      %c0_14 = arith.constant 0 : index
      %16 = vector.load %arg6[%c0_13, %c0_14] : memref<1x128xf32, #tpu.memory_space<vmem>>, vector<1x128xf32>
      %17 = vector.broadcast %16 : vector<1x128xf32> to vector<32x128xf32>
      %18 = arith.addf %15, %17 : vector<32x128xf32>
      %c0_15 = arith.constant 0 : index
      %c0_16 = arith.constant 0 : index
      %19 = vector.load %arg7[%c0_15, %c0_16] : memref<32x128xbf16, #tpu.memory_space<vmem>>, vector<32x128xbf16>
      %20 = arith.extf %19 : vector<32x128xbf16> to vector<32x128xf32>
      %21 = arith.addf %18, %20 : vector<32x128xf32>
      %cst_17 = arith.constant 0.000000e+00 : f32
      %22 = vector.broadcast %cst_17 : f32 to vector<32x128xf32>
      %23 = arith.maximumf %21, %22 : vector<32x128xf32>
      %24 = arith.truncf %23 : vector<32x128xf32> to vector<32x128xbf16>
      %c0_18 = arith.constant 0 : index
      %c0_19 = arith.constant 0 : index
      %25 = vector.load %arg8[%c0_18, %c0_19] : memref<32x128xbf16, #tpu.memory_space<vmem>>, vector<32x128xbf16>
      tpu.vector_store %arg8[%c0_18, %c0_19], %24 {strides = array<i32>} : memref<32x128xbf16, #tpu.memory_space<vmem>>, vector<32x128xbf16>,
    } else {
    }
    return
  }
  func.func @transform_0(%arg0: i32, %arg1: i32, %arg2: i32) -> (i32, i32) {
    %c0_i32 = arith.constant 0 : i32
    return %arg0, %arg2 : i32, i32
  }
  func.func @transform_1(%arg0: i32, %arg1: i32, %arg2: i32) -> (i32, i32) {
    %c0_i32 = arith.constant 0 : i32
    return %arg2, %arg1 : i32, i32
  }
  func.func @transform_2(%arg0: i32, %arg1: i32, %arg2: i32) -> (i32, i32) {
    %c0_i32 = arith.constant 0 : i32
    %c0_i32_0 = arith.constant 0 : i32
    return %c0_i32, %arg1 : i32, i32
  }
  func.func @transform_3(%arg0: i32, %arg1: i32, %arg2: i32) -> (i32, i32) {
    %c0_i32 = arith.constant 0 : i32
    %c0_i32_0 = arith.constant 0 : i32
    return %c0_i32, %arg1 : i32, i32
  }
  func.func @transform_4(%arg0: i32, %arg1: i32, %arg2: i32) -> (i32, i32) {
    %c0_i32 = arith.constant 0 : i32
    return %arg0, %arg1 : i32, i32
  }
  func.func @transform_5(%arg0: i32, %arg1: i32, %arg2: i32) -> (i32, i32) {
    %c0_i32 = arith.constant 0 : i32
    return %arg0, %arg1 : i32, i32
  }
}

module attributes {stable_mosaic.version = 11 : i64} {
  func.func @_fused_matmul_kernel(%arg0: i32, %arg1: i32, %arg2: i32, %arg3: memref<8x384xbf16, #tpu.memory_space<vmem>>, %arg4: memref<384x256xbf16, #tpu.memory_space<vmem>>, %arg5: memref<1x256xf32, #tpu.memory_space<vmem>>, %arg6: memref<1x256xf32, #tpu.memory_space<vmem>>, %arg7: memref<8x256xbf16, #tpu.memory_space<vmem>>, %arg8: memref<8x256xf32, #tpu.memory_space<vmem>>) attributes {dimension_semantics = [#tpu.dimension_semantics<parallel>, #tpu.dimension_semantics<parallel>, #tpu.dimension_semantics<arbitrary>], iteration_bounds = array<i64: 1, 1, 3>, scalar_prefetch = 0 : i64, scratch_operands = 1 : i64, tpu.core_type = #tpu.core_type<tc>, window_params = [{transform_indices = @transform_0, window_bounds = array<i64: 8, 384>}, {transform_indices = @transform_1, window_bounds = array<i64: 384, 256>}, {transform_indices = @transform_2, window_bounds = array<i64: 1, 256>}, {transform_indices = @transform_3, window_bounds = array<i64: 1, 256>}, {transform_indices = @transform_4, window_bounds = array<i64: 8, 256>}]} {
    %c0_i32 = arith.constant 0 : i32
    %0 = arith.cmpi eq, %arg2, %c0_i32 : i32
    %1 = arith.extui %0 : i1 to i32
    %c0_i32_0 = arith.constant 0 : i32
    %2 = arith.cmpi ne, %1, %c0_i32_0 : i32
    scf.if %2 {
      %cst_9 = arith.constant 0.000000e+00 : f32
      %12 = vector.broadcast %cst_9 : f32 to vector<8x256xf32>
      %c0_10 = arith.constant 0 : index
      %c0_11 = arith.constant 0 : index
      %13 = vector.load %arg8[%c0_10, %c0_11] : memref<8x256xf32, #tpu.memory_space<vmem>>, vector<8x256xf32>
      tpu.vector_store %arg8[%c0_10, %c0_11], %12 {strides = array<i32>} : memref<8x256xf32, #tpu.memory_space<vmem>>, vector<8x256xf32>,
    } else {
    }
    %c0 = arith.constant 0 : index
    %c0_1 = arith.constant 0 : index
    %3 = vector.load %arg8[%c0, %c0_1] : memref<8x256xf32, #tpu.memory_space<vmem>>, vector<8x256xf32>
    %c0_2 = arith.constant 0 : index
    %c0_3 = arith.constant 0 : index
    %4 = vector.load %arg3[%c0_2, %c0_3] : memref<8x384xbf16, #tpu.memory_space<vmem>>, vector<8x384xbf16>
    %c0_4 = arith.constant 0 : index
    %c0_5 = arith.constant 0 : index
    %5 = vector.load %arg4[%c0_4, %c0_5] : memref<384x256xbf16, #tpu.memory_space<vmem>>, vector<384x256xbf16>
    %cst = arith.constant dense<0.000000e+00> : vector<8x256xf32>
    %6 = tpu.matmul %4, %5, %cst {dimension_numbers = #tpu.dot_dimension_numbers<[1], [0], [0], [1], [0, 0, 1, 1], [], []>} : vector<8x384xbf16>, vector<384x256xbf16>, vector<8x256xf32> -> vector<8x256xf32>
    %7 = arith.addf %3, %6 : vector<8x256xf32>
    %c0_6 = arith.constant 0 : index
    %c0_7 = arith.constant 0 : index
    %8 = vector.load %arg8[%c0_6, %c0_7] : memref<8x256xf32, #tpu.memory_space<vmem>>, vector<8x256xf32>
    tpu.vector_store %arg8[%c0_6, %c0_7], %7 {strides = array<i32>} : memref<8x256xf32, #tpu.memory_space<vmem>>, vector<8x256xf32>,
    %c2_i32 = arith.constant 2 : i32
    %9 = arith.cmpi eq, %arg2, %c2_i32 : i32
    %10 = arith.extui %9 : i1 to i32
    %c0_i32_8 = arith.constant 0 : i32
    %11 = arith.cmpi ne, %10, %c0_i32_8 : i32
    scf.if %11 {
      %c0_9 = arith.constant 0 : index
      %c0_10 = arith.constant 0 : index
      %12 = vector.load %arg8[%c0_9, %c0_10] : memref<8x256xf32, #tpu.memory_space<vmem>>, vector<8x256xf32>
      %c0_11 = arith.constant 0 : index
      %c0_12 = arith.constant 0 : index
      %13 = vector.load %arg5[%c0_11, %c0_12] : memref<1x256xf32, #tpu.memory_space<vmem>>, vector<1x256xf32>
      %14 = vector.broadcast %13 : vector<1x256xf32> to vector<8x256xf32>
      %15 = arith.mulf %12, %14 : vector<8x256xf32>
      %c0_13 = arith.constant 0 : index
      %c0_14 = arith.constant 0 : index
      %16 = vector.load %arg6[%c0_13, %c0_14] : memref<1x256xf32, #tpu.memory_space<vmem>>, vector<1x256xf32>
      %17 = vector.broadcast %16 : vector<1x256xf32> to vector<8x256xf32>
      %18 = arith.addf %15, %17 : vector<8x256xf32>
      %cst_15 = arith.constant 0.000000e+00 : f32
      %19 = vector.broadcast %cst_15 : f32 to vector<8x256xf32>
      %20 = arith.maximumf %18, %19 : vector<8x256xf32>
      %21 = arith.truncf %20 : vector<8x256xf32> to vector<8x256xbf16>
      %c0_16 = arith.constant 0 : index
      %c0_17 = arith.constant 0 : index
      %22 = vector.load %arg7[%c0_16, %c0_17] : memref<8x256xbf16, #tpu.memory_space<vmem>>, vector<8x256xbf16>
      tpu.vector_store %arg7[%c0_16, %c0_17], %21 {strides = array<i32>} : memref<8x256xbf16, #tpu.memory_space<vmem>>, vector<8x256xbf16>,
    } else {
    }
    return
  }
  func.func @transform_0(%arg0: i32, %arg1: i32, %arg2: i32) -> (i32, i32) {
    %c0_i32 = arith.constant 0 : i32
    return %arg0, %arg2 : i32, i32
  }
  func.func @transform_1(%arg0: i32, %arg1: i32, %arg2: i32) -> (i32, i32) {
    %c0_i32 = arith.constant 0 : i32
    return %arg2, %arg1 : i32, i32
  }
  func.func @transform_2(%arg0: i32, %arg1: i32, %arg2: i32) -> (i32, i32) {
    %c0_i32 = arith.constant 0 : i32
    %c0_i32_0 = arith.constant 0 : i32
    return %c0_i32, %arg1 : i32, i32
  }
  func.func @transform_3(%arg0: i32, %arg1: i32, %arg2: i32) -> (i32, i32) {
    %c0_i32 = arith.constant 0 : i32
    %c0_i32_0 = arith.constant 0 : i32
    return %c0_i32, %arg1 : i32, i32
  }
  func.func @transform_4(%arg0: i32, %arg1: i32, %arg2: i32) -> (i32, i32) {
    %c0_i32 = arith.constant 0 : i32
    return %arg0, %arg1 : i32, i32
  }
}

module attributes {stable_mosaic.version = 11 : i64} {
  func.func @_fused_matmul_kernel(%arg0: i32, %arg1: i32, %arg2: i32, %arg3: memref<8x128xbf16, #tpu.memory_space<vmem>>, %arg4: memref<128x256xbf16, #tpu.memory_space<vmem>>, %arg5: memref<1x256xf32, #tpu.memory_space<vmem>>, %arg6: memref<1x256xf32, #tpu.memory_space<vmem>>, %arg7: memref<8x256xbf16, #tpu.memory_space<vmem>>, %arg8: memref<8x256xf32, #tpu.memory_space<vmem>>) attributes {dimension_semantics = [#tpu.dimension_semantics<parallel>, #tpu.dimension_semantics<parallel>, #tpu.dimension_semantics<arbitrary>], iteration_bounds = array<i64: 1, 1, 1>, scalar_prefetch = 0 : i64, scratch_operands = 1 : i64, tpu.core_type = #tpu.core_type<tc>, window_params = [{transform_indices = @transform_0, window_bounds = array<i64: 8, 128>}, {transform_indices = @transform_1, window_bounds = array<i64: 128, 256>}, {transform_indices = @transform_2, window_bounds = array<i64: 1, 256>}, {transform_indices = @transform_3, window_bounds = array<i64: 1, 256>}, {transform_indices = @transform_4, window_bounds = array<i64: 8, 256>}]} {
    %c0_i32 = arith.constant 0 : i32
    %0 = arith.cmpi eq, %arg2, %c0_i32 : i32
    %1 = arith.extui %0 : i1 to i32
    %c0_i32_0 = arith.constant 0 : i32
    %2 = arith.cmpi ne, %1, %c0_i32_0 : i32
    scf.if %2 {
      %cst_10 = arith.constant 0.000000e+00 : f32
      %12 = vector.broadcast %cst_10 : f32 to vector<8x256xf32>
      %c0_11 = arith.constant 0 : index
      %c0_12 = arith.constant 0 : index
      %13 = vector.load %arg8[%c0_11, %c0_12] : memref<8x256xf32, #tpu.memory_space<vmem>>, vector<8x256xf32>
      tpu.vector_store %arg8[%c0_11, %c0_12], %12 {strides = array<i32>} : memref<8x256xf32, #tpu.memory_space<vmem>>, vector<8x256xf32>,
    } else {
    }
    %c0 = arith.constant 0 : index
    %c0_1 = arith.constant 0 : index
    %3 = vector.load %arg8[%c0, %c0_1] : memref<8x256xf32, #tpu.memory_space<vmem>>, vector<8x256xf32>
    %c0_2 = arith.constant 0 : index
    %c0_3 = arith.constant 0 : index
    %4 = vector.load %arg3[%c0_2, %c0_3] : memref<8x128xbf16, #tpu.memory_space<vmem>>, vector<8x128xbf16>
    %c0_4 = arith.constant 0 : index
    %c0_5 = arith.constant 0 : index
    %5 = vector.load %arg4[%c0_4, %c0_5] : memref<128x256xbf16, #tpu.memory_space<vmem>>, vector<128x256xbf16>
    %cst = arith.constant dense<0.000000e+00> : vector<8x256xf32>
    %6 = tpu.matmul %4, %5, %cst {dimension_numbers = #tpu.dot_dimension_numbers<[1], [0], [0], [1], [0, 0, 1, 1], [], []>} : vector<8x128xbf16>, vector<128x256xbf16>, vector<8x256xf32> -> vector<8x256xf32>
    %7 = arith.addf %3, %6 : vector<8x256xf32>
    %c0_6 = arith.constant 0 : index
    %c0_7 = arith.constant 0 : index
    %8 = vector.load %arg8[%c0_6, %c0_7] : memref<8x256xf32, #tpu.memory_space<vmem>>, vector<8x256xf32>
    tpu.vector_store %arg8[%c0_6, %c0_7], %7 {strides = array<i32>} : memref<8x256xf32, #tpu.memory_space<vmem>>, vector<8x256xf32>,
    %c0_i32_8 = arith.constant 0 : i32
    %9 = arith.cmpi eq, %arg2, %c0_i32_8 : i32
    %10 = arith.extui %9 : i1 to i32
    %c0_i32_9 = arith.constant 0 : i32
    %11 = arith.cmpi ne, %10, %c0_i32_9 : i32
    scf.if %11 {
      %c0_10 = arith.constant 0 : index
      %c0_11 = arith.constant 0 : index
      %12 = vector.load %arg8[%c0_10, %c0_11] : memref<8x256xf32, #tpu.memory_space<vmem>>, vector<8x256xf32>
      %c0_12 = arith.constant 0 : index
      %c0_13 = arith.constant 0 : index
      %13 = vector.load %arg5[%c0_12, %c0_13] : memref<1x256xf32, #tpu.memory_space<vmem>>, vector<1x256xf32>
      %14 = vector.broadcast %13 : vector<1x256xf32> to vector<8x256xf32>
      %15 = arith.mulf %12, %14 : vector<8x256xf32>
      %c0_14 = arith.constant 0 : index
      %c0_15 = arith.constant 0 : index
      %16 = vector.load %arg6[%c0_14, %c0_15] : memref<1x256xf32, #tpu.memory_space<vmem>>, vector<1x256xf32>
      %17 = vector.broadcast %16 : vector<1x256xf32> to vector<8x256xf32>
      %18 = arith.addf %15, %17 : vector<8x256xf32>
      %19 = arith.truncf %18 : vector<8x256xf32> to vector<8x256xbf16>
      %c0_16 = arith.constant 0 : index
      %c0_17 = arith.constant 0 : index
      %20 = vector.load %arg7[%c0_16, %c0_17] : memref<8x256xbf16, #tpu.memory_space<vmem>>, vector<8x256xbf16>
      tpu.vector_store %arg7[%c0_16, %c0_17], %19 {strides = array<i32>} : memref<8x256xbf16, #tpu.memory_space<vmem>>, vector<8x256xbf16>,
    } else {
    }
    return
  }
  func.func @transform_0(%arg0: i32, %arg1: i32, %arg2: i32) -> (i32, i32) {
    %c0_i32 = arith.constant 0 : i32
    return %arg0, %arg2 : i32, i32
  }
  func.func @transform_1(%arg0: i32, %arg1: i32, %arg2: i32) -> (i32, i32) {
    %c0_i32 = arith.constant 0 : i32
    return %arg2, %arg1 : i32, i32
  }
  func.func @transform_2(%arg0: i32, %arg1: i32, %arg2: i32) -> (i32, i32) {
    %c0_i32 = arith.constant 0 : i32
    %c0_i32_0 = arith.constant 0 : i32
    return %c0_i32, %arg1 : i32, i32
  }
  func.func @transform_3(%arg0: i32, %arg1: i32, %arg2: i32) -> (i32, i32) {
    %c0_i32 = arith.constant 0 : i32
    %c0_i32_0 = arith.constant 0 : i32
    return %c0_i32, %arg1 : i32, i32
  }
  func.func @transform_4(%arg0: i32, %arg1: i32, %arg2: i32) -> (i32, i32) {
    %c0_i32 = arith.constant 0 : i32
    return %arg0, %arg1 : i32, i32
  }
}

module attributes {stable_mosaic.version = 11 : i64} {
  func.func @_fused_matmul_kernel(%arg0: i32, %arg1: i32, %arg2: i32, %arg3: memref<8x384xbf16, #tpu.memory_space<vmem>>, %arg4: memref<384x256xbf16, #tpu.memory_space<vmem>>, %arg5: memref<1x256xf32, #tpu.memory_space<vmem>>, %arg6: memref<1x256xf32, #tpu.memory_space<vmem>>, %arg7: memref<8x256xbf16, #tpu.memory_space<vmem>>, %arg8: memref<8x256xbf16, #tpu.memory_space<vmem>>, %arg9: memref<8x256xf32, #tpu.memory_space<vmem>>) attributes {dimension_semantics = [#tpu.dimension_semantics<parallel>, #tpu.dimension_semantics<parallel>, #tpu.dimension_semantics<arbitrary>], iteration_bounds = array<i64: 1, 1, 6>, scalar_prefetch = 0 : i64, scratch_operands = 1 : i64, tpu.core_type = #tpu.core_type<tc>, window_params = [{transform_indices = @transform_0, window_bounds = array<i64: 8, 384>}, {transform_indices = @transform_1, window_bounds = array<i64: 384, 256>}, {transform_indices = @transform_2, window_bounds = array<i64: 1, 256>}, {transform_indices = @transform_3, window_bounds = array<i64: 1, 256>}, {transform_indices = @transform_4, window_bounds = array<i64: 8, 256>}, {transform_indices = @transform_5, window_bounds = array<i64: 8, 256>}]} {
    %c0_i32 = arith.constant 0 : i32
    %0 = arith.cmpi eq, %arg2, %c0_i32 : i32
    %1 = arith.extui %0 : i1 to i32
    %c0_i32_0 = arith.constant 0 : i32
    %2 = arith.cmpi ne, %1, %c0_i32_0 : i32
    scf.if %2 {
      %cst_9 = arith.constant 0.000000e+00 : f32
      %12 = vector.broadcast %cst_9 : f32 to vector<8x256xf32>
      %c0_10 = arith.constant 0 : index
      %c0_11 = arith.constant 0 : index
      %13 = vector.load %arg9[%c0_10, %c0_11] : memref<8x256xf32, #tpu.memory_space<vmem>>, vector<8x256xf32>
      tpu.vector_store %arg9[%c0_10, %c0_11], %12 {strides = array<i32>} : memref<8x256xf32, #tpu.memory_space<vmem>>, vector<8x256xf32>,
    } else {
    }
    %c0 = arith.constant 0 : index
    %c0_1 = arith.constant 0 : index
    %3 = vector.load %arg9[%c0, %c0_1] : memref<8x256xf32, #tpu.memory_space<vmem>>, vector<8x256xf32>
    %c0_2 = arith.constant 0 : index
    %c0_3 = arith.constant 0 : index
    %4 = vector.load %arg3[%c0_2, %c0_3] : memref<8x384xbf16, #tpu.memory_space<vmem>>, vector<8x384xbf16>
    %c0_4 = arith.constant 0 : index
    %c0_5 = arith.constant 0 : index
    %5 = vector.load %arg4[%c0_4, %c0_5] : memref<384x256xbf16, #tpu.memory_space<vmem>>, vector<384x256xbf16>
    %cst = arith.constant dense<0.000000e+00> : vector<8x256xf32>
    %6 = tpu.matmul %4, %5, %cst {dimension_numbers = #tpu.dot_dimension_numbers<[1], [0], [0], [1], [0, 0, 1, 1], [], []>} : vector<8x384xbf16>, vector<384x256xbf16>, vector<8x256xf32> -> vector<8x256xf32>
    %7 = arith.addf %3, %6 : vector<8x256xf32>
    %c0_6 = arith.constant 0 : index
    %c0_7 = arith.constant 0 : index
    %8 = vector.load %arg9[%c0_6, %c0_7] : memref<8x256xf32, #tpu.memory_space<vmem>>, vector<8x256xf32>
    tpu.vector_store %arg9[%c0_6, %c0_7], %7 {strides = array<i32>} : memref<8x256xf32, #tpu.memory_space<vmem>>, vector<8x256xf32>,
    %c5_i32 = arith.constant 5 : i32
    %9 = arith.cmpi eq, %arg2, %c5_i32 : i32
    %10 = arith.extui %9 : i1 to i32
    %c0_i32_8 = arith.constant 0 : i32
    %11 = arith.cmpi ne, %10, %c0_i32_8 : i32
    scf.if %11 {
      %c0_9 = arith.constant 0 : index
      %c0_10 = arith.constant 0 : index
      %12 = vector.load %arg9[%c0_9, %c0_10] : memref<8x256xf32, #tpu.memory_space<vmem>>, vector<8x256xf32>
      %c0_11 = arith.constant 0 : index
      %c0_12 = arith.constant 0 : index
      %13 = vector.load %arg5[%c0_11, %c0_12] : memref<1x256xf32, #tpu.memory_space<vmem>>, vector<1x256xf32>
      %14 = vector.broadcast %13 : vector<1x256xf32> to vector<8x256xf32>
      %15 = arith.mulf %12, %14 : vector<8x256xf32>
      %c0_13 = arith.constant 0 : index
      %c0_14 = arith.constant 0 : index
      %16 = vector.load %arg6[%c0_13, %c0_14] : memref<1x256xf32, #tpu.memory_space<vmem>>, vector<1x256xf32>
      %17 = vector.broadcast %16 : vector<1x256xf32> to vector<8x256xf32>
      %18 = arith.addf %15, %17 : vector<8x256xf32>
      %c0_15 = arith.constant 0 : index
      %c0_16 = arith.constant 0 : index
      %19 = vector.load %arg7[%c0_15, %c0_16] : memref<8x256xbf16, #tpu.memory_space<vmem>>, vector<8x256xbf16>
      %20 = arith.extf %19 : vector<8x256xbf16> to vector<8x256xf32>
      %21 = arith.addf %18, %20 : vector<8x256xf32>
      %cst_17 = arith.constant 0.000000e+00 : f32
      %22 = vector.broadcast %cst_17 : f32 to vector<8x256xf32>
      %23 = arith.maximumf %21, %22 : vector<8x256xf32>
      %24 = arith.truncf %23 : vector<8x256xf32> to vector<8x256xbf16>
      %c0_18 = arith.constant 0 : index
      %c0_19 = arith.constant 0 : index
      %25 = vector.load %arg8[%c0_18, %c0_19] : memref<8x256xbf16, #tpu.memory_space<vmem>>, vector<8x256xbf16>
      tpu.vector_store %arg8[%c0_18, %c0_19], %24 {strides = array<i32>} : memref<8x256xbf16, #tpu.memory_space<vmem>>, vector<8x256xbf16>,
    } else {
    }
    return
  }
  func.func @transform_0(%arg0: i32, %arg1: i32, %arg2: i32) -> (i32, i32) {
    %c0_i32 = arith.constant 0 : i32
    return %arg0, %arg2 : i32, i32
  }
  func.func @transform_1(%arg0: i32, %arg1: i32, %arg2: i32) -> (i32, i32) {
    %c0_i32 = arith.constant 0 : i32
    return %arg2, %arg1 : i32, i32
  }
  func.func @transform_2(%arg0: i32, %arg1: i32, %arg2: i32) -> (i32, i32) {
    %c0_i32 = arith.constant 0 : i32
    %c0_i32_0 = arith.constant 0 : i32
    return %c0_i32, %arg1 : i32, i32
  }
  func.func @transform_3(%arg0: i32, %arg1: i32, %arg2: i32) -> (i32, i32) {
    %c0_i32 = arith.constant 0 : i32
    %c0_i32_0 = arith.constant 0 : i32
    return %c0_i32, %arg1 : i32, i32
  }
  func.func @transform_4(%arg0: i32, %arg1: i32, %arg2: i32) -> (i32, i32) {
    %c0_i32 = arith.constant 0 : i32
    return %arg0, %arg1 : i32, i32
  }
  func.func @transform_5(%arg0: i32, %arg1: i32, %arg2: i32) -> (i32, i32) {
    %c0_i32 = arith.constant 0 : i32
    return %arg0, %arg1 : i32, i32
  }
}

module attributes {stable_mosaic.version = 11 : i64} {
  func.func @_fused_matmul_kernel(%arg0: i32, %arg1: i32, %arg2: i32, %arg3: memref<8x384xbf16, #tpu.memory_space<vmem>>, %arg4: memref<384x256xbf16, #tpu.memory_space<vmem>>, %arg5: memref<1x256xf32, #tpu.memory_space<vmem>>, %arg6: memref<1x256xf32, #tpu.memory_space<vmem>>, %arg7: memref<8x256xbf16, #tpu.memory_space<vmem>>, %arg8: memref<8x256xf32, #tpu.memory_space<vmem>>) attributes {dimension_semantics = [#tpu.dimension_semantics<parallel>, #tpu.dimension_semantics<parallel>, #tpu.dimension_semantics<arbitrary>], iteration_bounds = array<i64: 1, 1, 6>, scalar_prefetch = 0 : i64, scratch_operands = 1 : i64, tpu.core_type = #tpu.core_type<tc>, window_params = [{transform_indices = @transform_0, window_bounds = array<i64: 8, 384>}, {transform_indices = @transform_1, window_bounds = array<i64: 384, 256>}, {transform_indices = @transform_2, window_bounds = array<i64: 1, 256>}, {transform_indices = @transform_3, window_bounds = array<i64: 1, 256>}, {transform_indices = @transform_4, window_bounds = array<i64: 8, 256>}]} {
    %c0_i32 = arith.constant 0 : i32
    %0 = arith.cmpi eq, %arg2, %c0_i32 : i32
    %1 = arith.extui %0 : i1 to i32
    %c0_i32_0 = arith.constant 0 : i32
    %2 = arith.cmpi ne, %1, %c0_i32_0 : i32
    scf.if %2 {
      %cst_9 = arith.constant 0.000000e+00 : f32
      %12 = vector.broadcast %cst_9 : f32 to vector<8x256xf32>
      %c0_10 = arith.constant 0 : index
      %c0_11 = arith.constant 0 : index
      %13 = vector.load %arg8[%c0_10, %c0_11] : memref<8x256xf32, #tpu.memory_space<vmem>>, vector<8x256xf32>
      tpu.vector_store %arg8[%c0_10, %c0_11], %12 {strides = array<i32>} : memref<8x256xf32, #tpu.memory_space<vmem>>, vector<8x256xf32>,
    } else {
    }
    %c0 = arith.constant 0 : index
    %c0_1 = arith.constant 0 : index
    %3 = vector.load %arg8[%c0, %c0_1] : memref<8x256xf32, #tpu.memory_space<vmem>>, vector<8x256xf32>
    %c0_2 = arith.constant 0 : index
    %c0_3 = arith.constant 0 : index
    %4 = vector.load %arg3[%c0_2, %c0_3] : memref<8x384xbf16, #tpu.memory_space<vmem>>, vector<8x384xbf16>
    %c0_4 = arith.constant 0 : index
    %c0_5 = arith.constant 0 : index
    %5 = vector.load %arg4[%c0_4, %c0_5] : memref<384x256xbf16, #tpu.memory_space<vmem>>, vector<384x256xbf16>
    %cst = arith.constant dense<0.000000e+00> : vector<8x256xf32>
    %6 = tpu.matmul %4, %5, %cst {dimension_numbers = #tpu.dot_dimension_numbers<[1], [0], [0], [1], [0, 0, 1, 1], [], []>} : vector<8x384xbf16>, vector<384x256xbf16>, vector<8x256xf32> -> vector<8x256xf32>
    %7 = arith.addf %3, %6 : vector<8x256xf32>
    %c0_6 = arith.constant 0 : index
    %c0_7 = arith.constant 0 : index
    %8 = vector.load %arg8[%c0_6, %c0_7] : memref<8x256xf32, #tpu.memory_space<vmem>>, vector<8x256xf32>
    tpu.vector_store %arg8[%c0_6, %c0_7], %7 {strides = array<i32>} : memref<8x256xf32, #tpu.memory_space<vmem>>, vector<8x256xf32>,
    %c5_i32 = arith.constant 5 : i32
    %9 = arith.cmpi eq, %arg2, %c5_i32 : i32
    %10 = arith.extui %9 : i1 to i32
    %c0_i32_8 = arith.constant 0 : i32
    %11 = arith.cmpi ne, %10, %c0_i32_8 : i32
    scf.if %11 {
      %c0_9 = arith.constant 0 : index
      %c0_10 = arith.constant 0 : index
      %12 = vector.load %arg8[%c0_9, %c0_10] : memref<8x256xf32, #tpu.memory_space<vmem>>, vector<8x256xf32>
      %c0_11 = arith.constant 0 : index
      %c0_12 = arith.constant 0 : index
      %13 = vector.load %arg5[%c0_11, %c0_12] : memref<1x256xf32, #tpu.memory_space<vmem>>, vector<1x256xf32>
      %14 = vector.broadcast %13 : vector<1x256xf32> to vector<8x256xf32>
      %15 = arith.mulf %12, %14 : vector<8x256xf32>
      %c0_13 = arith.constant 0 : index
      %c0_14 = arith.constant 0 : index
      %16 = vector.load %arg6[%c0_13, %c0_14] : memref<1x256xf32, #tpu.memory_space<vmem>>, vector<1x256xf32>
      %17 = vector.broadcast %16 : vector<1x256xf32> to vector<8x256xf32>
      %18 = arith.addf %15, %17 : vector<8x256xf32>
      %cst_15 = arith.constant 0.000000e+00 : f32
      %19 = vector.broadcast %cst_15 : f32 to vector<8x256xf32>
      %20 = arith.maximumf %18, %19 : vector<8x256xf32>
      %21 = arith.truncf %20 : vector<8x256xf32> to vector<8x256xbf16>
      %c0_16 = arith.constant 0 : index
      %c0_17 = arith.constant 0 : index
      %22 = vector.load %arg7[%c0_16, %c0_17] : memref<8x256xbf16, #tpu.memory_space<vmem>>, vector<8x256xbf16>
      tpu.vector_store %arg7[%c0_16, %c0_17], %21 {strides = array<i32>} : memref<8x256xbf16, #tpu.memory_space<vmem>>, vector<8x256xbf16>,
    } else {
    }
    return
  }
  func.func @transform_0(%arg0: i32, %arg1: i32, %arg2: i32) -> (i32, i32) {
    %c0_i32 = arith.constant 0 : i32
    return %arg0, %arg2 : i32, i32
  }
  func.func @transform_1(%arg0: i32, %arg1: i32, %arg2: i32) -> (i32, i32) {
    %c0_i32 = arith.constant 0 : i32
    return %arg2, %arg1 : i32, i32
  }
  func.func @transform_2(%arg0: i32, %arg1: i32, %arg2: i32) -> (i32, i32) {
    %c0_i32 = arith.constant 0 : i32
    %c0_i32_0 = arith.constant 0 : i32
    return %c0_i32, %arg1 : i32, i32
  }
  func.func @transform_3(%arg0: i32, %arg1: i32, %arg2: i32) -> (i32, i32) {
    %c0_i32 = arith.constant 0 : i32
    %c0_i32_0 = arith.constant 0 : i32
    return %c0_i32, %arg1 : i32, i32
  }
  func.func @transform_4(%arg0: i32, %arg1: i32, %arg2: i32) -> (i32, i32) {
    %c0_i32 = arith.constant 0 : i32
    return %arg0, %arg1 : i32, i32
  }
}

module attributes {stable_mosaic.version = 11 : i64} {
  func.func @_fused_matmul_kernel(%arg0: i32, %arg1: i32, %arg2: i32, %arg3: memref<8x384xbf16, #tpu.memory_space<vmem>>, %arg4: memref<384x256xbf16, #tpu.memory_space<vmem>>, %arg5: memref<1x256xf32, #tpu.memory_space<vmem>>, %arg6: memref<1x256xf32, #tpu.memory_space<vmem>>, %arg7: memref<8x256xbf16, #tpu.memory_space<vmem>>, %arg8: memref<8x256xf32, #tpu.memory_space<vmem>>) attributes {dimension_semantics = [#tpu.dimension_semantics<parallel>, #tpu.dimension_semantics<parallel>, #tpu.dimension_semantics<arbitrary>], iteration_bounds = array<i64: 1, 2, 6>, scalar_prefetch = 0 : i64, scratch_operands = 1 : i64, tpu.core_type = #tpu.core_type<tc>, window_params = [{transform_indices = @transform_0, window_bounds = array<i64: 8, 384>}, {transform_indices = @transform_1, window_bounds = array<i64: 384, 256>}, {transform_indices = @transform_2, window_bounds = array<i64: 1, 256>}, {transform_indices = @transform_3, window_bounds = array<i64: 1, 256>}, {transform_indices = @transform_4, window_bounds = array<i64: 8, 256>}]} {
    %c0_i32 = arith.constant 0 : i32
    %0 = arith.cmpi eq, %arg2, %c0_i32 : i32
    %1 = arith.extui %0 : i1 to i32
    %c0_i32_0 = arith.constant 0 : i32
    %2 = arith.cmpi ne, %1, %c0_i32_0 : i32
    scf.if %2 {
      %cst_9 = arith.constant 0.000000e+00 : f32
      %12 = vector.broadcast %cst_9 : f32 to vector<8x256xf32>
      %c0_10 = arith.constant 0 : index
      %c0_11 = arith.constant 0 : index
      %13 = vector.load %arg8[%c0_10, %c0_11] : memref<8x256xf32, #tpu.memory_space<vmem>>, vector<8x256xf32>
      tpu.vector_store %arg8[%c0_10, %c0_11], %12 {strides = array<i32>} : memref<8x256xf32, #tpu.memory_space<vmem>>, vector<8x256xf32>,
    } else {
    }
    %c0 = arith.constant 0 : index
    %c0_1 = arith.constant 0 : index
    %3 = vector.load %arg8[%c0, %c0_1] : memref<8x256xf32, #tpu.memory_space<vmem>>, vector<8x256xf32>
    %c0_2 = arith.constant 0 : index
    %c0_3 = arith.constant 0 : index
    %4 = vector.load %arg3[%c0_2, %c0_3] : memref<8x384xbf16, #tpu.memory_space<vmem>>, vector<8x384xbf16>
    %c0_4 = arith.constant 0 : index
    %c0_5 = arith.constant 0 : index
    %5 = vector.load %arg4[%c0_4, %c0_5] : memref<384x256xbf16, #tpu.memory_space<vmem>>, vector<384x256xbf16>
    %cst = arith.constant dense<0.000000e+00> : vector<8x256xf32>
    %6 = tpu.matmul %4, %5, %cst {dimension_numbers = #tpu.dot_dimension_numbers<[1], [0], [0], [1], [0, 0, 1, 1], [], []>} : vector<8x384xbf16>, vector<384x256xbf16>, vector<8x256xf32> -> vector<8x256xf32>
    %7 = arith.addf %3, %6 : vector<8x256xf32>
    %c0_6 = arith.constant 0 : index
    %c0_7 = arith.constant 0 : index
    %8 = vector.load %arg8[%c0_6, %c0_7] : memref<8x256xf32, #tpu.memory_space<vmem>>, vector<8x256xf32>
    tpu.vector_store %arg8[%c0_6, %c0_7], %7 {strides = array<i32>} : memref<8x256xf32, #tpu.memory_space<vmem>>, vector<8x256xf32>,
    %c5_i32 = arith.constant 5 : i32
    %9 = arith.cmpi eq, %arg2, %c5_i32 : i32
    %10 = arith.extui %9 : i1 to i32
    %c0_i32_8 = arith.constant 0 : i32
    %11 = arith.cmpi ne, %10, %c0_i32_8 : i32
    scf.if %11 {
      %c0_9 = arith.constant 0 : index
      %c0_10 = arith.constant 0 : index
      %12 = vector.load %arg8[%c0_9, %c0_10] : memref<8x256xf32, #tpu.memory_space<vmem>>, vector<8x256xf32>
      %c0_11 = arith.constant 0 : index
      %c0_12 = arith.constant 0 : index
      %13 = vector.load %arg5[%c0_11, %c0_12] : memref<1x256xf32, #tpu.memory_space<vmem>>, vector<1x256xf32>
      %14 = vector.broadcast %13 : vector<1x256xf32> to vector<8x256xf32>
      %15 = arith.mulf %12, %14 : vector<8x256xf32>
      %c0_13 = arith.constant 0 : index
      %c0_14 = arith.constant 0 : index
      %16 = vector.load %arg6[%c0_13, %c0_14] : memref<1x256xf32, #tpu.memory_space<vmem>>, vector<1x256xf32>
      %17 = vector.broadcast %16 : vector<1x256xf32> to vector<8x256xf32>
      %18 = arith.addf %15, %17 : vector<8x256xf32>
      %cst_15 = arith.constant 0.000000e+00 : f32
      %19 = vector.broadcast %cst_15 : f32 to vector<8x256xf32>
      %20 = arith.maximumf %18, %19 : vector<8x256xf32>
      %21 = arith.truncf %20 : vector<8x256xf32> to vector<8x256xbf16>
      %c0_16 = arith.constant 0 : index
      %c0_17 = arith.constant 0 : index
      %22 = vector.load %arg7[%c0_16, %c0_17] : memref<8x256xbf16, #tpu.memory_space<vmem>>, vector<8x256xbf16>
      tpu.vector_store %arg7[%c0_16, %c0_17], %21 {strides = array<i32>} : memref<8x256xbf16, #tpu.memory_space<vmem>>, vector<8x256xbf16>,
    } else {
    }
    return
  }
  func.func @transform_0(%arg0: i32, %arg1: i32, %arg2: i32) -> (i32, i32) {
    %c0_i32 = arith.constant 0 : i32
    return %arg0, %arg2 : i32, i32
  }
  func.func @transform_1(%arg0: i32, %arg1: i32, %arg2: i32) -> (i32, i32) {
    %c0_i32 = arith.constant 0 : i32
    return %arg2, %arg1 : i32, i32
  }
  func.func @transform_2(%arg0: i32, %arg1: i32, %arg2: i32) -> (i32, i32) {
    %c0_i32 = arith.constant 0 : i32
    %c0_i32_0 = arith.constant 0 : i32
    return %c0_i32, %arg1 : i32, i32
  }
  func.func @transform_3(%arg0: i32, %arg1: i32, %arg2: i32) -> (i32, i32) {
    %c0_i32 = arith.constant 0 : i32
    %c0_i32_0 = arith.constant 0 : i32
    return %c0_i32, %arg1 : i32, i32
  }
  func.func @transform_4(%arg0: i32, %arg1: i32, %arg2: i32) -> (i32, i32) {
    %c0_i32 = arith.constant 0 : i32
    return %arg0, %arg1 : i32, i32
  }
}

module attributes {stable_mosaic.version = 11 : i64} {
  func.func @_fused_matmul_kernel(%arg0: i32, %arg1: i32, %arg2: i32, %arg3: memref<8x256xbf16, #tpu.memory_space<vmem>>, %arg4: memref<256x256xbf16, #tpu.memory_space<vmem>>, %arg5: memref<1x256xf32, #tpu.memory_space<vmem>>, %arg6: memref<1x256xf32, #tpu.memory_space<vmem>>, %arg7: memref<8x256xbf16, #tpu.memory_space<vmem>>, %arg8: memref<8x256xf32, #tpu.memory_space<vmem>>) attributes {dimension_semantics = [#tpu.dimension_semantics<parallel>, #tpu.dimension_semantics<parallel>, #tpu.dimension_semantics<arbitrary>], iteration_bounds = array<i64: 1, 2, 1>, scalar_prefetch = 0 : i64, scratch_operands = 1 : i64, tpu.core_type = #tpu.core_type<tc>, window_params = [{transform_indices = @transform_0, window_bounds = array<i64: 8, 256>}, {transform_indices = @transform_1, window_bounds = array<i64: 256, 256>}, {transform_indices = @transform_2, window_bounds = array<i64: 1, 256>}, {transform_indices = @transform_3, window_bounds = array<i64: 1, 256>}, {transform_indices = @transform_4, window_bounds = array<i64: 8, 256>}]} {
    %c0_i32 = arith.constant 0 : i32
    %0 = arith.cmpi eq, %arg2, %c0_i32 : i32
    %1 = arith.extui %0 : i1 to i32
    %c0_i32_0 = arith.constant 0 : i32
    %2 = arith.cmpi ne, %1, %c0_i32_0 : i32
    scf.if %2 {
      %cst_10 = arith.constant 0.000000e+00 : f32
      %12 = vector.broadcast %cst_10 : f32 to vector<8x256xf32>
      %c0_11 = arith.constant 0 : index
      %c0_12 = arith.constant 0 : index
      %13 = vector.load %arg8[%c0_11, %c0_12] : memref<8x256xf32, #tpu.memory_space<vmem>>, vector<8x256xf32>
      tpu.vector_store %arg8[%c0_11, %c0_12], %12 {strides = array<i32>} : memref<8x256xf32, #tpu.memory_space<vmem>>, vector<8x256xf32>,
    } else {
    }
    %c0 = arith.constant 0 : index
    %c0_1 = arith.constant 0 : index
    %3 = vector.load %arg8[%c0, %c0_1] : memref<8x256xf32, #tpu.memory_space<vmem>>, vector<8x256xf32>
    %c0_2 = arith.constant 0 : index
    %c0_3 = arith.constant 0 : index
    %4 = vector.load %arg3[%c0_2, %c0_3] : memref<8x256xbf16, #tpu.memory_space<vmem>>, vector<8x256xbf16>
    %c0_4 = arith.constant 0 : index
    %c0_5 = arith.constant 0 : index
    %5 = vector.load %arg4[%c0_4, %c0_5] : memref<256x256xbf16, #tpu.memory_space<vmem>>, vector<256x256xbf16>
    %cst = arith.constant dense<0.000000e+00> : vector<8x256xf32>
    %6 = tpu.matmul %4, %5, %cst {dimension_numbers = #tpu.dot_dimension_numbers<[1], [0], [0], [1], [0, 0, 1, 1], [], []>} : vector<8x256xbf16>, vector<256x256xbf16>, vector<8x256xf32> -> vector<8x256xf32>
    %7 = arith.addf %3, %6 : vector<8x256xf32>
    %c0_6 = arith.constant 0 : index
    %c0_7 = arith.constant 0 : index
    %8 = vector.load %arg8[%c0_6, %c0_7] : memref<8x256xf32, #tpu.memory_space<vmem>>, vector<8x256xf32>
    tpu.vector_store %arg8[%c0_6, %c0_7], %7 {strides = array<i32>} : memref<8x256xf32, #tpu.memory_space<vmem>>, vector<8x256xf32>,
    %c0_i32_8 = arith.constant 0 : i32
    %9 = arith.cmpi eq, %arg2, %c0_i32_8 : i32
    %10 = arith.extui %9 : i1 to i32
    %c0_i32_9 = arith.constant 0 : i32
    %11 = arith.cmpi ne, %10, %c0_i32_9 : i32
    scf.if %11 {
      %c0_10 = arith.constant 0 : index
      %c0_11 = arith.constant 0 : index
      %12 = vector.load %arg8[%c0_10, %c0_11] : memref<8x256xf32, #tpu.memory_space<vmem>>, vector<8x256xf32>
      %c0_12 = arith.constant 0 : index
      %c0_13 = arith.constant 0 : index
      %13 = vector.load %arg5[%c0_12, %c0_13] : memref<1x256xf32, #tpu.memory_space<vmem>>, vector<1x256xf32>
      %14 = vector.broadcast %13 : vector<1x256xf32> to vector<8x256xf32>
      %15 = arith.mulf %12, %14 : vector<8x256xf32>
      %c0_14 = arith.constant 0 : index
      %c0_15 = arith.constant 0 : index
      %16 = vector.load %arg6[%c0_14, %c0_15] : memref<1x256xf32, #tpu.memory_space<vmem>>, vector<1x256xf32>
      %17 = vector.broadcast %16 : vector<1x256xf32> to vector<8x256xf32>
      %18 = arith.addf %15, %17 : vector<8x256xf32>
      %19 = arith.truncf %18 : vector<8x256xf32> to vector<8x256xbf16>
      %c0_16 = arith.constant 0 : index
      %c0_17 = arith.constant 0 : index
      %20 = vector.load %arg7[%c0_16, %c0_17] : memref<8x256xbf16, #tpu.memory_space<vmem>>, vector<8x256xbf16>
      tpu.vector_store %arg7[%c0_16, %c0_17], %19 {strides = array<i32>} : memref<8x256xbf16, #tpu.memory_space<vmem>>, vector<8x256xbf16>,
    } else {
    }
    return
  }
  func.func @transform_0(%arg0: i32, %arg1: i32, %arg2: i32) -> (i32, i32) {
    %c0_i32 = arith.constant 0 : i32
    return %arg0, %arg2 : i32, i32
  }
  func.func @transform_1(%arg0: i32, %arg1: i32, %arg2: i32) -> (i32, i32) {
    %c0_i32 = arith.constant 0 : i32
    return %arg2, %arg1 : i32, i32
  }
  func.func @transform_2(%arg0: i32, %arg1: i32, %arg2: i32) -> (i32, i32) {
    %c0_i32 = arith.constant 0 : i32
    %c0_i32_0 = arith.constant 0 : i32
    return %c0_i32, %arg1 : i32, i32
  }
  func.func @transform_3(%arg0: i32, %arg1: i32, %arg2: i32) -> (i32, i32) {
    %c0_i32 = arith.constant 0 : i32
    %c0_i32_0 = arith.constant 0 : i32
    return %c0_i32, %arg1 : i32, i32
  }
  func.func @transform_4(%arg0: i32, %arg1: i32, %arg2: i32) -> (i32, i32) {
    %c0_i32 = arith.constant 0 : i32
    return %arg0, %arg1 : i32, i32
  }
}

module attributes {stable_mosaic.version = 11 : i64} {
  func.func @_fused_matmul_kernel(%arg0: i32, %arg1: i32, %arg2: i32, %arg3: memref<8x512xbf16, #tpu.memory_space<vmem>>, %arg4: memref<512x256xbf16, #tpu.memory_space<vmem>>, %arg5: memref<1x256xf32, #tpu.memory_space<vmem>>, %arg6: memref<1x256xf32, #tpu.memory_space<vmem>>, %arg7: memref<8x256xbf16, #tpu.memory_space<vmem>>, %arg8: memref<8x256xbf16, #tpu.memory_space<vmem>>, %arg9: memref<8x256xf32, #tpu.memory_space<vmem>>) attributes {dimension_semantics = [#tpu.dimension_semantics<parallel>, #tpu.dimension_semantics<parallel>, #tpu.dimension_semantics<arbitrary>], iteration_bounds = array<i64: 1, 2, 9>, scalar_prefetch = 0 : i64, scratch_operands = 1 : i64, tpu.core_type = #tpu.core_type<tc>, window_params = [{transform_indices = @transform_0, window_bounds = array<i64: 8, 512>}, {transform_indices = @transform_1, window_bounds = array<i64: 512, 256>}, {transform_indices = @transform_2, window_bounds = array<i64: 1, 256>}, {transform_indices = @transform_3, window_bounds = array<i64: 1, 256>}, {transform_indices = @transform_4, window_bounds = array<i64: 8, 256>}, {transform_indices = @transform_5, window_bounds = array<i64: 8, 256>}]} {
    %c0_i32 = arith.constant 0 : i32
    %0 = arith.cmpi eq, %arg2, %c0_i32 : i32
    %1 = arith.extui %0 : i1 to i32
    %c0_i32_0 = arith.constant 0 : i32
    %2 = arith.cmpi ne, %1, %c0_i32_0 : i32
    scf.if %2 {
      %cst_9 = arith.constant 0.000000e+00 : f32
      %12 = vector.broadcast %cst_9 : f32 to vector<8x256xf32>
      %c0_10 = arith.constant 0 : index
      %c0_11 = arith.constant 0 : index
      %13 = vector.load %arg9[%c0_10, %c0_11] : memref<8x256xf32, #tpu.memory_space<vmem>>, vector<8x256xf32>
      tpu.vector_store %arg9[%c0_10, %c0_11], %12 {strides = array<i32>} : memref<8x256xf32, #tpu.memory_space<vmem>>, vector<8x256xf32>,
    } else {
    }
    %c0 = arith.constant 0 : index
    %c0_1 = arith.constant 0 : index
    %3 = vector.load %arg9[%c0, %c0_1] : memref<8x256xf32, #tpu.memory_space<vmem>>, vector<8x256xf32>
    %c0_2 = arith.constant 0 : index
    %c0_3 = arith.constant 0 : index
    %4 = vector.load %arg3[%c0_2, %c0_3] : memref<8x512xbf16, #tpu.memory_space<vmem>>, vector<8x512xbf16>
    %c0_4 = arith.constant 0 : index
    %c0_5 = arith.constant 0 : index
    %5 = vector.load %arg4[%c0_4, %c0_5] : memref<512x256xbf16, #tpu.memory_space<vmem>>, vector<512x256xbf16>
    %cst = arith.constant dense<0.000000e+00> : vector<8x256xf32>
    %6 = tpu.matmul %4, %5, %cst {dimension_numbers = #tpu.dot_dimension_numbers<[1], [0], [0], [1], [0, 0, 1, 1], [], []>} : vector<8x512xbf16>, vector<512x256xbf16>, vector<8x256xf32> -> vector<8x256xf32>
    %7 = arith.addf %3, %6 : vector<8x256xf32>
    %c0_6 = arith.constant 0 : index
    %c0_7 = arith.constant 0 : index
    %8 = vector.load %arg9[%c0_6, %c0_7] : memref<8x256xf32, #tpu.memory_space<vmem>>, vector<8x256xf32>
    tpu.vector_store %arg9[%c0_6, %c0_7], %7 {strides = array<i32>} : memref<8x256xf32, #tpu.memory_space<vmem>>, vector<8x256xf32>,
    %c8_i32 = arith.constant 8 : i32
    %9 = arith.cmpi eq, %arg2, %c8_i32 : i32
    %10 = arith.extui %9 : i1 to i32
    %c0_i32_8 = arith.constant 0 : i32
    %11 = arith.cmpi ne, %10, %c0_i32_8 : i32
    scf.if %11 {
      %c0_9 = arith.constant 0 : index
      %c0_10 = arith.constant 0 : index
      %12 = vector.load %arg9[%c0_9, %c0_10] : memref<8x256xf32, #tpu.memory_space<vmem>>, vector<8x256xf32>
      %c0_11 = arith.constant 0 : index
      %c0_12 = arith.constant 0 : index
      %13 = vector.load %arg5[%c0_11, %c0_12] : memref<1x256xf32, #tpu.memory_space<vmem>>, vector<1x256xf32>
      %14 = vector.broadcast %13 : vector<1x256xf32> to vector<8x256xf32>
      %15 = arith.mulf %12, %14 : vector<8x256xf32>
      %c0_13 = arith.constant 0 : index
      %c0_14 = arith.constant 0 : index
      %16 = vector.load %arg6[%c0_13, %c0_14] : memref<1x256xf32, #tpu.memory_space<vmem>>, vector<1x256xf32>
      %17 = vector.broadcast %16 : vector<1x256xf32> to vector<8x256xf32>
      %18 = arith.addf %15, %17 : vector<8x256xf32>
      %c0_15 = arith.constant 0 : index
      %c0_16 = arith.constant 0 : index
      %19 = vector.load %arg7[%c0_15, %c0_16] : memref<8x256xbf16, #tpu.memory_space<vmem>>, vector<8x256xbf16>
      %20 = arith.extf %19 : vector<8x256xbf16> to vector<8x256xf32>
      %21 = arith.addf %18, %20 : vector<8x256xf32>
      %cst_17 = arith.constant 0.000000e+00 : f32
      %22 = vector.broadcast %cst_17 : f32 to vector<8x256xf32>
      %23 = arith.maximumf %21, %22 : vector<8x256xf32>
      %24 = arith.truncf %23 : vector<8x256xf32> to vector<8x256xbf16>
      %c0_18 = arith.constant 0 : index
      %c0_19 = arith.constant 0 : index
      %25 = vector.load %arg8[%c0_18, %c0_19] : memref<8x256xbf16, #tpu.memory_space<vmem>>, vector<8x256xbf16>
      tpu.vector_store %arg8[%c0_18, %c0_19], %24 {strides = array<i32>} : memref<8x256xbf16, #tpu.memory_space<vmem>>, vector<8x256xbf16>,
    } else {
    }
    return
  }
  func.func @transform_0(%arg0: i32, %arg1: i32, %arg2: i32) -> (i32, i32) {
    %c0_i32 = arith.constant 0 : i32
    return %arg0, %arg2 : i32, i32
  }
  func.func @transform_1(%arg0: i32, %arg1: i32, %arg2: i32) -> (i32, i32) {
    %c0_i32 = arith.constant 0 : i32
    return %arg2, %arg1 : i32, i32
  }
  func.func @transform_2(%arg0: i32, %arg1: i32, %arg2: i32) -> (i32, i32) {
    %c0_i32 = arith.constant 0 : i32
    %c0_i32_0 = arith.constant 0 : i32
    return %c0_i32, %arg1 : i32, i32
  }
  func.func @transform_3(%arg0: i32, %arg1: i32, %arg2: i32) -> (i32, i32) {
    %c0_i32 = arith.constant 0 : i32
    %c0_i32_0 = arith.constant 0 : i32
    return %c0_i32, %arg1 : i32, i32
  }
  func.func @transform_4(%arg0: i32, %arg1: i32, %arg2: i32) -> (i32, i32) {
    %c0_i32 = arith.constant 0 : i32
    return %arg0, %arg1 : i32, i32
  }
  func.func @transform_5(%arg0: i32, %arg1: i32, %arg2: i32) -> (i32, i32) {
    %c0_i32 = arith.constant 0 : i32
    return %arg0, %arg1 : i32, i32
  }
}

module attributes {stable_mosaic.version = 11 : i64} {
  func.func @_fused_matmul_kernel(%arg0: i32, %arg1: i32, %arg2: i32, %arg3: memref<8x512xbf16, #tpu.memory_space<vmem>>, %arg4: memref<512x256xbf16, #tpu.memory_space<vmem>>, %arg5: memref<1x256xf32, #tpu.memory_space<vmem>>, %arg6: memref<1x256xf32, #tpu.memory_space<vmem>>, %arg7: memref<8x256xbf16, #tpu.memory_space<vmem>>, %arg8: memref<8x256xf32, #tpu.memory_space<vmem>>) attributes {dimension_semantics = [#tpu.dimension_semantics<parallel>, #tpu.dimension_semantics<parallel>, #tpu.dimension_semantics<arbitrary>], iteration_bounds = array<i64: 1, 2, 9>, scalar_prefetch = 0 : i64, scratch_operands = 1 : i64, tpu.core_type = #tpu.core_type<tc>, window_params = [{transform_indices = @transform_0, window_bounds = array<i64: 8, 512>}, {transform_indices = @transform_1, window_bounds = array<i64: 512, 256>}, {transform_indices = @transform_2, window_bounds = array<i64: 1, 256>}, {transform_indices = @transform_3, window_bounds = array<i64: 1, 256>}, {transform_indices = @transform_4, window_bounds = array<i64: 8, 256>}]} {
    %c0_i32 = arith.constant 0 : i32
    %0 = arith.cmpi eq, %arg2, %c0_i32 : i32
    %1 = arith.extui %0 : i1 to i32
    %c0_i32_0 = arith.constant 0 : i32
    %2 = arith.cmpi ne, %1, %c0_i32_0 : i32
    scf.if %2 {
      %cst_9 = arith.constant 0.000000e+00 : f32
      %12 = vector.broadcast %cst_9 : f32 to vector<8x256xf32>
      %c0_10 = arith.constant 0 : index
      %c0_11 = arith.constant 0 : index
      %13 = vector.load %arg8[%c0_10, %c0_11] : memref<8x256xf32, #tpu.memory_space<vmem>>, vector<8x256xf32>
      tpu.vector_store %arg8[%c0_10, %c0_11], %12 {strides = array<i32>} : memref<8x256xf32, #tpu.memory_space<vmem>>, vector<8x256xf32>,
    } else {
    }
    %c0 = arith.constant 0 : index
    %c0_1 = arith.constant 0 : index
    %3 = vector.load %arg8[%c0, %c0_1] : memref<8x256xf32, #tpu.memory_space<vmem>>, vector<8x256xf32>
    %c0_2 = arith.constant 0 : index
    %c0_3 = arith.constant 0 : index
    %4 = vector.load %arg3[%c0_2, %c0_3] : memref<8x512xbf16, #tpu.memory_space<vmem>>, vector<8x512xbf16>
    %c0_4 = arith.constant 0 : index
    %c0_5 = arith.constant 0 : index
    %5 = vector.load %arg4[%c0_4, %c0_5] : memref<512x256xbf16, #tpu.memory_space<vmem>>, vector<512x256xbf16>
    %cst = arith.constant dense<0.000000e+00> : vector<8x256xf32>
    %6 = tpu.matmul %4, %5, %cst {dimension_numbers = #tpu.dot_dimension_numbers<[1], [0], [0], [1], [0, 0, 1, 1], [], []>} : vector<8x512xbf16>, vector<512x256xbf16>, vector<8x256xf32> -> vector<8x256xf32>
    %7 = arith.addf %3, %6 : vector<8x256xf32>
    %c0_6 = arith.constant 0 : index
    %c0_7 = arith.constant 0 : index
    %8 = vector.load %arg8[%c0_6, %c0_7] : memref<8x256xf32, #tpu.memory_space<vmem>>, vector<8x256xf32>
    tpu.vector_store %arg8[%c0_6, %c0_7], %7 {strides = array<i32>} : memref<8x256xf32, #tpu.memory_space<vmem>>, vector<8x256xf32>,
    %c8_i32 = arith.constant 8 : i32
    %9 = arith.cmpi eq, %arg2, %c8_i32 : i32
    %10 = arith.extui %9 : i1 to i32
    %c0_i32_8 = arith.constant 0 : i32
    %11 = arith.cmpi ne, %10, %c0_i32_8 : i32
    scf.if %11 {
      %c0_9 = arith.constant 0 : index
      %c0_10 = arith.constant 0 : index
      %12 = vector.load %arg8[%c0_9, %c0_10] : memref<8x256xf32, #tpu.memory_space<vmem>>, vector<8x256xf32>
      %c0_11 = arith.constant 0 : index
      %c0_12 = arith.constant 0 : index
      %13 = vector.load %arg5[%c0_11, %c0_12] : memref<1x256xf32, #tpu.memory_space<vmem>>, vector<1x256xf32>
      %14 = vector.broadcast %13 : vector<1x256xf32> to vector<8x256xf32>
      %15 = arith.mulf %12, %14 : vector<8x256xf32>
      %c0_13 = arith.constant 0 : index
      %c0_14 = arith.constant 0 : index
      %16 = vector.load %arg6[%c0_13, %c0_14] : memref<1x256xf32, #tpu.memory_space<vmem>>, vector<1x256xf32>
      %17 = vector.broadcast %16 : vector<1x256xf32> to vector<8x256xf32>
      %18 = arith.addf %15, %17 : vector<8x256xf32>
      %cst_15 = arith.constant 0.000000e+00 : f32
      %19 = vector.broadcast %cst_15 : f32 to vector<8x256xf32>
      %20 = arith.maximumf %18, %19 : vector<8x256xf32>
      %21 = arith.truncf %20 : vector<8x256xf32> to vector<8x256xbf16>
      %c0_16 = arith.constant 0 : index
      %c0_17 = arith.constant 0 : index
      %22 = vector.load %arg7[%c0_16, %c0_17] : memref<8x256xbf16, #tpu.memory_space<vmem>>, vector<8x256xbf16>
      tpu.vector_store %arg7[%c0_16, %c0_17], %21 {strides = array<i32>} : memref<8x256xbf16, #tpu.memory_space<vmem>>, vector<8x256xbf16>,
    } else {
    }
    return
  }
  func.func @transform_0(%arg0: i32, %arg1: i32, %arg2: i32) -> (i32, i32) {
    %c0_i32 = arith.constant 0 : i32
    return %arg0, %arg2 : i32, i32
  }
  func.func @transform_1(%arg0: i32, %arg1: i32, %arg2: i32) -> (i32, i32) {
    %c0_i32 = arith.constant 0 : i32
    return %arg2, %arg1 : i32, i32
  }
  func.func @transform_2(%arg0: i32, %arg1: i32, %arg2: i32) -> (i32, i32) {
    %c0_i32 = arith.constant 0 : i32
    %c0_i32_0 = arith.constant 0 : i32
    return %c0_i32, %arg1 : i32, i32
  }
  func.func @transform_3(%arg0: i32, %arg1: i32, %arg2: i32) -> (i32, i32) {
    %c0_i32 = arith.constant 0 : i32
    %c0_i32_0 = arith.constant 0 : i32
    return %c0_i32, %arg1 : i32, i32
  }
  func.func @transform_4(%arg0: i32, %arg1: i32, %arg2: i32) -> (i32, i32) {
    %c0_i32 = arith.constant 0 : i32
    return %arg0, %arg1 : i32, i32
  }
}

module attributes {stable_mosaic.version = 11 : i64} {
  func.func @_tail_kernel(%arg0: memref<2x1x512xbf16, #tpu.memory_space<vmem>>, %arg1: memref<512x256xbf16, #tpu.memory_space<vmem>>, %arg2: memref<1x256xf32, #tpu.memory_space<vmem>>, %arg3: memref<256x128xbf16, #tpu.memory_space<vmem>>, %arg4: memref<1x128xf32, #tpu.memory_space<vmem>>, %arg5: memref<1x128xf32, #tpu.memory_space<vmem>>, %arg6: memref<1x128xf32, #tpu.memory_space<vmem>>, %arg7: memref<2x128xf32, #tpu.memory_space<vmem>>) attributes {dimension_semantics = [], scalar_prefetch = 0 : i64, scratch_operands = 0 : i64, tpu.core_type = #tpu.core_type<tc>} {
    %c0 = arith.constant 0 : index
    %c0_0 = arith.constant 0 : index
    %c0_1 = arith.constant 0 : index
    %0 = vector.load %arg0[%c0, %c0_0, %c0_1] : memref<2x1x512xbf16, #tpu.memory_space<vmem>>, vector<2x1x512xbf16>
    %1 = arith.extf %0 : vector<2x1x512xbf16> to vector<2x1x512xf32>
    %cst = arith.constant dense<0.000000e+00> : vector<2x512xf32>
    %2 = vector.multi_reduction <add>, %1, %cst [1] : vector<2x1x512xf32> to vector<2x512xf32>
    %cst_2 = arith.constant 1.000000e+00 : f32
    %3 = vector.broadcast %cst_2 : f32 to vector<2x512xf32>
    %4 = arith.divf %2, %3 : vector<2x512xf32>
    %5 = arith.truncf %4 : vector<2x512xf32> to vector<2x512xbf16>
    %c0_3 = arith.constant 0 : index
    %c0_4 = arith.constant 0 : index
    %6 = vector.load %arg1[%c0_3, %c0_4] : memref<512x256xbf16, #tpu.memory_space<vmem>>, vector<512x256xbf16>
    %cst_5 = arith.constant dense<0.000000e+00> : vector<2x256xf32>
    %7 = tpu.matmul %5, %6, %cst_5 {dimension_numbers = #tpu.dot_dimension_numbers<[1], [0], [0], [1], [0, 0, 1, 1], [], []>} : vector<2x512xbf16>, vector<512x256xbf16>, vector<2x256xf32> -> vector<2x256xf32>
    %c0_6 = arith.constant 0 : index
    %c0_7 = arith.constant 0 : index
    %8 = vector.load %arg2[%c0_6, %c0_7] : memref<1x256xf32, #tpu.memory_space<vmem>>, vector<1x256xf32>
    %9 = vector.broadcast %8 : vector<1x256xf32> to vector<2x256xf32>
    %10 = arith.addf %7, %9 : vector<2x256xf32>
    %11 = arith.truncf %10 : vector<2x256xf32> to vector<2x256xbf16>
    %c0_8 = arith.constant 0 : index
    %c0_9 = arith.constant 0 : index
    %12 = vector.load %arg3[%c0_8, %c0_9] : memref<256x128xbf16, #tpu.memory_space<vmem>>, vector<256x128xbf16>
    %cst_10 = arith.constant dense<0.000000e+00> : vector<2x128xf32>
    %13 = tpu.matmul %11, %12, %cst_10 {dimension_numbers = #tpu.dot_dimension_numbers<[1], [0], [0], [1], [0, 0, 1, 1], [], []>} : vector<2x256xbf16>, vector<256x128xbf16>, vector<2x128xf32> -> vector<2x128xf32>
    %c0_11 = arith.constant 0 : index
    %c0_12 = arith.constant 0 : index
    %14 = vector.load %arg4[%c0_11, %c0_12] : memref<1x128xf32, #tpu.memory_space<vmem>>, vector<1x128xf32>
    %15 = vector.broadcast %14 : vector<1x128xf32> to vector<2x128xf32>
    %16 = arith.addf %13, %15 : vector<2x128xf32>
    %cst_13 = arith.constant dense<0.000000e+00> : vector<128xf32>
    %17 = vector.multi_reduction <add>, %16, %cst_13 [0] : vector<2x128xf32> to vector<128xf32>
    %18 = vector.shape_cast %17 : vector<128xf32> to vector<1x128xf32>
    %cst_14 = arith.constant 2.000000e+00 : f32
    %19 = vector.broadcast %cst_14 : f32 to vector<1x128xf32>
    %20 = arith.divf %18, %19 : vector<1x128xf32>
    %21 = vector.broadcast %20 : vector<1x128xf32> to vector<2x128xf32>
    %22 = arith.subf %16, %21 : vector<2x128xf32>
    %23 = arith.mulf %22, %22 : vector<2x128xf32>
    %cst_15 = arith.constant dense<0.000000e+00> : vector<128xf32>
    %24 = vector.multi_reduction <add>, %23, %cst_15 [0] : vector<2x128xf32> to vector<128xf32>
    %25 = vector.shape_cast %24 : vector<128xf32> to vector<1x128xf32>
    %cst_16 = arith.constant 2.000000e+00 : f32
    %26 = vector.broadcast %cst_16 : f32 to vector<1x128xf32>
    %27 = arith.divf %25, %26 : vector<1x128xf32>
    %c0_17 = arith.constant 0 : index
    %c0_18 = arith.constant 0 : index
    %28 = vector.load %arg5[%c0_17, %c0_18] : memref<1x128xf32, #tpu.memory_space<vmem>>, vector<1x128xf32>
    %29 = vector.broadcast %20 : vector<1x128xf32> to vector<2x128xf32>
    %30 = arith.subf %16, %29 : vector<2x128xf32>
    %cst_19 = arith.constant 9.99999974E-6 : f32
    %31 = vector.broadcast %cst_19 : f32 to vector<1x128xf32>
    %32 = arith.addf %27, %31 : vector<1x128xf32>
    %33 = math.rsqrt %32 : vector<1x128xf32>
    %34 = vector.broadcast %33 : vector<1x128xf32> to vector<2x128xf32>
    %35 = arith.mulf %30, %34 : vector<2x128xf32>
    %36 = vector.broadcast %28 : vector<1x128xf32> to vector<2x128xf32>
    %37 = arith.mulf %36, %35 : vector<2x128xf32>
    %c0_20 = arith.constant 0 : index
    %c0_21 = arith.constant 0 : index
    %38 = vector.load %arg6[%c0_20, %c0_21] : memref<1x128xf32, #tpu.memory_space<vmem>>, vector<1x128xf32>
    %39 = vector.broadcast %38 : vector<1x128xf32> to vector<2x128xf32>
    %40 = arith.addf %37, %39 : vector<2x128xf32>
    %c0_22 = arith.constant 0 : index
    %c0_23 = arith.constant 0 : index
    %41 = vector.load %arg7[%c0_22, %c0_23] : memref<2x128xf32, #tpu.memory_space<vmem>>, vector<2x128xf32>
    tpu.vector_store %arg7[%c0_22, %c0_23], %40 {strides = array<i32>} : memref<2x128xf32, #tpu.memory_space<vmem>>, vector<2x128xf32>,
    return
  }
}

</mosaic_0001>

<bundles_post_ra>
// kernel: _lambda_.21
= control target key start
LH: loop header
LB: loop body
LE: loop exit
PB: predicated region body
PF: predicated region fallthrough
CT: control target
= control target key end

     0   :  { %v2222_v0 = vmov 0   ;;  %s2754_s1 = inlined_call_operand.vmem [shape: bf16[256,128], index: 1, kind: input, shape index: {}]   ;;  %s2755_s0 = inlined_call_operand.vmem [shape: bf16[512,256], index: 0, kind: input, shape index: {}]   ;;  %s2756_s2 = inlined_call_operand.vmem [shape: f32[1,128], index: 2, kind: input, shape index: {}]   ;;  %s2757_s3 = inlined_call_operand.vmem [shape: f32[1,128], index: 3, kind: input, shape index: {}]   ;;  %s2758_s4 = inlined_call_operand.vmem [shape: bf16[512,128], index: 4, kind: output, shape index: {}]  }
   0x1   :  { %662 = vmatprep.subr.bf16.mxu0 %v2222_v0  ;;  %2077 = vmatprep.subr.bf16.mxu1 %v2222_v0  ;;  %v2110_v1 = vld [vmem:[%s2754_s1] sm:$0xff]   ;;  %v2111_v2 = vld [vmem:[%s2754_s1 + $0x8] sm:$0xff]   ;;  %v2112_v3 = vld [vmem:[%s2754_s1 + $0x10] sm:$0xff]  }
   0x2   :  { %663 = vmatpush1.bf16.msra.mxu0 %v2110_v1  ;;  %2093 = vmatpush1.bf16.msra.mxu1 %v2110_v1  ;;  %v2113_v4 = vld [vmem:[%s2754_s1 + $0x18] sm:$0xff]   ;;  %v2114_v5 = vld [vmem:[%s2754_s1 + $0x20] sm:$0xff]   ;;  %v2115_v7 = vld [vmem:[%s2754_s1 + $0x28] sm:$0xff]  }
   0x3   :  { %664 = vmatprep.subr.bf16.mxu0 %v2222_v0  ;;  %2078 = vmatprep.subr.bf16.mxu1 %v2222_v0  ;;  %v2128_v6 = vld [vmem:[%s2755_s0 + $0x4] ss:$8 sps:$4 sm:$0xff]   ;;  %v2116_v9 = vld [vmem:[%s2754_s1 + $0x30] sm:$0xff]   ;;  %v2117_v10 = vld [vmem:[%s2754_s1 + $0x38] sm:$0xff]  }
   0x4   :  { %v2131_v8 = vld [vmem:[%s2755_s0 + $0x104] ss:$8 sps:$4 sm:$0xff]   ;;  %694 = vmatprep.mubr.bf16.mxu0 %v2128_v6  ;;  %v2120_v13 = vld [vmem:[%s2754_s1 + $0x50] sm:$0xff]   ;;  %v2121_v14 = vld [vmem:[%s2754_s1 + $0x58] sm:$0xff]  }
   0x5   :  { %822 = vmatprep.mubr.bf16.mxu1 %v2131_v8  ;;  %v2118_v11 = vld [vmem:[%s2754_s1 + $0x40] sm:$0xff]   ;;  %v2119_v12 = vld [vmem:[%s2754_s1 + $0x48] sm:$0xff]   ;;  %v2124_v17 = vld [vmem:[%s2754_s1 + $0x70] sm:$0xff]  }
   0x6   :  { %665 = vmatpush1.bf16.msra.mxu0 %v2111_v2  ;;  %2094 = vmatpush1.bf16.msra.mxu1 %v2111_v2  ;;  %v2122_v15 = vld [vmem:[%s2754_s1 + $0x60] sm:$0xff]   ;;  %v2123_v16 = vld [vmem:[%s2754_s1 + $0x68] sm:$0xff]   ;;  %v2125_v18 = vld [vmem:[%s2754_s1 + $0x78] sm:$0xff]  }
   0x7   :  { %666 = vmatprep.subr.bf16.mxu0 %v2222_v0  ;;  %2079 = vmatprep.subr.bf16.mxu1 %v2222_v0  ;;  %v2126_v19 = vld [vmem:[%s2755_s0] ss:$8 sps:$4 sm:$0xff]   ;;  %v2132_v21 = vld [vmem:[%s2755_s0 + $0x14] ss:$8 sps:$4 sm:$0xff]   ;;  %v2136_v23 = vld [vmem:[%s2755_s0 + $0x10] ss:$8 sps:$4 sm:$0xff]  }
   0x8   :  { %v2129_v20 = vld [vmem:[%s2755_s0 + $0x100] ss:$8 sps:$4 sm:$0xff]   ;;  %v2134_v22 = vld [vmem:[%s2755_s0 + $0x114] ss:$8 sps:$4 sm:$0xff]   ;;  %v2137_v24 = vld [vmem:[%s2755_s0 + $0x110] ss:$8 sps:$4 sm:$0xff]  }
   0x9   :  { %v2138_v25 = vld [vmem:[%s2755_s0 + $0x24] ss:$8 sps:$4 sm:$0xff]   ;;  %v2142_v27 = vld [vmem:[%s2755_s0 + $0x20] ss:$8 sps:$4 sm:$0xff]   ;;  %v2144_v29 = vld [vmem:[%s2755_s0 + $0x34] ss:$8 sps:$4 sm:$0xff]  }
   0xa   :  { %667 = vmatpush1.bf16.msra.mxu0 %v2112_v3  ;;  %2095 = vmatpush1.bf16.msra.mxu1 %v2112_v3  ;;  %v2140_v26 = vld [vmem:[%s2755_s0 + $0x124] ss:$8 sps:$4 sm:$0xff]   ;;  %v2143_v28 = vld [vmem:[%s2755_s0 + $0x120] ss:$8 sps:$4 sm:$0xff]   ;;  %v2146_v30 = vld [vmem:[%s2755_s0 + $0x134] ss:$8 sps:$4 sm:$0xff]  }
   0xb   :  { %668 = vmatprep.subr.bf16.mxu0 %v2222_v0  ;;  %2080 = vmatprep.subr.bf16.mxu1 %v2222_v0  ;;  %v2148_v31 = vld [vmem:[%s2755_s0 + $0x30] ss:$8 sps:$4 sm:$0xff]   ;;  %v2150_v33 = vld [vmem:[%s2755_s0 + $0x44] ss:$8 sps:$4 sm:$0xff]   ;;  %v2154_v35 = vld [vmem:[%s2755_s0 + $0x40] ss:$8 sps:$4 sm:$0xff]  }
   0xc   :  { %v2149_v32 = vld [vmem:[%s2755_s0 + $0x130] ss:$8 sps:$4 sm:$0xff]   ;;  %v2152_v34 = vld [vmem:[%s2755_s0 + $0x144] ss:$8 sps:$4 sm:$0xff]   ;;  %v2155_v36 = vld [vmem:[%s2755_s0 + $0x140] ss:$8 sps:$4 sm:$0xff]  }
   0xd   :  { %v2156_v37 = vld [vmem:[%s2755_s0 + $0x54] ss:$8 sps:$4 sm:$0xff]   ;;  %v2160_v39 = vld [vmem:[%s2755_s0 + $0x50] ss:$8 sps:$4 sm:$0xff]   ;;  %v2162_v41 = vld [vmem:[%s2755_s0 + $0x64] ss:$8 sps:$4 sm:$0xff]  }
   0xe   :  { %669 = vmatpush1.bf16.msra.mxu0 %v2113_v4  ;;  %2096 = vmatpush1.bf16.msra.mxu1 %v2113_v4  ;;  %v2158_v38 = vld [vmem:[%s2755_s0 + $0x154] ss:$8 sps:$4 sm:$0xff]   ;;  %v2161_v40 = vld [vmem:[%s2755_s0 + $0x150] ss:$8 sps:$4 sm:$0xff]   ;;  %v2164_v42 = vld [vmem:[%s2755_s0 + $0x164] ss:$8 sps:$4 sm:$0xff]  }
   0xf   :  { %670 = vmatprep.subr.bf16.mxu0 %v2222_v0  ;;  %2081 = vmatprep.subr.bf16.mxu1 %v2222_v0  ;;  %v2166_v43 = vld [vmem:[%s2755_s0 + $0x60] ss:$8 sps:$4 sm:$0xff]   ;;  %v2168_v45 = vld [vmem:[%s2755_s0 + $0x74] ss:$8 sps:$4 sm:$0xff]   ;;  %v2172_v47 = vld [vmem:[%s2755_s0 + $0x70] ss:$8 sps:$4 sm:$0xff]  }
  0x10   :  { %v2167_v44 = vld [vmem:[%s2755_s0 + $0x160] ss:$8 sps:$4 sm:$0xff]   ;;  %v2170_v46 = vld [vmem:[%s2755_s0 + $0x174] ss:$8 sps:$4 sm:$0xff]   ;;  %v2173_v48 = vld [vmem:[%s2755_s0 + $0x170] ss:$8 sps:$4 sm:$0xff]  }
  0x11   :  { %v2174_v49 = vld [vmem:[%s2755_s0 + $0x84] ss:$8 sps:$4 sm:$0xff]   ;;  %v2178_v51 = vld [vmem:[%s2755_s0 + $0x80] ss:$8 sps:$4 sm:$0xff]   ;;  %v2180_v53 = vld [vmem:[%s2755_s0 + $0x94] ss:$8 sps:$4 sm:$0xff]  }
  0x12   :  { %671 = vmatpush1.bf16.msra.mxu0 %v2114_v5  ;;  %2097 = vmatpush1.bf16.msra.mxu1 %v2114_v5  ;;  %v2176_v50 = vld [vmem:[%s2755_s0 + $0x184] ss:$8 sps:$4 sm:$0xff]   ;;  %v2179_v52 = vld [vmem:[%s2755_s0 + $0x180] ss:$8 sps:$4 sm:$0xff]   ;;  %v2182_v54 = vld [vmem:[%s2755_s0 + $0x194] ss:$8 sps:$4 sm:$0xff]  }
  0x13   :  { %672 = vmatprep.subr.bf16.mxu0 %v2222_v0  ;;  %2082 = vmatprep.subr.bf16.mxu1 %v2222_v0  ;;  %v2184_v55 = vld [vmem:[%s2755_s0 + $0x90] ss:$8 sps:$4 sm:$0xff]   ;;  %v2186_v57 = vld [vmem:[%s2755_s0 + $0xa4] ss:$8 sps:$4 sm:$0xff]   ;;  %v2190_v59 = vld [vmem:[%s2755_s0 + $0xa0] ss:$8 sps:$4 sm:$0xff]  }
  0x14   :  { %v2185_v56 = vld [vmem:[%s2755_s0 + $0x190] ss:$8 sps:$4 sm:$0xff]   ;;  %v2188_v58 = vld [vmem:[%s2755_s0 + $0x1a4] ss:$8 sps:$4 sm:$0xff]   ;;  %v2191_v60 = vld [vmem:[%s2755_s0 + $0x1a0] ss:$8 sps:$4 sm:$0xff]  }
  0x15   :  { %v2192_v61 = vld [vmem:[%s2755_s0 + $0xb4] ss:$8 sps:$4 sm:$0xff]   ;;  %v2196_v63 = vld [vmem:[%s2755_s0 + $0xb0] ss:$8 sps:$4 sm:$0xff]   ;;  %v2198_v1 = vld [vmem:[%s2755_s0 + $0xc4] ss:$8 sps:$4 sm:$0xff]  }
  0x16   :  { %673 = vmatpush1.bf16.msra.mxu0 %v2115_v7  ;;  %2098 = vmatpush1.bf16.msra.mxu1 %v2115_v7  ;;  %v2194_v62 = vld [vmem:[%s2755_s0 + $0x1b4] ss:$8 sps:$4 sm:$0xff]   ;;  %v2200_v2 = vld [vmem:[%s2755_s0 + $0x1c4] ss:$8 sps:$4 sm:$0xff]   ;;  %v2202_v3 = vld [vmem:[%s2755_s0 + $0xc0] ss:$8 sps:$4 sm:$0xff]  }
  0x17   :  { %674 = vmatprep.subr.bf16.mxu0 %v2222_v0  ;;  %2083 = vmatprep.subr.bf16.mxu1 %v2222_v0  ;;  %v2203_v4 = vld [vmem:[%s2755_s0 + $0x1c0] ss:$8 sps:$4 sm:$0xff]   ;;  %v2204_v5 = vld [vmem:[%s2755_s0 + $0xd4] ss:$8 sps:$4 sm:$0xff]   ;;  %v2208_v7 = vld [vmem:[%s2755_s0 + $0xd0] ss:$8 sps:$4 sm:$0xff]  }
  0x18   :  { %v2206_v6 = vld [vmem:[%s2755_s0 + $0x1d4] ss:$8 sps:$4 sm:$0xff]   ;;  %v2209_v8 = vld [vmem:[%s2755_s0 + $0x1d0] ss:$8 sps:$4 sm:$0xff]  }
  0x1a   :  { %675 = vmatpush1.bf16.msra.mxu0 %v2116_v9  ;;  %2099 = vmatpush1.bf16.msra.mxu1 %v2116_v9  ;;  %v2210_v9 = vld [vmem:[%s2755_s0 + $0xe4] ss:$8 sps:$4 sm:$0xff]  }
  0x1b   :  { %676 = vmatprep.subr.bf16.mxu0 %v2222_v0  ;;  %2084 = vmatprep.subr.bf16.mxu1 %v2222_v0 }
  0x1e   :  { %677 = vmatpush1.bf16.msra.mxu0 %v2117_v10  ;;  %2100 = vmatpush1.bf16.msra.mxu1 %v2117_v10  ;;  %v2212_v10 = vld [vmem:[%s2755_s0 + $0x1e4] ss:$8 sps:$4 sm:$0xff]  }
  0x1f   :  { %678 = vmatprep.subr.bf16.mxu0 %v2222_v0  ;;  %2085 = vmatprep.subr.bf16.mxu1 %v2222_v0 }
  0x22   :  { %679 = vmatpush1.bf16.msra.mxu0 %v2118_v11  ;;  %2101 = vmatpush1.bf16.msra.mxu1 %v2118_v11  ;;  %v2214_v11 = vld [vmem:[%s2755_s0 + $0xe0] ss:$8 sps:$4 sm:$0xff]  }
  0x23   :  { %680 = vmatprep.subr.bf16.mxu0 %v2222_v0  ;;  %2086 = vmatprep.subr.bf16.mxu1 %v2222_v0 }
  0x26   :  { %681 = vmatpush1.bf16.msra.mxu0 %v2119_v12  ;;  %2102 = vmatpush1.bf16.msra.mxu1 %v2119_v12  ;;  %v2215_v12 = vld [vmem:[%s2755_s0 + $0x1e0] ss:$8 sps:$4 sm:$0xff]  }
  0x27   :  { %682 = vmatprep.subr.bf16.mxu0 %v2222_v0  ;;  %2087 = vmatprep.subr.bf16.mxu1 %v2222_v0 }
  0x2a   :  { %683 = vmatpush1.bf16.msra.mxu0 %v2120_v13  ;;  %2103 = vmatpush1.bf16.msra.mxu1 %v2120_v13  ;;  %v2216_v13 = vld [vmem:[%s2755_s0 + $0xf4] ss:$8 sps:$4 sm:$0xff]  }
  0x2b   :  { %684 = vmatprep.subr.bf16.mxu0 %v2222_v0  ;;  %2088 = vmatprep.subr.bf16.mxu1 %v2222_v0 }
  0x2e   :  { %685 = vmatpush1.bf16.msra.mxu0 %v2121_v14  ;;  %2104 = vmatpush1.bf16.msra.mxu1 %v2121_v14  ;;  %v2218_v14 = vld [vmem:[%s2755_s0 + $0x1f4] ss:$8 sps:$4 sm:$0xff]  }
  0x2f   :  { %686 = vmatprep.subr.bf16.mxu0 %v2222_v0  ;;  %2089 = vmatprep.subr.bf16.mxu1 %v2222_v0 }
  0x32   :  { %687 = vmatpush1.bf16.msra.mxu0 %v2122_v15  ;;  %2105 = vmatpush1.bf16.msra.mxu1 %v2122_v15  ;;  %v2220_v15 = vld [vmem:[%s2755_s0 + $0xf0] ss:$8 sps:$4 sm:$0xff]  }
  0x33   :  { %688 = vmatprep.subr.bf16.mxu0 %v2222_v0  ;;  %2090 = vmatprep.subr.bf16.mxu1 %v2222_v0 }
  0x36   :  { %689 = vmatpush1.bf16.msra.mxu0 %v2123_v16  ;;  %2106 = vmatpush1.bf16.msra.mxu1 %v2123_v16  ;;  %v2221_v16 = vld [vmem:[%s2755_s0 + $0x1f0] ss:$8 sps:$4 sm:$0xff]  }
  0x37   :  { %690 = vmatprep.subr.bf16.mxu0 %v2222_v0  ;;  %2091 = vmatprep.subr.bf16.mxu1 %v2222_v0 }
  0x3a   :  { %691 = vmatpush1.bf16.msra.mxu0 %v2124_v17  ;;  %2107 = vmatpush1.bf16.msra.mxu1 %v2124_v17  ;;  %v2523_v17 = vld [vmem:[%s2756_s2] ss:$0 sm:$0xff] }
  0x3b   :  { %692 = vmatprep.subr.bf16.mxu0 %v2222_v0  ;;  %2092 = vmatprep.subr.bf16.mxu1 %v2222_v0  ;;  %v2197_v0 = vld [vmem:[%s2755_s0 + $0x1b0] ss:$8 sps:$4 sm:$0xff]  }
  0x3e   :  { %693 = vmatpush1.bf16.msra.mxu0 %v2125_v18  ;;  %2108 = vmatpush1.bf16.msra.mxu1 %v2125_v18 }
  0x41   :  { %695 = vmatmul.mubr.bf16.vlgmr.msra.gmra.mrb[0].mxu0 %v2126_v19  ;;  %823 = vmatmul.mubr.bf16.vlgmr.msra.gmra.mrb[0].mxu1 %v2129_v20  ;;  %v2528_v19 = vld [vmem:[%s2757_s3] ss:$0 sm:$0xff] }
  0x42   :  { %702 = vmatprep.mubr.bf16.mxu0 %v2132_v21  ;;  %830 = vmatprep.mubr.bf16.mxu1 %v2134_v22 }
  0x49   :  { %703 = vmatmul.mubr.bf16.gmra.mrb[4].mxu0 %v2136_v23  ;;  %831 = vmatmul.mubr.bf16.gmra.mrb[4].mxu1 %v2137_v24 }
  0x4a   :  { %710 = vmatprep.mubr.bf16.mxu0 %v2138_v25  ;;  %838 = vmatprep.mubr.bf16.mxu1 %v2140_v26 }
  0x51   :  { %711 = vmatmul.mubr.bf16.gmra.mrb[8].mxu0 %v2142_v27  ;;  %839 = vmatmul.mubr.bf16.gmra.mrb[8].mxu1 %v2143_v28 }
  0x52   :  { %718 = vmatprep.mubr.bf16.mxu0 %v2144_v29  ;;  %846 = vmatprep.mubr.bf16.mxu1 %v2146_v30 }
  0x59   :  { %719 = vmatmul.mubr.bf16.gmra.mrb[12].mxu0 %v2148_v31  ;;  %847 = vmatmul.mubr.bf16.gmra.mrb[12].mxu1 %v2149_v32 }
  0x5a   :  { %726 = vmatprep.mubr.bf16.mxu0 %v2150_v33  ;;  %854 = vmatprep.mubr.bf16.mxu1 %v2152_v34 }
  0x61   :  { %727 = vmatmul.mubr.bf16.gmra.mrb[16].mxu0 %v2154_v35  ;;  %855 = vmatmul.mubr.bf16.gmra.mrb[16].mxu1 %v2155_v36 }
  0x62   :  { %734 = vmatprep.mubr.bf16.mxu0 %v2156_v37  ;;  %862 = vmatprep.mubr.bf16.mxu1 %v2158_v38 }
  0x69   :  { %735 = vmatmul.mubr.bf16.gmra.mrb[20].mxu0 %v2160_v39  ;;  %863 = vmatmul.mubr.bf16.gmra.mrb[20].mxu1 %v2161_v40 }
  0x6a   :  { %742 = vmatprep.mubr.bf16.mxu0 %v2162_v41  ;;  %870 = vmatprep.mubr.bf16.mxu1 %v2164_v42 }
  0x71   :  { %743 = vmatmul.mubr.bf16.gmra.mrb[24].mxu0 %v2166_v43  ;;  %871 = vmatmul.mubr.bf16.gmra.mrb[24].mxu1 %v2167_v44 }
  0x72   :  { %750 = vmatprep.mubr.bf16.mxu0 %v2168_v45  ;;  %878 = vmatprep.mubr.bf16.mxu1 %v2170_v46 }
  0x79   :  { %751 = vmatmul.mubr.bf16.gmra.mrb[28].mxu0 %v2172_v47  ;;  %879 = vmatmul.mubr.bf16.gmra.mrb[28].mxu1 %v2173_v48 }
  0x7a   :  { %758 = vmatprep.mubr.bf16.mxu0 %v2174_v49  ;;  %886 = vmatprep.mubr.bf16.mxu1 %v2176_v50 }
  0x81   :  { %759 = vmatmul.mubr.bf16.gmra.mrb[32].mxu0 %v2178_v51  ;;  %887 = vmatmul.mubr.bf16.gmra.mrb[32].mxu1 %v2179_v52 }
  0x82   :  { %766 = vmatprep.mubr.bf16.mxu0 %v2180_v53  ;;  %894 = vmatprep.mubr.bf16.mxu1 %v2182_v54 }
  0x89   :  { %767 = vmatmul.mubr.bf16.gmra.mrb[36].mxu0 %v2184_v55  ;;  %895 = vmatmul.mubr.bf16.gmra.mrb[36].mxu1 %v2185_v56 }
  0x8a   :  { %774 = vmatprep.mubr.bf16.mxu0 %v2186_v57  ;;  %902 = vmatprep.mubr.bf16.mxu1 %v2188_v58 }
  0x91   :  { %775 = vmatmul.mubr.bf16.gmra.mrb[40].mxu0 %v2190_v59  ;;  %903 = vmatmul.mubr.bf16.gmra.mrb[40].mxu1 %v2191_v60 }
  0x92   :  { %782 = vmatprep.mubr.bf16.mxu0 %v2192_v61  ;;  %910 = vmatprep.mubr.bf16.mxu1 %v2194_v62 }
  0x99   :  { %783 = vmatmul.mubr.bf16.gmra.mrb[44].mxu0 %v2196_v63  ;;  %911 = vmatmul.mubr.bf16.gmra.mrb[44].mxu1 %v2197_v0 }
  0x9a   :  { %790 = vmatprep.mubr.bf16.mxu0 %v2198_v1  ;;  %918 = vmatprep.mubr.bf16.mxu1 %v2200_v2 }
  0xa1   :  { %791 = vmatmul.mubr.bf16.gmra.mrb[48].mxu0 %v2202_v3  ;;  %919 = vmatmul.mubr.bf16.gmra.mrb[48].mxu1 %v2203_v4 }
  0xa2   :  { %798 = vmatprep.mubr.bf16.mxu0 %v2204_v5  ;;  %926 = vmatprep.mubr.bf16.mxu1 %v2206_v6 }
  0xa9   :  { %799 = vmatmul.mubr.bf16.gmra.mrb[52].mxu0 %v2208_v7  ;;  %927 = vmatmul.mubr.bf16.gmra.mrb[52].mxu1 %v2209_v8 }
  0xaa   :  { %806 = vmatprep.mubr.bf16.mxu0 %v2210_v9  ;;  %934 = vmatprep.mubr.bf16.mxu1 %v2212_v10 }
  0xb1   :  { %807 = vmatmul.mubr.bf16.gmra.mrb[56].mxu0 %v2214_v11  ;;  %935 = vmatmul.mubr.bf16.gmra.mrb[56].mxu1 %v2215_v12 }
  0xb2   :  { %814 = vmatprep.mubr.bf16.mxu0 %v2216_v13  ;;  %942 = vmatprep.mubr.bf16.mxu1 %v2218_v14 }
  0xb9   :  { %815 = vmatmul.mubr.bf16.gmra.mrb[60].mxu0 %v2220_v15  ;;  %943 = vmatmul.mubr.bf16.gmra.mrb[60].mxu1 %v2221_v16 }
 0x114   :  { %v696_v18 = vpop.f32.mrb[0].mxu0  ;;  %v824_v20 = vpop.f32.mrb[0].mxu1 }
 0x115   :  { %v1153_v21 = vmul.f32 %v2523_v17, %v696_v18  ;;  %v1185_v22 = vmul.f32 %v2523_v17, %v824_v20  ;;  %v698_v23 = vpop.f32.mrb[1].mxu0  ;;  %v826_v24 = vpop.f32.mrb[1].mxu1 }
 0x116   :  { %v699_v25 = vpop.f32.mrb[2].mxu0  ;;  %v827_v26 = vpop.f32.mrb[2].mxu1 }
 0x117   :  { %v1224_v27 = vadd.f32 %v2528_v19, %v1153_v21  ;;  %v1256_v28 = vadd.f32 %v2528_v19, %v1185_v22  ;;  %v1154_v29 = vmul.f32 %v2523_v17, %v699_v25  ;;  %v1186_v30 = vmul.f32 %v2523_v17, %v827_v26  ;;  %v701_v31 = vpop.f32.mrb[3].mxu0  ;;  %v829_v32 = vpop.f32.mrb[3].mxu1 }
 0x119   :  { %v1225_v33 = vadd.f32 %v2528_v19, %v1154_v29  ;;  %v1257_v34 = vadd.f32 %v2528_v19, %v1186_v30  ;;  %v1288_v35 = vmax.f32 %v1224_v27, 0.0  ;;  %v1320_v36 = vmax.f32 %v1256_v28, 0.0 }
 0x11b   :  { %v1289_v37 = vmax.f32 %v1225_v33, 0.0  ;;  %v1321_v38 = vmax.f32 %v1257_v34, 0.0 }
 0x11c   :  { %v704_v39 = vpop.f32.mrb[4].mxu0  ;;  %v832_v40 = vpop.f32.mrb[4].mxu1 }
 0x11d   :  { %v1889_v41 = vpack.c.bf16 %v1289_v37, %v1288_v35  ;;  %v1969_v42 = vpack.c.bf16 %v1321_v38, %v1320_v36  ;;  %v1155_v43 = vmul.f32 %v2523_v17, %v704_v39  ;;  %v1187_v44 = vmul.f32 %v2523_v17, %v832_v40  ;;  %v706_v45 = vpop.f32.mrb[5].mxu0  ;;  %v834_v46 = vpop.f32.mrb[5].mxu1 }
 0x11e   :  { %v707_v47 = vpop.f32.mrb[6].mxu0  ;;  %v835_v48 = vpop.f32.mrb[6].mxu1 }
 0x11f   :  { %1890 = vst [vmem:[%s2758_s4] sm:$0xff] %v1889_v41   ;;  %2061 = vst [vmem:[%s2758_s4 + $0x80] sm:$0xff] %v1969_v42   ;;  %v1226_v49 = vadd.f32 %v2528_v19, %v1155_v43  ;;  %v1258_v50 = vadd.f32 %v2528_v19, %v1187_v44  ;;  %v1156_v51 = vmul.f32 %v2523_v17, %v707_v47  ;;  %v709_v53 = vpop.f32.mrb[7].mxu0  ;;  %v837_v54 = vpop.f32.mrb[7].mxu1 }
 0x120   :  { %v1188_v52 = vmul.f32 %v2523_v17, %v835_v48 }
 0x121   :  { %v1227_v55 = vadd.f32 %v2528_v19, %v1156_v51  ;;  %v1290_v57 = vmax.f32 %v1226_v49, 0.0  ;;  %v1322_v58 = vmax.f32 %v1258_v50, 0.0 }
 0x122   :  { %v1259_v56 = vadd.f32 %v2528_v19, %v1188_v52 }
 0x123   :  { %v1291_v59 = vmax.f32 %v1227_v55, 0.0 }
 0x124   :  { %v1323_v60 = vmax.f32 %v1259_v56, 0.0  ;;  %v712_v61 = vpop.f32.mrb[8].mxu0  ;;  %v840_v62 = vpop.f32.mrb[8].mxu1 }
 0x125   :  { %v1894_v63 = vpack.c.bf16 %v1291_v59, %v1290_v57  ;;  %v1157_v1 = vmul.f32 %v2523_v17, %v712_v61  ;;  %v1189_v2 = vmul.f32 %v2523_v17, %v840_v62  ;;  %v714_v3 = vpop.f32.mrb[9].mxu0  ;;  %v842_v4 = vpop.f32.mrb[9].mxu1 }
 0x126   :  { %v1974_v0 = vpack.c.bf16 %v1323_v60, %v1322_v58  ;;  %v715_v5 = vpop.f32.mrb[10].mxu0  ;;  %v843_v6 = vpop.f32.mrb[10].mxu1 }
 0x127   :  { %2046 = vst [vmem:[%s2758_s4 + $0x8] sm:$0xff] %v1894_v63   ;;  %v1228_v7 = vadd.f32 %v2528_v19, %v1157_v1  ;;  %v1260_v8 = vadd.f32 %v2528_v19, %v1189_v2  ;;  %v1158_v9 = vmul.f32 %v2523_v17, %v715_v5  ;;  %v1190_v10 = vmul.f32 %v2523_v17, %v843_v6  ;;  %v717_v11 = vpop.f32.mrb[11].mxu0  ;;  %v845_v12 = vpop.f32.mrb[11].mxu1 }
 0x128   :  { %2062 = vst [vmem:[%s2758_s4 + $0x88] sm:$0xff] %v1974_v0  }
 0x129   :  { %v1229_v13 = vadd.f32 %v2528_v19, %v1158_v9  ;;  %v1261_v14 = vadd.f32 %v2528_v19, %v1190_v10  ;;  %v1292_v15 = vmax.f32 %v1228_v7, 0.0  ;;  %v1324_v16 = vmax.f32 %v1260_v8, 0.0 }
 0x12b   :  { %v1293_v18 = vmax.f32 %v1229_v13, 0.0  ;;  %v1325_v20 = vmax.f32 %v1261_v14, 0.0 }
 0x12c   :  { %v720_v21 = vpop.f32.mrb[12].mxu0  ;;  %v848_v22 = vpop.f32.mrb[12].mxu1 }
 0x12d   :  { %v1899_v23 = vpack.c.bf16 %v1293_v18, %v1292_v15  ;;  %v1979_v24 = vpack.c.bf16 %v1325_v20, %v1324_v16  ;;  %v1159_v25 = vmul.f32 %v2523_v17, %v720_v21  ;;  %v1191_v26 = vmul.f32 %v2523_v17, %v848_v22  ;;  %v722_v27 = vpop.f32.mrb[13].mxu0  ;;  %v850_v28 = vpop.f32.mrb[13].mxu1 }
 0x12e   :  { %v723_v29 = vpop.f32.mrb[14].mxu0  ;;  %v851_v30 = vpop.f32.mrb[14].mxu1 }
 0x12f   :  { %2047 = vst [vmem:[%s2758_s4 + $0x10] sm:$0xff] %v1899_v23   ;;  %2063 = vst [vmem:[%s2758_s4 + $0x90] sm:$0xff] %v1979_v24   ;;  %v1230_v31 = vadd.f32 %v2528_v19, %v1159_v25  ;;  %v1262_v32 = vadd.f32 %v2528_v19, %v1191_v26  ;;  %v1160_v33 = vmul.f32 %v2523_v17, %v723_v29  ;;  %v725_v35 = vpop.f32.mrb[15].mxu0  ;;  %v853_v36 = vpop.f32.mrb[15].mxu1 }
 0x130   :  { %v1192_v34 = vmul.f32 %v2523_v17, %v851_v30 }
 0x131   :  { %v1231_v37 = vadd.f32 %v2528_v19, %v1160_v33  ;;  %v1294_v39 = vmax.f32 %v1230_v31, 0.0  ;;  %v1326_v40 = vmax.f32 %v1262_v32, 0.0 }
 0x132   :  { %v1263_v38 = vadd.f32 %v2528_v19, %v1192_v34 }
 0x133   :  { %v1295_v41 = vmax.f32 %v1231_v37, 0.0 }
 0x134   :  { %v1327_v42 = vmax.f32 %v1263_v38, 0.0  ;;  %v728_v43 = vpop.f32.mrb[16].mxu0  ;;  %v856_v44 = vpop.f32.mrb[16].mxu1 }
 0x135   :  { %v1904_v45 = vpack.c.bf16 %v1295_v41, %v1294_v39  ;;  %v1161_v47 = vmul.f32 %v2523_v17, %v728_v43  ;;  %v1193_v48 = vmul.f32 %v2523_v17, %v856_v44  ;;  %v730_v49 = vpop.f32.mrb[17].mxu0  ;;  %v858_v50 = vpop.f32.mrb[17].mxu1 }
 0x136   :  { %v1984_v46 = vpack.c.bf16 %v1327_v42, %v1326_v40  ;;  %v731_v51 = vpop.f32.mrb[18].mxu0  ;;  %v859_v52 = vpop.f32.mrb[18].mxu1 }
 0x137   :  { %2048 = vst [vmem:[%s2758_s4 + $0x18] sm:$0xff] %v1904_v45   ;;  %v1232_v53 = vadd.f32 %v2528_v19, %v1161_v47  ;;  %v1264_v54 = vadd.f32 %v2528_v19, %v1193_v48  ;;  %v1162_v55 = vmul.f32 %v2523_v17, %v731_v51  ;;  %v1194_v56 = vmul.f32 %v2523_v17, %v859_v52  ;;  %v733_v57 = vpop.f32.mrb[19].mxu0  ;;  %v861_v58 = vpop.f32.mrb[19].mxu1 }
 0x138   :  { %2064 = vst [vmem:[%s2758_s4 + $0x98] sm:$0xff] %v1984_v46  }
 0x139   :  { %v1233_v59 = vadd.f32 %v2528_v19, %v1162_v55  ;;  %v1265_v60 = vadd.f32 %v2528_v19, %v1194_v56  ;;  %v1296_v61 = vmax.f32 %v1232_v53, 0.0  ;;  %v1328_v62 = vmax.f32 %v1264_v54, 0.0 }
 0x13b   :  { %v1297_v63 = vmax.f32 %v1233_v59, 0.0  ;;  %v1329_v0 = vmax.f32 %v1265_v60, 0.0 }
 0x13c   :  { %v736_v1 = vpop.f32.mrb[20].mxu0  ;;  %v864_v2 = vpop.f32.mrb[20].mxu1 }
 0x13d   :  { %v1909_v3 = vpack.c.bf16 %v1297_v63, %v1296_v61  ;;  %v1989_v4 = vpack.c.bf16 %v1329_v0, %v1328_v62  ;;  %v1163_v5 = vmul.f32 %v2523_v17, %v736_v1  ;;  %v1195_v6 = vmul.f32 %v2523_v17, %v864_v2  ;;  %v738_v7 = vpop.f32.mrb[21].mxu0  ;;  %v866_v8 = vpop.f32.mrb[21].mxu1 }
 0x13e   :  { %v739_v9 = vpop.f32.mrb[22].mxu0  ;;  %v867_v10 = vpop.f32.mrb[22].mxu1 }
 0x13f   :  { %2049 = vst [vmem:[%s2758_s4 + $0x20] sm:$0xff] %v1909_v3   ;;  %2065 = vst [vmem:[%s2758_s4 + $0xa0] sm:$0xff] %v1989_v4   ;;  %v1234_v11 = vadd.f32 %v2528_v19, %v1163_v5  ;;  %v1266_v12 = vadd.f32 %v2528_v19, %v1195_v6  ;;  %v1164_v13 = vmul.f32 %v2523_v17, %v739_v9  ;;  %v741_v15 = vpop.f32.mrb[23].mxu0  ;;  %v869_v16 = vpop.f32.mrb[23].mxu1 }
 0x140   :  { %v1196_v14 = vmul.f32 %v2523_v17, %v867_v10 }
 0x141   :  { %v1235_v18 = vadd.f32 %v2528_v19, %v1164_v13  ;;  %v1298_v21 = vmax.f32 %v1234_v11, 0.0  ;;  %v1330_v22 = vmax.f32 %v1266_v12, 0.0 }
 0x142   :  { %v1267_v20 = vadd.f32 %v2528_v19, %v1196_v14 }
 0x143   :  { %v1299_v23 = vmax.f32 %v1235_v18, 0.0 }
 0x144   :  { %v1331_v24 = vmax.f32 %v1267_v20, 0.0  ;;  %v744_v25 = vpop.f32.mrb[24].mxu0  ;;  %v872_v26 = vpop.f32.mrb[24].mxu1 }
 0x145   :  { %v1914_v27 = vpack.c.bf16 %v1299_v23, %v1298_v21  ;;  %v1165_v29 = vmul.f32 %v2523_v17, %v744_v25  ;;  %v1197_v30 = vmul.f32 %v2523_v17, %v872_v26  ;;  %v746_v31 = vpop.f32.mrb[25].mxu0  ;;  %v874_v32 = vpop.f32.mrb[25].mxu1 }
 0x146   :  { %v1994_v28 = vpack.c.bf16 %v1331_v24, %v1330_v22  ;;  %v747_v33 = vpop.f32.mrb[26].mxu0  ;;  %v875_v34 = vpop.f32.mrb[26].mxu1 }
 0x147   :  { %2050 = vst [vmem:[%s2758_s4 + $0x28] sm:$0xff] %v1914_v27   ;;  %v1236_v35 = vadd.f32 %v2528_v19, %v1165_v29  ;;  %v1268_v36 = vadd.f32 %v2528_v19, %v1197_v30  ;;  %v1166_v37 = vmul.f32 %v2523_v17, %v747_v33  ;;  %v1198_v38 = vmul.f32 %v2523_v17, %v875_v34  ;;  %v749_v39 = vpop.f32.mrb[27].mxu0  ;;  %v877_v40 = vpop.f32.mrb[27].mxu1 }
 0x148   :  { %2066 = vst [vmem:[%s2758_s4 + $0xa8] sm:$0xff] %v1994_v28  }
 0x149   :  { %v1237_v41 = vadd.f32 %v2528_v19, %v1166_v37  ;;  %v1269_v42 = vadd.f32 %v2528_v19, %v1198_v38  ;;  %v1300_v43 = vmax.f32 %v1236_v35, 0.0  ;;  %v1332_v44 = vmax.f32 %v1268_v36, 0.0 }
 0x14b   :  { %v1301_v45 = vmax.f32 %v1237_v41, 0.0  ;;  %v1333_v46 = vmax.f32 %v1269_v42, 0.0 }
 0x14c   :  { %v752_v47 = vpop.f32.mrb[28].mxu0  ;;  %v880_v48 = vpop.f32.mrb[28].mxu1 }
 0x14d   :  { %v1919_v49 = vpack.c.bf16 %v1301_v45, %v1300_v43  ;;  %v1999_v50 = vpack.c.bf16 %v1333_v46, %v1332_v44  ;;  %v1167_v51 = vmul.f32 %v2523_v17, %v752_v47  ;;  %v1199_v52 = vmul.f32 %v2523_v17, %v880_v48  ;;  %v754_v53 = vpop.f32.mrb[29].mxu0  ;;  %v882_v54 = vpop.f32.mrb[29].mxu1 }
 0x14e   :  { %v755_v55 = vpop.f32.mrb[30].mxu0  ;;  %v883_v56 = vpop.f32.mrb[30].mxu1 }
 0x14f   :  { %2051 = vst [vmem:[%s2758_s4 + $0x30] sm:$0xff] %v1919_v49   ;;  %2067 = vst [vmem:[%s2758_s4 + $0xb0] sm:$0xff] %v1999_v50   ;;  %v1238_v57 = vadd.f32 %v2528_v19, %v1167_v51  ;;  %v1270_v58 = vadd.f32 %v2528_v19, %v1199_v52  ;;  %v1168_v59 = vmul.f32 %v2523_v17, %v755_v55  ;;  %v757_v61 = vpop.f32.mrb[31].mxu0  ;;  %v885_v62 = vpop.f32.mrb[31].mxu1 }
 0x150   :  { %v1200_v60 = vmul.f32 %v2523_v17, %v883_v56 }
 0x151   :  { %v1239_v63 = vadd.f32 %v2528_v19, %v1168_v59  ;;  %v1302_v1 = vmax.f32 %v1238_v57, 0.0  ;;  %v1334_v2 = vmax.f32 %v1270_v58, 0.0 }
 0x152   :  { %v1271_v0 = vadd.f32 %v2528_v19, %v1200_v60 }
 0x153   :  { %v1303_v3 = vmax.f32 %v1239_v63, 0.0 }
 0x154   :  { %v1335_v4 = vmax.f32 %v1271_v0, 0.0  ;;  %v760_v5 = vpop.f32.mrb[32].mxu0  ;;  %v888_v6 = vpop.f32.mrb[32].mxu1 }
 0x155   :  { %v1924_v7 = vpack.c.bf16 %v1303_v3, %v1302_v1  ;;  %v1169_v9 = vmul.f32 %v2523_v17, %v760_v5  ;;  %v1201_v10 = vmul.f32 %v2523_v17, %v888_v6  ;;  %v762_v11 = vpop.f32.mrb[33].mxu0  ;;  %v890_v12 = vpop.f32.mrb[33].mxu1 }
 0x156   :  { %v2004_v8 = vpack.c.bf16 %v1335_v4, %v1334_v2  ;;  %v763_v13 = vpop.f32.mrb[34].mxu0  ;;  %v891_v14 = vpop.f32.mrb[34].mxu1 }
 0x157   :  { %2052 = vst [vmem:[%s2758_s4 + $0x38] sm:$0xff] %v1924_v7   ;;  %v1240_v15 = vadd.f32 %v2528_v19, %v1169_v9  ;;  %v1272_v16 = vadd.f32 %v2528_v19, %v1201_v10  ;;  %v1170_v18 = vmul.f32 %v2523_v17, %v763_v13  ;;  %v1202_v20 = vmul.f32 %v2523_v17, %v891_v14  ;;  %v765_v21 = vpop.f32.mrb[35].mxu0  ;;  %v893_v22 = vpop.f32.mrb[35].mxu1 }
 0x158   :  { %2068 = vst [vmem:[%s2758_s4 + $0xb8] sm:$0xff] %v2004_v8  }
 0x159   :  { %v1241_v23 = vadd.f32 %v2528_v19, %v1170_v18  ;;  %v1273_v24 = vadd.f32 %v2528_v19, %v1202_v20  ;;  %v1304_v25 = vmax.f32 %v1240_v15, 0.0  ;;  %v1336_v26 = vmax.f32 %v1272_v16, 0.0 }
 0x15b   :  { %v1305_v27 = vmax.f32 %v1241_v23, 0.0  ;;  %v1337_v28 = vmax.f32 %v1273_v24, 0.0 }
 0x15c   :  { %v768_v29 = vpop.f32.mrb[36].mxu0  ;;  %v896_v30 = vpop.f32.mrb[36].mxu1 }
 0x15d   :  { %v1929_v31 = vpack.c.bf16 %v1305_v27, %v1304_v25  ;;  %v2009_v32 = vpack.c.bf16 %v1337_v28, %v1336_v26  ;;  %v1171_v33 = vmul.f32 %v2523_v17, %v768_v29  ;;  %v1203_v34 = vmul.f32 %v2523_v17, %v896_v30  ;;  %v770_v35 = vpop.f32.mrb[37].mxu0  ;;  %v898_v36 = vpop.f32.mrb[37].mxu1 }
 0x15e   :  { %v771_v37 = vpop.f32.mrb[38].mxu0  ;;  %v899_v38 = vpop.f32.mrb[38].mxu1 }
 0x15f   :  { %2053 = vst [vmem:[%s2758_s4 + $0x40] sm:$0xff] %v1929_v31   ;;  %2069 = vst [vmem:[%s2758_s4 + $0xc0] sm:$0xff] %v2009_v32   ;;  %v1242_v39 = vadd.f32 %v2528_v19, %v1171_v33  ;;  %v1274_v40 = vadd.f32 %v2528_v19, %v1203_v34  ;;  %v1172_v41 = vmul.f32 %v2523_v17, %v771_v37  ;;  %v773_v43 = vpop.f32.mrb[39].mxu0  ;;  %v901_v44 = vpop.f32.mrb[39].mxu1 }
 0x160   :  { %v1204_v42 = vmul.f32 %v2523_v17, %v899_v38 }
 0x161   :  { %v1243_v45 = vadd.f32 %v2528_v19, %v1172_v41  ;;  %v1306_v47 = vmax.f32 %v1242_v39, 0.0  ;;  %v1338_v48 = vmax.f32 %v1274_v40, 0.0 }
 0x162   :  { %v1275_v46 = vadd.f32 %v2528_v19, %v1204_v42 }
 0x163   :  { %v1307_v49 = vmax.f32 %v1243_v45, 0.0 }
 0x164   :  { %v1339_v50 = vmax.f32 %v1275_v46, 0.0  ;;  %v776_v51 = vpop.f32.mrb[40].mxu0  ;;  %v904_v52 = vpop.f32.mrb[40].mxu1 }
 0x165   :  { %v1934_v53 = vpack.c.bf16 %v1307_v49, %v1306_v47  ;;  %v1173_v55 = vmul.f32 %v2523_v17, %v776_v51  ;;  %v1205_v56 = vmul.f32 %v2523_v17, %v904_v52  ;;  %v778_v57 = vpop.f32.mrb[41].mxu0  ;;  %v906_v58 = vpop.f32.mrb[41].mxu1 }
 0x166   :  { %v2014_v54 = vpack.c.bf16 %v1339_v50, %v1338_v48  ;;  %v779_v59 = vpop.f32.mrb[42].mxu0  ;;  %v907_v60 = vpop.f32.mrb[42].mxu1 }
 0x167   :  { %2054 = vst [vmem:[%s2758_s4 + $0x48] sm:$0xff] %v1934_v53   ;;  %v1244_v61 = vadd.f32 %v2528_v19, %v1173_v55  ;;  %v1276_v62 = vadd.f32 %v2528_v19, %v1205_v56  ;;  %v1174_v63 = vmul.f32 %v2523_v17, %v779_v59  ;;  %v1206_v0 = vmul.f32 %v2523_v17, %v907_v60  ;;  %v781_v1 = vpop.f32.mrb[43].mxu0  ;;  %v909_v2 = vpop.f32.mrb[43].mxu1 }
 0x168   :  { %2070 = vst [vmem:[%s2758_s4 + $0xc8] sm:$0xff] %v2014_v54  }
 0x169   :  { %v1245_v3 = vadd.f32 %v2528_v19, %v1174_v63  ;;  %v1277_v4 = vadd.f32 %v2528_v19, %v1206_v0  ;;  %v1308_v5 = vmax.f32 %v1244_v61, 0.0  ;;  %v1340_v6 = vmax.f32 %v1276_v62, 0.0 }
 0x16b   :  { %v1309_v7 = vmax.f32 %v1245_v3, 0.0  ;;  %v1341_v8 = vmax.f32 %v1277_v4, 0.0 }
 0x16c   :  { %v784_v9 = vpop.f32.mrb[44].mxu0  ;;  %v912_v10 = vpop.f32.mrb[44].mxu1 }
 0x16d   :  { %v1939_v11 = vpack.c.bf16 %v1309_v7, %v1308_v5  ;;  %v2019_v12 = vpack.c.bf16 %v1341_v8, %v1340_v6  ;;  %v1175_v13 = vmul.f32 %v2523_v17, %v784_v9  ;;  %v1207_v14 = vmul.f32 %v2523_v17, %v912_v10  ;;  %v786_v15 = vpop.f32.mrb[45].mxu0  ;;  %v914_v16 = vpop.f32.mrb[45].mxu1 }
 0x16e   :  { %v787_v18 = vpop.f32.mrb[46].mxu0  ;;  %v915_v20 = vpop.f32.mrb[46].mxu1 }
 0x16f   :  { %2055 = vst [vmem:[%s2758_s4 + $0x50] sm:$0xff] %v1939_v11   ;;  %2071 = vst [vmem:[%s2758_s4 + $0xd0] sm:$0xff] %v2019_v12   ;;  %v1246_v21 = vadd.f32 %v2528_v19, %v1175_v13  ;;  %v1278_v22 = vadd.f32 %v2528_v19, %v1207_v14  ;;  %v1176_v23 = vmul.f32 %v2523_v17, %v787_v18  ;;  %v789_v25 = vpop.f32.mrb[47].mxu0  ;;  %v917_v26 = vpop.f32.mrb[47].mxu1 }
 0x170   :  { %v1208_v24 = vmul.f32 %v2523_v17, %v915_v20 }
 0x171   :  { %v1247_v27 = vadd.f32 %v2528_v19, %v1176_v23  ;;  %v1310_v29 = vmax.f32 %v1246_v21, 0.0  ;;  %v1342_v30 = vmax.f32 %v1278_v22, 0.0 }
 0x172   :  { %v1279_v28 = vadd.f32 %v2528_v19, %v1208_v24 }
 0x173   :  { %v1311_v31 = vmax.f32 %v1247_v27, 0.0 }
 0x174   :  { %v1343_v32 = vmax.f32 %v1279_v28, 0.0  ;;  %v792_v33 = vpop.f32.mrb[48].mxu0  ;;  %v920_v34 = vpop.f32.mrb[48].mxu1 }
 0x175   :  { %v1944_v35 = vpack.c.bf16 %v1311_v31, %v1310_v29  ;;  %v1177_v37 = vmul.f32 %v2523_v17, %v792_v33  ;;  %v1209_v38 = vmul.f32 %v2523_v17, %v920_v34  ;;  %v794_v39 = vpop.f32.mrb[49].mxu0  ;;  %v922_v40 = vpop.f32.mrb[49].mxu1 }
 0x176   :  { %v2024_v36 = vpack.c.bf16 %v1343_v32, %v1342_v30  ;;  %v795_v41 = vpop.f32.mrb[50].mxu0  ;;  %v923_v42 = vpop.f32.mrb[50].mxu1 }
 0x177   :  { %2056 = vst [vmem:[%s2758_s4 + $0x58] sm:$0xff] %v1944_v35   ;;  %v1248_v43 = vadd.f32 %v2528_v19, %v1177_v37  ;;  %v1280_v44 = vadd.f32 %v2528_v19, %v1209_v38  ;;  %v1178_v45 = vmul.f32 %v2523_v17, %v795_v41  ;;  %v1210_v46 = vmul.f32 %v2523_v17, %v923_v42  ;;  %v797_v47 = vpop.f32.mrb[51].mxu0  ;;  %v925_v48 = vpop.f32.mrb[51].mxu1 }
 0x178   :  { %2072 = vst [vmem:[%s2758_s4 + $0xd8] sm:$0xff] %v2024_v36  }
 0x179   :  { %v1249_v49 = vadd.f32 %v2528_v19, %v1178_v45  ;;  %v1281_v50 = vadd.f32 %v2528_v19, %v1210_v46  ;;  %v1312_v51 = vmax.f32 %v1248_v43, 0.0  ;;  %v1344_v52 = vmax.f32 %v1280_v44, 0.0 }
 0x17b   :  { %v1313_v53 = vmax.f32 %v1249_v49, 0.0  ;;  %v1345_v54 = vmax.f32 %v1281_v50, 0.0 }
 0x17c   :  { %v800_v55 = vpop.f32.mrb[52].mxu0  ;;  %v928_v56 = vpop.f32.mrb[52].mxu1 }
 0x17d   :  { %v1949_v57 = vpack.c.bf16 %v1313_v53, %v1312_v51  ;;  %v2029_v58 = vpack.c.bf16 %v1345_v54, %v1344_v52  ;;  %v1179_v59 = vmul.f32 %v2523_v17, %v800_v55  ;;  %v1211_v60 = vmul.f32 %v2523_v17, %v928_v56  ;;  %v802_v61 = vpop.f32.mrb[53].mxu0  ;;  %v930_v62 = vpop.f32.mrb[53].mxu1 }
 0x17e   :  { %v803_v63 = vpop.f32.mrb[54].mxu0  ;;  %v931_v0 = vpop.f32.mrb[54].mxu1 }
 0x17f   :  { %2057 = vst [vmem:[%s2758_s4 + $0x60] sm:$0xff] %v1949_v57   ;;  %2073 = vst [vmem:[%s2758_s4 + $0xe0] sm:$0xff] %v2029_v58   ;;  %v1250_v1 = vadd.f32 %v2528_v19, %v1179_v59  ;;  %v1282_v2 = vadd.f32 %v2528_v19, %v1211_v60  ;;  %v1180_v3 = vmul.f32 %v2523_v17, %v803_v63  ;;  %v805_v5 = vpop.f32.mrb[55].mxu0  ;;  %v933_v6 = vpop.f32.mrb[55].mxu1 }
 0x180   :  { %v1212_v4 = vmul.f32 %v2523_v17, %v931_v0 }
 0x181   :  { %v1251_v7 = vadd.f32 %v2528_v19, %v1180_v3  ;;  %v1314_v9 = vmax.f32 %v1250_v1, 0.0  ;;  %v1346_v10 = vmax.f32 %v1282_v2, 0.0 }
 0x182   :  { %v1283_v8 = vadd.f32 %v2528_v19, %v1212_v4 }
 0x183   :  { %v1315_v11 = vmax.f32 %v1251_v7, 0.0 }
 0x184   :  { %v1347_v12 = vmax.f32 %v1283_v8, 0.0  ;;  %v808_v13 = vpop.f32.mrb[56].mxu0  ;;  %v936_v14 = vpop.f32.mrb[56].mxu1 }
 0x185   :  { %v1954_v15 = vpack.c.bf16 %v1315_v11, %v1314_v9  ;;  %v1181_v18 = vmul.f32 %v2523_v17, %v808_v13  ;;  %v1213_v20 = vmul.f32 %v2523_v17, %v936_v14  ;;  %v810_v21 = vpop.f32.mrb[57].mxu0  ;;  %v938_v22 = vpop.f32.mrb[57].mxu1 }
 0x186   :  { %v2034_v16 = vpack.c.bf16 %v1347_v12, %v1346_v10  ;;  %v811_v23 = vpop.f32.mrb[58].mxu0  ;;  %v939_v24 = vpop.f32.mrb[58].mxu1 }
 0x187   :  { %2058 = vst [vmem:[%s2758_s4 + $0x68] sm:$0xff] %v1954_v15   ;;  %v1252_v25 = vadd.f32 %v2528_v19, %v1181_v18  ;;  %v1284_v26 = vadd.f32 %v2528_v19, %v1213_v20  ;;  %v1182_v27 = vmul.f32 %v2523_v17, %v811_v23  ;;  %v1214_v28 = vmul.f32 %v2523_v17, %v939_v24  ;;  %v813_v29 = vpop.f32.mrb[59].mxu0  ;;  %v941_v30 = vpop.f32.mrb[59].mxu1 }
 0x188   :  { %2074 = vst [vmem:[%s2758_s4 + $0xe8] sm:$0xff] %v2034_v16  }
 0x189   :  { %v1253_v31 = vadd.f32 %v2528_v19, %v1182_v27  ;;  %v1285_v32 = vadd.f32 %v2528_v19, %v1214_v28  ;;  %v1316_v33 = vmax.f32 %v1252_v25, 0.0  ;;  %v1348_v34 = vmax.f32 %v1284_v26, 0.0 }
 0x18b   :  { %v1317_v35 = vmax.f32 %v1253_v31, 0.0  ;;  %v1349_v36 = vmax.f32 %v1285_v32, 0.0 }
 0x18c   :  { %v816_v37 = vpop.f32.mrb[60].mxu0  ;;  %v944_v38 = vpop.f32.mrb[60].mxu1 }
 0x18d   :  { %v1959_v39 = vpack.c.bf16 %v1317_v35, %v1316_v33  ;;  %v2039_v40 = vpack.c.bf16 %v1349_v36, %v1348_v34  ;;  %v1183_v41 = vmul.f32 %v2523_v17, %v816_v37  ;;  %v1215_v42 = vmul.f32 %v2523_v17, %v944_v38  ;;  %v818_v43 = vpop.f32.mrb[61].mxu0  ;;  %v946_v44 = vpop.f32.mrb[61].mxu1 }
 0x18e   :  { %v819_v45 = vpop.f32.mrb[62].mxu0  ;;  %v947_v46 = vpop.f32.mrb[62].mxu1 }
 0x18f   :  { %2059 = vst [vmem:[%s2758_s4 + $0x70] sm:$0xff] %v1959_v39   ;;  %2075 = vst [vmem:[%s2758_s4 + $0xf0] sm:$0xff] %v2039_v40   ;;  %v1254_v47 = vadd.f32 %v2528_v19, %v1183_v41  ;;  %v1286_v48 = vadd.f32 %v2528_v19, %v1215_v42  ;;  %v1184_v49 = vmul.f32 %v2523_v17, %v819_v45  ;;  %v821_v51 = vpop.f32.mrb[63].mxu0  ;;  %v949_v52 = vpop.f32.mrb[63].mxu1 }
 0x190   :  { %v1216_v50 = vmul.f32 %v2523_v17, %v947_v46 }
 0x191   :  { %v1255_v53 = vadd.f32 %v2528_v19, %v1184_v49  ;;  %v1318_v55 = vmax.f32 %v1254_v47, 0.0  ;;  %v1350_v56 = vmax.f32 %v1286_v48, 0.0 }
 0x192   :  { %v1287_v54 = vadd.f32 %v2528_v19, %v1216_v50 }
 0x193   :  { %v1319_v57 = vmax.f32 %v1255_v53, 0.0 }
 0x194   :  { %v1351_v58 = vmax.f32 %v1287_v54, 0.0 }
 0x195   :  { %v1964_v59 = vpack.c.bf16 %v1319_v57, %v1318_v55 }
 0x196   :  { %v2044_v60 = vpack.c.bf16 %v1351_v58, %v1350_v56 }
 0x197   :  { %2060 = vst [vmem:[%s2758_s4 + $0x78] sm:$0xff] %v1964_v59  }
 0x198   :  { %2076 = vst [vmem:[%s2758_s4 + $0xf8] sm:$0xff] %v2044_v60  }

// kernel: _lambda_.22
= control target key start
LH: loop header
LB: loop body
LE: loop exit
PB: predicated region body
PF: predicated region fallthrough
CT: control target
= control target key end

     0   :  { %s1742_s15 = smov 0   ;;  %s1744_s16 = smov 0   ;;  %s1995_s0 = inlined_call_operand.vmem [shape: bf16[128,1152], index: 0, kind: input, shape index: {}]   ;;  %s1996_s1 = inlined_call_operand.vmem [shape: bf16[1152,128], index: 1, kind: input, shape index: {}]   ;;  %s1997_s2 = inlined_call_operand.vmem [shape: f32[1,128], index: 2, kind: input, shape index: {}]   ;;  %s1998_s3 = inlined_call_operand.vmem [shape: f32[1,128], index: 3, kind: input, shape index: {}]   ;;  %s1999_s4 = inlined_call_operand.vmem [shape: bf16[128,128], index: 4, kind: output, shape index: {}]  }
   0x1   :  { %s1746_s17 = smov 0   ;;  %s1748_s18 = smov 0  }
   0x2   :  { %s1750_s19 = smov 0  }
   0x3 LB: > { %s26_s20 = sadd.s32 1, %s1710_s18  ;;  %p49_p1 = scmp.ne.s32.totalorder %s1702_s16, %s1698_s15  ;;  %s1714_s19 = sphi %s1750_s19, %s14_s19   ;;  %s1710_s18 = sphi %s1748_s18, %s2003_s18   ;;  %s1706_s17 = sphi %s1746_s17, %s2002_s17   ;;  %s1702_s16 = sphi %s1744_s16, %s2001_s16   ;;  %s1698_s15 = sphi %s1742_s15, %s2000_s15  }
   0x4   : > { %p27_p0 = scmp.ge.s32.totalorder %s26_s20, 3  ;;  %p50_p2 = scmp.eq.s32.totalorder %s1714_s19, 0 }
   0x5   : > { %s42_s22 = sadd.s32 1, %s1702_s16  ;;  %p1293_p5 = scmp.ge.s32.totalorder %s1714_s19, 3 }
   0x6   : > { %s2005_s20 = smov (%p27_p0, %s26_s20), 0  ;;  %p51_p3 = por %p50_p2, %p49_p1 }
   0x7   : > { %s38_s21 = ssub.s32 %s1710_s18, %s2005_s20  ;;  %195 = sbr.rel (%p1293_p5) target bundleno = 37 (0x25), region = 24 }
   0x8   : > { %p40_p4 = scmp.eq.s32.totalorder %s38_s21, 0 }
   0xa   : > { %s1777_s23 = scalar_select %p40_p4, %s1702_s16, %s42_s22  }
   0xe   : > { %198 = sbr.rel (!%p51_p3) target bundleno = 37 (0x25), region = 28  ;;  %s200_s24 = sand.u32 (%p51_p3), 1, %s1702_s16  }
   0xf   : > { %s1401_s25 = smul.u32 (%p51_p3), 12, %s1710_s18 }
  0x10   : > { %s1577_s26 = smul.u32 (%p51_p3), 192, %s200_s24 }
  0x11   : > { %s1785_s29 = scalar_lea.vmem (%p51_p3), %s1995_s0, %s1401_s25 }
  0x12   : > { %v223_v0 = vld [vmem:[%s1785_s29] sm:$0xff] (%p51_p3)  ;;  %v227_v2 = vld [vmem:[%s1785_s29 + $0x48] sm:$0xff] (%p51_p3)  ;;  %s1790_s30 = scalar_lea.vmem (%p51_p3), [#allocation3], %s1577_s26  ;;  %v231_v4 = vld [vmem:[%s1785_s29 + $0x90] sm:$0xff] (%p51_p3) }
  0x13   : > { %v225_v1 = vld [vmem:[%s1785_s29 + $0x24] sm:$0xff] (%p51_p3)  ;;  %224 = vst [vmem:[%s1790_s30] sm:$0xff] (%p51_p3), %v223_v0  ;;  %228 = vst [vmem:[%s1790_s30 + $0x18] sm:$0xff] (%p51_p3), %v227_v2  ;;  %v229_v3 = vld [vmem:[%s1785_s29 + $0x6c] sm:$0xff] (%p51_p3) }
  0x14   : > { %226 = vst [vmem:[%s1790_s30 + $0xc] sm:$0xff] (%p51_p3), %v225_v1  ;;  %v233_v5 = vld [vmem:[%s1785_s29 + $0xb4] sm:$0xff] (%p51_p3)  ;;  %230 = vst [vmem:[%s1790_s30 + $0x24] sm:$0xff] (%p51_p3), %v229_v3  ;;  %v237_v7 = vld [vmem:[%s1785_s29 + $0xfc] sm:$0xff] (%p51_p3) }
  0x15   : > { %232 = vst [vmem:[%s1790_s30 + $0x30] sm:$0xff] %v231_v4  ;;  %234 = vst [vmem:[%s1790_s30 + $0x3c] sm:$0xff] %v233_v5  ;;  %v235_v6 = vld [vmem:[%s1785_s29 + $0xd8] sm:$0xff]  ;;  %v239_v8 = vld [vmem:[%s1785_s29 + $0x120] sm:$0xff] }
  0x16   : > { %236 = vst [vmem:[%s1790_s30 + $0x48] sm:$0xff] %v235_v6  ;;  %238 = vst [vmem:[%s1790_s30 + $0x54] sm:$0xff] %v237_v7  ;;  %v241_v9 = vld [vmem:[%s1785_s29 + $0x144] sm:$0xff]  ;;  %v245_v11 = vld [vmem:[%s1785_s29 + $0x18c] sm:$0xff] }
  0x17   : > { %240 = vst [vmem:[%s1790_s30 + $0x60] sm:$0xff] %v239_v8  ;;  %v243_v10 = vld [vmem:[%s1785_s29 + $0x168] sm:$0xff]  ;;  %242 = vst [vmem:[%s1790_s30 + $0x6c] sm:$0xff] %v241_v9  ;;  %v247_v12 = vld [vmem:[%s1785_s29 + $0x1b0] sm:$0xff] }
  0x18   : > { %244 = vst [vmem:[%s1790_s30 + $0x78] sm:$0xff] %v243_v10  ;;  %246 = vst [vmem:[%s1790_s30 + $0x84] sm:$0xff] %v245_v11  ;;  %v249_v13 = vld [vmem:[%s1785_s29 + $0x1d4] sm:$0xff]  ;;  %v253_v15 = vld [vmem:[%s1785_s29 + $0x21c] sm:$0xff] }
  0x19   : > { %v251_v14 = vld [vmem:[%s1785_s29 + $0x1f8] sm:$0xff]  ;;  %248 = vst [vmem:[%s1790_s30 + $0x90] sm:$0xff] %v247_v12  ;;  %250 = vst [vmem:[%s1790_s30 + $0x9c] sm:$0xff] %v249_v13  ;;  %v1295_v16 = vld [vmem:[%s1785_s29 + $0x8] sm:$0xf] }
  0x1a   : > { %252 = vst [vmem:[%s1790_s30 + $0xa8] sm:$0xff] %v251_v14  ;;  %v1297_v17 = vld [vmem:[%s1785_s29 + $0x2c] sm:$0xf]  ;;  %254 = vst [vmem:[%s1790_s30 + $0xb4] sm:$0xff] %v253_v15  ;;  %v1299_v18 = vld [vmem:[%s1785_s29 + $0x50] sm:$0xf] }
  0x1b   : > { %1296 = vst [vmem:[%s1790_s30 + $0x8] sm:$0xf] %v1295_v16  ;;  %1298 = vst [vmem:[%s1790_s30 + $0x14] sm:$0xf] %v1297_v17  ;;  %v1301_v19 = vld [vmem:[%s1785_s29 + $0x74] sm:$0xf] }
  0x1c   : > { %v1303_v20 = vld [vmem:[%s1785_s29 + $0x98] sm:$0xf]  ;;  %1300 = vst [vmem:[%s1790_s30 + $0x20] sm:$0xf] %v1299_v18  ;;  %1302 = vst [vmem:[%s1790_s30 + $0x2c] sm:$0xf] %v1301_v19 }
  0x1d   : > { %1304 = vst [vmem:[%s1790_s30 + $0x38] sm:$0xf] %v1303_v20  ;;  %v1305_v21 = vld [vmem:[%s1785_s29 + $0xbc] sm:$0xf]  ;;  %v1307_v22 = vld [vmem:[%s1785_s29 + $0xe0] sm:$0xf] }
  0x1e   : > { %v1309_v23 = vld [vmem:[%s1785_s29 + $0x104] sm:$0xf]  ;;  %1306 = vst [vmem:[%s1790_s30 + $0x44] sm:$0xf] %v1305_v21  ;;  %1308 = vst [vmem:[%s1790_s30 + $0x50] sm:$0xf] %v1307_v22 }
  0x1f   : > { %1310 = vst [vmem:[%s1790_s30 + $0x5c] sm:$0xf] %v1309_v23  ;;  %v1311_v24 = vld [vmem:[%s1785_s29 + $0x128] sm:$0xf]  ;;  %v1313_v25 = vld [vmem:[%s1785_s29 + $0x14c] sm:$0xf] }
  0x20   : > { %v1315_v26 = vld [vmem:[%s1785_s29 + $0x170] sm:$0xf]  ;;  %1312 = vst [vmem:[%s1790_s30 + $0x68] sm:$0xf] %v1311_v24  ;;  %1314 = vst [vmem:[%s1790_s30 + $0x74] sm:$0xf] %v1313_v25 }
  0x21   : > { %1316 = vst [vmem:[%s1790_s30 + $0x80] sm:$0xf] %v1315_v26  ;;  %v1317_v27 = vld [vmem:[%s1785_s29 + $0x194] sm:$0xf]  ;;  %v1319_v28 = vld [vmem:[%s1785_s29 + $0x1b8] sm:$0xf] }
  0x22   : > { %v1321_v29 = vld [vmem:[%s1785_s29 + $0x1dc] sm:$0xf]  ;;  %1318 = vst [vmem:[%s1790_s30 + $0x8c] sm:$0xf] %v1317_v27  ;;  %1320 = vst [vmem:[%s1790_s30 + $0x98] sm:$0xf] %v1319_v28 }
  0x23   : > { %1322 = vst [vmem:[%s1790_s30 + $0xa4] sm:$0xf] %v1321_v29  ;;  %v1323_v30 = vld [vmem:[%s1785_s29 + $0x200] sm:$0xf]  ;;  %v1325_v31 = vld [vmem:[%s1785_s29 + $0x224] sm:$0xf] }
  0x24   : > { %1324 = vst [vmem:[%s1790_s30 + $0xb0] sm:$0xf] %v1323_v30  ;;  %1326 = vst [vmem:[%s1790_s30 + $0xbc] sm:$0xf] %v1325_v31 }
  0x25 PF: > { %p1327_p6 = scmp.ge.s32.totalorder %s1714_s19, 1  ;;  %p310_p7 = scmp.lt.s32.totalorder %s1714_s19, 4 }
  0x27   : > { %p311_p8 = pnand %p1327_p6, %p310_p7 }
  0x28   : > { %s317_s5 = sand.u32 (!%p311_p8), 1, %s1698_s15   ;;  %s361_s6 = smul.u32 (!%p311_p8), 48, %s1706_s17 }
  0x29   : > { %314 = sbr.rel (%p311_p8) target bundleno = 385 (0x181), region = 58  ;;  %p1329_p10 = scmp.ne.s32.totalorder (!%p311_p8), %s1706_s17, 0 }
  0x2a   : > { %s1578_s7 = smul.u32 (!%p311_p8), 192, %s317_s5  ;;  %p362_p9 = scmp.lt.s32.totalorder (!%p311_p8), %s361_s6, 143 }
  0x2c   : > { %s1862_s12 = scalar_lea.vmem (!%p311_p8), [#allocation3], %s1578_s7 }
  0x30   : > { %s2007_s6 = smov (!%p362_p9, %s361_s6), 143  ;;  %389 = sbr.rel (%p1329_p10) target bundleno = 58 (0x3a), region = 66 }
  0x31   : > { %s1328_s8 = sshll.u32 %s2007_s6, 2  ;;  %v1716_v32 = vmov (!%p1329_p10), 0.0  }
  0x32   : > { %s1860_s11 = scalar_lea.vmem %s1996_s1, %s1328_s8  ;;  %390 = vst [vmem:[#allocation2] sm:$0xff] (!%p1329_p10), %v1716_v32  ;;  %391 = vst [vmem:[#allocation2 + $0x8] sm:$0xff] (!%p1329_p10), %v1716_v32 }
  0x33   : > { %392 = vst [vmem:[#allocation2 + $0x10] sm:$0xff] (!%p1329_p10), %v1716_v32  ;;  %393 = vst [vmem:[#allocation2 + $0x18] sm:$0xff] (!%p1329_p10), %v1716_v32 }
  0x34   : > { %394 = vst [vmem:[#allocation2 + $0x20] sm:$0xff] (!%p1329_p10), %v1716_v32  ;;  %395 = vst [vmem:[#allocation2 + $0x28] sm:$0xff] (!%p1329_p10), %v1716_v32 }
  0x35   : > { %396 = vst [vmem:[#allocation2 + $0x30] sm:$0xff] (!%p1329_p10), %v1716_v32  ;;  %397 = vst [vmem:[#allocation2 + $0x38] sm:$0xff] (!%p1329_p10), %v1716_v32 }
  0x36   : > { %398 = vst [vmem:[#allocation2 + $0x40] sm:$0xff] (!%p1329_p10), %v1716_v32  ;;  %399 = vst [vmem:[#allocation2 + $0x48] sm:$0xff] (!%p1329_p10), %v1716_v32 }
  0x37   : > { %400 = vst [vmem:[#allocation2 + $0x50] sm:$0xff] %v1716_v32  ;;  %401 = vst [vmem:[#allocation2 + $0x58] sm:$0xff] %v1716_v32 }
  0x38   : > { %402 = vst [vmem:[#allocation2 + $0x60] sm:$0xff] %v1716_v32  ;;  %403 = vst [vmem:[#allocation2 + $0x68] sm:$0xff] %v1716_v32 }
  0x39   : > { %404 = vst [vmem:[#allocation2 + $0x70] sm:$0xff] %v1716_v32  ;;  %405 = vst [vmem:[#allocation2 + $0x78] sm:$0xff] %v1716_v32 }
  0x3a PF: > { %v1620_v33 = vld [vmem:[%s1860_s11 + $0x40] sm:$0xff]   ;;  %v1623_v36 = vld [vmem:[%s1860_s11 + $0x48] sm:$0xff]   ;;  %v1626_v39 = vld [vmem:[%s1860_s11 + $0x50] sm:$0xff]   ;;  %p1378_p11 = scmp.ne.s32.totalorder %s1706_s17, 2 }
  0x3b   : > { %v1621_v34 = vld [vmem:[%s1860_s11] sm:$0xff]   ;;  %1465 = vmatprep.subr.bf16.mxu0 %v1620_v33  ;;  %v1624_v37 = vld [vmem:[%s1860_s11 + $0x8] sm:$0xff]   ;;  %v1627_v40 = vld [vmem:[%s1860_s11 + $0x10] sm:$0xff]  }
  0x3c   : > { %v1622_v35 = vld [vmem:[%s1860_s11 + $0x80] sm:$0xff]   ;;  %1466 = vmatpush3.bf16.msra.mxu0 %v1621_v34  ;;  %v1625_v38 = vld [vmem:[%s1860_s11 + $0x88] sm:$0xff]   ;;  %v1628_v41 = vld [vmem:[%s1860_s11 + $0x90] sm:$0xff]  }
  0x3d   : > { %1545 = vmatprep.subr.bf16.mxu1 %v1622_v35  ;;  %1467 = vmatprep.subr.bf16.mxu0 %v1623_v36  ;;  %v1629_v42 = vld [vmem:[%s1860_s11 + $0x58] sm:$0xff]   ;;  %v1632_v45 = vld [vmem:[%s1860_s11 + $0x60] sm:$0xff]   ;;  %v1635_v48 = vld [vmem:[%s1860_s11 + $0x68] sm:$0xff]  }
  0x3e   : > { %1546 = vmatpush3.bf16.msra.mxu1 %v1622_v35  ;;  %v1630_v43 = vld [vmem:[%s1860_s11 + $0x18] sm:$0xff]   ;;  %v1634_v46 = vld [vmem:[%s1860_s11 + $0xa0] sm:$0xff]   ;;  %v1637_v49 = vld [vmem:[%s1860_s11 + $0xa8] sm:$0xff]  }
  0x3f   : > { %1547 = vmatprep.subr.bf16.mxu1 %v1625_v38  ;;  %v1631_v44 = vld [vmem:[%s1860_s11 + $0x98] sm:$0xff]   ;;  %v1633_v47 = vld [vmem:[%s1860_s11 + $0x20] sm:$0xff]   ;;  %v1636_v50 = vld [vmem:[%s1860_s11 + $0x28] sm:$0xff]  }
  0x40   : > { %1468 = vmatpush3.bf16.msra.mxu0 %v1624_v37  ;;  %v1638_v51 = vld [vmem:[%s1860_s11 + $0x70] sm:$0xff]   ;;  %v1641_v54 = vld [vmem:[%s1860_s11 + $0x78] sm:$0xff]   ;;  %v1644_v59 = vld [vmem:[%s1862_s12] ss:$12 sps:$4 sm:$0xff]  }
  0x41   : > { %1469 = vmatprep.subr.bf16.mxu0 %v1626_v39  ;;  %v1639_v52 = vld [vmem:[%s1860_s11 + $0x30] sm:$0xff]   ;;  %v1643_v55 = vld [vmem:[%s1860_s11 + $0xb8] sm:$0xff]   ;;  %v1648_v61 = vld [vmem:[%s1862_s12 + $0x20] ss:$12 sps:$4 sm:$0xff]  }
  0x42   : > { %1548 = vmatpush3.bf16.msra.mxu1 %v1625_v38  ;;  %v1640_v53 = vld [vmem:[%s1860_s11 + $0xb0] sm:$0xff]   ;;  %v1642_v58 = vld [vmem:[%s1860_s11 + $0x38] sm:$0xff]   ;;  %v1664_v5 = vld [vmem:[%s1862_s12 + $0x80] ss:$12 sps:$4 sm:$0xff]  }
  0x43   : > { %1549 = vmatprep.subr.bf16.mxu1 %v1628_v41  ;;  %v1646_v56 = vld [vmem:[%s1862_s12 + $0x4] ss:$12 sps:$4 sm:$0xff]   ;;  %v1647_v57 = vld [vmem:[%s1862_s12 + $0x8] ss:$12 sps:$4 sm:$0xff]   ;;  %v1657_v4 = vld [vmem:[%s1862_s12 + $0x4c] ss:$12 sps:$4 sm:$0xff]  }
  0x44   : > { %1470 = vmatpush3.bf16.msra.mxu0 %v1627_v40  ;;  %806 = vmatprep.mubr.bf16.mxu0 %v1646_v56  ;;  %v1649_v60 = vld [vmem:[%s1862_s12 + $0x1c] ss:$12 sps:$4 sm:$0xff]   ;;  %v1655_v62 = vld [vmem:[%s1862_s12 + $0x38] ss:$12 sps:$4 sm:$0xff]   ;;  %v1652_v0 = vld [vmem:[%s1862_s12 + $0x34] ss:$12 sps:$4 sm:$0xff]  }
  0x45   : > { %1471 = vmatprep.subr.bf16.mxu0 %v1629_v42  ;;  %1561 = vmatprep.mubr.bf16.mxu1 %v1647_v57  ;;  %v1651_v63 = vld [vmem:[%s1862_s12 + $0x18] ss:$12 sps:$4 sm:$0xff]   ;;  %v1656_v1 = vld [vmem:[%s1862_s12 + $0x50] ss:$12 sps:$4 sm:$0xff]   ;;  %v1663_v2 = vld [vmem:[%s1862_s12 + $0x68] ss:$12 sps:$4 sm:$0xff]  }
  0x46   : > { %1550 = vmatpush3.bf16.msra.mxu1 %v1628_v41  ;;  %v1654_v3 = vld [vmem:[%s1862_s12 + $0x30] ss:$12 sps:$4 sm:$0xff]   ;;  %v1671_v6 = vld [vmem:[%s1862_s12 + $0x98] ss:$12 sps:$4 sm:$0xff]   ;;  %v1659_v7 = vld [vmem:[%s1862_s12 + $0x48] ss:$12 sps:$4 sm:$0xff]  }
  0x47   : > { %1551 = vmatprep.subr.bf16.mxu1 %v1631_v44  ;;  %v1660_v8 = vld [vmem:[%s1862_s12 + $0x64] ss:$12 sps:$4 sm:$0xff]   ;;  %v1662_v10 = vld [vmem:[%s1862_s12 + $0x60] ss:$12 sps:$4 sm:$0xff]   ;;  %v1665_v11 = vld [vmem:[%s1862_s12 + $0x7c] ss:$12 sps:$4 sm:$0xff]  }
  0x48   : > { %1472 = vmatpush3.bf16.msra.mxu0 %v1630_v43  ;;  %v1672_v9 = vld [vmem:[%s1862_s12 + $0xb0] ss:$12 sps:$4 sm:$0xff]   ;;  %v1667_v12 = vld [vmem:[%s1862_s12 + $0x78] ss:$12 sps:$4 sm:$0xff]   ;;  %v1668_v13 = vld [vmem:[%s1862_s12 + $0x94] ss:$12 sps:$4 sm:$0xff]  }
  0x49   : > { %1473 = vmatprep.subr.bf16.mxu0 %v1632_v45  ;;  %v1670_v14 = vld [vmem:[%s1862_s12 + $0x90] ss:$12 sps:$4 sm:$0xff]   ;;  %v1673_v15 = vld [vmem:[%s1862_s12 + $0xac] ss:$12 sps:$4 sm:$0xff]   ;;  %v1675_v16 = vld [vmem:[%s1862_s12 + $0xa8] ss:$12 sps:$4 sm:$0xff]  }
  0x4a   : > { %1552 = vmatpush3.bf16.msra.mxu1 %v1631_v44  ;;  %v406_v23 = vld [vmem:[#allocation2] sm:$0xff]  ;;  %v407_v28 = vld [vmem:[#allocation2 + $0x8] sm:$0xff]  ;;  %v408_v38 = vld [vmem:[#allocation2 + $0x10] sm:$0xff] }
  0x4b   : > { %1553 = vmatprep.subr.bf16.mxu1 %v1634_v46  ;;  %v409_v44 = vld [vmem:[#allocation2 + $0x18] sm:$0xff] }
  0x4c   : > { %1474 = vmatpush3.bf16.msra.mxu0 %v1633_v47 }
  0x4d   : > { %1475 = vmatprep.subr.bf16.mxu0 %v1635_v48 }
  0x4e   : > { %1554 = vmatpush3.bf16.msra.mxu1 %v1634_v46 }
  0x4f   : > { %1555 = vmatprep.subr.bf16.mxu1 %v1637_v49 }
  0x50   : > { %1476 = vmatpush3.bf16.msra.mxu0 %v1636_v50 }
  0x51   : > { %1477 = vmatprep.subr.bf16.mxu0 %v1638_v51 }
  0x52   : > { %1556 = vmatpush3.bf16.msra.mxu1 %v1637_v49 }
  0x53   : > { %1557 = vmatprep.subr.bf16.mxu1 %v1640_v53 }
  0x54   : > { %1478 = vmatpush3.bf16.msra.mxu0 %v1639_v52 }
  0x55   : > { %1479 = vmatprep.subr.bf16.mxu0 %v1641_v54 }
  0x56   : > { %1558 = vmatpush3.bf16.msra.mxu1 %v1640_v53 }
  0x57   : > { %1559 = vmatprep.subr.bf16.mxu1 %v1643_v55 }
  0x58   : > { %1480 = vmatpush3.bf16.msra.mxu0 %v1642_v58 }
  0x5a   : > { %1560 = vmatpush3.bf16.msra.mxu1 %v1643_v55  ;;  %v410_v55 = vld [vmem:[#allocation2 + $0x20] sm:$0xff] }
  0x5b   : > { %807 = vmatmul.mubr.bf16.vlgmr.msra.gmra.mrb[0].mxu0 %v1644_v59 }
  0x5c   : > { %814 = vmatprep.mubr.bf16.mxu0 %v1649_v60  ;;  %v411_v60 = vld [vmem:[#allocation2 + $0x28] sm:$0xff] }
  0x5d   : > { %1562 = vmatmul.mubr.bf16.vlgmr.msra.gmra.mrb[0].mxu1 %v1648_v61 }
  0x5e   : > { %1565 = vmatprep.mubr.bf16.mxu1 %v1655_v62 }
  0x63   : > { %815 = vmatmul.mubr.bf16.gmra.mrb[4].mxu0 %v1651_v63 }
  0x64   : > { %822 = vmatprep.mubr.bf16.mxu0 %v1652_v0 }
  0x65   : > { %1566 = vmatmul.mubr.bf16.gmra.mrb[4].mxu1 %v1656_v1 }
  0x66   : > { %1569 = vmatprep.mubr.bf16.mxu1 %v1663_v2 }
  0x6b   : > { %823 = vmatmul.mubr.bf16.gmra.mrb[8].mxu0 %v1654_v3 }
  0x6c   : > { %830 = vmatprep.mubr.bf16.mxu0 %v1657_v4 }
  0x6d   : > { %1570 = vmatmul.mubr.bf16.gmra.mrb[8].mxu1 %v1664_v5 }
  0x6e   : > { %1573 = vmatprep.mubr.bf16.mxu1 %v1671_v6  ;;  %v412_v6 = vld [vmem:[#allocation2 + $0x30] sm:$0xff] }
  0x73   : > { %831 = vmatmul.mubr.bf16.gmra.mrb[12].mxu0 %v1659_v7 }
  0x74   : > { %838 = vmatprep.mubr.bf16.mxu0 %v1660_v8 }
  0x75   : > { %1574 = vmatmul.mubr.bf16.gmra.mrb[12].mxu1 %v1672_v9 }
  0x7b   : > { %839 = vmatmul.mubr.bf16.gmra.mrb[16].mxu0 %v1662_v10 }
  0x7c   : > { %846 = vmatprep.mubr.bf16.mxu0 %v1665_v11 }
  0x83   : > { %847 = vmatmul.mubr.bf16.gmra.mrb[20].mxu0 %v1667_v12  ;;  %v413_v12 = vld [vmem:[#allocation2 + $0x38] sm:$0xff] }
  0x84   : > { %854 = vmatprep.mubr.bf16.mxu0 %v1668_v13 }
  0x8b   : > { %855 = vmatmul.mubr.bf16.gmra.mrb[24].mxu0 %v1670_v14 }
  0x8c   : > { %862 = vmatprep.mubr.bf16.mxu0 %v1673_v15 }
  0x93   : > { %863 = vmatmul.mubr.bf16.gmra.mrb[28].mxu0 %v1675_v16 }
 0x12e   : > { %v1481_v17 = vpop.f32.mrb[0].mxu0 }
 0x12f   : > { %v1482_v18 = vpop.f32.mrb[1].mxu0 }
 0x130   : > { %v1483_v19 = vadd.f32 %v1482_v18, %v1481_v17  ;;  %v1484_v20 = vpop.f32.mrb[2].mxu0  ;;  %v1563_v21 = vpop.f32.mrb[0].mxu1 }
 0x131   : > { %v1485_v22 = vpop.f32.mrb[3].mxu0  ;;  %v905_v24 = vpop.f32.mrb[1].mxu1 }
 0x132   : > { %v1486_v25 = vadd.f32 %v1485_v22, %v1484_v20  ;;  %v906_v26 = vadd.f32 %v1483_v19, %v905_v24  ;;  %v1564_v27 = vpop.f32.mrb[2].mxu1  ;;  %v414_v22 = vld [vmem:[#allocation2 + $0x40] sm:$0xff] }
 0x133   : > { %v908_v29 = vpop.f32.mrb[3].mxu1 }
 0x134   : > { %v968_v30 = vadd.f32 %v906_v26, %v406_v23  ;;  %v909_v31 = vadd.f32 %v1486_v25, %v908_v29  ;;  %v415_v25 = vld [vmem:[#allocation2 + $0x48] sm:$0xff] }
 0x136   : > { %984 = vst [vmem:[#allocation2] sm:$0xff] %v968_v30  ;;  %v969_v32 = vadd.f32 %v909_v31, %v407_v28  ;;  %v1487_v33 = vpop.f32.mrb[4].mxu0 }
 0x137   : > { %v1488_v34 = vpop.f32.mrb[5].mxu0 }
 0x138   : > { %985 = vst [vmem:[#allocation2 + $0x8] sm:$0xff] %v969_v32  ;;  %v1489_v35 = vadd.f32 %v1488_v34, %v1487_v33  ;;  %v1490_v36 = vpop.f32.mrb[6].mxu0  ;;  %v1567_v37 = vpop.f32.mrb[4].mxu1  ;;  %v416_v33 = vld [vmem:[#allocation2 + $0x50] sm:$0xff] }
 0x139   : > { %v1491_v39 = vpop.f32.mrb[7].mxu0  ;;  %v921_v40 = vpop.f32.mrb[5].mxu1 }
 0x13a   : > { %v914_v41 = vadd.f32 %v1563_v21, %v1489_v35  ;;  %v1492_v42 = vadd.f32 %v1491_v39, %v1490_v36  ;;  %v1568_v43 = vpop.f32.mrb[6].mxu1 }
 0x13b   : > { %v924_v45 = vpop.f32.mrb[7].mxu1 }
 0x13c   : > { %v970_v46 = vadd.f32 %v914_v41, %v408_v38  ;;  %v917_v47 = vadd.f32 %v1564_v27, %v1492_v42 }
 0x13e   : > { %986 = vst [vmem:[#allocation2 + $0x10] sm:$0xff] %v970_v46  ;;  %v971_v48 = vadd.f32 %v917_v47, %v409_v44  ;;  %v1493_v49 = vpop.f32.mrb[8].mxu0  ;;  %v418_v46 = vld [vmem:[#allocation2 + $0x60] sm:$0xff] }
 0x13f   : > { %v1494_v50 = vpop.f32.mrb[9].mxu0 }
 0x140   : > { %987 = vst [vmem:[#allocation2 + $0x18] sm:$0xff] %v971_v48  ;;  %v1495_v51 = vadd.f32 %v1494_v50, %v1493_v49  ;;  %v1496_v52 = vpop.f32.mrb[10].mxu0  ;;  %v1571_v53 = vpop.f32.mrb[8].mxu1  ;;  %v419_v49 = vld [vmem:[#allocation2 + $0x68] sm:$0xff] }
 0x141   : > { %v1497_v54 = vpop.f32.mrb[11].mxu0  ;;  %v937_v56 = vpop.f32.mrb[9].mxu1 }
 0x142   : > { %v1498_v57 = vadd.f32 %v1497_v54, %v1496_v52  ;;  %v922_v58 = vadd.f32 %v1495_v51, %v921_v40  ;;  %v1572_v59 = vpop.f32.mrb[10].mxu1 }
 0x143   : > { %v940_v61 = vpop.f32.mrb[11].mxu1 }
 0x144   : > { %v972_v62 = vadd.f32 %v922_v58, %v410_v55  ;;  %v925_v63 = vadd.f32 %v1498_v57, %v924_v45  ;;  %v420_v57 = vld [vmem:[#allocation2 + $0x70] sm:$0xff] }
 0x146   : > { %988 = vst [vmem:[#allocation2 + $0x20] sm:$0xff] %v972_v62  ;;  %v973_v0 = vadd.f32 %v925_v63, %v411_v60  ;;  %v1499_v1 = vpop.f32.mrb[12].mxu0 }
 0x147   : > { %v1500_v2 = vpop.f32.mrb[13].mxu0 }
 0x148   : > { %989 = vst [vmem:[#allocation2 + $0x28] sm:$0xff] %v973_v0  ;;  %v1501_v3 = vadd.f32 %v1500_v2, %v1499_v1  ;;  %v1502_v4 = vpop.f32.mrb[14].mxu0  ;;  %v1575_v5 = vpop.f32.mrb[12].mxu1  ;;  %v1004_v1 = vld [vmem:[#allocation2] sm:$0xff] (!%p1378_p11)  ;;  %v1005_v2 = vld [vmem:[#allocation2 + $0x8] sm:$0xff] (!%p1378_p11) }
 0x149   : > { %v1503_v7 = vpop.f32.mrb[15].mxu0  ;;  %v953_v8 = vpop.f32.mrb[13].mxu1 }
 0x14a   : > { %v930_v9 = vadd.f32 %v1567_v37, %v1501_v3  ;;  %v1504_v10 = vadd.f32 %v1503_v7, %v1502_v4  ;;  %v1576_v11 = vpop.f32.mrb[14].mxu1  ;;  %v417_v37 = vld [vmem:[#allocation2 + $0x58] sm:$0xff]  ;;  %v1917_v3 = vld [vmem:[%s1997_s2] ss:$0 sm:$0xff] (!%p1378_p11)  ;;  %v1006_v7 = vld [vmem:[#allocation2 + $0x10] sm:$0xff] (!%p1378_p11) }
 0x14b   : > { %v956_v13 = vpop.f32.mrb[15].mxu1  ;;  %v1027_v4 = vmul.f32 (!%p1378_p11), %v1917_v3, %v1004_v1 }
 0x14c   : > { %v974_v14 = vadd.f32 %v930_v9, %v412_v6  ;;  %v933_v15 = vadd.f32 %v1568_v43, %v1504_v10  ;;  %v1924_v6 = vld [vmem:[%s1998_s3] ss:$0 sm:$0xff] (!%p1378_p11)  ;;  %v1029_v9 = vmul.f32 (!%p1378_p11), %v1917_v3, %v1006_v7 }
 0x14e   : > { %990 = vst [vmem:[#allocation2 + $0x30] sm:$0xff] %v974_v14  ;;  %v975_v16 = vadd.f32 %v933_v15, %v413_v12  ;;  %v1505_v17 = vpop.f32.mrb[16].mxu0  ;;  %v1050_v14 = vadd.f32 (!%p1378_p11), %v1924_v6, %v1027_v4 }
 0x14f   : > { %v1506_v18 = vpop.f32.mrb[17].mxu0  ;;  %v1009_v12 = vld [vmem:[#allocation2 + $0x28] sm:$0xff] (!%p1378_p11) }
 0x150   : > { %991 = vst [vmem:[#allocation2 + $0x38] sm:$0xff] %v975_v16  ;;  %v1507_v19 = vadd.f32 %v1506_v18, %v1505_v17  ;;  %v1508_v20 = vpop.f32.mrb[18].mxu0  ;;  %v1032_v17 = vmul.f32 (!%p1378_p11), %v1917_v3, %v1009_v12 }
 0x151   : > { %v1509_v21 = vpop.f32.mrb[19].mxu0 }
 0x152   : > { %v1510_v23 = vadd.f32 %v1509_v21, %v1508_v20  ;;  %v938_v24 = vadd.f32 %v1507_v19, %v937_v56  ;;  %v1052_v19 = vadd.f32 (!%p1378_p11), %v1924_v6, %v1029_v9 }
 0x154   : > { %v976_v26 = vadd.f32 %v938_v24, %v414_v22  ;;  %v941_v27 = vadd.f32 %v1510_v23, %v940_v61  ;;  %v421_v61 = vld [vmem:[#allocation2 + $0x78] sm:$0xff]  ;;  %v1066_v24 = vmax.f32 (!%p1378_p11), %v1050_v14, 0.0 }
 0x156   : > { %992 = vst [vmem:[#allocation2 + $0x40] sm:$0xff] %v976_v26  ;;  %v977_v28 = vadd.f32 %v941_v27, %v415_v25  ;;  %v1511_v29 = vpop.f32.mrb[20].mxu0  ;;  %v1055_v27 = vadd.f32 (!%p1378_p11), %v1924_v6, %v1032_v17 }
 0x157   : > { %v1512_v30 = vpop.f32.mrb[21].mxu0  ;;  %v1011_v18 = vld [vmem:[#allocation2 + $0x38] sm:$0xff] (!%p1378_p11) }
 0x158   : > { %993 = vst [vmem:[#allocation2 + $0x48] sm:$0xff] %v977_v28  ;;  %v1513_v31 = vadd.f32 %v1512_v30, %v1511_v29  ;;  %v1514_v32 = vpop.f32.mrb[22].mxu0  ;;  %v1034_v22 = vmul.f32 (!%p1378_p11), %v1917_v3, %v1011_v18  ;;  %v1068_v29 = vmax.f32 (!%p1378_p11), %v1052_v19, 0.0 }
 0x159   : > { %v1515_v34 = vpop.f32.mrb[23].mxu0 }
 0x15a   : > { %v946_v35 = vadd.f32 %v1571_v53, %v1513_v31  ;;  %v1516_v36 = vadd.f32 %v1515_v34, %v1514_v32  ;;  %v1057_v32 = vadd.f32 (!%p1378_p11), %v1924_v6, %v1034_v22 }
 0x15c   : > { %v978_v38 = vadd.f32 %v946_v35, %v416_v33  ;;  %v949_v39 = vadd.f32 %v1572_v59, %v1516_v36 }
 0x15d   : > { %v1012_v23 = vld [vmem:[#allocation2 + $0x40] sm:$0xff] (!%p1378_p11) }
 0x15e   : > { %994 = vst [vmem:[#allocation2 + $0x50] sm:$0xff] %v978_v38  ;;  %v979_v40 = vadd.f32 %v949_v39, %v417_v37  ;;  %v1517_v41 = vpop.f32.mrb[24].mxu0  ;;  %v1071_v37 = vmax.f32 (!%p1378_p11), %v1055_v27, 0.0  ;;  %v1035_v38 = vmul.f32 (!%p1378_p11), %v1917_v3, %v1012_v23 }
 0x15f   : > { %v1518_v42 = vpop.f32.mrb[25].mxu0  ;;  %v1013_v28 = vld [vmem:[#allocation2 + $0x48] sm:$0xff] (!%p1378_p11) }
 0x160   : > { %995 = vst [vmem:[#allocation2 + $0x58] sm:$0xff] %v979_v40  ;;  %v1519_v43 = vadd.f32 %v1518_v42, %v1517_v41  ;;  %v1520_v44 = vpop.f32.mrb[26].mxu0 }
 0x161   : > { %v1521_v45 = vpop.f32.mrb[27].mxu0 }
 0x162   : > { %v1522_v47 = vadd.f32 %v1521_v45, %v1520_v44  ;;  %v954_v48 = vadd.f32 %v1519_v43, %v953_v8  ;;  %v1007_v8 = vld [vmem:[#allocation2 + $0x18] sm:$0xff] (!%p1378_p11)  ;;  %v1073_v43 = vmax.f32 (!%p1378_p11), %v1057_v32, 0.0  ;;  %v1036_v44 = vmul.f32 (!%p1378_p11), %v1917_v3, %v1013_v28 }
 0x163   : > { %v1030_v10 = vmul.f32 (!%p1378_p11), %v1917_v3, %v1007_v8 }
 0x164   : > { %v980_v50 = vadd.f32 %v954_v48, %v418_v46  ;;  %v957_v51 = vadd.f32 %v1522_v47, %v956_v13  ;;  %v1010_v13 = vld [vmem:[#allocation2 + $0x30] sm:$0xff] (!%p1378_p11)  ;;  %v1058_v47 = vadd.f32 (!%p1378_p11), %v1924_v6, %v1035_v38 }
 0x165   : > { %v1053_v20 = vadd.f32 (!%p1378_p11), %v1924_v6, %v1030_v10  ;;  %v1033_v21 = vmul.f32 (!%p1378_p11), %v1917_v3, %v1010_v13  ;;  %v1014_v33 = vld [vmem:[#allocation2 + $0x50] sm:$0xff] (!%p1378_p11) }
 0x166   : > { %996 = vst [vmem:[#allocation2 + $0x60] sm:$0xff] %v980_v50  ;;  %v981_v52 = vadd.f32 %v957_v51, %v419_v49  ;;  %v1523_v53 = vpop.f32.mrb[28].mxu0  ;;  %v1037_v48 = vmul.f32 (!%p1378_p11), %v1917_v3, %v1014_v33 }
 0x167   : > { %v1524_v54 = vpop.f32.mrb[29].mxu0  ;;  %v1069_v30 = vmax.f32 (!%p1378_p11), %v1053_v20, 0.0  ;;  %v1056_v31 = vadd.f32 (!%p1378_p11), %v1924_v6, %v1033_v21  ;;  %v1015_v34 = vld [vmem:[#allocation2 + $0x58] sm:$0xff] (!%p1378_p11) }
 0x168   : > { %997 = vst [vmem:[#allocation2 + $0x68] sm:$0xff] %v981_v52  ;;  %v1525_v55 = vadd.f32 %v1524_v54, %v1523_v53  ;;  %v1526_v56 = vpop.f32.mrb[30].mxu0  ;;  %v1038_v49 = vmul.f32 (!%p1378_p11), %v1917_v3, %v1015_v34  ;;  %v1059_v52 = vadd.f32 (!%p1378_p11), %v1924_v6, %v1036_v44 }
 0x169   : > { %v1527_v58 = vpop.f32.mrb[31].mxu0  ;;  %v1426_v41 = vpack.c.bf16 (!%p1378_p11), %v1069_v30, %v1068_v29  ;;  %v1072_v42 = vmax.f32 (!%p1378_p11), %v1056_v31, 0.0 }
 0x16a   : > { %v962_v59 = vadd.f32 %v1575_v5, %v1525_v55  ;;  %v1528_v60 = vadd.f32 %v1527_v58, %v1526_v56  ;;  %1003 = sbr.rel (%p1378_p11) target bundleno = 385 (0x181), region = 70  ;;  %v1028_v5 = vmul.f32 (!%p1378_p11), %v1917_v3, %v1005_v2  ;;  %v1074_v55 = vmax.f32 (!%p1378_p11), %v1058_v47, 0.0 }
 0x16b   : > { %1458 = vst [vmem:[%s1999_s4 + $0x8] sm:$0xff] (!%p1378_p11), %v1426_v41   ;;  %v1436_v51 = vpack.c.bf16 (!%p1378_p11), %v1073_v43, %v1072_v42  ;;  %v1060_v56 = vadd.f32 (!%p1378_p11), %v1924_v6, %v1037_v48 }
 0x16c   : > { %v982_v62 = vadd.f32 %v962_v59, %v420_v57  ;;  %v965_v63 = vadd.f32 %v1576_v11, %v1528_v60  ;;  %v1008_v11 = vld [vmem:[#allocation2 + $0x20] sm:$0xff] (!%p1378_p11)  ;;  %v1051_v15 = vadd.f32 (!%p1378_p11), %v1924_v6, %v1028_v5  ;;  %v1061_v57 = vadd.f32 (!%p1378_p11), %v1924_v6, %v1038_v49 }
 0x16d   : > { %v1031_v16 = vmul.f32 (!%p1378_p11), %v1917_v3, %v1008_v11  ;;  %v1016_v39 = vld [vmem:[#allocation2 + $0x60] sm:$0xff] (!%p1378_p11)  ;;  %1460 = vst [vmem:[%s1999_s4 + $0x18] sm:$0xff] (!%p1378_p11), %v1436_v51   ;;  %v1075_v59 = vmax.f32 (!%p1378_p11), %v1059_v52, 0.0 }
 0x16e   : > { %998 = vst [vmem:[#allocation2 + $0x70] sm:$0xff] %v982_v62  ;;  %v983_v0 = vadd.f32 %v965_v63, %v421_v61  ;;  %v1067_v25 = vmax.f32 (!%p1378_p11), %v1051_v15, 0.0  ;;  %v1039_v53 = vmul.f32 (!%p1378_p11), %v1917_v3, %v1016_v39  ;;  %v1076_v63 = vmax.f32 (!%p1378_p11), %v1060_v56, 0.0 }
 0x16f   : > { %v1054_v26 = vadd.f32 (!%p1378_p11), %v1924_v6, %v1031_v16  ;;  %v1017_v40 = vld [vmem:[#allocation2 + $0x68] sm:$0xff] (!%p1378_p11)  ;;  %v1441_v2 = vpack.c.bf16 (!%p1378_p11), %v1075_v59, %v1074_v55 }
 0x170   : > { %999 = vst [vmem:[#allocation2 + $0x78] sm:$0xff] %v983_v0  ;;  %v1421_v35 = vpack.c.bf16 (!%p1378_p11), %v1067_v25, %v1066_v24  ;;  %v1040_v54 = vmul.f32 (!%p1378_p11), %v1917_v3, %v1017_v40  ;;  %v1062_v60 = vadd.f32 (!%p1378_p11), %v1924_v6, %v1039_v53  ;;  %v1077_v0 = vmax.f32 (!%p1378_p11), %v1061_v57, 0.0 }
 0x171   : > { %v1070_v36 = vmax.f32 %v1054_v26, 0.0  ;;  %1461 = vst [vmem:[%s1999_s4 + $0x20] sm:$0xff] %v1441_v2  }
 0x172   : > { %1422 = vst [vmem:[%s1999_s4] sm:$0xff] %v1421_v35   ;;  %v1063_v61 = vadd.f32 %v1924_v6, %v1040_v54  ;;  %v1078_v4 = vmax.f32 %v1062_v60, 0.0  ;;  %v1446_v8 = vpack.c.bf16 %v1077_v0, %v1076_v63 }
 0x173   : > { %v1431_v46 = vpack.c.bf16 %v1071_v37, %v1070_v36 }
 0x174   : > { %v1079_v5 = vmax.f32 %v1063_v61, 0.0  ;;  %1462 = vst [vmem:[%s1999_s4 + $0x28] sm:$0xff] %v1446_v8  }
 0x175   : > { %v1018_v45 = vld [vmem:[#allocation2 + $0x70] sm:$0xff]  ;;  %1459 = vst [vmem:[%s1999_s4 + $0x10] sm:$0xff] %v1431_v46  }
 0x176   : > { %v1041_v58 = vmul.f32 %v1917_v3, %v1018_v45  ;;  %v1451_v10 = vpack.c.bf16 %v1079_v5, %v1078_v4 }
 0x177   : > { %v1019_v50 = vld [vmem:[#allocation2 + $0x78] sm:$0xff] }
 0x178   : > { %v1042_v62 = vmul.f32 %v1917_v3, %v1019_v50  ;;  %v1064_v1 = vadd.f32 %v1924_v6, %v1041_v58  ;;  %1463 = vst [vmem:[%s1999_s4 + $0x30] sm:$0xff] %v1451_v10  }
 0x17a   : > { %v1065_v7 = vadd.f32 %v1924_v6, %v1042_v62  ;;  %v1080_v9 = vmax.f32 %v1064_v1, 0.0 }
 0x17c   : > { %v1081_v11 = vmax.f32 %v1065_v7, 0.0 }
 0x17e   : > { %v1456_v3 = vpack.c.bf16 %v1081_v11, %v1080_v9 }
 0x180   : > { %1464 = vst [vmem:[%s1999_s4 + $0x38] sm:$0xff] %v1456_v3  }
 0x181 PF: > { %s14_s19 = sadd.s32 1, %s1714_s19   ;;  %s2000_s15 = smov %s1702_s16 }
 0x182   : > { %p11_p12 = scmp.ge.s32.totalorder %s14_s19, 5   ;;  %s2001_s16 = smov %s1777_s23 }
 0x183   : > { %s2002_s17 = smov %s1710_s18  ;;  %s2003_s18 = smov %s2005_s20 }
 0x184   :  { %13 = sbr.rel (!%p11_p12) target bundleno = 3 (0x3), region = 120 }

// kernel: _lambda_.23
= control target key start
LH: loop header
LB: loop body
LE: loop exit
PB: predicated region body
PF: predicated region fallthrough
CT: control target
= control target key end

     0   :  { %s1913_s18 = smov 0   ;;  %s1915_s19 = smov 0   ;;  %s2190_s0 = inlined_call_operand.vmem [shape: bf16[128,1152], index: 0, kind: input, shape index: {}]   ;;  %s2191_s1 = inlined_call_operand.vmem [shape: bf16[1152,128], index: 1, kind: input, shape index: {}]   ;;  %s2192_s2 = inlined_call_operand.vmem [shape: f32[1,128], index: 2, kind: input, shape index: {}]   ;;  %s2193_s3 = inlined_call_operand.vmem [shape: f32[1,128], index: 3, kind: input, shape index: {}]   ;;  %s2194_s4 = inlined_call_operand.vmem [shape: bf16[128,128], index: 4, kind: input, shape index: {}]   ;;  %s2195_s5 = inlined_call_operand.vmem [shape: bf16[128,128], index: 5, kind: output, shape index: {}]  }
   0x1   :  { %s1917_s20 = smov 0   ;;  %s1919_s21 = smov 0  }
   0x2   :  { %s1921_s22 = smov 0  }
   0x3 LB: > { %s27_s23 = sadd.s32 1, %s1876_s21  ;;  %p50_p1 = scmp.ne.s32.totalorder %s1868_s19, %s1864_s18  ;;  %s1880_s22 = sphi %s1921_s22, %s15_s22   ;;  %s1876_s21 = sphi %s1919_s21, %s2199_s21   ;;  %s1872_s20 = sphi %s1917_s20, %s2198_s20   ;;  %s1868_s19 = sphi %s1915_s19, %s2197_s19   ;;  %s1864_s18 = sphi %s1913_s18, %s2196_s18  }
   0x4   : > { %p28_p0 = scmp.ge.s32.totalorder %s27_s23, 3  ;;  %p51_p2 = scmp.eq.s32.totalorder %s1880_s22, 0 }
   0x5   : > { %s43_s25 = sadd.s32 1, %s1868_s19  ;;  %p1420_p5 = scmp.ge.s32.totalorder %s1880_s22, 3 }
   0x6   : > { %s2201_s23 = smov (%p28_p0, %s27_s23), 0  ;;  %p52_p3 = por %p51_p2, %p50_p1 }
   0x7   : > { %s39_s24 = ssub.s32 %s1876_s21, %s2201_s23  ;;  %236 = sbr.rel (%p1420_p5) target bundleno = 37 (0x25), region = 28 }
   0x8   : > { %p41_p4 = scmp.eq.s32.totalorder %s39_s24, 0 }
   0xa   : > { %s1948_s26 = scalar_select %p41_p4, %s1868_s19, %s43_s25  }
   0xe   : > { %239 = sbr.rel (!%p52_p3) target bundleno = 37 (0x25), region = 32  ;;  %s241_s27 = sand.u32 (%p52_p3), 1, %s1868_s19  }
   0xf   : > { %s1528_s28 = smul.u32 (%p52_p3), 12, %s1876_s21 }
  0x10   : > { %s1743_s29 = smul.u32 (%p52_p3), 192, %s241_s27 }
  0x11   : > { %s1956_s7 = scalar_lea.vmem (%p52_p3), %s2190_s0, %s1528_s28 }
  0x12   : > { %v264_v0 = vld [vmem:[%s1956_s7] sm:$0xff] (%p52_p3)  ;;  %v268_v2 = vld [vmem:[%s1956_s7 + $0x48] sm:$0xff] (%p52_p3)  ;;  %s1961_s8 = scalar_lea.vmem (%p52_p3), [#allocation3], %s1743_s29  ;;  %v272_v4 = vld [vmem:[%s1956_s7 + $0x90] sm:$0xff] (%p52_p3) }
  0x13   : > { %v266_v1 = vld [vmem:[%s1956_s7 + $0x24] sm:$0xff] (%p52_p3)  ;;  %265 = vst [vmem:[%s1961_s8] sm:$0xff] (%p52_p3), %v264_v0  ;;  %269 = vst [vmem:[%s1961_s8 + $0x18] sm:$0xff] (%p52_p3), %v268_v2  ;;  %v270_v3 = vld [vmem:[%s1956_s7 + $0x6c] sm:$0xff] (%p52_p3) }
  0x14   : > { %267 = vst [vmem:[%s1961_s8 + $0xc] sm:$0xff] (%p52_p3), %v266_v1  ;;  %v274_v5 = vld [vmem:[%s1956_s7 + $0xb4] sm:$0xff] (%p52_p3)  ;;  %271 = vst [vmem:[%s1961_s8 + $0x24] sm:$0xff] (%p52_p3), %v270_v3  ;;  %v278_v7 = vld [vmem:[%s1956_s7 + $0xfc] sm:$0xff] (%p52_p3) }
  0x15   : > { %273 = vst [vmem:[%s1961_s8 + $0x30] sm:$0xff] %v272_v4  ;;  %275 = vst [vmem:[%s1961_s8 + $0x3c] sm:$0xff] %v274_v5  ;;  %v276_v6 = vld [vmem:[%s1956_s7 + $0xd8] sm:$0xff]  ;;  %v280_v8 = vld [vmem:[%s1956_s7 + $0x120] sm:$0xff] }
  0x16   : > { %277 = vst [vmem:[%s1961_s8 + $0x48] sm:$0xff] %v276_v6  ;;  %279 = vst [vmem:[%s1961_s8 + $0x54] sm:$0xff] %v278_v7  ;;  %v282_v9 = vld [vmem:[%s1956_s7 + $0x144] sm:$0xff]  ;;  %v286_v11 = vld [vmem:[%s1956_s7 + $0x18c] sm:$0xff] }
  0x17   : > { %281 = vst [vmem:[%s1961_s8 + $0x60] sm:$0xff] %v280_v8  ;;  %v284_v10 = vld [vmem:[%s1956_s7 + $0x168] sm:$0xff]  ;;  %283 = vst [vmem:[%s1961_s8 + $0x6c] sm:$0xff] %v282_v9  ;;  %v288_v12 = vld [vmem:[%s1956_s7 + $0x1b0] sm:$0xff] }
  0x18   : > { %285 = vst [vmem:[%s1961_s8 + $0x78] sm:$0xff] %v284_v10  ;;  %287 = vst [vmem:[%s1961_s8 + $0x84] sm:$0xff] %v286_v11  ;;  %v290_v13 = vld [vmem:[%s1956_s7 + $0x1d4] sm:$0xff]  ;;  %v294_v15 = vld [vmem:[%s1956_s7 + $0x21c] sm:$0xff] }
  0x19   : > { %v292_v14 = vld [vmem:[%s1956_s7 + $0x1f8] sm:$0xff]  ;;  %289 = vst [vmem:[%s1961_s8 + $0x90] sm:$0xff] %v288_v12  ;;  %291 = vst [vmem:[%s1961_s8 + $0x9c] sm:$0xff] %v290_v13  ;;  %v1422_v16 = vld [vmem:[%s1956_s7 + $0x8] sm:$0xf] }
  0x1a   : > { %293 = vst [vmem:[%s1961_s8 + $0xa8] sm:$0xff] %v292_v14  ;;  %v1424_v17 = vld [vmem:[%s1956_s7 + $0x2c] sm:$0xf]  ;;  %295 = vst [vmem:[%s1961_s8 + $0xb4] sm:$0xff] %v294_v15  ;;  %v1426_v18 = vld [vmem:[%s1956_s7 + $0x50] sm:$0xf] }
  0x1b   : > { %1423 = vst [vmem:[%s1961_s8 + $0x8] sm:$0xf] %v1422_v16  ;;  %1425 = vst [vmem:[%s1961_s8 + $0x14] sm:$0xf] %v1424_v17  ;;  %v1428_v19 = vld [vmem:[%s1956_s7 + $0x74] sm:$0xf] }
  0x1c   : > { %v1430_v20 = vld [vmem:[%s1956_s7 + $0x98] sm:$0xf]  ;;  %1427 = vst [vmem:[%s1961_s8 + $0x20] sm:$0xf] %v1426_v18  ;;  %1429 = vst [vmem:[%s1961_s8 + $0x2c] sm:$0xf] %v1428_v19 }
  0x1d   : > { %1431 = vst [vmem:[%s1961_s8 + $0x38] sm:$0xf] %v1430_v20  ;;  %v1432_v21 = vld [vmem:[%s1956_s7 + $0xbc] sm:$0xf]  ;;  %v1434_v22 = vld [vmem:[%s1956_s7 + $0xe0] sm:$0xf] }
  0x1e   : > { %v1436_v23 = vld [vmem:[%s1956_s7 + $0x104] sm:$0xf]  ;;  %1433 = vst [vmem:[%s1961_s8 + $0x44] sm:$0xf] %v1432_v21  ;;  %1435 = vst [vmem:[%s1961_s8 + $0x50] sm:$0xf] %v1434_v22 }
  0x1f   : > { %1437 = vst [vmem:[%s1961_s8 + $0x5c] sm:$0xf] %v1436_v23  ;;  %v1438_v24 = vld [vmem:[%s1956_s7 + $0x128] sm:$0xf]  ;;  %v1440_v25 = vld [vmem:[%s1956_s7 + $0x14c] sm:$0xf] }
  0x20   : > { %v1442_v26 = vld [vmem:[%s1956_s7 + $0x170] sm:$0xf]  ;;  %1439 = vst [vmem:[%s1961_s8 + $0x68] sm:$0xf] %v1438_v24  ;;  %1441 = vst [vmem:[%s1961_s8 + $0x74] sm:$0xf] %v1440_v25 }
  0x21   : > { %1443 = vst [vmem:[%s1961_s8 + $0x80] sm:$0xf] %v1442_v26  ;;  %v1444_v27 = vld [vmem:[%s1956_s7 + $0x194] sm:$0xf]  ;;  %v1446_v28 = vld [vmem:[%s1956_s7 + $0x1b8] sm:$0xf] }
  0x22   : > { %v1448_v29 = vld [vmem:[%s1956_s7 + $0x1dc] sm:$0xf]  ;;  %1445 = vst [vmem:[%s1961_s8 + $0x8c] sm:$0xf] %v1444_v27  ;;  %1447 = vst [vmem:[%s1961_s8 + $0x98] sm:$0xf] %v1446_v28 }
  0x23   : > { %1449 = vst [vmem:[%s1961_s8 + $0xa4] sm:$0xf] %v1448_v29  ;;  %v1450_v30 = vld [vmem:[%s1956_s7 + $0x200] sm:$0xf]  ;;  %v1452_v31 = vld [vmem:[%s1956_s7 + $0x224] sm:$0xf] }
  0x24   : > { %1451 = vst [vmem:[%s1961_s8 + $0xb0] sm:$0xf] %v1450_v30  ;;  %1453 = vst [vmem:[%s1961_s8 + $0xbc] sm:$0xf] %v1452_v31 }
  0x25 PF: > { %p1454_p6 = scmp.ge.s32.totalorder %s1880_s22, 1  ;;  %p351_p7 = scmp.lt.s32.totalorder %s1880_s22, 4 }
  0x27   : > { %p352_p8 = pnand %p1454_p6, %p351_p7 }
  0x28   : > { %s358_s9 = sand.u32 (!%p352_p8), 1, %s1864_s18   ;;  %s412_s10 = smul.u32 (!%p352_p8), 48, %s1872_s20 }
  0x29   : > { %355 = sbr.rel (%p352_p8) target bundleno = 387 (0x183), region = 62  ;;  %p1456_p10 = scmp.ne.s32.totalorder (!%p352_p8), %s1872_s20, 0 }
  0x2a   : > { %s1744_s11 = smul.u32 (!%p352_p8), 192, %s358_s9  ;;  %p413_p9 = scmp.lt.s32.totalorder (!%p352_p8), %s412_s10, 143 }
  0x2c   : > { %s2033_s16 = scalar_lea.vmem (!%p352_p8), [#allocation3], %s1744_s11 }
  0x30   : > { %s2203_s10 = smov (!%p413_p9, %s412_s10), 143  ;;  %449 = sbr.rel (%p1456_p10) target bundleno = 58 (0x3a), region = 70 }
  0x31   : > { %s1455_s12 = sshll.u32 %s2203_s10, 2  ;;  %v1882_v32 = vmov (!%p1456_p10), 0.0  }
  0x32   : > { %s2031_s15 = scalar_lea.vmem %s2191_s1, %s1455_s12  ;;  %450 = vst [vmem:[#allocation2] sm:$0xff] (!%p1456_p10), %v1882_v32  ;;  %451 = vst [vmem:[#allocation2 + $0x8] sm:$0xff] (!%p1456_p10), %v1882_v32 }
  0x33   : > { %452 = vst [vmem:[#allocation2 + $0x10] sm:$0xff] (!%p1456_p10), %v1882_v32  ;;  %453 = vst [vmem:[#allocation2 + $0x18] sm:$0xff] (!%p1456_p10), %v1882_v32 }
  0x34   : > { %454 = vst [vmem:[#allocation2 + $0x20] sm:$0xff] (!%p1456_p10), %v1882_v32  ;;  %455 = vst [vmem:[#allocation2 + $0x28] sm:$0xff] (!%p1456_p10), %v1882_v32 }
  0x35   : > { %456 = vst [vmem:[#allocation2 + $0x30] sm:$0xff] (!%p1456_p10), %v1882_v32  ;;  %457 = vst [vmem:[#allocation2 + $0x38] sm:$0xff] (!%p1456_p10), %v1882_v32 }
  0x36   : > { %458 = vst [vmem:[#allocation2 + $0x40] sm:$0xff] (!%p1456_p10), %v1882_v32  ;;  %459 = vst [vmem:[#allocation2 + $0x48] sm:$0xff] (!%p1456_p10), %v1882_v32 }
  0x37   : > { %460 = vst [vmem:[#allocation2 + $0x50] sm:$0xff] %v1882_v32  ;;  %461 = vst [vmem:[#allocation2 + $0x58] sm:$0xff] %v1882_v32 }
  0x38   : > { %462 = vst [vmem:[#allocation2 + $0x60] sm:$0xff] %v1882_v32  ;;  %463 = vst [vmem:[#allocation2 + $0x68] sm:$0xff] %v1882_v32 }
  0x39   : > { %464 = vst [vmem:[#allocation2 + $0x70] sm:$0xff] %v1882_v32  ;;  %465 = vst [vmem:[#allocation2 + $0x78] sm:$0xff] %v1882_v32 }
  0x3a PF: > { %v1786_v33 = vld [vmem:[%s2031_s15 + $0x40] sm:$0xff]   ;;  %v1789_v36 = vld [vmem:[%s2031_s15 + $0x48] sm:$0xff]   ;;  %v1792_v39 = vld [vmem:[%s2031_s15 + $0x50] sm:$0xff]   ;;  %p1505_p11 = scmp.ne.s32.totalorder %s1872_s20, 2 }
  0x3b   : > { %v1787_v34 = vld [vmem:[%s2031_s15] sm:$0xff]   ;;  %1631 = vmatprep.subr.bf16.mxu0 %v1786_v33  ;;  %v1790_v37 = vld [vmem:[%s2031_s15 + $0x8] sm:$0xff]   ;;  %v1793_v40 = vld [vmem:[%s2031_s15 + $0x10] sm:$0xff]  }
  0x3c   : > { %v1788_v35 = vld [vmem:[%s2031_s15 + $0x80] sm:$0xff]   ;;  %1632 = vmatpush3.bf16.msra.mxu0 %v1787_v34  ;;  %v1791_v38 = vld [vmem:[%s2031_s15 + $0x88] sm:$0xff]   ;;  %v1794_v41 = vld [vmem:[%s2031_s15 + $0x90] sm:$0xff]  }
  0x3d   : > { %1711 = vmatprep.subr.bf16.mxu1 %v1788_v35  ;;  %1633 = vmatprep.subr.bf16.mxu0 %v1789_v36  ;;  %v1795_v42 = vld [vmem:[%s2031_s15 + $0x58] sm:$0xff]   ;;  %v1798_v45 = vld [vmem:[%s2031_s15 + $0x60] sm:$0xff]   ;;  %v1801_v48 = vld [vmem:[%s2031_s15 + $0x68] sm:$0xff]  }
  0x3e   : > { %1712 = vmatpush3.bf16.msra.mxu1 %v1788_v35  ;;  %v1796_v43 = vld [vmem:[%s2031_s15 + $0x18] sm:$0xff]   ;;  %v1800_v46 = vld [vmem:[%s2031_s15 + $0xa0] sm:$0xff]   ;;  %v1803_v49 = vld [vmem:[%s2031_s15 + $0xa8] sm:$0xff]  }
  0x3f   : > { %1713 = vmatprep.subr.bf16.mxu1 %v1791_v38  ;;  %v1797_v44 = vld [vmem:[%s2031_s15 + $0x98] sm:$0xff]   ;;  %v1799_v47 = vld [vmem:[%s2031_s15 + $0x20] sm:$0xff]   ;;  %v1802_v50 = vld [vmem:[%s2031_s15 + $0x28] sm:$0xff]  }
  0x40   : > { %1634 = vmatpush3.bf16.msra.mxu0 %v1790_v37  ;;  %v1804_v51 = vld [vmem:[%s2031_s15 + $0x70] sm:$0xff]   ;;  %v1807_v54 = vld [vmem:[%s2031_s15 + $0x78] sm:$0xff]   ;;  %v1810_v59 = vld [vmem:[%s2033_s16] ss:$12 sps:$4 sm:$0xff]  }
  0x41   : > { %1635 = vmatprep.subr.bf16.mxu0 %v1792_v39  ;;  %v1805_v52 = vld [vmem:[%s2031_s15 + $0x30] sm:$0xff]   ;;  %v1809_v55 = vld [vmem:[%s2031_s15 + $0xb8] sm:$0xff]   ;;  %v1814_v61 = vld [vmem:[%s2033_s16 + $0x20] ss:$12 sps:$4 sm:$0xff]  }
  0x42   : > { %1714 = vmatpush3.bf16.msra.mxu1 %v1791_v38  ;;  %v1806_v53 = vld [vmem:[%s2031_s15 + $0xb0] sm:$0xff]   ;;  %v1808_v58 = vld [vmem:[%s2031_s15 + $0x38] sm:$0xff]   ;;  %v1830_v5 = vld [vmem:[%s2033_s16 + $0x80] ss:$12 sps:$4 sm:$0xff]  }
  0x43   : > { %1715 = vmatprep.subr.bf16.mxu1 %v1794_v41  ;;  %v1812_v56 = vld [vmem:[%s2033_s16 + $0x4] ss:$12 sps:$4 sm:$0xff]   ;;  %v1813_v57 = vld [vmem:[%s2033_s16 + $0x8] ss:$12 sps:$4 sm:$0xff]   ;;  %v1823_v4 = vld [vmem:[%s2033_s16 + $0x4c] ss:$12 sps:$4 sm:$0xff]  }
  0x44   : > { %1636 = vmatpush3.bf16.msra.mxu0 %v1793_v40  ;;  %866 = vmatprep.mubr.bf16.mxu0 %v1812_v56  ;;  %v1815_v60 = vld [vmem:[%s2033_s16 + $0x1c] ss:$12 sps:$4 sm:$0xff]   ;;  %v1821_v62 = vld [vmem:[%s2033_s16 + $0x38] ss:$12 sps:$4 sm:$0xff]   ;;  %v1818_v0 = vld [vmem:[%s2033_s16 + $0x34] ss:$12 sps:$4 sm:$0xff]  }
  0x45   : > { %1637 = vmatprep.subr.bf16.mxu0 %v1795_v42  ;;  %1727 = vmatprep.mubr.bf16.mxu1 %v1813_v57  ;;  %v1817_v63 = vld [vmem:[%s2033_s16 + $0x18] ss:$12 sps:$4 sm:$0xff]   ;;  %v1822_v1 = vld [vmem:[%s2033_s16 + $0x50] ss:$12 sps:$4 sm:$0xff]   ;;  %v1829_v2 = vld [vmem:[%s2033_s16 + $0x68] ss:$12 sps:$4 sm:$0xff]  }
  0x46   : > { %1716 = vmatpush3.bf16.msra.mxu1 %v1794_v41  ;;  %v1820_v3 = vld [vmem:[%s2033_s16 + $0x30] ss:$12 sps:$4 sm:$0xff]   ;;  %v1837_v6 = vld [vmem:[%s2033_s16 + $0x98] ss:$12 sps:$4 sm:$0xff]   ;;  %v1825_v7 = vld [vmem:[%s2033_s16 + $0x48] ss:$12 sps:$4 sm:$0xff]  }
  0x47   : > { %1717 = vmatprep.subr.bf16.mxu1 %v1797_v44  ;;  %v1826_v8 = vld [vmem:[%s2033_s16 + $0x64] ss:$12 sps:$4 sm:$0xff]   ;;  %v1828_v10 = vld [vmem:[%s2033_s16 + $0x60] ss:$12 sps:$4 sm:$0xff]   ;;  %v1831_v11 = vld [vmem:[%s2033_s16 + $0x7c] ss:$12 sps:$4 sm:$0xff]  }
  0x48   : > { %1638 = vmatpush3.bf16.msra.mxu0 %v1796_v43  ;;  %v1838_v9 = vld [vmem:[%s2033_s16 + $0xb0] ss:$12 sps:$4 sm:$0xff]   ;;  %v1833_v12 = vld [vmem:[%s2033_s16 + $0x78] ss:$12 sps:$4 sm:$0xff]   ;;  %v1834_v13 = vld [vmem:[%s2033_s16 + $0x94] ss:$12 sps:$4 sm:$0xff]  }
  0x49   : > { %1639 = vmatprep.subr.bf16.mxu0 %v1798_v45  ;;  %v1836_v14 = vld [vmem:[%s2033_s16 + $0x90] ss:$12 sps:$4 sm:$0xff]   ;;  %v1839_v15 = vld [vmem:[%s2033_s16 + $0xac] ss:$12 sps:$4 sm:$0xff]   ;;  %v1841_v16 = vld [vmem:[%s2033_s16 + $0xa8] ss:$12 sps:$4 sm:$0xff]  }
  0x4a   : > { %1718 = vmatpush3.bf16.msra.mxu1 %v1797_v44  ;;  %v466_v23 = vld [vmem:[#allocation2] sm:$0xff]  ;;  %v467_v28 = vld [vmem:[#allocation2 + $0x8] sm:$0xff]  ;;  %v468_v38 = vld [vmem:[#allocation2 + $0x10] sm:$0xff] }
  0x4b   : > { %1719 = vmatprep.subr.bf16.mxu1 %v1800_v46  ;;  %v469_v44 = vld [vmem:[#allocation2 + $0x18] sm:$0xff] }
  0x4c   : > { %1640 = vmatpush3.bf16.msra.mxu0 %v1799_v47 }
  0x4d   : > { %1641 = vmatprep.subr.bf16.mxu0 %v1801_v48 }
  0x4e   : > { %1720 = vmatpush3.bf16.msra.mxu1 %v1800_v46 }
  0x4f   : > { %1721 = vmatprep.subr.bf16.mxu1 %v1803_v49 }
  0x50   : > { %1642 = vmatpush3.bf16.msra.mxu0 %v1802_v50 }
  0x51   : > { %1643 = vmatprep.subr.bf16.mxu0 %v1804_v51 }
  0x52   : > { %1722 = vmatpush3.bf16.msra.mxu1 %v1803_v49 }
  0x53   : > { %1723 = vmatprep.subr.bf16.mxu1 %v1806_v53 }
  0x54   : > { %1644 = vmatpush3.bf16.msra.mxu0 %v1805_v52 }
  0x55   : > { %1645 = vmatprep.subr.bf16.mxu0 %v1807_v54 }
  0x56   : > { %1724 = vmatpush3.bf16.msra.mxu1 %v1806_v53 }
  0x57   : > { %1725 = vmatprep.subr.bf16.mxu1 %v1809_v55 }
  0x58   : > { %1646 = vmatpush3.bf16.msra.mxu0 %v1808_v58 }
  0x5a   : > { %1726 = vmatpush3.bf16.msra.mxu1 %v1809_v55  ;;  %v470_v55 = vld [vmem:[#allocation2 + $0x20] sm:$0xff] }
  0x5b   : > { %867 = vmatmul.mubr.bf16.vlgmr.msra.gmra.mrb[0].mxu0 %v1810_v59 }
  0x5c   : > { %874 = vmatprep.mubr.bf16.mxu0 %v1815_v60  ;;  %v471_v60 = vld [vmem:[#allocation2 + $0x28] sm:$0xff] }
  0x5d   : > { %1728 = vmatmul.mubr.bf16.vlgmr.msra.gmra.mrb[0].mxu1 %v1814_v61 }
  0x5e   : > { %1731 = vmatprep.mubr.bf16.mxu1 %v1821_v62 }
  0x63   : > { %875 = vmatmul.mubr.bf16.gmra.mrb[4].mxu0 %v1817_v63 }
  0x64   : > { %882 = vmatprep.mubr.bf16.mxu0 %v1818_v0 }
  0x65   : > { %1732 = vmatmul.mubr.bf16.gmra.mrb[4].mxu1 %v1822_v1 }
  0x66   : > { %1735 = vmatprep.mubr.bf16.mxu1 %v1829_v2 }
  0x6b   : > { %883 = vmatmul.mubr.bf16.gmra.mrb[8].mxu0 %v1820_v3 }
  0x6c   : > { %890 = vmatprep.mubr.bf16.mxu0 %v1823_v4 }
  0x6d   : > { %1736 = vmatmul.mubr.bf16.gmra.mrb[8].mxu1 %v1830_v5 }
  0x6e   : > { %1739 = vmatprep.mubr.bf16.mxu1 %v1837_v6  ;;  %v472_v6 = vld [vmem:[#allocation2 + $0x30] sm:$0xff] }
  0x73   : > { %891 = vmatmul.mubr.bf16.gmra.mrb[12].mxu0 %v1825_v7 }
  0x74   : > { %898 = vmatprep.mubr.bf16.mxu0 %v1826_v8 }
  0x75   : > { %1740 = vmatmul.mubr.bf16.gmra.mrb[12].mxu1 %v1838_v9 }
  0x7b   : > { %899 = vmatmul.mubr.bf16.gmra.mrb[16].mxu0 %v1828_v10 }
  0x7c   : > { %906 = vmatprep.mubr.bf16.mxu0 %v1831_v11 }
  0x83   : > { %907 = vmatmul.mubr.bf16.gmra.mrb[20].mxu0 %v1833_v12  ;;  %v473_v12 = vld [vmem:[#allocation2 + $0x38] sm:$0xff] }
  0x84   : > { %914 = vmatprep.mubr.bf16.mxu0 %v1834_v13 }
  0x8b   : > { %915 = vmatmul.mubr.bf16.gmra.mrb[24].mxu0 %v1836_v14 }
  0x8c   : > { %922 = vmatprep.mubr.bf16.mxu0 %v1839_v15 }
  0x93   : > { %923 = vmatmul.mubr.bf16.gmra.mrb[28].mxu0 %v1841_v16 }
 0x12e   : > { %v1647_v17 = vpop.f32.mrb[0].mxu0 }
 0x12f   : > { %v1648_v18 = vpop.f32.mrb[1].mxu0 }
 0x130   : > { %v1649_v19 = vadd.f32 %v1648_v18, %v1647_v17  ;;  %v1650_v20 = vpop.f32.mrb[2].mxu0  ;;  %v1729_v21 = vpop.f32.mrb[0].mxu1 }
 0x131   : > { %v1651_v22 = vpop.f32.mrb[3].mxu0  ;;  %v965_v24 = vpop.f32.mrb[1].mxu1 }
 0x132   : > { %v1652_v25 = vadd.f32 %v1651_v22, %v1650_v20  ;;  %v966_v26 = vadd.f32 %v1649_v19, %v965_v24  ;;  %v1730_v27 = vpop.f32.mrb[2].mxu1  ;;  %v474_v22 = vld [vmem:[#allocation2 + $0x40] sm:$0xff] }
 0x133   : > { %v968_v29 = vpop.f32.mrb[3].mxu1 }
 0x134   : > { %v1028_v30 = vadd.f32 %v966_v26, %v466_v23  ;;  %v969_v31 = vadd.f32 %v1652_v25, %v968_v29  ;;  %v475_v25 = vld [vmem:[#allocation2 + $0x48] sm:$0xff] }
 0x136   : > { %1044 = vst [vmem:[#allocation2] sm:$0xff] %v1028_v30  ;;  %v1029_v32 = vadd.f32 %v969_v31, %v467_v28  ;;  %v1653_v33 = vpop.f32.mrb[4].mxu0 }
 0x137   : > { %v1654_v34 = vpop.f32.mrb[5].mxu0 }
 0x138   : > { %1045 = vst [vmem:[#allocation2 + $0x8] sm:$0xff] %v1029_v32  ;;  %v1655_v35 = vadd.f32 %v1654_v34, %v1653_v33  ;;  %v1656_v36 = vpop.f32.mrb[6].mxu0  ;;  %v1733_v37 = vpop.f32.mrb[4].mxu1  ;;  %v476_v33 = vld [vmem:[#allocation2 + $0x50] sm:$0xff] }
 0x139   : > { %v1657_v39 = vpop.f32.mrb[7].mxu0  ;;  %v981_v40 = vpop.f32.mrb[5].mxu1 }
 0x13a   : > { %v974_v41 = vadd.f32 %v1729_v21, %v1655_v35  ;;  %v1658_v42 = vadd.f32 %v1657_v39, %v1656_v36  ;;  %v1734_v43 = vpop.f32.mrb[6].mxu1 }
 0x13b   : > { %v984_v45 = vpop.f32.mrb[7].mxu1 }
 0x13c   : > { %v1030_v46 = vadd.f32 %v974_v41, %v468_v38  ;;  %v977_v47 = vadd.f32 %v1730_v27, %v1658_v42 }
 0x13e   : > { %1046 = vst [vmem:[#allocation2 + $0x10] sm:$0xff] %v1030_v46  ;;  %v1031_v48 = vadd.f32 %v977_v47, %v469_v44  ;;  %v1659_v49 = vpop.f32.mrb[8].mxu0  ;;  %v478_v46 = vld [vmem:[#allocation2 + $0x60] sm:$0xff] }
 0x13f   : > { %v1660_v50 = vpop.f32.mrb[9].mxu0 }
 0x140   : > { %1047 = vst [vmem:[#allocation2 + $0x18] sm:$0xff] %v1031_v48  ;;  %v1661_v51 = vadd.f32 %v1660_v50, %v1659_v49  ;;  %v1662_v52 = vpop.f32.mrb[10].mxu0  ;;  %v1737_v53 = vpop.f32.mrb[8].mxu1  ;;  %v479_v49 = vld [vmem:[#allocation2 + $0x68] sm:$0xff] }
 0x141   : > { %v1663_v54 = vpop.f32.mrb[11].mxu0  ;;  %v997_v56 = vpop.f32.mrb[9].mxu1 }
 0x142   : > { %v1664_v57 = vadd.f32 %v1663_v54, %v1662_v52  ;;  %v982_v58 = vadd.f32 %v1661_v51, %v981_v40  ;;  %v1738_v59 = vpop.f32.mrb[10].mxu1 }
 0x143   : > { %v1000_v61 = vpop.f32.mrb[11].mxu1 }
 0x144   : > { %v1032_v62 = vadd.f32 %v982_v58, %v470_v55  ;;  %v985_v63 = vadd.f32 %v1664_v57, %v984_v45  ;;  %v480_v57 = vld [vmem:[#allocation2 + $0x70] sm:$0xff] }
 0x146   : > { %1048 = vst [vmem:[#allocation2 + $0x20] sm:$0xff] %v1032_v62  ;;  %v1033_v0 = vadd.f32 %v985_v63, %v471_v60  ;;  %v1665_v1 = vpop.f32.mrb[12].mxu0 }
 0x147   : > { %v1666_v2 = vpop.f32.mrb[13].mxu0 }
 0x148   : > { %1049 = vst [vmem:[#allocation2 + $0x28] sm:$0xff] %v1033_v0  ;;  %v1667_v3 = vadd.f32 %v1666_v2, %v1665_v1  ;;  %v1668_v4 = vpop.f32.mrb[14].mxu0  ;;  %v1741_v5 = vpop.f32.mrb[12].mxu1  ;;  %v1064_v1 = vld [vmem:[#allocation2] sm:$0xff] (!%p1505_p11)  ;;  %v1065_v2 = vld [vmem:[#allocation2 + $0x8] sm:$0xff] (!%p1505_p11) }
 0x149   : > { %v1669_v7 = vpop.f32.mrb[15].mxu0  ;;  %v1013_v8 = vpop.f32.mrb[13].mxu1 }
 0x14a   : > { %v990_v9 = vadd.f32 %v1733_v37, %v1667_v3  ;;  %v1670_v10 = vadd.f32 %v1669_v7, %v1668_v4  ;;  %v1742_v11 = vpop.f32.mrb[14].mxu1  ;;  %v477_v37 = vld [vmem:[#allocation2 + $0x58] sm:$0xff]  ;;  %v2088_v3 = vld [vmem:[%s2192_s2] ss:$0 sm:$0xff] (!%p1505_p11) }
 0x14b   : > { %v1016_v13 = vpop.f32.mrb[15].mxu1  ;;  %v1087_v4 = vmul.f32 (!%p1505_p11), %v2088_v3, %v1064_v1  ;;  %v1546_v7 = vld [vmem:[%s2194_s4] sm:$0xff] (!%p1505_p11)  }
 0x14c   : > { %v1034_v14 = vadd.f32 %v990_v9, %v472_v6  ;;  %v993_v15 = vadd.f32 %v1734_v43, %v1670_v10  ;;  %v2095_v6 = vld [vmem:[%s2193_s3] ss:$0 sm:$0xff] (!%p1505_p11)  ;;  %v1547_v9 = vunpack.c.l.bf16 (!%p1505_p11), %v1546_v7  ;;  %v1548_v10 = vunpack.c.h.bf16 (!%p1505_p11), %v1546_v7 }
 0x14e   : > { %1050 = vst [vmem:[#allocation2 + $0x30] sm:$0xff] %v1034_v14  ;;  %v1035_v16 = vadd.f32 %v993_v15, %v473_v12  ;;  %v1671_v17 = vpop.f32.mrb[16].mxu0  ;;  %v1068_v14 = vld [vmem:[#allocation2 + $0x20] sm:$0xff] (!%p1505_p11)  ;;  %v1110_v15 = vadd.f32 (!%p1505_p11), %v2095_v6, %v1087_v4 }
 0x14f   : > { %v1672_v18 = vpop.f32.mrb[17].mxu0 }
 0x150   : > { %1051 = vst [vmem:[#allocation2 + $0x38] sm:$0xff] %v1035_v16  ;;  %v1673_v19 = vadd.f32 %v1672_v18, %v1671_v17  ;;  %v1674_v20 = vpop.f32.mrb[18].mxu0 }
 0x151   : > { %v1675_v21 = vpop.f32.mrb[19].mxu0 }
 0x152   : > { %v1676_v23 = vadd.f32 %v1675_v21, %v1674_v20  ;;  %v998_v24 = vadd.f32 %v1673_v19, %v997_v56  ;;  %v1069_v19 = vld [vmem:[#allocation2 + $0x28] sm:$0xff] (!%p1505_p11)  ;;  %v1618_v20 = vld [vmem:[%s2194_s4 + $0x10] sm:$0xff] (!%p1505_p11)  }
 0x154   : > { %v1036_v26 = vadd.f32 %v998_v24, %v474_v22  ;;  %v1001_v27 = vadd.f32 %v1676_v23, %v1000_v61  ;;  %v481_v61 = vld [vmem:[#allocation2 + $0x78] sm:$0xff]  ;;  %v1091_v23 = vmul.f32 (!%p1505_p11), %v2088_v3, %v1068_v14  ;;  %v1092_v24 = vmul.f32 (!%p1505_p11), %v2088_v3, %v1069_v19 }
 0x156   : > { %1052 = vst [vmem:[#allocation2 + $0x40] sm:$0xff] %v1036_v26  ;;  %v1037_v28 = vadd.f32 %v1001_v27, %v475_v25  ;;  %v1677_v29 = vpop.f32.mrb[20].mxu0  ;;  %v1070_v25 = vld [vmem:[#allocation2 + $0x30] sm:$0xff] (!%p1505_p11)  ;;  %v1158_v26 = vadd.f32 (!%p1505_p11), %v1547_v9, %v1110_v15 }
 0x157   : > { %v1678_v30 = vpop.f32.mrb[21].mxu0 }
 0x158   : > { %1053 = vst [vmem:[#allocation2 + $0x48] sm:$0xff] %v1037_v28  ;;  %v1679_v31 = vadd.f32 %v1678_v30, %v1677_v29  ;;  %v1680_v32 = vpop.f32.mrb[22].mxu0  ;;  %v1555_v29 = vunpack.c.l.bf16 (!%p1505_p11), %v1618_v20  ;;  %v1071_v30 = vld [vmem:[#allocation2 + $0x38] sm:$0xff] (!%p1505_p11) }
 0x159   : > { %v1681_v34 = vpop.f32.mrb[23].mxu0 }
 0x15a   : > { %v1006_v35 = vadd.f32 %v1737_v53, %v1679_v31  ;;  %v1682_v36 = vadd.f32 %v1681_v34, %v1680_v32  ;;  %v1114_v32 = vadd.f32 (!%p1505_p11), %v2095_v6, %v1091_v23  ;;  %v1556_v34 = vunpack.c.h.bf16 (!%p1505_p11), %v1618_v20 }
 0x15c   : > { %v1038_v38 = vadd.f32 %v1006_v35, %v476_v33  ;;  %v1009_v39 = vadd.f32 %v1738_v59, %v1682_v36  ;;  %v1115_v33 = vadd.f32 (!%p1505_p11), %v2095_v6, %v1092_v24  ;;  %v1619_v35 = vld [vmem:[%s2194_s4 + $0x18] sm:$0xff] (!%p1505_p11)   ;;  %v1174_v36 = vmax.f32 (!%p1505_p11), %v1158_v26, 0.0 }
 0x15e   : > { %1054 = vst [vmem:[#allocation2 + $0x50] sm:$0xff] %v1038_v38  ;;  %v1039_v40 = vadd.f32 %v1009_v39, %v477_v37  ;;  %v1683_v41 = vpop.f32.mrb[24].mxu0  ;;  %v1093_v39 = vmul.f32 (!%p1505_p11), %v2088_v3, %v1070_v25 }
 0x15f   : > { %v1684_v42 = vpop.f32.mrb[25].mxu0 }
 0x160   : > { %1055 = vst [vmem:[#allocation2 + $0x58] sm:$0xff] %v1039_v40  ;;  %v1685_v43 = vadd.f32 %v1684_v42, %v1683_v41  ;;  %v1686_v44 = vpop.f32.mrb[26].mxu0  ;;  %v1162_v41 = vadd.f32 (!%p1505_p11), %v1555_v29, %v1114_v32  ;;  %v1163_v42 = vadd.f32 (!%p1505_p11), %v1556_v34, %v1115_v33  ;;  %v1623_v29 = vld [vmem:[%s2194_s4 + $0x38] sm:$0xff] (!%p1505_p11)  }
 0x161   : > { %v1687_v45 = vpop.f32.mrb[27].mxu0 }
 0x162   : > { %v1688_v47 = vadd.f32 %v1687_v45, %v1686_v44  ;;  %v1014_v48 = vadd.f32 %v1685_v43, %v1013_v8  ;;  %v1066_v8 = vld [vmem:[#allocation2 + $0x10] sm:$0xff] (!%p1505_p11)  ;;  %v1094_v43 = vmul.f32 (!%p1505_p11), %v2088_v3, %v1071_v30  ;;  %v1072_v44 = vld [vmem:[#allocation2 + $0x40] sm:$0xff] (!%p1505_p11)  ;;  %v1073_v45 = vld [vmem:[#allocation2 + $0x48] sm:$0xff] (!%p1505_p11) }
 0x163   : > { %v1089_v12 = vmul.f32 (!%p1505_p11), %v2088_v3, %v1066_v8 }
 0x164   : > { %v1040_v50 = vadd.f32 %v1014_v48, %v478_v46  ;;  %v1017_v51 = vadd.f32 %v1688_v47, %v1016_v13  ;;  %v1617_v13 = vld [vmem:[%s2194_s4 + $0x8] sm:$0xff] (!%p1505_p11)   ;;  %v1116_v48 = vadd.f32 (!%p1505_p11), %v2095_v6, %v1093_v39 }
 0x165   : > { %v1551_v18 = vunpack.c.l.bf16 (!%p1505_p11), %v1617_v13  ;;  %v1112_v21 = vadd.f32 (!%p1505_p11), %v2095_v6, %v1089_v12  ;;  %v1552_v22 = vunpack.c.h.bf16 (!%p1505_p11), %v1617_v13 }
 0x166   : > { %1056 = vst [vmem:[#allocation2 + $0x60] sm:$0xff] %v1040_v50  ;;  %v1041_v52 = vadd.f32 %v1017_v51, %v479_v49  ;;  %v1689_v53 = vpop.f32.mrb[28].mxu0  ;;  %v1559_v49 = vunpack.c.l.bf16 (!%p1505_p11), %v1619_v35  ;;  %v1620_v50 = vld [vmem:[%s2194_s4 + $0x20] sm:$0xff] (!%p1505_p11)   ;;  %v1178_v51 = vmax.f32 (!%p1505_p11), %v1162_v41, 0.0  ;;  %v1575_v41 = vunpack.c.l.bf16 (!%p1505_p11), %v1623_v29 }
 0x167   : > { %v1690_v54 = vpop.f32.mrb[29].mxu0  ;;  %v1160_v31 = vadd.f32 (!%p1505_p11), %v1551_v18, %v1112_v21  ;;  %v1564_v1 = vunpack.c.h.bf16 (!%p1505_p11), %v1620_v50 }
 0x168   : > { %1057 = vst [vmem:[#allocation2 + $0x68] sm:$0xff] %v1041_v52  ;;  %v1691_v55 = vadd.f32 %v1690_v54, %v1689_v53  ;;  %v1692_v56 = vpop.f32.mrb[30].mxu0  ;;  %v1179_v52 = vmax.f32 (!%p1505_p11), %v1163_v42, 0.0  ;;  %v1117_v53 = vadd.f32 (!%p1505_p11), %v2095_v6, %v1094_v43  ;;  %v1560_v54 = vunpack.c.h.bf16 (!%p1505_p11), %v1619_v35 }
 0x169   : > { %v1693_v58 = vpop.f32.mrb[31].mxu0  ;;  %v1176_v40 = vmax.f32 (!%p1505_p11), %v1160_v31, 0.0 }
 0x16a   : > { %v1022_v59 = vadd.f32 %v1741_v5, %v1691_v55  ;;  %v1694_v60 = vadd.f32 %v1693_v58, %v1692_v56  ;;  %1063 = sbr.rel (%p1505_p11) target bundleno = 387 (0x183), region = 74  ;;  %v1088_v5 = vmul.f32 (!%p1505_p11), %v2088_v3, %v1065_v2  ;;  %v1074_v55 = vld [vmem:[#allocation2 + $0x50] sm:$0xff] (!%p1505_p11)  ;;  %v1095_v58 = vmul.f32 (!%p1505_p11), %v2088_v3, %v1072_v44 }
 0x16b   : > { %v1097_v8 = vmul.f32 (!%p1505_p11), %v2088_v3, %v1074_v55  ;;  %v1576_v44 = vunpack.c.h.bf16 (!%p1505_p11), %v1623_v29 }
 0x16c   : > { %v1042_v62 = vadd.f32 %v1022_v59, %v480_v57  ;;  %v1025_v63 = vadd.f32 %v1742_v11, %v1694_v60  ;;  %v1067_v11 = vld [vmem:[#allocation2 + $0x18] sm:$0xff] (!%p1505_p11)  ;;  %v1111_v16 = vadd.f32 (!%p1505_p11), %v2095_v6, %v1088_v5  ;;  %v1164_v57 = vadd.f32 (!%p1505_p11), %v1559_v49, %v1116_v48 }
 0x16d   : > { %v1090_v17 = vmul.f32 (!%p1505_p11), %v2088_v3, %v1067_v11  ;;  %v1096_v59 = vmul.f32 (!%p1505_p11), %v2088_v3, %v1073_v45  ;;  %v1075_v60 = vld [vmem:[#allocation2 + $0x58] sm:$0xff] (!%p1505_p11)  ;;  %v1076_v2 = vld [vmem:[#allocation2 + $0x60] sm:$0xff] (!%p1505_p11)  ;;  %v1118_v5 = vadd.f32 (!%p1505_p11), %v2095_v6, %v1095_v58 }
 0x16e   : > { %1058 = vst [vmem:[#allocation2 + $0x70] sm:$0xff] %v1042_v62  ;;  %v1043_v0 = vadd.f32 %v1025_v63, %v481_v61  ;;  %v1159_v27 = vadd.f32 (!%p1505_p11), %v1548_v10, %v1111_v16  ;;  %v1621_v61 = vld [vmem:[%s2194_s4 + $0x28] sm:$0xff] (!%p1505_p11)   ;;  %v1590_v62 = vpack.c.bf16 (!%p1505_p11), %v1179_v52, %v1178_v51  ;;  %v1165_v63 = vadd.f32 (!%p1505_p11), %v1560_v54, %v1117_v53  ;;  %v1622_v10 = vld [vmem:[%s2194_s4 + $0x30] sm:$0xff] (!%p1505_p11)  }
 0x16f   : > { %v1113_v28 = vadd.f32 (!%p1505_p11), %v2095_v6, %v1090_v17  ;;  %v1180_v4 = vmax.f32 (!%p1505_p11), %v1164_v57, 0.0  ;;  %v1119_v7 = vadd.f32 (!%p1505_p11), %v2095_v6, %v1096_v59  ;;  %v1077_v9 = vld [vmem:[#allocation2 + $0x68] sm:$0xff] (!%p1505_p11)  ;;  %v1098_v12 = vmul.f32 (!%p1505_p11), %v2088_v3, %v1075_v60 }
 0x170   : > { %1059 = vst [vmem:[#allocation2 + $0x78] sm:$0xff] %v1043_v0  ;;  %v1175_v37 = vmax.f32 (!%p1505_p11), %v1159_v27, 0.0  ;;  %v1563_v0 = vunpack.c.l.bf16 (!%p1505_p11), %v1620_v50  ;;  %1625 = vst [vmem:[%s2195_s5 + $0x10] sm:$0xff] (!%p1505_p11), %v1590_v62   ;;  %v1181_v11 = vmax.f32 (!%p1505_p11), %v1165_v63, 0.0  ;;  %v1567_v13 = vunpack.c.l.bf16 (!%p1505_p11), %v1621_v61 }
 0x171   : > { %v1161_v38 = vadd.f32 %v1552_v22, %v1113_v28  ;;  %v1568_v14 = vunpack.c.h.bf16 %v1621_v61  ;;  %v1167_v16 = vadd.f32 %v1564_v1, %v1119_v7  ;;  %v1120_v17 = vadd.f32 %v2095_v6, %v1097_v8 }
 0x172   : > { %v1580_v46 = vpack.c.bf16 %v1175_v37, %v1174_v36  ;;  %v1166_v15 = vadd.f32 %v1563_v0, %v1118_v5  ;;  %v1099_v18 = vmul.f32 %v2088_v3, %v1076_v2  ;;  %v1595_v20 = vpack.c.bf16 %v1181_v11, %v1180_v4 }
 0x173   : > { %v1177_v47 = vmax.f32 %v1161_v38, 0.0  ;;  %v1121_v21 = vadd.f32 %v2095_v6, %v1098_v12  ;;  %v1100_v22 = vmul.f32 %v2088_v3, %v1077_v9  ;;  %v1571_v23 = vunpack.c.l.bf16 %v1622_v10 }
 0x174   : > { %1581 = vst [vmem:[%s2195_s5] sm:$0xff] %v1580_v46   ;;  %v1182_v25 = vmax.f32 %v1166_v15, 0.0  ;;  %v1183_v26 = vmax.f32 %v1167_v16, 0.0  ;;  %v1168_v27 = vadd.f32 %v1567_v13, %v1120_v17  ;;  %v1122_v28 = vadd.f32 %v2095_v6, %v1099_v18  ;;  %1626 = vst [vmem:[%s2195_s5 + $0x18] sm:$0xff] %v1595_v20  }
 0x175   : > { %v1585_v56 = vpack.c.bf16 %v1177_v47, %v1176_v40  ;;  %v1078_v19 = vld [vmem:[#allocation2 + $0x70] sm:$0xff]  ;;  %v1169_v30 = vadd.f32 %v1568_v14, %v1121_v21  ;;  %v1123_v31 = vadd.f32 %v2095_v6, %v1100_v22  ;;  %v1572_v32 = vunpack.c.h.bf16 %v1622_v10 }
 0x176   : > { %v1101_v33 = vmul.f32 %v2088_v3, %v1078_v19  ;;  %v1600_v34 = vpack.c.bf16 %v1183_v26, %v1182_v25  ;;  %v1184_v35 = vmax.f32 %v1168_v27, 0.0  ;;  %v1170_v36 = vadd.f32 %v1571_v23, %v1122_v28 }
 0x177   : > { %1624 = vst [vmem:[%s2195_s5 + $0x8] sm:$0xff] %v1585_v56   ;;  %v1079_v24 = vld [vmem:[#allocation2 + $0x78] sm:$0xff]  ;;  %v1185_v38 = vmax.f32 %v1169_v30, 0.0  ;;  %v1171_v39 = vadd.f32 %v1572_v32, %v1123_v31 }
 0x178   : > { %v1102_v37 = vmul.f32 %v2088_v3, %v1079_v24  ;;  %v1124_v40 = vadd.f32 %v2095_v6, %v1101_v33  ;;  %1627 = vst [vmem:[%s2195_s5 + $0x20] sm:$0xff] %v1600_v34   ;;  %v1186_v42 = vmax.f32 %v1170_v36, 0.0 }
 0x179   : > { %v1605_v45 = vpack.c.bf16 %v1185_v38, %v1184_v35  ;;  %v1187_v46 = vmax.f32 %v1171_v39, 0.0 }
 0x17a   : > { %v1125_v43 = vadd.f32 %v2095_v6, %v1102_v37  ;;  %v1172_v47 = vadd.f32 %v1575_v41, %v1124_v40 }
 0x17b   : > { %1628 = vst [vmem:[%s2195_s5 + $0x28] sm:$0xff] %v1605_v45   ;;  %v1610_v3 = vpack.c.bf16 %v1187_v46, %v1186_v42 }
 0x17c   : > { %v1173_v48 = vadd.f32 %v1576_v44, %v1125_v43  ;;  %v1188_v49 = vmax.f32 %v1172_v47, 0.0 }
 0x17d   : > { %1629 = vst [vmem:[%s2195_s5 + $0x30] sm:$0xff] %v1610_v3  }
 0x17e   : > { %v1189_v50 = vmax.f32 %v1173_v48, 0.0 }
 0x180   : > { %v1615_v51 = vpack.c.bf16 %v1189_v50, %v1188_v49 }
 0x182   : > { %1630 = vst [vmem:[%s2195_s5 + $0x38] sm:$0xff] %v1615_v51  }
 0x183 PF: > { %s15_s22 = sadd.s32 1, %s1880_s22   ;;  %s2196_s18 = smov %s1868_s19 }
 0x184   : > { %p12_p12 = scmp.ge.s32.totalorder %s15_s22, 5   ;;  %s2197_s19 = smov %s1948_s26 }
 0x185   : > { %s2198_s20 = smov %s1876_s21  ;;  %s2199_s21 = smov %s2201_s23 }
 0x186   :  { %14 = sbr.rel (!%p12_p12) target bundleno = 3 (0x3), region = 127 }

// kernel: _lambda_.26
= control target key start
LH: loop header
LB: loop body
LE: loop exit
PB: predicated region body
PF: predicated region fallthrough
CT: control target
= control target key end

     0   :  { %s1142_s15 = smov 0   ;;  %s1144_s16 = smov 0   ;;  %s1255_s0 = inlined_call_operand.vmem [shape: bf16[32,1152], index: 0, kind: input, shape index: {}]   ;;  %s1256_s1 = inlined_call_operand.vmem [shape: bf16[1152,128], index: 1, kind: input, shape index: {}]   ;;  %s1257_s2 = inlined_call_operand.vmem [shape: f32[1,128], index: 2, kind: input, shape index: {}]   ;;  %s1258_s3 = inlined_call_operand.vmem [shape: f32[1,128], index: 3, kind: input, shape index: {}]   ;;  %s1259_s4 = inlined_call_operand.vmem [shape: bf16[32,128], index: 4, kind: output, shape index: {}]  }
   0x1   :  { %s1146_s17 = smov 0   ;;  %s1148_s18 = smov 0  }
   0x2   :  { %s1150_s19 = smov 0  }
   0x3 LB: > { %s26_s20 = sadd.s32 1, %s1110_s18  ;;  %p49_p1 = scmp.ne.s32.totalorder %s1102_s16, %s1098_s15  ;;  %s1114_s19 = sphi %s1150_s19, %s14_s19   ;;  %s1110_s18 = sphi %s1148_s18, %s1263_s18   ;;  %s1106_s17 = sphi %s1146_s17, %s1262_s17   ;;  %s1102_s16 = sphi %s1144_s16, %s1261_s16   ;;  %s1098_s15 = sphi %s1142_s15, %s1260_s15  }
   0x4   : > { %p27_p0 = scmp.ge.s32.totalorder %s26_s20, 3  ;;  %p50_p2 = scmp.eq.s32.totalorder %s1114_s19, 0 }
   0x5   : > { %s42_s22 = sadd.s32 1, %s1102_s16  ;;  %p873_p5 = scmp.ge.s32.totalorder %s1114_s19, 3 }
   0x6   : > { %s1265_s20 = smov (%p27_p0, %s26_s20), 0  ;;  %p51_p3 = por %p50_p2, %p49_p1 }
   0x7   : > { %s38_s21 = ssub.s32 %s1110_s18, %s1265_s20  ;;  %195 = sbr.rel (%p873_p5) target bundleno = 23 (0x17), region = 24 }
   0x8   : > { %p40_p4 = scmp.eq.s32.totalorder %s38_s21, 0 }
   0xa   : > { %s1177_s23 = scalar_select %p40_p4, %s1102_s16, %s42_s22  }
   0xe   : > { %198 = sbr.rel (!%p51_p3) target bundleno = 23 (0x17), region = 28  ;;  %s200_s24 = sand.u32 (%p51_p3), 1, %s1102_s16  }
   0xf   : > { %s927_s25 = smul.u32 (%p51_p3), 12, %s1110_s18 }
  0x10   : > { %s1001_s26 = smul.u32 (%p51_p3), 48, %s200_s24 }
  0x11   : > { %s208_s29 = scalar_lea.vmem (%p51_p3), %s1255_s0, %s927_s25 }
  0x12   : > { %v223_v0 = vld [vmem:[%s208_s29] sm:$0xff] (%p51_p3)  ;;  %v227_v2 = vld [vmem:[%s208_s29 + $0x48] sm:$0xff] (%p51_p3)  ;;  %s202_s30 = scalar_lea.vmem (%p51_p3), [#allocation3], %s1001_s26  ;;  %v879_v6 = vld [vmem:[%s208_s29 + $0x50] sm:$0xf] (%p51_p3) }
  0x13   : > { %v225_v1 = vld [vmem:[%s208_s29 + $0x24] sm:$0xff] (%p51_p3)  ;;  %224 = vst [vmem:[%s202_s30] sm:$0xff] (%p51_p3), %v223_v0  ;;  %228 = vst [vmem:[%s202_s30 + $0x18] sm:$0xff] (%p51_p3), %v227_v2  ;;  %v229_v3 = vld [vmem:[%s208_s29 + $0x6c] sm:$0xff] (%p51_p3) }
  0x14   : > { %226 = vst [vmem:[%s202_s30 + $0xc] sm:$0xff] (%p51_p3), %v225_v1  ;;  %v875_v4 = vld [vmem:[%s208_s29 + $0x8] sm:$0xf] (%p51_p3)  ;;  %v877_v5 = vld [vmem:[%s208_s29 + $0x2c] sm:$0xf] (%p51_p3)  ;;  %230 = vst [vmem:[%s202_s30 + $0x24] sm:$0xff] (%p51_p3), %v229_v3 }
  0x15   : > { %876 = vst [vmem:[%s202_s30 + $0x8] sm:$0xf] %v875_v4  ;;  %878 = vst [vmem:[%s202_s30 + $0x14] sm:$0xf] %v877_v5  ;;  %v881_v7 = vld [vmem:[%s208_s29 + $0x74] sm:$0xf] }
  0x16   : > { %880 = vst [vmem:[%s202_s30 + $0x20] sm:$0xf] %v879_v6  ;;  %882 = vst [vmem:[%s202_s30 + $0x2c] sm:$0xf] %v881_v7 }
  0x17 PF: > { %p883_p6 = scmp.ge.s32.totalorder %s1114_s19, 1  ;;  %p262_p7 = scmp.lt.s32.totalorder %s1114_s19, 4 }
  0x19   : > { %p263_p8 = pnand %p883_p6, %p262_p7 }
  0x1a   : > { %s269_s5 = sand.u32 (!%p263_p8), 1, %s1098_s15   ;;  %s313_s6 = smul.u32 (!%p263_p8), 48, %s1106_s17 }
  0x1b   : > { %266 = sbr.rel (%p263_p8) target bundleno = 320 (0x140), region = 58  ;;  %p885_p10 = scmp.ne.s32.totalorder (!%p263_p8), %s1106_s17, 0 }
  0x1c   : > { %s1002_s7 = smul.u32 (!%p263_p8), 48, %s269_s5  ;;  %p314_p9 = scmp.lt.s32.totalorder (!%p263_p8), %s313_s6, 143 }
  0x1e   : > { %s1194_s12 = scalar_lea.vmem (!%p263_p8), [#allocation3], %s1002_s7 }
  0x22   : > { %s1267_s6 = smov (!%p314_p9, %s313_s6), 143  ;;  %341 = sbr.rel (%p885_p10) target bundleno = 41 (0x29), region = 66 }
  0x23   : > { %s884_s8 = sshll.u32 %s1267_s6, 2  ;;  %v1116_v8 = vmov (!%p885_p10), 0.0  }
  0x24   : > { %s1192_s11 = scalar_lea.vmem %s1256_s1, %s884_s8  ;;  %342 = vst [vmem:[#allocation2] sm:$0xff] (!%p885_p10), %v1116_v8  ;;  %343 = vst [vmem:[#allocation2 + $0x8] sm:$0xff] (!%p885_p10), %v1116_v8 }
  0x25   : > { %344 = vst [vmem:[#allocation2 + $0x10] sm:$0xff] (!%p885_p10), %v1116_v8  ;;  %345 = vst [vmem:[#allocation2 + $0x18] sm:$0xff] (!%p885_p10), %v1116_v8 }
  0x29 PF: > { %v1044_v9 = vld [vmem:[%s1192_s11 + $0x40] sm:$0xff]   ;;  %v1047_v12 = vld [vmem:[%s1192_s11 + $0x48] sm:$0xff]   ;;  %v1050_v15 = vld [vmem:[%s1192_s11 + $0x50] sm:$0xff]   ;;  %p916_p11 = scmp.ne.s32.totalorder %s1106_s17, 2 }
  0x2a   : > { %v1045_v10 = vld [vmem:[%s1192_s11] sm:$0xff]   ;;  %943 = vmatprep.subr.bf16.mxu0 %v1044_v9  ;;  %v1048_v13 = vld [vmem:[%s1192_s11 + $0x8] sm:$0xff]   ;;  %v1051_v16 = vld [vmem:[%s1192_s11 + $0x10] sm:$0xff]  }
  0x2b   : > { %v1046_v11 = vld [vmem:[%s1192_s11 + $0x80] sm:$0xff]   ;;  %944 = vmatpush3.bf16.msra.mxu0 %v1045_v10  ;;  %v1049_v14 = vld [vmem:[%s1192_s11 + $0x88] sm:$0xff]   ;;  %v1052_v17 = vld [vmem:[%s1192_s11 + $0x90] sm:$0xff]  }
  0x2c   : > { %981 = vmatprep.subr.bf16.mxu1 %v1046_v11  ;;  %945 = vmatprep.subr.bf16.mxu0 %v1047_v12  ;;  %v1053_v18 = vld [vmem:[%s1192_s11 + $0x58] sm:$0xff]   ;;  %v1056_v21 = vld [vmem:[%s1192_s11 + $0x60] sm:$0xff]   ;;  %v1059_v24 = vld [vmem:[%s1192_s11 + $0x68] sm:$0xff]  }
  0x2d   : > { %982 = vmatpush3.bf16.msra.mxu1 %v1046_v11  ;;  %v1054_v19 = vld [vmem:[%s1192_s11 + $0x18] sm:$0xff]   ;;  %v1058_v22 = vld [vmem:[%s1192_s11 + $0xa0] sm:$0xff]   ;;  %v1061_v25 = vld [vmem:[%s1192_s11 + $0xa8] sm:$0xff]  }
  0x2e   : > { %983 = vmatprep.subr.bf16.mxu1 %v1049_v14  ;;  %v1055_v20 = vld [vmem:[%s1192_s11 + $0x98] sm:$0xff]   ;;  %v1057_v23 = vld [vmem:[%s1192_s11 + $0x20] sm:$0xff]   ;;  %v1060_v26 = vld [vmem:[%s1192_s11 + $0x28] sm:$0xff]  }
  0x2f   : > { %946 = vmatpush3.bf16.msra.mxu0 %v1048_v13  ;;  %v1062_v27 = vld [vmem:[%s1192_s11 + $0x70] sm:$0xff]   ;;  %v1065_v30 = vld [vmem:[%s1192_s11 + $0x78] sm:$0xff]   ;;  %v346_v45 = vld [vmem:[#allocation2] sm:$0xff] }
  0x30   : > { %947 = vmatprep.subr.bf16.mxu0 %v1050_v15  ;;  %v1063_v28 = vld [vmem:[%s1192_s11 + $0x30] sm:$0xff]   ;;  %v1067_v31 = vld [vmem:[%s1192_s11 + $0xb8] sm:$0xff]   ;;  %v347_v50 = vld [vmem:[#allocation2 + $0x8] sm:$0xff] }
  0x31   : > { %984 = vmatpush3.bf16.msra.mxu1 %v1049_v14  ;;  %v1064_v29 = vld [vmem:[%s1192_s11 + $0xb0] sm:$0xff]   ;;  %v1066_v34 = vld [vmem:[%s1192_s11 + $0x38] sm:$0xff]   ;;  %v917_v5 = vld [vmem:[%s1257_s2] ss:$0 sm:$0xff] (!%p916_p11) }
  0x32   : > { %985 = vmatprep.subr.bf16.mxu1 %v1052_v17  ;;  %v1070_v32 = vld [vmem:[%s1194_s12 + $0x4] ss:$12 sps:$4 sm:$0xff]   ;;  %v1071_v33 = vld [vmem:[%s1194_s12 + $0x8] ss:$12 sps:$4 sm:$0xff]   ;;  %v1068_v35 = vld [vmem:[%s1194_s12] ss:$12 sps:$4 sm:$0xff]  }
  0x33   : > { %948 = vmatpush3.bf16.msra.mxu0 %v1051_v16  ;;  %614 = vmatprep.mubr.bf16.mxu0 %v1070_v32  ;;  %v1073_v36 = vld [vmem:[%s1194_s12 + $0x1c] ss:$12 sps:$4 sm:$0xff]   ;;  %v1072_v37 = vld [vmem:[%s1194_s12 + $0x20] ss:$12 sps:$4 sm:$0xff]   ;;  %v1075_v38 = vld [vmem:[%s1194_s12 + $0x18] ss:$12 sps:$4 sm:$0xff]  }
  0x34   : > { %949 = vmatprep.subr.bf16.mxu0 %v1053_v18  ;;  %997 = vmatprep.mubr.bf16.mxu1 %v1071_v33  ;;  %v348_v59 = vld [vmem:[#allocation2 + $0x10] sm:$0xff]  ;;  %v349_v63 = vld [vmem:[#allocation2 + $0x18] sm:$0xff]  ;;  %v918_v8 = vld [vmem:[%s1258_s3] ss:$0 sm:$0xff] (!%p916_p11) }
  0x35   : > { %986 = vmatpush3.bf16.msra.mxu1 %v1052_v17 }
  0x36   : > { %987 = vmatprep.subr.bf16.mxu1 %v1055_v20 }
  0x37   : > { %950 = vmatpush3.bf16.msra.mxu0 %v1054_v19 }
  0x38   : > { %951 = vmatprep.subr.bf16.mxu0 %v1056_v21 }
  0x39   : > { %988 = vmatpush3.bf16.msra.mxu1 %v1055_v20 }
  0x3a   : > { %989 = vmatprep.subr.bf16.mxu1 %v1058_v22 }
  0x3b   : > { %952 = vmatpush3.bf16.msra.mxu0 %v1057_v23 }
  0x3c   : > { %953 = vmatprep.subr.bf16.mxu0 %v1059_v24 }
  0x3d   : > { %990 = vmatpush3.bf16.msra.mxu1 %v1058_v22 }
  0x3e   : > { %991 = vmatprep.subr.bf16.mxu1 %v1061_v25 }
  0x3f   : > { %954 = vmatpush3.bf16.msra.mxu0 %v1060_v26 }
  0x40   : > { %955 = vmatprep.subr.bf16.mxu0 %v1062_v27 }
  0x41   : > { %992 = vmatpush3.bf16.msra.mxu1 %v1061_v25 }
  0x42   : > { %993 = vmatprep.subr.bf16.mxu1 %v1064_v29 }
  0x43   : > { %956 = vmatpush3.bf16.msra.mxu0 %v1063_v28 }
  0x44   : > { %957 = vmatprep.subr.bf16.mxu0 %v1065_v30 }
  0x45   : > { %994 = vmatpush3.bf16.msra.mxu1 %v1064_v29 }
  0x46   : > { %995 = vmatprep.subr.bf16.mxu1 %v1067_v31 }
  0x47   : > { %958 = vmatpush3.bf16.msra.mxu0 %v1066_v34 }
  0x49   : > { %996 = vmatpush3.bf16.msra.mxu1 %v1067_v31 }
  0x4a   : > { %615 = vmatmul.mubr.bf16.vlgmr.msra.gmra.mrb[0].mxu0 %v1068_v35 }
  0x4b   : > { %622 = vmatprep.mubr.bf16.mxu0 %v1073_v36 }
  0x4c   : > { %998 = vmatmul.mubr.bf16.vlgmr.msra.gmra.mrb[0].mxu1 %v1072_v37 }
  0x52   : > { %623 = vmatmul.mubr.bf16.gmra.mrb[4].mxu0 %v1075_v38 }
 0x11d   : > { %v959_v39 = vpop.f32.mrb[0].mxu0 }
 0x11e   : > { %v960_v40 = vpop.f32.mrb[1].mxu0 }
 0x11f   : > { %v961_v41 = vadd.f32 %v960_v40, %v959_v39  ;;  %v962_v42 = vpop.f32.mrb[2].mxu0  ;;  %v999_v43 = vpop.f32.mrb[0].mxu1 }
 0x120   : > { %v963_v44 = vpop.f32.mrb[3].mxu0  ;;  %v665_v46 = vpop.f32.mrb[1].mxu1 }
 0x121   : > { %v964_v47 = vadd.f32 %v963_v44, %v962_v42  ;;  %v666_v48 = vadd.f32 %v961_v41, %v665_v46  ;;  %v1000_v49 = vpop.f32.mrb[2].mxu1 }
 0x122   : > { %v668_v51 = vpop.f32.mrb[3].mxu1 }
 0x123   : > { %v680_v52 = vadd.f32 %v666_v48, %v346_v45  ;;  %v669_v53 = vadd.f32 %v964_v47, %v668_v51 }
 0x125   : > { %684 = vst [vmem:[#allocation2] sm:$0xff] %v680_v52  ;;  %v681_v54 = vadd.f32 %v669_v53, %v347_v50  ;;  %v965_v55 = vpop.f32.mrb[4].mxu0 }
 0x126   : > { %v966_v56 = vpop.f32.mrb[5].mxu0 }
 0x127   : > { %685 = vst [vmem:[#allocation2 + $0x8] sm:$0xff] %v681_v54  ;;  %v967_v57 = vadd.f32 %v966_v56, %v965_v55  ;;  %v968_v58 = vpop.f32.mrb[6].mxu0 }
 0x128   : > { %v969_v60 = vpop.f32.mrb[7].mxu0 }
 0x129   : > { %v674_v61 = vadd.f32 %v999_v43, %v967_v57  ;;  %v970_v62 = vadd.f32 %v969_v60, %v968_v58  ;;  %691 = sbr.rel (%p916_p11) target bundleno = 320 (0x140), region = 70 }
 0x12b   : > { %v682_v0 = vadd.f32 %v674_v61, %v348_v59  ;;  %v677_v1 = vadd.f32 %v1000_v49, %v970_v62 }
 0x12c   : > { %v692_v3 = vld [vmem:[#allocation2] sm:$0xff] (!%p916_p11) }
 0x12d   : > { %686 = vst [vmem:[#allocation2 + $0x10] sm:$0xff] %v682_v0  ;;  %v683_v2 = vadd.f32 %v677_v1, %v349_v63  ;;  %v703_v6 = vmul.f32 (!%p916_p11), %v917_v5, %v692_v3 }
 0x12e   : > { %v693_v4 = vld [vmem:[#allocation2 + $0x8] sm:$0xff] (!%p916_p11) }
 0x12f   : > { %687 = vst [vmem:[#allocation2 + $0x18] sm:$0xff] %v683_v2  ;;  %v704_v7 = vmul.f32 (!%p916_p11), %v917_v5, %v693_v4  ;;  %v714_v13 = vadd.f32 (!%p916_p11), %v918_v8, %v703_v6 }
 0x131   : > { %v715_v14 = vadd.f32 %v918_v8, %v704_v7  ;;  %v718_v17 = vmax.f32 %v714_v13, 0.0 }
 0x133   : > { %v719_v18 = vmax.f32 %v715_v14, 0.0 }
 0x134   : > { %v694_v9 = vld [vmem:[#allocation2 + $0x10] sm:$0xff] }
 0x135   : > { %v705_v11 = vmul.f32 %v917_v5, %v694_v9  ;;  %v935_v21 = vpack.c.bf16 %v719_v18, %v718_v17 }
 0x136   : > { %v695_v10 = vld [vmem:[#allocation2 + $0x18] sm:$0xff] }
 0x137   : > { %v706_v12 = vmul.f32 %v917_v5, %v695_v10  ;;  %v716_v15 = vadd.f32 %v918_v8, %v705_v11  ;;  %936 = vst [vmem:[%s1259_s4] sm:$0xff] %v935_v21  }
 0x139   : > { %v717_v16 = vadd.f32 %v918_v8, %v706_v12  ;;  %v720_v19 = vmax.f32 %v716_v15, 0.0 }
 0x13b   : > { %v721_v20 = vmax.f32 %v717_v16, 0.0 }
 0x13d   : > { %v940_v22 = vpack.c.bf16 %v721_v20, %v720_v19 }
 0x13f   : > { %942 = vst [vmem:[%s1259_s4 + $0x8] sm:$0xff] %v940_v22  }
 0x140 PF: > { %s14_s19 = sadd.s32 1, %s1114_s19   ;;  %s1260_s15 = smov %s1102_s16 }
 0x141   : > { %p11_p12 = scmp.ge.s32.totalorder %s14_s19, 5   ;;  %s1261_s16 = smov %s1177_s23 }
 0x142   : > { %s1262_s17 = smov %s1110_s18  ;;  %s1263_s18 = smov %s1265_s20 }
 0x143   :  { %13 = sbr.rel (!%p11_p12) target bundleno = 3 (0x3), region = 120 }

// kernel: _lambda_.27
= control target key start
LH: loop header
LB: loop body
LE: loop exit
PB: predicated region body
PF: predicated region fallthrough
CT: control target
= control target key end

     0   :  { %s358_s1 = inlined_call_operand.vmem [shape: bf16[128,128], index: 1, kind: input, shape index: {}]   ;;  %s359_s0 = inlined_call_operand.vmem [shape: bf16[32,128], index: 0, kind: input, shape index: {}]   ;;  %s360_s2 = inlined_call_operand.vmem [shape: f32[1,128], index: 2, kind: input, shape index: {}]   ;;  %s361_s3 = inlined_call_operand.vmem [shape: f32[1,128], index: 3, kind: input, shape index: {}]   ;;  %s362_s4 = inlined_call_operand.vmem [shape: bf16[32,128], index: 4, kind: output, shape index: {}]  }
   0x1   :  { %v281_v0 = vld [vmem:[%s358_s1] sm:$0xff]   ;;  %v282_v1 = vld [vmem:[%s358_s1 + $0x8] sm:$0xff]   ;;  %v283_v2 = vld [vmem:[%s358_s1 + $0x10] sm:$0xff]  }
   0x2   :  { %261 = vmatprep.subr.bf16.mxu0 %v281_v0  ;;  %v284_v3 = vld [vmem:[%s358_s1 + $0x18] sm:$0xff]   ;;  %v289_v4 = vld [vmem:[%s359_s0] sm:$0xff]   ;;  %v286_v6 = vld [vmem:[%s358_s1 + $0x28] sm:$0xff]  }
   0x3   :  { %262 = vmatpush3.bf16.msra.mxu0 %v281_v0  ;;  %277 = vmatprep.mubr.bf16.mxu0 %v289_v4  ;;  %v285_v5 = vld [vmem:[%s358_s1 + $0x20] sm:$0xff]   ;;  %v287_v7 = vld [vmem:[%s358_s1 + $0x30] sm:$0xff]   ;;  %v288_v8 = vld [vmem:[%s358_s1 + $0x38] sm:$0xff]  }
   0x4   :  { %263 = vmatprep.subr.bf16.mxu0 %v282_v1  ;;  %v290_v9 = vld [vmem:[%s359_s0 + $0x8] sm:$0xff]   ;;  %v230_v10 = vld [vmem:[%s360_s2] ss:$0 sm:$0xff] }
   0x5   :  { %v231_v14 = vld [vmem:[%s361_s3] ss:$0 sm:$0xff] }
   0x7   :  { %264 = vmatpush3.bf16.msra.mxu0 %v282_v1 }
   0x8   :  { %265 = vmatprep.subr.bf16.mxu0 %v283_v2 }
   0xb   :  { %266 = vmatpush3.bf16.msra.mxu0 %v283_v2 }
   0xc   :  { %267 = vmatprep.subr.bf16.mxu0 %v284_v3 }
   0xf   :  { %268 = vmatpush3.bf16.msra.mxu0 %v284_v3 }
  0x10   :  { %269 = vmatprep.subr.bf16.mxu0 %v285_v5 }
  0x13   :  { %270 = vmatpush3.bf16.msra.mxu0 %v285_v5 }
  0x14   :  { %271 = vmatprep.subr.bf16.mxu0 %v286_v6 }
  0x17   :  { %272 = vmatpush3.bf16.msra.mxu0 %v286_v6 }
  0x18   :  { %273 = vmatprep.subr.bf16.mxu0 %v287_v7 }
  0x1b   :  { %274 = vmatpush3.bf16.msra.mxu0 %v287_v7 }
  0x1c   :  { %275 = vmatprep.subr.bf16.mxu0 %v288_v8 }
  0x1f   :  { %276 = vmatpush3.bf16.msra.mxu0 %v288_v8 }
  0x22   :  { %278 = vmatmul.mubr.bf16.vlgmr.msra.gmra.mrb[0].mxu0 %v290_v9 }
  0xf5   :  { %v279_v11 = vpop.f32.mrb[0].mxu0 }
  0xf6   :  { %v183_v12 = vmul.f32 %v279_v11, %v230_v10  ;;  %v144_v13 = vpop.f32.mrb[1].mxu0 }
  0xf7   :  { %v181_v15 = vmul.f32 %v230_v10, %v144_v13  ;;  %v280_v16 = vpop.f32.mrb[2].mxu0 }
  0xf8   :  { %v184_v17 = vmul.f32 %v280_v16, %v230_v10  ;;  %v147_v18 = vpop.f32.mrb[3].mxu0  ;;  %v194_v20 = vadd.f32 %v231_v14, %v183_v12 }
  0xf9   :  { %v182_v19 = vmul.f32 %v230_v10, %v147_v18  ;;  %v192_v22 = vadd.f32 %v231_v14, %v181_v15 }
  0xfa   :  { %v195_v21 = vadd.f32 %v231_v14, %v184_v17 }
  0xfb   :  { %v193_v23 = vadd.f32 %v231_v14, %v182_v19 }
  0xfc   :  { %v248_v24 = vpack.c.bf16 %v195_v21, %v194_v20 }
  0xfd   :  { %v243_v25 = vpack.c.bf16 %v193_v23, %v192_v22 }
  0xfe   :  { %250 = vst [vmem:[%s362_s4 + $0x8] sm:$0xff] %v248_v24  }
  0xff   :  { %244 = vst [vmem:[%s362_s4] sm:$0xff] %v243_v25  }

// kernel: _lambda_.28
= control target key start
LH: loop header
LB: loop body
LE: loop exit
PB: predicated region body
PF: predicated region fallthrough
CT: control target
= control target key end

     0   :  { %s1247_s18 = smov 0   ;;  %s1249_s19 = smov 0   ;;  %s1366_s0 = inlined_call_operand.vmem [shape: bf16[32,1152], index: 0, kind: input, shape index: {}]   ;;  %s1367_s1 = inlined_call_operand.vmem [shape: bf16[1152,128], index: 1, kind: input, shape index: {}]   ;;  %s1368_s2 = inlined_call_operand.vmem [shape: f32[1,128], index: 2, kind: input, shape index: {}]   ;;  %s1369_s3 = inlined_call_operand.vmem [shape: f32[1,128], index: 3, kind: input, shape index: {}]   ;;  %s1370_s4 = inlined_call_operand.vmem [shape: bf16[32,128], index: 4, kind: input, shape index: {}]   ;;  %s1371_s5 = inlined_call_operand.vmem [shape: bf16[32,128], index: 5, kind: output, shape index: {}]  }
   0x1   :  { %s1251_s20 = smov 0   ;;  %s1253_s21 = smov 0  }
   0x2   :  { %s1255_s22 = smov 0  }
   0x3 LB: > { %s27_s23 = sadd.s32 1, %s1210_s21  ;;  %p50_p1 = scmp.ne.s32.totalorder %s1202_s19, %s1198_s18  ;;  %s1214_s22 = sphi %s1255_s22, %s15_s22   ;;  %s1210_s21 = sphi %s1253_s21, %s1375_s21   ;;  %s1206_s20 = sphi %s1251_s20, %s1374_s20   ;;  %s1202_s19 = sphi %s1249_s19, %s1373_s19   ;;  %s1198_s18 = sphi %s1247_s18, %s1372_s18  }
   0x4   : > { %p28_p0 = scmp.ge.s32.totalorder %s27_s23, 3  ;;  %p51_p2 = scmp.eq.s32.totalorder %s1214_s22, 0 }
   0x5   : > { %s43_s25 = sadd.s32 1, %s1202_s19  ;;  %p964_p5 = scmp.ge.s32.totalorder %s1214_s22, 3 }
   0x6   : > { %s1377_s23 = smov (%p28_p0, %s27_s23), 0  ;;  %p52_p3 = por %p51_p2, %p50_p1 }
   0x7   : > { %s39_s24 = ssub.s32 %s1210_s21, %s1377_s23  ;;  %236 = sbr.rel (%p964_p5) target bundleno = 23 (0x17), region = 28 }
   0x8   : > { %p41_p4 = scmp.eq.s32.totalorder %s39_s24, 0 }
   0xa   : > { %s1282_s26 = scalar_select %p41_p4, %s1202_s19, %s43_s25  }
   0xe   : > { %239 = sbr.rel (!%p52_p3) target bundleno = 23 (0x17), region = 32  ;;  %s241_s27 = sand.u32 (%p52_p3), 1, %s1202_s19  }
   0xf   : > { %s1018_s28 = smul.u32 (%p52_p3), 12, %s1210_s21 }
  0x10   : > { %s1101_s29 = smul.u32 (%p52_p3), 48, %s241_s27 }
  0x11   : > { %s249_s7 = scalar_lea.vmem (%p52_p3), %s1366_s0, %s1018_s28 }
  0x12   : > { %v264_v0 = vld [vmem:[%s249_s7] sm:$0xff] (%p52_p3)  ;;  %v268_v2 = vld [vmem:[%s249_s7 + $0x48] sm:$0xff] (%p52_p3)  ;;  %s243_s8 = scalar_lea.vmem (%p52_p3), [#allocation3], %s1101_s29  ;;  %v970_v6 = vld [vmem:[%s249_s7 + $0x50] sm:$0xf] (%p52_p3) }
  0x13   : > { %v266_v1 = vld [vmem:[%s249_s7 + $0x24] sm:$0xff] (%p52_p3)  ;;  %265 = vst [vmem:[%s243_s8] sm:$0xff] (%p52_p3), %v264_v0  ;;  %269 = vst [vmem:[%s243_s8 + $0x18] sm:$0xff] (%p52_p3), %v268_v2  ;;  %v270_v3 = vld [vmem:[%s249_s7 + $0x6c] sm:$0xff] (%p52_p3) }
  0x14   : > { %267 = vst [vmem:[%s243_s8 + $0xc] sm:$0xff] (%p52_p3), %v266_v1  ;;  %v966_v4 = vld [vmem:[%s249_s7 + $0x8] sm:$0xf] (%p52_p3)  ;;  %v968_v5 = vld [vmem:[%s249_s7 + $0x2c] sm:$0xf] (%p52_p3)  ;;  %271 = vst [vmem:[%s243_s8 + $0x24] sm:$0xff] (%p52_p3), %v270_v3 }
  0x15   : > { %967 = vst [vmem:[%s243_s8 + $0x8] sm:$0xf] %v966_v4  ;;  %969 = vst [vmem:[%s243_s8 + $0x14] sm:$0xf] %v968_v5  ;;  %v972_v7 = vld [vmem:[%s249_s7 + $0x74] sm:$0xf] }
  0x16   : > { %971 = vst [vmem:[%s243_s8 + $0x20] sm:$0xf] %v970_v6  ;;  %973 = vst [vmem:[%s243_s8 + $0x2c] sm:$0xf] %v972_v7 }
  0x17 PF: > { %p974_p6 = scmp.ge.s32.totalorder %s1214_s22, 1  ;;  %p303_p7 = scmp.lt.s32.totalorder %s1214_s22, 4 }
  0x19   : > { %p304_p8 = pnand %p974_p6, %p303_p7 }
  0x1a   : > { %s310_s9 = sand.u32 (!%p304_p8), 1, %s1198_s18   ;;  %s364_s10 = smul.u32 (!%p304_p8), 48, %s1206_s20 }
  0x1b   : > { %307 = sbr.rel (%p304_p8) target bundleno = 322 (0x142), region = 62  ;;  %p976_p10 = scmp.ne.s32.totalorder (!%p304_p8), %s1206_s20, 0 }
  0x1c   : > { %s1102_s11 = smul.u32 (!%p304_p8), 48, %s310_s9  ;;  %p365_p9 = scmp.lt.s32.totalorder (!%p304_p8), %s364_s10, 143 }
  0x1e   : > { %s1299_s16 = scalar_lea.vmem (!%p304_p8), [#allocation3], %s1102_s11 }
  0x22   : > { %s1379_s10 = smov (!%p365_p9, %s364_s10), 143  ;;  %401 = sbr.rel (%p976_p10) target bundleno = 41 (0x29), region = 70 }
  0x23   : > { %s975_s12 = sshll.u32 %s1379_s10, 2  ;;  %v1216_v8 = vmov (!%p976_p10), 0.0  }
  0x24   : > { %s1297_s15 = scalar_lea.vmem %s1367_s1, %s975_s12  ;;  %402 = vst [vmem:[#allocation2] sm:$0xff] (!%p976_p10), %v1216_v8  ;;  %403 = vst [vmem:[#allocation2 + $0x8] sm:$0xff] (!%p976_p10), %v1216_v8 }
  0x25   : > { %404 = vst [vmem:[#allocation2 + $0x10] sm:$0xff] (!%p976_p10), %v1216_v8  ;;  %405 = vst [vmem:[#allocation2 + $0x18] sm:$0xff] (!%p976_p10), %v1216_v8 }
  0x29 PF: > { %v1144_v9 = vld [vmem:[%s1297_s15 + $0x40] sm:$0xff]   ;;  %v1147_v12 = vld [vmem:[%s1297_s15 + $0x48] sm:$0xff]   ;;  %v1150_v15 = vld [vmem:[%s1297_s15 + $0x50] sm:$0xff]   ;;  %p1007_p11 = scmp.ne.s32.totalorder %s1206_s20, 2 }
  0x2a   : > { %v1145_v10 = vld [vmem:[%s1297_s15] sm:$0xff]   ;;  %1043 = vmatprep.subr.bf16.mxu0 %v1144_v9  ;;  %v1148_v13 = vld [vmem:[%s1297_s15 + $0x8] sm:$0xff]   ;;  %v1151_v16 = vld [vmem:[%s1297_s15 + $0x10] sm:$0xff]  }
  0x2b   : > { %v1146_v11 = vld [vmem:[%s1297_s15 + $0x80] sm:$0xff]   ;;  %1044 = vmatpush3.bf16.msra.mxu0 %v1145_v10  ;;  %v1149_v14 = vld [vmem:[%s1297_s15 + $0x88] sm:$0xff]   ;;  %v1152_v17 = vld [vmem:[%s1297_s15 + $0x90] sm:$0xff]  }
  0x2c   : > { %1081 = vmatprep.subr.bf16.mxu1 %v1146_v11  ;;  %1045 = vmatprep.subr.bf16.mxu0 %v1147_v12  ;;  %v1153_v18 = vld [vmem:[%s1297_s15 + $0x58] sm:$0xff]   ;;  %v1156_v21 = vld [vmem:[%s1297_s15 + $0x60] sm:$0xff]   ;;  %v1159_v24 = vld [vmem:[%s1297_s15 + $0x68] sm:$0xff]  }
  0x2d   : > { %1082 = vmatpush3.bf16.msra.mxu1 %v1146_v11  ;;  %v1154_v19 = vld [vmem:[%s1297_s15 + $0x18] sm:$0xff]   ;;  %v1158_v22 = vld [vmem:[%s1297_s15 + $0xa0] sm:$0xff]   ;;  %v1161_v25 = vld [vmem:[%s1297_s15 + $0xa8] sm:$0xff]  }
  0x2e   : > { %1083 = vmatprep.subr.bf16.mxu1 %v1149_v14  ;;  %v1155_v20 = vld [vmem:[%s1297_s15 + $0x98] sm:$0xff]   ;;  %v1157_v23 = vld [vmem:[%s1297_s15 + $0x20] sm:$0xff]   ;;  %v1160_v26 = vld [vmem:[%s1297_s15 + $0x28] sm:$0xff]  }
  0x2f   : > { %1046 = vmatpush3.bf16.msra.mxu0 %v1148_v13  ;;  %v1162_v27 = vld [vmem:[%s1297_s15 + $0x70] sm:$0xff]   ;;  %v1165_v30 = vld [vmem:[%s1297_s15 + $0x78] sm:$0xff]   ;;  %v406_v45 = vld [vmem:[#allocation2] sm:$0xff] }
  0x30   : > { %1047 = vmatprep.subr.bf16.mxu0 %v1150_v15  ;;  %v1163_v28 = vld [vmem:[%s1297_s15 + $0x30] sm:$0xff]   ;;  %v1167_v31 = vld [vmem:[%s1297_s15 + $0xb8] sm:$0xff]   ;;  %v407_v50 = vld [vmem:[#allocation2 + $0x8] sm:$0xff] }
  0x31   : > { %1084 = vmatpush3.bf16.msra.mxu1 %v1149_v14  ;;  %v1164_v29 = vld [vmem:[%s1297_s15 + $0xb0] sm:$0xff]   ;;  %v1166_v34 = vld [vmem:[%s1297_s15 + $0x38] sm:$0xff]   ;;  %v1008_v5 = vld [vmem:[%s1368_s2] ss:$0 sm:$0xff] (!%p1007_p11) }
  0x32   : > { %1085 = vmatprep.subr.bf16.mxu1 %v1152_v17  ;;  %v1170_v32 = vld [vmem:[%s1299_s16 + $0x4] ss:$12 sps:$4 sm:$0xff]   ;;  %v1171_v33 = vld [vmem:[%s1299_s16 + $0x8] ss:$12 sps:$4 sm:$0xff]   ;;  %v1168_v35 = vld [vmem:[%s1299_s16] ss:$12 sps:$4 sm:$0xff]  }
  0x33   : > { %1048 = vmatpush3.bf16.msra.mxu0 %v1151_v16  ;;  %674 = vmatprep.mubr.bf16.mxu0 %v1170_v32  ;;  %v1173_v36 = vld [vmem:[%s1299_s16 + $0x1c] ss:$12 sps:$4 sm:$0xff]   ;;  %v1172_v37 = vld [vmem:[%s1299_s16 + $0x20] ss:$12 sps:$4 sm:$0xff]   ;;  %v1175_v38 = vld [vmem:[%s1299_s16 + $0x18] ss:$12 sps:$4 sm:$0xff]  }
  0x34   : > { %1049 = vmatprep.subr.bf16.mxu0 %v1153_v18  ;;  %1097 = vmatprep.mubr.bf16.mxu1 %v1171_v33  ;;  %v408_v59 = vld [vmem:[#allocation2 + $0x10] sm:$0xff]  ;;  %v409_v63 = vld [vmem:[#allocation2 + $0x18] sm:$0xff]  ;;  %v1009_v8 = vld [vmem:[%s1369_s3] ss:$0 sm:$0xff] (!%p1007_p11) }
  0x35   : > { %1086 = vmatpush3.bf16.msra.mxu1 %v1152_v17  ;;  %v1024_v9 = vld [vmem:[%s1370_s4] sm:$0xff] (!%p1007_p11)   ;;  %v1041_v15 = vld [vmem:[%s1370_s4 + $0x8] sm:$0xff] (!%p1007_p11)  }
  0x36   : > { %1087 = vmatprep.subr.bf16.mxu1 %v1155_v20  ;;  %v1025_v11 = vunpack.c.l.bf16 (!%p1007_p11), %v1024_v9  ;;  %v1026_v12 = vunpack.c.h.bf16 (!%p1007_p11), %v1024_v9 }
  0x37   : > { %1050 = vmatpush3.bf16.msra.mxu0 %v1154_v19  ;;  %v1029_v19 = vunpack.c.l.bf16 (!%p1007_p11), %v1041_v15 }
  0x38   : > { %1051 = vmatprep.subr.bf16.mxu0 %v1156_v21  ;;  %v1030_v21 = vunpack.c.h.bf16 (!%p1007_p11), %v1041_v15 }
  0x39   : > { %1088 = vmatpush3.bf16.msra.mxu1 %v1155_v20 }
  0x3a   : > { %1089 = vmatprep.subr.bf16.mxu1 %v1158_v22 }
  0x3b   : > { %1052 = vmatpush3.bf16.msra.mxu0 %v1157_v23 }
  0x3c   : > { %1053 = vmatprep.subr.bf16.mxu0 %v1159_v24 }
  0x3d   : > { %1090 = vmatpush3.bf16.msra.mxu1 %v1158_v22 }
  0x3e   : > { %1091 = vmatprep.subr.bf16.mxu1 %v1161_v25 }
  0x3f   : > { %1054 = vmatpush3.bf16.msra.mxu0 %v1160_v26 }
  0x40   : > { %1055 = vmatprep.subr.bf16.mxu0 %v1162_v27 }
  0x41   : > { %1092 = vmatpush3.bf16.msra.mxu1 %v1161_v25 }
  0x42   : > { %1093 = vmatprep.subr.bf16.mxu1 %v1164_v29 }
  0x43   : > { %1056 = vmatpush3.bf16.msra.mxu0 %v1163_v28 }
  0x44   : > { %1057 = vmatprep.subr.bf16.mxu0 %v1165_v30 }
  0x45   : > { %1094 = vmatpush3.bf16.msra.mxu1 %v1164_v29 }
  0x46   : > { %1095 = vmatprep.subr.bf16.mxu1 %v1167_v31 }
  0x47   : > { %1058 = vmatpush3.bf16.msra.mxu0 %v1166_v34 }
  0x49   : > { %1096 = vmatpush3.bf16.msra.mxu1 %v1167_v31 }
  0x4a   : > { %675 = vmatmul.mubr.bf16.vlgmr.msra.gmra.mrb[0].mxu0 %v1168_v35 }
  0x4b   : > { %682 = vmatprep.mubr.bf16.mxu0 %v1173_v36 }
  0x4c   : > { %1098 = vmatmul.mubr.bf16.vlgmr.msra.gmra.mrb[0].mxu1 %v1172_v37 }
  0x52   : > { %683 = vmatmul.mubr.bf16.gmra.mrb[4].mxu0 %v1175_v38 }
 0x11d   : > { %v1059_v39 = vpop.f32.mrb[0].mxu0 }
 0x11e   : > { %v1060_v40 = vpop.f32.mrb[1].mxu0 }
 0x11f   : > { %v1061_v41 = vadd.f32 %v1060_v40, %v1059_v39  ;;  %v1062_v42 = vpop.f32.mrb[2].mxu0  ;;  %v1099_v43 = vpop.f32.mrb[0].mxu1 }
 0x120   : > { %v1063_v44 = vpop.f32.mrb[3].mxu0  ;;  %v725_v46 = vpop.f32.mrb[1].mxu1 }
 0x121   : > { %v1064_v47 = vadd.f32 %v1063_v44, %v1062_v42  ;;  %v726_v48 = vadd.f32 %v1061_v41, %v725_v46  ;;  %v1100_v49 = vpop.f32.mrb[2].mxu1 }
 0x122   : > { %v728_v51 = vpop.f32.mrb[3].mxu1 }
 0x123   : > { %v740_v52 = vadd.f32 %v726_v48, %v406_v45  ;;  %v729_v53 = vadd.f32 %v1064_v47, %v728_v51 }
 0x125   : > { %744 = vst [vmem:[#allocation2] sm:$0xff] %v740_v52  ;;  %v741_v54 = vadd.f32 %v729_v53, %v407_v50  ;;  %v1065_v55 = vpop.f32.mrb[4].mxu0 }
 0x126   : > { %v1066_v56 = vpop.f32.mrb[5].mxu0 }
 0x127   : > { %745 = vst [vmem:[#allocation2 + $0x8] sm:$0xff] %v741_v54  ;;  %v1067_v57 = vadd.f32 %v1066_v56, %v1065_v55  ;;  %v1068_v58 = vpop.f32.mrb[6].mxu0 }
 0x128   : > { %v1069_v60 = vpop.f32.mrb[7].mxu0 }
 0x129   : > { %v734_v61 = vadd.f32 %v1099_v43, %v1067_v57  ;;  %v1070_v62 = vadd.f32 %v1069_v60, %v1068_v58  ;;  %751 = sbr.rel (%p1007_p11) target bundleno = 322 (0x142), region = 74 }
 0x12b   : > { %v742_v0 = vadd.f32 %v734_v61, %v408_v59  ;;  %v737_v1 = vadd.f32 %v1100_v49, %v1070_v62 }
 0x12c   : > { %v752_v3 = vld [vmem:[#allocation2] sm:$0xff] (!%p1007_p11) }
 0x12d   : > { %746 = vst [vmem:[#allocation2 + $0x10] sm:$0xff] %v742_v0  ;;  %v743_v2 = vadd.f32 %v737_v1, %v409_v63  ;;  %v763_v6 = vmul.f32 (!%p1007_p11), %v1008_v5, %v752_v3 }
 0x12e   : > { %v753_v4 = vld [vmem:[#allocation2 + $0x8] sm:$0xff] (!%p1007_p11) }
 0x12f   : > { %747 = vst [vmem:[#allocation2 + $0x18] sm:$0xff] %v743_v2  ;;  %v764_v7 = vmul.f32 (!%p1007_p11), %v1008_v5, %v753_v4  ;;  %v774_v16 = vadd.f32 (!%p1007_p11), %v1009_v8, %v763_v6 }
 0x131   : > { %v775_v17 = vadd.f32 %v1009_v8, %v764_v7  ;;  %v786_v22 = vadd.f32 %v1025_v11, %v774_v16 }
 0x133   : > { %v787_v23 = vadd.f32 %v1026_v12, %v775_v17  ;;  %v790_v26 = vmax.f32 %v786_v22, 0.0 }
 0x134   : > { %v754_v10 = vld [vmem:[#allocation2 + $0x10] sm:$0xff] }
 0x135   : > { %v765_v14 = vmul.f32 %v1008_v5, %v754_v10  ;;  %v791_v27 = vmax.f32 %v787_v23, 0.0 }
 0x136   : > { %v755_v13 = vld [vmem:[#allocation2 + $0x18] sm:$0xff] }
 0x137   : > { %v766_v18 = vmul.f32 %v1008_v5, %v755_v13  ;;  %v776_v20 = vadd.f32 %v1009_v8, %v765_v14  ;;  %v1034_v30 = vpack.c.bf16 %v791_v27, %v790_v26 }
 0x139   : > { %v777_v24 = vadd.f32 %v1009_v8, %v766_v18  ;;  %v788_v25 = vadd.f32 %v1029_v19, %v776_v20  ;;  %1035 = vst [vmem:[%s1371_s5] sm:$0xff] %v1034_v30  }
 0x13b   : > { %v789_v28 = vadd.f32 %v1030_v21, %v777_v24  ;;  %v792_v29 = vmax.f32 %v788_v25, 0.0 }
 0x13d   : > { %v793_v31 = vmax.f32 %v789_v28, 0.0 }
 0x13f   : > { %v1039_v32 = vpack.c.bf16 %v793_v31, %v792_v29 }
 0x141   : > { %1042 = vst [vmem:[%s1371_s5 + $0x8] sm:$0xff] %v1039_v32  }
 0x142 PF: > { %s15_s22 = sadd.s32 1, %s1214_s22   ;;  %s1372_s18 = smov %s1202_s19 }
 0x143   : > { %p12_p12 = scmp.ge.s32.totalorder %s15_s22, 5   ;;  %s1373_s19 = smov %s1282_s26 }
 0x144   : > { %s1374_s20 = smov %s1210_s21  ;;  %s1375_s21 = smov %s1377_s23 }
 0x145   :  { %14 = sbr.rel (!%p12_p12) target bundleno = 3 (0x3), region = 127 }

// kernel: _lambda_.31
= control target key start
LH: loop header
LB: loop body
LE: loop exit
PB: predicated region body
PF: predicated region fallthrough
CT: control target
= control target key end

     0   :  { %s1114_s15 = smov 0   ;;  %s1116_s16 = smov 0   ;;  %s1216_s0 = inlined_call_operand.vmem [shape: bf16[8,1152], index: 0, kind: input, shape index: {}]   ;;  %s1217_s1 = inlined_call_operand.vmem [shape: bf16[1152,256], index: 1, kind: input, shape index: {}]   ;;  %s1218_s2 = inlined_call_operand.vmem [shape: f32[1,256], index: 2, kind: input, shape index: {}]   ;;  %s1219_s3 = inlined_call_operand.vmem [shape: f32[1,256], index: 3, kind: input, shape index: {}]   ;;  %s1220_s4 = inlined_call_operand.vmem [shape: bf16[8,256], index: 4, kind: output, shape index: {}]  }
   0x1   :  { %s1118_s17 = smov 0  }
   0x2 LB: > { %s26_s18 = sadd.s32 1, %s1081_s16  ;;  %p898_p0 = scmp.ge.s32.totalorder %s1085_s17, 1  ;;  %s1085_s17 = sphi %s1118_s17, %s14_s17   ;;  %s1081_s16 = sphi %s1116_s16, %s1222_s16   ;;  %s1077_s15 = sphi %s1114_s15, %s1221_s15  }
   0x3   : > { %p27_p1 = scmp.ge.s32.totalorder %s26_s18, 3  ;;  %p229_p2 = scmp.lt.s32.totalorder %s1085_s17, 4 }
   0x5   : > { %s1224_s18 = smov (%p27_p1, %s26_s18), 0  ;;  %p230_p3 = pnand %p898_p0, %p229_p2 }
   0x6   : > { %s281_s19 = smul.u32 (!%p230_p3), 3, %s1077_s15  ;;  %p902_p6 = scmp.ne.s32.totalorder (!%p230_p3), %s1077_s15, 0 }
   0x7   : > { %233 = sbr.rel (%p230_p3) target bundleno = 323 (0x143), region = 36 }
   0x8   : > { %s291_s20 = smul.u32 (!%p230_p3), 48, %s1077_s15  ;;  %p284_p4 = scmp.lt.s32.totalorder (!%p230_p3), %s281_s19, 8 }
   0xa   : > { %p293_p5 = scmp.lt.s32.totalorder (!%p230_p3), %s291_s20, 143 }
   0xe   : > { %s1226_s19 = smov (!%p284_p4, %s281_s19), 8  ;;  %s1228_s20 = smov (!%p293_p5, %s291_s20), 143 }
   0xf   : > { %s899_s21 = sshll.u32 %s1226_s19, 2  ;;  %s960_s25 = sshll.u32 %s1228_s20, 3  ;;  %v1087_v0 = vmov (!%p902_p6), 0.0  }
  0x10   : > { %s1139_s24 = scalar_lea.vmem %s1216_s0, %s899_s21  ;;  %s1144_s28 = scalar_lea.vmem %s1217_s1, %s960_s25  ;;  %328 = vst [vmem:[#allocation2] sm:$0xff] (!%p902_p6), %v1087_v0  ;;  %329 = vst [vmem:[#allocation2 + $0x8] sm:$0xff] (!%p902_p6), %v1087_v0 }
  0x11   : > { %327 = sbr.rel (%p902_p6) target bundleno = 24 (0x18), region = 40 }
  0x18 PF: > { %v988_v1 = vld [vmem:[%s1144_s28 + $0x4] ss:$8 sps:$4 sm:$0xff]   ;;  %v990_v2 = vld [vmem:[%s1144_s28] ss:$8 sps:$4 sm:$0xff]   ;;  %v1088_v3 = vmov 0   ;;  %p954_p7 = scmp.ne.s32.totalorder %s1077_s15, 2 }
  0x19   : > { %706 = vmatprep.mubr.bf16.mxu1 %v1088_v3  ;;  %633 = vmatprep.subr.bf16.mxu0 %v988_v1  ;;  %v991_v4 = vld [vmem:[%s1144_s28 + $0x14] ss:$8 sps:$4 sm:$0xff]   ;;  %v993_v5 = vld [vmem:[%s1144_s28 + $0x10] ss:$8 sps:$4 sm:$0xff]   ;;  %v994_v6 = vld [vmem:[%s1144_s28 + $0x24] ss:$8 sps:$4 sm:$0xff]  }
  0x1a   : > { %634 = vmatpush1.bf16.msra.mxu0 %v990_v2  ;;  %v996_v7 = vld [vmem:[%s1144_s28 + $0x20] ss:$8 sps:$4 sm:$0xff]   ;;  %v997_v8 = vld [vmem:[%s1144_s28 + $0x34] ss:$8 sps:$4 sm:$0xff]   ;;  %v999_v9 = vld [vmem:[%s1144_s28 + $0x30] ss:$8 sps:$4 sm:$0xff]  }
  0x1b   : > { %635 = vmatprep.subr.bf16.mxu0 %v991_v4  ;;  %v1012_v10 = vld [vmem:[%s1144_s28 + $0x104] ss:$8 sps:$4 sm:$0xff]   ;;  %v1014_v11 = vld [vmem:[%s1144_s28 + $0x100] ss:$8 sps:$4 sm:$0xff]   ;;  %v1018_v13 = vld [vmem:[%s1144_s28 + $0x114] ss:$8 sps:$4 sm:$0xff]   ;;  %v727_v4 = vlaneseq (!%p954_p7) }
  0x1c   : > { %v1000_v12 = vld [vmem:[%s1144_s28 + $0x44] ss:$8 sps:$4 sm:$0xff]   ;;  %674 = vmatprep.subr.bf16.mxu1 %v1012_v10  ;;  %v1020_v14 = vld [vmem:[%s1144_s28 + $0x110] ss:$8 sps:$4 sm:$0xff]   ;;  %v1002_v15 = vld [vmem:[%s1144_s28 + $0x40] ss:$8 sps:$4 sm:$0xff]  }
  0x1d   : > { %675 = vmatpush1.bf16.msra.mxu1 %v1014_v11  ;;  %v1003_v16 = vld [vmem:[%s1144_s28 + $0x54] ss:$8 sps:$4 sm:$0xff]   ;;  %v1024_v17 = vld [vmem:[%s1144_s28 + $0x124] ss:$8 sps:$4 sm:$0xff]   ;;  %v1026_v18 = vld [vmem:[%s1144_s28 + $0x120] ss:$8 sps:$4 sm:$0xff]  }
  0x1e   : > { %636 = vmatpush1.bf16.msra.mxu0 %v993_v5  ;;  %676 = vmatprep.subr.bf16.mxu1 %v1018_v13  ;;  %v1005_v19 = vld [vmem:[%s1144_s28 + $0x50] ss:$8 sps:$4 sm:$0xff]   ;;  %v1030_v20 = vld [vmem:[%s1144_s28 + $0x134] ss:$8 sps:$4 sm:$0xff]   ;;  %v1006_v21 = vld [vmem:[%s1144_s28 + $0x64] ss:$8 sps:$4 sm:$0xff]  }
  0x1f   : > { %637 = vmatprep.subr.bf16.mxu0 %v994_v6  ;;  %v1032_v22 = vld [vmem:[%s1144_s28 + $0x130] ss:$8 sps:$4 sm:$0xff]   ;;  %v1008_v23 = vld [vmem:[%s1144_s28 + $0x60] ss:$8 sps:$4 sm:$0xff]   ;;  %v1036_v24 = vld [vmem:[%s1144_s28 + $0x144] ss:$8 sps:$4 sm:$0xff]  }
  0x20   : > { %v1009_v25 = vld [vmem:[%s1144_s28 + $0x74] ss:$8 sps:$4 sm:$0xff]   ;;  %v1038_v26 = vld [vmem:[%s1144_s28 + $0x140] ss:$8 sps:$4 sm:$0xff]   ;;  %v1011_v27 = vld [vmem:[%s1144_s28 + $0x70] ss:$8 sps:$4 sm:$0xff]  }
  0x21   : > { %677 = vmatpush1.bf16.msra.mxu1 %v1020_v14  ;;  %v1042_v28 = vld [vmem:[%s1144_s28 + $0x154] ss:$8 sps:$4 sm:$0xff]   ;;  %v1015_v29 = vld [vmem:[%s1144_s28 + $0x84] ss:$8 sps:$4 sm:$0xff]   ;;  %v1044_v30 = vld [vmem:[%s1144_s28 + $0x150] ss:$8 sps:$4 sm:$0xff]  }
  0x22   : > { %638 = vmatpush1.bf16.msra.mxu0 %v996_v7  ;;  %678 = vmatprep.subr.bf16.mxu1 %v1024_v17  ;;  %v1017_v31 = vld [vmem:[%s1144_s28 + $0x80] ss:$8 sps:$4 sm:$0xff]   ;;  %v1048_v32 = vld [vmem:[%s1144_s28 + $0x164] ss:$8 sps:$4 sm:$0xff]   ;;  %v1021_v33 = vld [vmem:[%s1144_s28 + $0x94] ss:$8 sps:$4 sm:$0xff]  }
  0x23   : > { %639 = vmatprep.subr.bf16.mxu0 %v997_v8  ;;  %v332_v34 = vld [vmem:[%s1139_s24] sm:$0xff]  ;;  %v1023_v37 = vld [vmem:[%s1144_s28 + $0x90] ss:$8 sps:$4 sm:$0xff]   ;;  %v1054_v38 = vld [vmem:[%s1144_s28 + $0x174] ss:$8 sps:$4 sm:$0xff]   ;;  %v728_v5 = vshrl.u32 (!%p954_p7), %v727_v4, 7 }
  0x24   : > { %v904_v35 = vcombine.high %v332_v34, %v332_v34  ;;  %v1050_v36 = vld [vmem:[%s1144_s28 + $0x160] ss:$8 sps:$4 sm:$0xff]   ;;  %v1027_v39 = vld [vmem:[%s1144_s28 + $0xa4] ss:$8 sps:$4 sm:$0xff]   ;;  %v1056_v40 = vld [vmem:[%s1144_s28 + $0x170] ss:$8 sps:$4 sm:$0xff]   ;;  %v903_v53 = vcombine.low %v332_v34, %v332_v34 }
  0x25   : > { %679 = vmatpush1.bf16.msra.mxu1 %v1026_v18  ;;  %v1029_v41 = vld [vmem:[%s1144_s28 + $0xa0] ss:$8 sps:$4 sm:$0xff]   ;;  %v1033_v42 = vld [vmem:[%s1144_s28 + $0xb4] ss:$8 sps:$4 sm:$0xff]   ;;  %v1035_v44 = vld [vmem:[%s1144_s28 + $0xb0] ss:$8 sps:$4 sm:$0xff]  }
  0x26   : > { %640 = vmatpush1.bf16.msra.mxu0 %v999_v9  ;;  %680 = vmatprep.subr.bf16.mxu1 %v1030_v20  ;;  %v1060_v43 = vld [vmem:[%s1139_s24 + $0x8] ss:$0 sps:$4 sm:$0xff]   ;;  %v1039_v45 = vld [vmem:[%s1144_s28 + $0xc4] ss:$8 sps:$4 sm:$0xff]   ;;  %v1045_v47 = vld [vmem:[%s1144_s28 + $0xd4] ss:$8 sps:$4 sm:$0xff]  }
  0x27   : > { %641 = vmatprep.subr.bf16.mxu0 %v1000_v12  ;;  %665 = vmatprep.mubr.bf16.mxu0 %v904_v35  ;;  %v1041_v46 = vld [vmem:[%s1144_s28 + $0xc0] ss:$8 sps:$4 sm:$0xff]   ;;  %v1047_v48 = vld [vmem:[%s1144_s28 + $0xd0] ss:$8 sps:$4 sm:$0xff]   ;;  %v1051_v49 = vld [vmem:[%s1144_s28 + $0xe4] ss:$8 sps:$4 sm:$0xff]  }
  0x28   : > { %v1053_v50 = vld [vmem:[%s1144_s28 + $0xe0] ss:$8 sps:$4 sm:$0xff]   ;;  %v1057_v51 = vld [vmem:[%s1144_s28 + $0xf4] ss:$8 sps:$4 sm:$0xff]   ;;  %v1059_v52 = vld [vmem:[%s1144_s28 + $0xf0] ss:$8 sps:$4 sm:$0xff]  }
  0x29   : > { %681 = vmatpush1.bf16.msra.mxu1 %v1032_v22  ;;  %v330_v58 = vld [vmem:[#allocation2] sm:$0xff]  ;;  %v331_v61 = vld [vmem:[#allocation2 + $0x8] sm:$0xff]  ;;  %v729_v8 = vsub.s32 (!%p954_p7), 0, %v728_v5  ;;  %v733_v9 = vsub.s32 (!%p954_p7), 1, %v728_v5 }
  0x2a   : > { %642 = vmatpush1.bf16.msra.mxu0 %v1002_v15  ;;  %682 = vmatprep.subr.bf16.mxu1 %v1036_v24  ;;  %v725_v6 = vld [vmem:[%s1218_s2] sm:$0x3] (!%p954_p7) }
  0x2b   : > { %643 = vmatprep.subr.bf16.mxu0 %v1003_v16  ;;  %v739_v7 = vld [vmem:[%s1219_s3] sm:$0x3] (!%p954_p7)  ;;  %v730_v12 = vrot.slane (!%p954_p7), %v725_v6, %v729_v8  ;;  %v734_v13 = vrot.slane (!%p954_p7), %v725_v6, %v733_v9 }
  0x2c   : > { %v744_v14 = vrot.slane (!%p954_p7), %v739_v7, %v729_v8  ;;  %v748_v15 = vrot.slane (!%p954_p7), %v739_v7, %v733_v9 }
  0x2d   : > { %683 = vmatpush1.bf16.msra.mxu1 %v1038_v26 }
  0x2e   : > { %644 = vmatpush1.bf16.msra.mxu0 %v1005_v19  ;;  %684 = vmatprep.subr.bf16.mxu1 %v1042_v28 }
  0x2f   : > { %645 = vmatprep.subr.bf16.mxu0 %v1006_v21 }
  0x31   : > { %685 = vmatpush1.bf16.msra.mxu1 %v1044_v30 }
  0x32   : > { %646 = vmatpush1.bf16.msra.mxu0 %v1008_v23  ;;  %686 = vmatprep.subr.bf16.mxu1 %v1048_v32 }
  0x33   : > { %647 = vmatprep.subr.bf16.mxu0 %v1009_v25 }
  0x35   : > { %687 = vmatpush1.bf16.msra.mxu1 %v1050_v36 }
  0x36   : > { %648 = vmatpush1.bf16.msra.mxu0 %v1011_v27  ;;  %688 = vmatprep.subr.bf16.mxu1 %v1054_v38 }
  0x37   : > { %649 = vmatprep.subr.bf16.mxu0 %v1015_v29 }
  0x39   : > { %689 = vmatpush1.bf16.msra.mxu1 %v1056_v40 }
  0x3a   : > { %650 = vmatpush1.bf16.msra.mxu0 %v1017_v31 }
  0x3b   : > { %651 = vmatprep.subr.bf16.mxu0 %v1021_v33 }
  0x3c   : > { %707 = vmatmul.mubr.bf16.vlgmr.msra.gmra.mrb[0].mxu1 %v1060_v43 }
  0x3e   : > { %652 = vmatpush1.bf16.msra.mxu0 %v1023_v37 }
  0x3f   : > { %653 = vmatprep.subr.bf16.mxu0 %v1027_v39 }
  0x42   : > { %654 = vmatpush1.bf16.msra.mxu0 %v1029_v41 }
  0x43   : > { %655 = vmatprep.subr.bf16.mxu0 %v1033_v42 }
  0x46   : > { %656 = vmatpush1.bf16.msra.mxu0 %v1035_v44 }
  0x47   : > { %657 = vmatprep.subr.bf16.mxu0 %v1039_v45 }
  0x4a   : > { %658 = vmatpush1.bf16.msra.mxu0 %v1041_v46 }
  0x4b   : > { %659 = vmatprep.subr.bf16.mxu0 %v1045_v47 }
  0x4e   : > { %660 = vmatpush1.bf16.msra.mxu0 %v1047_v48 }
  0x4f   : > { %661 = vmatprep.subr.bf16.mxu0 %v1051_v49 }
  0x52   : > { %662 = vmatpush1.bf16.msra.mxu0 %v1053_v50 }
  0x53   : > { %663 = vmatprep.subr.bf16.mxu0 %v1057_v51 }
  0x56   : > { %664 = vmatpush1.bf16.msra.mxu0 %v1059_v52 }
  0x59   : > { %666 = vmatmul.mubr.bf16.vlgmr.msra.gmra.mrb[0].mxu0 %v903_v53 }
 0x10f   : > { %v708_v54 = vpop.f32.mrb[0].mxu1 }
 0x110   : > { %v710_v55 = vpop.f32.mrb[1].mxu1 }
 0x111   : > { %v712_v56 = vpop.f32.mrb[2].mxu1 }
 0x112   : > { %v713_v57 = vpop.f32.mrb[3].mxu1 }
 0x12c   : > { %v667_v59 = vpop.f32.mrb[0].mxu0  ;;  %722 = sbr.rel (%p954_p7) target bundleno = 323 (0x143), region = 44 }
 0x12d   : > { %v709_v60 = vadd.f32 %v708_v54, %v667_v59  ;;  %v669_v62 = vpop.f32.mrb[1].mxu0 }
 0x12e   : > { %v711_v63 = vadd.f32 %v710_v55, %v669_v62  ;;  %v671_v0 = vpop.f32.mrb[2].mxu0 }
 0x12f   : > { %v715_v1 = vadd.f32 %v709_v60, %v330_v58  ;;  %v672_v2 = vpop.f32.mrb[3].mxu0 }
 0x130   : > { %v716_v3 = vadd.f32 %v711_v63, %v331_v61 }
 0x131   : > { %717 = vst [vmem:[#allocation2] sm:$0xff] %v715_v1 }
 0x132   : > { %718 = vst [vmem:[#allocation2 + $0x8] sm:$0xff] %v716_v3 }
 0x138   : > { %v723_v10 = vld [vmem:[#allocation2] sm:$0xff] }
 0x139   : > { %v724_v11 = vld [vmem:[#allocation2 + $0x8] sm:$0xff]  ;;  %v737_v16 = vmul.f32 %v730_v12, %v723_v10 }
 0x13a   : > { %v738_v17 = vmul.f32 %v734_v13, %v724_v11 }
 0x13b   : > { %v751_v18 = vadd.f32 %v744_v14, %v737_v16 }
 0x13c   : > { %v752_v19 = vadd.f32 %v748_v15, %v738_v17 }
 0x13d   : > { %v753_v20 = vmax.f32 %v751_v18, 0.0 }
 0x13e   : > { %v754_v21 = vmax.f32 %v752_v19, 0.0 }
 0x140   : > { %v961_v22 = vpack.c.bf16 %v754_v21, %v753_v20 }
 0x142   : > { %763 = vst [vmem:[%s1220_s4] sm:$0xff] %v961_v22 }
 0x143 PF: > { %s14_s17 = sadd.s32 1, %s1085_s17   ;;  %s1221_s15 = smov %s1081_s16 }
 0x144   : > { %p11_p8 = scmp.ge.s32.totalorder %s14_s17, 5   ;;  %s1222_s16 = smov %s1224_s18 }
 0x146   :  { %13 = sbr.rel (!%p11_p8) target bundleno = 2 (0x2), region = 83 }

// kernel: _lambda_.32
= control target key start
LH: loop header
LB: loop body
LE: loop exit
PB: predicated region body
PF: predicated region fallthrough
CT: control target
= control target key end

     0   :  { %v257_v1 = vmov 0   ;;  %v175_v18 = vlaneseq  ;;  %s343_s1 = inlined_call_operand.vmem [shape: bf16[128,256], index: 1, kind: input, shape index: {}]   ;;  %s344_s0 = inlined_call_operand.vmem [shape: bf16[8,128], index: 0, kind: input, shape index: {}]   ;;  %s345_s2 = inlined_call_operand.vmem [shape: f32[1,256], index: 2, kind: input, shape index: {}]   ;;  %s346_s3 = inlined_call_operand.vmem [shape: f32[1,256], index: 3, kind: input, shape index: {}]   ;;  %s347_s4 = inlined_call_operand.vmem [shape: bf16[8,256], index: 4, kind: output, shape index: {}]  }
   0x1   :  { %v233_v0 = vld [vmem:[%s343_s1 + $0x4] ss:$8 sps:$4 sm:$0xff]   ;;  %155 = vmatprep.mubr.bf16.mxu0 %v257_v1  ;;  %v235_v2 = vld [vmem:[%s343_s1] ss:$8 sps:$4 sm:$0xff]   ;;  %v236_v3 = vld [vmem:[%s343_s1 + $0x14] ss:$8 sps:$4 sm:$0xff]  }
   0x2   :  { %123 = vmatprep.subr.bf16.mxu0 %v233_v0  ;;  %v238_v4 = vld [vmem:[%s343_s1 + $0x10] ss:$8 sps:$4 sm:$0xff]   ;;  %v239_v5 = vld [vmem:[%s343_s1 + $0x24] ss:$8 sps:$4 sm:$0xff]   ;;  %v241_v6 = vld [vmem:[%s343_s1 + $0x20] ss:$8 sps:$4 sm:$0xff]  }
   0x3   :  { %124 = vmatpush1.bf16.msra.mxu0 %v235_v2  ;;  %v242_v7 = vld [vmem:[%s343_s1 + $0x34] ss:$8 sps:$4 sm:$0xff]   ;;  %v244_v8 = vld [vmem:[%s343_s1 + $0x30] ss:$8 sps:$4 sm:$0xff]   ;;  %v245_v9 = vld [vmem:[%s343_s1 + $0x44] ss:$8 sps:$4 sm:$0xff]  }
   0x4   :  { %125 = vmatprep.subr.bf16.mxu0 %v236_v3  ;;  %v247_v10 = vld [vmem:[%s343_s1 + $0x40] ss:$8 sps:$4 sm:$0xff]   ;;  %v248_v11 = vld [vmem:[%s343_s1 + $0x54] ss:$8 sps:$4 sm:$0xff]   ;;  %v250_v12 = vld [vmem:[%s343_s1 + $0x50] ss:$8 sps:$4 sm:$0xff]  }
   0x5   :  { %v251_v13 = vld [vmem:[%s343_s1 + $0x64] ss:$8 sps:$4 sm:$0xff]   ;;  %v253_v14 = vld [vmem:[%s343_s1 + $0x60] ss:$8 sps:$4 sm:$0xff]   ;;  %v254_v15 = vld [vmem:[%s343_s1 + $0x74] ss:$8 sps:$4 sm:$0xff]  }
   0x6   :  { %v256_v16 = vld [vmem:[%s343_s1 + $0x70] ss:$8 sps:$4 sm:$0xff]   ;;  %v26_v17 = vld [vmem:[%s344_s0] sm:$0xf]  ;;  %v176_v19 = vshrl.u32 %v175_v18, 7 }
   0x7   :  { %126 = vmatpush1.bf16.msra.mxu0 %v238_v4  ;;  %v173_v21 = vld [vmem:[%s345_s2] sm:$0x3] }
   0x8   :  { %127 = vmatprep.subr.bf16.mxu0 %v239_v5  ;;  %v177_v20 = vsub.s32 0, %v176_v19  ;;  %v181_v22 = vsub.s32 1, %v176_v19  ;;  %v187_v23 = vld [vmem:[%s346_s3] sm:$0x3] }
   0xa   :  { %v178_v24 = vrot.slane %v173_v21, %v177_v20  ;;  %v182_v25 = vrot.slane %v173_v21, %v181_v22  ;;  %v192_v26 = vrot.slane %v187_v23, %v177_v20  ;;  %v196_v28 = vrot.slane %v187_v23, %v181_v22 }
   0xb   :  { %128 = vmatpush1.bf16.msra.mxu0 %v241_v6 }
   0xc   :  { %129 = vmatprep.subr.bf16.mxu0 %v242_v7 }
   0xf   :  { %130 = vmatpush1.bf16.msra.mxu0 %v244_v8 }
  0x10   :  { %131 = vmatprep.subr.bf16.mxu0 %v245_v9 }
  0x13   :  { %132 = vmatpush1.bf16.msra.mxu0 %v247_v10 }
  0x14   :  { %133 = vmatprep.subr.bf16.mxu0 %v248_v11 }
  0x17   :  { %134 = vmatpush1.bf16.msra.mxu0 %v250_v12 }
  0x18   :  { %135 = vmatprep.subr.bf16.mxu0 %v251_v13 }
  0x1b   :  { %136 = vmatpush1.bf16.msra.mxu0 %v253_v14 }
  0x1c   :  { %137 = vmatprep.subr.bf16.mxu0 %v254_v15 }
  0x1f   :  { %138 = vmatpush1.bf16.msra.mxu0 %v256_v16 }
  0x22   :  { %156 = vmatmul.mubr.bf16.vlgmr.msra.gmra.mrb[0].mxu0 %v26_v17 }
  0xf5   :  { %v157_v27 = vpop.f32.mrb[0].mxu0 }
  0xf6   :  { %v185_v29 = vmul.f32 %v178_v24, %v157_v27  ;;  %v159_v30 = vpop.f32.mrb[1].mxu0 }
  0xf7   :  { %v186_v31 = vmul.f32 %v182_v25, %v159_v30  ;;  %v161_v32 = vpop.f32.mrb[2].mxu0 }
  0xf8   :  { %v199_v33 = vadd.f32 %v192_v26, %v185_v29  ;;  %v162_v34 = vpop.f32.mrb[3].mxu0 }
  0xf9   :  { %v200_v35 = vadd.f32 %v196_v28, %v186_v31 }
  0xfb   :  { %v231_v36 = vpack.c.bf16 %v200_v35, %v199_v33 }
  0xfd   :  { %209 = vst [vmem:[%s347_s4] sm:$0xff] %v231_v36 }

// kernel: _lambda_.33
= control target key start
LH: loop header
LB: loop body
LE: loop exit
PB: predicated region body
PF: predicated region fallthrough
CT: control target
= control target key end

     0   :  { %s1209_s18 = smov 0   ;;  %s1211_s19 = smov 0   ;;  %s1314_s0 = inlined_call_operand.vmem [shape: bf16[8,2304], index: 0, kind: input, shape index: {}]   ;;  %s1315_s1 = inlined_call_operand.vmem [shape: bf16[2304,256], index: 1, kind: input, shape index: {}]   ;;  %s1316_s2 = inlined_call_operand.vmem [shape: f32[1,256], index: 2, kind: input, shape index: {}]   ;;  %s1317_s3 = inlined_call_operand.vmem [shape: f32[1,256], index: 3, kind: input, shape index: {}]   ;;  %s1318_s4 = inlined_call_operand.vmem [shape: bf16[8,256], index: 4, kind: input, shape index: {}]   ;;  %s1319_s5 = inlined_call_operand.vmem [shape: bf16[8,256], index: 5, kind: output, shape index: {}]  }
   0x1   :  { %s1213_s20 = smov 0  }
   0x2 LB: > { %s27_s21 = sadd.s32 1, %s1171_s19  ;;  %p988_p0 = scmp.ge.s32.totalorder %s1175_s20, 1  ;;  %s1175_s20 = sphi %s1213_s20, %s15_s20   ;;  %s1171_s19 = sphi %s1211_s19, %s1321_s19   ;;  %s1167_s18 = sphi %s1209_s18, %s1320_s18  }
   0x3   : > { %p28_p1 = scmp.ge.s32.totalorder %s27_s21, 6  ;;  %p271_p2 = scmp.lt.s32.totalorder %s1175_s20, 7 }
   0x5   : > { %s1323_s21 = smov (%p28_p1, %s27_s21), 0  ;;  %p272_p3 = pnand %p988_p0, %p271_p2 }
   0x6   : > { %s334_s22 = smul.u32 (!%p272_p3), 3, %s1167_s18  ;;  %p992_p6 = scmp.ne.s32.totalorder (!%p272_p3), %s1167_s18, 0 }
   0x7   : > { %275 = sbr.rel (%p272_p3) target bundleno = 325 (0x145), region = 40 }
   0x8   : > { %s344_s23 = smul.u32 (!%p272_p3), 48, %s1167_s18  ;;  %p337_p4 = scmp.lt.s32.totalorder (!%p272_p3), %s334_s22, 17 }
   0xa   : > { %p346_p5 = scmp.lt.s32.totalorder (!%p272_p3), %s344_s23, 287 }
   0xe   : > { %s1325_s22 = smov (!%p337_p4, %s334_s22), 17  ;;  %s1327_s23 = smov (!%p346_p5, %s344_s23), 287 }
   0xf   : > { %s989_s24 = sshll.u32 %s1325_s22, 2  ;;  %s1050_s28 = sshll.u32 %s1327_s23, 3  ;;  %v1177_v0 = vmov (!%p992_p6), 0.0  }
  0x10   : > { %s1234_s27 = scalar_lea.vmem %s1314_s0, %s989_s24  ;;  %s1239_s6 = scalar_lea.vmem %s1315_s1, %s1050_s28  ;;  %391 = vst [vmem:[#allocation2] sm:$0xff] (!%p992_p6), %v1177_v0  ;;  %392 = vst [vmem:[#allocation2 + $0x8] sm:$0xff] (!%p992_p6), %v1177_v0 }
  0x11   : > { %390 = sbr.rel (%p992_p6) target bundleno = 24 (0x18), region = 44 }
  0x18 PF: > { %v1078_v1 = vld [vmem:[%s1239_s6 + $0x4] ss:$8 sps:$4 sm:$0xff]   ;;  %v1080_v2 = vld [vmem:[%s1239_s6] ss:$8 sps:$4 sm:$0xff]   ;;  %v1178_v3 = vmov 0   ;;  %p1044_p7 = scmp.ne.s32.totalorder %s1167_s18, 5 }
  0x19   : > { %769 = vmatprep.mubr.bf16.mxu1 %v1178_v3  ;;  %696 = vmatprep.subr.bf16.mxu0 %v1078_v1  ;;  %v1081_v4 = vld [vmem:[%s1239_s6 + $0x14] ss:$8 sps:$4 sm:$0xff]   ;;  %v1083_v5 = vld [vmem:[%s1239_s6 + $0x10] ss:$8 sps:$4 sm:$0xff]   ;;  %v1084_v6 = vld [vmem:[%s1239_s6 + $0x24] ss:$8 sps:$4 sm:$0xff]  }
  0x1a   : > { %697 = vmatpush1.bf16.msra.mxu0 %v1080_v2  ;;  %v1086_v7 = vld [vmem:[%s1239_s6 + $0x20] ss:$8 sps:$4 sm:$0xff]   ;;  %v1087_v8 = vld [vmem:[%s1239_s6 + $0x34] ss:$8 sps:$4 sm:$0xff]   ;;  %v1089_v9 = vld [vmem:[%s1239_s6 + $0x30] ss:$8 sps:$4 sm:$0xff]  }
  0x1b   : > { %698 = vmatprep.subr.bf16.mxu0 %v1081_v4  ;;  %v1102_v10 = vld [vmem:[%s1239_s6 + $0x104] ss:$8 sps:$4 sm:$0xff]   ;;  %v1104_v11 = vld [vmem:[%s1239_s6 + $0x100] ss:$8 sps:$4 sm:$0xff]   ;;  %v1108_v13 = vld [vmem:[%s1239_s6 + $0x114] ss:$8 sps:$4 sm:$0xff]   ;;  %v790_v4 = vlaneseq (!%p1044_p7) }
  0x1c   : > { %v1090_v12 = vld [vmem:[%s1239_s6 + $0x44] ss:$8 sps:$4 sm:$0xff]   ;;  %737 = vmatprep.subr.bf16.mxu1 %v1102_v10  ;;  %v1110_v14 = vld [vmem:[%s1239_s6 + $0x110] ss:$8 sps:$4 sm:$0xff]   ;;  %v1092_v15 = vld [vmem:[%s1239_s6 + $0x40] ss:$8 sps:$4 sm:$0xff]  }
  0x1d   : > { %738 = vmatpush1.bf16.msra.mxu1 %v1104_v11  ;;  %v1093_v16 = vld [vmem:[%s1239_s6 + $0x54] ss:$8 sps:$4 sm:$0xff]   ;;  %v1114_v17 = vld [vmem:[%s1239_s6 + $0x124] ss:$8 sps:$4 sm:$0xff]   ;;  %v1116_v18 = vld [vmem:[%s1239_s6 + $0x120] ss:$8 sps:$4 sm:$0xff]  }
  0x1e   : > { %699 = vmatpush1.bf16.msra.mxu0 %v1083_v5  ;;  %739 = vmatprep.subr.bf16.mxu1 %v1108_v13  ;;  %v1095_v19 = vld [vmem:[%s1239_s6 + $0x50] ss:$8 sps:$4 sm:$0xff]   ;;  %v1120_v20 = vld [vmem:[%s1239_s6 + $0x134] ss:$8 sps:$4 sm:$0xff]   ;;  %v1096_v21 = vld [vmem:[%s1239_s6 + $0x64] ss:$8 sps:$4 sm:$0xff]  }
  0x1f   : > { %700 = vmatprep.subr.bf16.mxu0 %v1084_v6  ;;  %v1122_v22 = vld [vmem:[%s1239_s6 + $0x130] ss:$8 sps:$4 sm:$0xff]   ;;  %v1098_v23 = vld [vmem:[%s1239_s6 + $0x60] ss:$8 sps:$4 sm:$0xff]   ;;  %v1126_v24 = vld [vmem:[%s1239_s6 + $0x144] ss:$8 sps:$4 sm:$0xff]  }
  0x20   : > { %v1099_v25 = vld [vmem:[%s1239_s6 + $0x74] ss:$8 sps:$4 sm:$0xff]   ;;  %v1128_v26 = vld [vmem:[%s1239_s6 + $0x140] ss:$8 sps:$4 sm:$0xff]   ;;  %v1101_v27 = vld [vmem:[%s1239_s6 + $0x70] ss:$8 sps:$4 sm:$0xff]  }
  0x21   : > { %740 = vmatpush1.bf16.msra.mxu1 %v1110_v14  ;;  %v1132_v28 = vld [vmem:[%s1239_s6 + $0x154] ss:$8 sps:$4 sm:$0xff]   ;;  %v1105_v29 = vld [vmem:[%s1239_s6 + $0x84] ss:$8 sps:$4 sm:$0xff]   ;;  %v1134_v30 = vld [vmem:[%s1239_s6 + $0x150] ss:$8 sps:$4 sm:$0xff]  }
  0x22   : > { %701 = vmatpush1.bf16.msra.mxu0 %v1086_v7  ;;  %741 = vmatprep.subr.bf16.mxu1 %v1114_v17  ;;  %v1107_v31 = vld [vmem:[%s1239_s6 + $0x80] ss:$8 sps:$4 sm:$0xff]   ;;  %v1138_v32 = vld [vmem:[%s1239_s6 + $0x164] ss:$8 sps:$4 sm:$0xff]   ;;  %v1111_v33 = vld [vmem:[%s1239_s6 + $0x94] ss:$8 sps:$4 sm:$0xff]  }
  0x23   : > { %702 = vmatprep.subr.bf16.mxu0 %v1087_v8  ;;  %v395_v34 = vld [vmem:[%s1234_s27] sm:$0xff]  ;;  %v1113_v37 = vld [vmem:[%s1239_s6 + $0x90] ss:$8 sps:$4 sm:$0xff]   ;;  %v1144_v38 = vld [vmem:[%s1239_s6 + $0x174] ss:$8 sps:$4 sm:$0xff]   ;;  %v791_v5 = vshrl.u32 (!%p1044_p7), %v790_v4, 7 }
  0x24   : > { %v994_v35 = vcombine.high %v395_v34, %v395_v34  ;;  %v1140_v36 = vld [vmem:[%s1239_s6 + $0x160] ss:$8 sps:$4 sm:$0xff]   ;;  %v1117_v39 = vld [vmem:[%s1239_s6 + $0xa4] ss:$8 sps:$4 sm:$0xff]   ;;  %v1146_v40 = vld [vmem:[%s1239_s6 + $0x170] ss:$8 sps:$4 sm:$0xff]   ;;  %v993_v53 = vcombine.low %v395_v34, %v395_v34 }
  0x25   : > { %742 = vmatpush1.bf16.msra.mxu1 %v1116_v18  ;;  %v1119_v41 = vld [vmem:[%s1239_s6 + $0xa0] ss:$8 sps:$4 sm:$0xff]   ;;  %v1123_v42 = vld [vmem:[%s1239_s6 + $0xb4] ss:$8 sps:$4 sm:$0xff]   ;;  %v1125_v44 = vld [vmem:[%s1239_s6 + $0xb0] ss:$8 sps:$4 sm:$0xff]  }
  0x26   : > { %703 = vmatpush1.bf16.msra.mxu0 %v1089_v9  ;;  %743 = vmatprep.subr.bf16.mxu1 %v1120_v20  ;;  %v1150_v43 = vld [vmem:[%s1234_s27 + $0x8] ss:$0 sps:$4 sm:$0xff]   ;;  %v1129_v45 = vld [vmem:[%s1239_s6 + $0xc4] ss:$8 sps:$4 sm:$0xff]   ;;  %v1135_v47 = vld [vmem:[%s1239_s6 + $0xd4] ss:$8 sps:$4 sm:$0xff]  }
  0x27   : > { %704 = vmatprep.subr.bf16.mxu0 %v1090_v12  ;;  %728 = vmatprep.mubr.bf16.mxu0 %v994_v35  ;;  %v1131_v46 = vld [vmem:[%s1239_s6 + $0xc0] ss:$8 sps:$4 sm:$0xff]   ;;  %v1137_v48 = vld [vmem:[%s1239_s6 + $0xd0] ss:$8 sps:$4 sm:$0xff]   ;;  %v1141_v49 = vld [vmem:[%s1239_s6 + $0xe4] ss:$8 sps:$4 sm:$0xff]  }
  0x28   : > { %v1143_v50 = vld [vmem:[%s1239_s6 + $0xe0] ss:$8 sps:$4 sm:$0xff]   ;;  %v1147_v51 = vld [vmem:[%s1239_s6 + $0xf4] ss:$8 sps:$4 sm:$0xff]   ;;  %v1149_v52 = vld [vmem:[%s1239_s6 + $0xf0] ss:$8 sps:$4 sm:$0xff]  }
  0x29   : > { %744 = vmatpush1.bf16.msra.mxu1 %v1122_v22  ;;  %v393_v58 = vld [vmem:[#allocation2] sm:$0xff]  ;;  %v394_v61 = vld [vmem:[#allocation2 + $0x8] sm:$0xff]  ;;  %v792_v8 = vsub.s32 (!%p1044_p7), 0, %v791_v5  ;;  %v796_v9 = vsub.s32 (!%p1044_p7), 1, %v791_v5 }
  0x2a   : > { %705 = vmatpush1.bf16.msra.mxu0 %v1092_v15  ;;  %745 = vmatprep.subr.bf16.mxu1 %v1126_v24  ;;  %v788_v6 = vld [vmem:[%s1316_s2] sm:$0x3] (!%p1044_p7) }
  0x2b   : > { %706 = vmatprep.subr.bf16.mxu0 %v1093_v16  ;;  %v802_v7 = vld [vmem:[%s1317_s3] sm:$0x3] (!%p1044_p7)  ;;  %v793_v13 = vrot.slane (!%p1044_p7), %v788_v6, %v792_v8  ;;  %v797_v14 = vrot.slane (!%p1044_p7), %v788_v6, %v796_v9 }
  0x2c   : > { %v816_v12 = vld [vmem:[%s1318_s4] sm:$0xff] (!%p1044_p7)  ;;  %v807_v15 = vrot.slane (!%p1044_p7), %v802_v7, %v792_v8  ;;  %v811_v16 = vrot.slane (!%p1044_p7), %v802_v7, %v796_v9 }
  0x2d   : > { %746 = vmatpush1.bf16.msra.mxu1 %v1128_v26  ;;  %v818_v20 = vunpack.c.h.bf16 (!%p1044_p7), %v816_v12 }
  0x2e   : > { %707 = vmatpush1.bf16.msra.mxu0 %v1095_v19  ;;  %747 = vmatprep.subr.bf16.mxu1 %v1132_v28  ;;  %v817_v19 = vunpack.c.l.bf16 (!%p1044_p7), %v816_v12 }
  0x2f   : > { %708 = vmatprep.subr.bf16.mxu0 %v1096_v21 }
  0x31   : > { %748 = vmatpush1.bf16.msra.mxu1 %v1134_v30 }
  0x32   : > { %709 = vmatpush1.bf16.msra.mxu0 %v1098_v23  ;;  %749 = vmatprep.subr.bf16.mxu1 %v1138_v32 }
  0x33   : > { %710 = vmatprep.subr.bf16.mxu0 %v1099_v25 }
  0x35   : > { %750 = vmatpush1.bf16.msra.mxu1 %v1140_v36 }
  0x36   : > { %711 = vmatpush1.bf16.msra.mxu0 %v1101_v27  ;;  %751 = vmatprep.subr.bf16.mxu1 %v1144_v38 }
  0x37   : > { %712 = vmatprep.subr.bf16.mxu0 %v1105_v29 }
  0x39   : > { %752 = vmatpush1.bf16.msra.mxu1 %v1146_v40 }
  0x3a   : > { %713 = vmatpush1.bf16.msra.mxu0 %v1107_v31 }
  0x3b   : > { %714 = vmatprep.subr.bf16.mxu0 %v1111_v33 }
  0x3c   : > { %770 = vmatmul.mubr.bf16.vlgmr.msra.gmra.mrb[0].mxu1 %v1150_v43 }
  0x3e   : > { %715 = vmatpush1.bf16.msra.mxu0 %v1113_v37 }
  0x3f   : > { %716 = vmatprep.subr.bf16.mxu0 %v1117_v39 }
  0x42   : > { %717 = vmatpush1.bf16.msra.mxu0 %v1119_v41 }
  0x43   : > { %718 = vmatprep.subr.bf16.mxu0 %v1123_v42 }
  0x46   : > { %719 = vmatpush1.bf16.msra.mxu0 %v1125_v44 }
  0x47   : > { %720 = vmatprep.subr.bf16.mxu0 %v1129_v45 }
  0x4a   : > { %721 = vmatpush1.bf16.msra.mxu0 %v1131_v46 }
  0x4b   : > { %722 = vmatprep.subr.bf16.mxu0 %v1135_v47 }
  0x4e   : > { %723 = vmatpush1.bf16.msra.mxu0 %v1137_v48 }
  0x4f   : > { %724 = vmatprep.subr.bf16.mxu0 %v1141_v49 }
  0x52   : > { %725 = vmatpush1.bf16.msra.mxu0 %v1143_v50 }
  0x53   : > { %726 = vmatprep.subr.bf16.mxu0 %v1147_v51 }
  0x56   : > { %727 = vmatpush1.bf16.msra.mxu0 %v1149_v52 }
  0x59   : > { %729 = vmatmul.mubr.bf16.vlgmr.msra.gmra.mrb[0].mxu0 %v993_v53 }
 0x10f   : > { %v771_v54 = vpop.f32.mrb[0].mxu1 }
 0x110   : > { %v773_v55 = vpop.f32.mrb[1].mxu1 }
 0x111   : > { %v775_v56 = vpop.f32.mrb[2].mxu1 }
 0x112   : > { %v776_v57 = vpop.f32.mrb[3].mxu1 }
 0x12c   : > { %v730_v59 = vpop.f32.mrb[0].mxu0  ;;  %785 = sbr.rel (%p1044_p7) target bundleno = 325 (0x145), region = 48 }
 0x12d   : > { %v772_v60 = vadd.f32 %v771_v54, %v730_v59  ;;  %v732_v62 = vpop.f32.mrb[1].mxu0 }
 0x12e   : > { %v774_v63 = vadd.f32 %v773_v55, %v732_v62  ;;  %v734_v0 = vpop.f32.mrb[2].mxu0 }
 0x12f   : > { %v778_v1 = vadd.f32 %v772_v60, %v393_v58  ;;  %v735_v2 = vpop.f32.mrb[3].mxu0 }
 0x130   : > { %v779_v3 = vadd.f32 %v774_v63, %v394_v61 }
 0x131   : > { %780 = vst [vmem:[#allocation2] sm:$0xff] %v778_v1 }
 0x132   : > { %781 = vst [vmem:[#allocation2 + $0x8] sm:$0xff] %v779_v3 }
 0x138   : > { %v786_v10 = vld [vmem:[#allocation2] sm:$0xff] }
 0x139   : > { %v787_v11 = vld [vmem:[#allocation2 + $0x8] sm:$0xff]  ;;  %v800_v17 = vmul.f32 %v793_v13, %v786_v10 }
 0x13a   : > { %v801_v18 = vmul.f32 %v797_v14, %v787_v11 }
 0x13b   : > { %v814_v21 = vadd.f32 %v807_v15, %v800_v17 }
 0x13c   : > { %v815_v22 = vadd.f32 %v811_v16, %v801_v18 }
 0x13d   : > { %v819_v23 = vadd.f32 %v817_v19, %v814_v21 }
 0x13e   : > { %v820_v24 = vadd.f32 %v818_v20, %v815_v22 }
 0x13f   : > { %v821_v25 = vmax.f32 %v819_v23, 0.0 }
 0x140   : > { %v822_v26 = vmax.f32 %v820_v24, 0.0 }
 0x142   : > { %v1051_v27 = vpack.c.bf16 %v822_v26, %v821_v25 }
 0x144   : > { %831 = vst [vmem:[%s1319_s5] sm:$0xff] %v1051_v27 }
 0x145 PF: > { %s15_s20 = sadd.s32 1, %s1175_s20   ;;  %s1320_s18 = smov %s1171_s19 }
 0x146   : > { %p12_p8 = scmp.ge.s32.totalorder %s15_s20, 8   ;;  %s1321_s19 = smov %s1323_s21 }
 0x148   :  { %14 = sbr.rel (!%p12_p8) target bundleno = 2 (0x2), region = 90 }

// kernel: _lambda_.34
= control target key start
LH: loop header
LB: loop body
LE: loop exit
PB: predicated region body
PF: predicated region fallthrough
CT: control target
= control target key end

     0   :  { %s1114_s15 = smov 0   ;;  %s1116_s16 = smov 0   ;;  %s1216_s0 = inlined_call_operand.vmem [shape: bf16[8,2304], index: 0, kind: input, shape index: {}]   ;;  %s1217_s1 = inlined_call_operand.vmem [shape: bf16[2304,256], index: 1, kind: input, shape index: {}]   ;;  %s1218_s2 = inlined_call_operand.vmem [shape: f32[1,256], index: 2, kind: input, shape index: {}]   ;;  %s1219_s3 = inlined_call_operand.vmem [shape: f32[1,256], index: 3, kind: input, shape index: {}]   ;;  %s1220_s4 = inlined_call_operand.vmem [shape: bf16[8,256], index: 4, kind: output, shape index: {}]  }
   0x1   :  { %s1118_s17 = smov 0  }
   0x2 LB: > { %s26_s18 = sadd.s32 1, %s1081_s16  ;;  %p898_p0 = scmp.ge.s32.totalorder %s1085_s17, 1  ;;  %s1085_s17 = sphi %s1118_s17, %s14_s17   ;;  %s1081_s16 = sphi %s1116_s16, %s1222_s16   ;;  %s1077_s15 = sphi %s1114_s15, %s1221_s15  }
   0x3   : > { %p27_p1 = scmp.ge.s32.totalorder %s26_s18, 6  ;;  %p229_p2 = scmp.lt.s32.totalorder %s1085_s17, 7 }
   0x5   : > { %s1224_s18 = smov (%p27_p1, %s26_s18), 0  ;;  %p230_p3 = pnand %p898_p0, %p229_p2 }
   0x6   : > { %s281_s19 = smul.u32 (!%p230_p3), 3, %s1077_s15  ;;  %p902_p6 = scmp.ne.s32.totalorder (!%p230_p3), %s1077_s15, 0 }
   0x7   : > { %233 = sbr.rel (%p230_p3) target bundleno = 323 (0x143), region = 36 }
   0x8   : > { %s291_s20 = smul.u32 (!%p230_p3), 48, %s1077_s15  ;;  %p284_p4 = scmp.lt.s32.totalorder (!%p230_p3), %s281_s19, 17 }
   0xa   : > { %p293_p5 = scmp.lt.s32.totalorder (!%p230_p3), %s291_s20, 287 }
   0xe   : > { %s1226_s19 = smov (!%p284_p4, %s281_s19), 17  ;;  %s1228_s20 = smov (!%p293_p5, %s291_s20), 287 }
   0xf   : > { %s899_s21 = sshll.u32 %s1226_s19, 2  ;;  %s960_s25 = sshll.u32 %s1228_s20, 3  ;;  %v1087_v0 = vmov (!%p902_p6), 0.0  }
  0x10   : > { %s1139_s24 = scalar_lea.vmem %s1216_s0, %s899_s21  ;;  %s1144_s28 = scalar_lea.vmem %s1217_s1, %s960_s25  ;;  %328 = vst [vmem:[#allocation2] sm:$0xff] (!%p902_p6), %v1087_v0  ;;  %329 = vst [vmem:[#allocation2 + $0x8] sm:$0xff] (!%p902_p6), %v1087_v0 }
  0x11   : > { %327 = sbr.rel (%p902_p6) target bundleno = 24 (0x18), region = 40 }
  0x18 PF: > { %v988_v1 = vld [vmem:[%s1144_s28 + $0x4] ss:$8 sps:$4 sm:$0xff]   ;;  %v990_v2 = vld [vmem:[%s1144_s28] ss:$8 sps:$4 sm:$0xff]   ;;  %v1088_v3 = vmov 0   ;;  %p954_p7 = scmp.ne.s32.totalorder %s1077_s15, 5 }
  0x19   : > { %706 = vmatprep.mubr.bf16.mxu1 %v1088_v3  ;;  %633 = vmatprep.subr.bf16.mxu0 %v988_v1  ;;  %v991_v4 = vld [vmem:[%s1144_s28 + $0x14] ss:$8 sps:$4 sm:$0xff]   ;;  %v993_v5 = vld [vmem:[%s1144_s28 + $0x10] ss:$8 sps:$4 sm:$0xff]   ;;  %v994_v6 = vld [vmem:[%s1144_s28 + $0x24] ss:$8 sps:$4 sm:$0xff]  }
  0x1a   : > { %634 = vmatpush1.bf16.msra.mxu0 %v990_v2  ;;  %v996_v7 = vld [vmem:[%s1144_s28 + $0x20] ss:$8 sps:$4 sm:$0xff]   ;;  %v997_v8 = vld [vmem:[%s1144_s28 + $0x34] ss:$8 sps:$4 sm:$0xff]   ;;  %v999_v9 = vld [vmem:[%s1144_s28 + $0x30] ss:$8 sps:$4 sm:$0xff]  }
  0x1b   : > { %635 = vmatprep.subr.bf16.mxu0 %v991_v4  ;;  %v1012_v10 = vld [vmem:[%s1144_s28 + $0x104] ss:$8 sps:$4 sm:$0xff]   ;;  %v1014_v11 = vld [vmem:[%s1144_s28 + $0x100] ss:$8 sps:$4 sm:$0xff]   ;;  %v1018_v13 = vld [vmem:[%s1144_s28 + $0x114] ss:$8 sps:$4 sm:$0xff]   ;;  %v727_v4 = vlaneseq (!%p954_p7) }
  0x1c   : > { %v1000_v12 = vld [vmem:[%s1144_s28 + $0x44] ss:$8 sps:$4 sm:$0xff]   ;;  %674 = vmatprep.subr.bf16.mxu1 %v1012_v10  ;;  %v1020_v14 = vld [vmem:[%s1144_s28 + $0x110] ss:$8 sps:$4 sm:$0xff]   ;;  %v1002_v15 = vld [vmem:[%s1144_s28 + $0x40] ss:$8 sps:$4 sm:$0xff]  }
  0x1d   : > { %675 = vmatpush1.bf16.msra.mxu1 %v1014_v11  ;;  %v1003_v16 = vld [vmem:[%s1144_s28 + $0x54] ss:$8 sps:$4 sm:$0xff]   ;;  %v1024_v17 = vld [vmem:[%s1144_s28 + $0x124] ss:$8 sps:$4 sm:$0xff]   ;;  %v1026_v18 = vld [vmem:[%s1144_s28 + $0x120] ss:$8 sps:$4 sm:$0xff]  }
  0x1e   : > { %636 = vmatpush1.bf16.msra.mxu0 %v993_v5  ;;  %676 = vmatprep.subr.bf16.mxu1 %v1018_v13  ;;  %v1005_v19 = vld [vmem:[%s1144_s28 + $0x50] ss:$8 sps:$4 sm:$0xff]   ;;  %v1030_v20 = vld [vmem:[%s1144_s28 + $0x134] ss:$8 sps:$4 sm:$0xff]   ;;  %v1006_v21 = vld [vmem:[%s1144_s28 + $0x64] ss:$8 sps:$4 sm:$0xff]  }
  0x1f   : > { %637 = vmatprep.subr.bf16.mxu0 %v994_v6  ;;  %v1032_v22 = vld [vmem:[%s1144_s28 + $0x130] ss:$8 sps:$4 sm:$0xff]   ;;  %v1008_v23 = vld [vmem:[%s1144_s28 + $0x60] ss:$8 sps:$4 sm:$0xff]   ;;  %v1036_v24 = vld [vmem:[%s1144_s28 + $0x144] ss:$8 sps:$4 sm:$0xff]  }
  0x20   : > { %v1009_v25 = vld [vmem:[%s1144_s28 + $0x74] ss:$8 sps:$4 sm:$0xff]   ;;  %v1038_v26 = vld [vmem:[%s1144_s28 + $0x140] ss:$8 sps:$4 sm:$0xff]   ;;  %v1011_v27 = vld [vmem:[%s1144_s28 + $0x70] ss:$8 sps:$4 sm:$0xff]  }
  0x21   : > { %677 = vmatpush1.bf16.msra.mxu1 %v1020_v14  ;;  %v1042_v28 = vld [vmem:[%s1144_s28 + $0x154] ss:$8 sps:$4 sm:$0xff]   ;;  %v1015_v29 = vld [vmem:[%s1144_s28 + $0x84] ss:$8 sps:$4 sm:$0xff]   ;;  %v1044_v30 = vld [vmem:[%s1144_s28 + $0x150] ss:$8 sps:$4 sm:$0xff]  }
  0x22   : > { %638 = vmatpush1.bf16.msra.mxu0 %v996_v7  ;;  %678 = vmatprep.subr.bf16.mxu1 %v1024_v17  ;;  %v1017_v31 = vld [vmem:[%s1144_s28 + $0x80] ss:$8 sps:$4 sm:$0xff]   ;;  %v1048_v32 = vld [vmem:[%s1144_s28 + $0x164] ss:$8 sps:$4 sm:$0xff]   ;;  %v1021_v33 = vld [vmem:[%s1144_s28 + $0x94] ss:$8 sps:$4 sm:$0xff]  }
  0x23   : > { %639 = vmatprep.subr.bf16.mxu0 %v997_v8  ;;  %v332_v34 = vld [vmem:[%s1139_s24] sm:$0xff]  ;;  %v1023_v37 = vld [vmem:[%s1144_s28 + $0x90] ss:$8 sps:$4 sm:$0xff]   ;;  %v1054_v38 = vld [vmem:[%s1144_s28 + $0x174] ss:$8 sps:$4 sm:$0xff]   ;;  %v728_v5 = vshrl.u32 (!%p954_p7), %v727_v4, 7 }
  0x24   : > { %v904_v35 = vcombine.high %v332_v34, %v332_v34  ;;  %v1050_v36 = vld [vmem:[%s1144_s28 + $0x160] ss:$8 sps:$4 sm:$0xff]   ;;  %v1027_v39 = vld [vmem:[%s1144_s28 + $0xa4] ss:$8 sps:$4 sm:$0xff]   ;;  %v1056_v40 = vld [vmem:[%s1144_s28 + $0x170] ss:$8 sps:$4 sm:$0xff]   ;;  %v903_v53 = vcombine.low %v332_v34, %v332_v34 }
  0x25   : > { %679 = vmatpush1.bf16.msra.mxu1 %v1026_v18  ;;  %v1029_v41 = vld [vmem:[%s1144_s28 + $0xa0] ss:$8 sps:$4 sm:$0xff]   ;;  %v1033_v42 = vld [vmem:[%s1144_s28 + $0xb4] ss:$8 sps:$4 sm:$0xff]   ;;  %v1035_v44 = vld [vmem:[%s1144_s28 + $0xb0] ss:$8 sps:$4 sm:$0xff]  }
  0x26   : > { %640 = vmatpush1.bf16.msra.mxu0 %v999_v9  ;;  %680 = vmatprep.subr.bf16.mxu1 %v1030_v20  ;;  %v1060_v43 = vld [vmem:[%s1139_s24 + $0x8] ss:$0 sps:$4 sm:$0xff]   ;;  %v1039_v45 = vld [vmem:[%s1144_s28 + $0xc4] ss:$8 sps:$4 sm:$0xff]   ;;  %v1045_v47 = vld [vmem:[%s1144_s28 + $0xd4] ss:$8 sps:$4 sm:$0xff]  }
  0x27   : > { %641 = vmatprep.subr.bf16.mxu0 %v1000_v12  ;;  %665 = vmatprep.mubr.bf16.mxu0 %v904_v35  ;;  %v1041_v46 = vld [vmem:[%s1144_s28 + $0xc0] ss:$8 sps:$4 sm:$0xff]   ;;  %v1047_v48 = vld [vmem:[%s1144_s28 + $0xd0] ss:$8 sps:$4 sm:$0xff]   ;;  %v1051_v49 = vld [vmem:[%s1144_s28 + $0xe4] ss:$8 sps:$4 sm:$0xff]  }
  0x28   : > { %v1053_v50 = vld [vmem:[%s1144_s28 + $0xe0] ss:$8 sps:$4 sm:$0xff]   ;;  %v1057_v51 = vld [vmem:[%s1144_s28 + $0xf4] ss:$8 sps:$4 sm:$0xff]   ;;  %v1059_v52 = vld [vmem:[%s1144_s28 + $0xf0] ss:$8 sps:$4 sm:$0xff]  }
  0x29   : > { %681 = vmatpush1.bf16.msra.mxu1 %v1032_v22  ;;  %v330_v58 = vld [vmem:[#allocation2] sm:$0xff]  ;;  %v331_v61 = vld [vmem:[#allocation2 + $0x8] sm:$0xff]  ;;  %v729_v8 = vsub.s32 (!%p954_p7), 0, %v728_v5  ;;  %v733_v9 = vsub.s32 (!%p954_p7), 1, %v728_v5 }
  0x2a   : > { %642 = vmatpush1.bf16.msra.mxu0 %v1002_v15  ;;  %682 = vmatprep.subr.bf16.mxu1 %v1036_v24  ;;  %v725_v6 = vld [vmem:[%s1218_s2] sm:$0x3] (!%p954_p7) }
  0x2b   : > { %643 = vmatprep.subr.bf16.mxu0 %v1003_v16  ;;  %v739_v7 = vld [vmem:[%s1219_s3] sm:$0x3] (!%p954_p7)  ;;  %v730_v12 = vrot.slane (!%p954_p7), %v725_v6, %v729_v8  ;;  %v734_v13 = vrot.slane (!%p954_p7), %v725_v6, %v733_v9 }
  0x2c   : > { %v744_v14 = vrot.slane (!%p954_p7), %v739_v7, %v729_v8  ;;  %v748_v15 = vrot.slane (!%p954_p7), %v739_v7, %v733_v9 }
  0x2d   : > { %683 = vmatpush1.bf16.msra.mxu1 %v1038_v26 }
  0x2e   : > { %644 = vmatpush1.bf16.msra.mxu0 %v1005_v19  ;;  %684 = vmatprep.subr.bf16.mxu1 %v1042_v28 }
  0x2f   : > { %645 = vmatprep.subr.bf16.mxu0 %v1006_v21 }
  0x31   : > { %685 = vmatpush1.bf16.msra.mxu1 %v1044_v30 }
  0x32   : > { %646 = vmatpush1.bf16.msra.mxu0 %v1008_v23  ;;  %686 = vmatprep.subr.bf16.mxu1 %v1048_v32 }
  0x33   : > { %647 = vmatprep.subr.bf16.mxu0 %v1009_v25 }
  0x35   : > { %687 = vmatpush1.bf16.msra.mxu1 %v1050_v36 }
  0x36   : > { %648 = vmatpush1.bf16.msra.mxu0 %v1011_v27  ;;  %688 = vmatprep.subr.bf16.mxu1 %v1054_v38 }
  0x37   : > { %649 = vmatprep.subr.bf16.mxu0 %v1015_v29 }
  0x39   : > { %689 = vmatpush1.bf16.msra.mxu1 %v1056_v40 }
  0x3a   : > { %650 = vmatpush1.bf16.msra.mxu0 %v1017_v31 }
  0x3b   : > { %651 = vmatprep.subr.bf16.mxu0 %v1021_v33 }
  0x3c   : > { %707 = vmatmul.mubr.bf16.vlgmr.msra.gmra.mrb[0].mxu1 %v1060_v43 }
  0x3e   : > { %652 = vmatpush1.bf16.msra.mxu0 %v1023_v37 }
  0x3f   : > { %653 = vmatprep.subr.bf16.mxu0 %v1027_v39 }
  0x42   : > { %654 = vmatpush1.bf16.msra.mxu0 %v1029_v41 }
  0x43   : > { %655 = vmatprep.subr.bf16.mxu0 %v1033_v42 }
  0x46   : > { %656 = vmatpush1.bf16.msra.mxu0 %v1035_v44 }
  0x47   : > { %657 = vmatprep.subr.bf16.mxu0 %v1039_v45 }
  0x4a   : > { %658 = vmatpush1.bf16.msra.mxu0 %v1041_v46 }
  0x4b   : > { %659 = vmatprep.subr.bf16.mxu0 %v1045_v47 }
  0x4e   : > { %660 = vmatpush1.bf16.msra.mxu0 %v1047_v48 }
  0x4f   : > { %661 = vmatprep.subr.bf16.mxu0 %v1051_v49 }
  0x52   : > { %662 = vmatpush1.bf16.msra.mxu0 %v1053_v50 }
  0x53   : > { %663 = vmatprep.subr.bf16.mxu0 %v1057_v51 }
  0x56   : > { %664 = vmatpush1.bf16.msra.mxu0 %v1059_v52 }
  0x59   : > { %666 = vmatmul.mubr.bf16.vlgmr.msra.gmra.mrb[0].mxu0 %v903_v53 }
 0x10f   : > { %v708_v54 = vpop.f32.mrb[0].mxu1 }
 0x110   : > { %v710_v55 = vpop.f32.mrb[1].mxu1 }
 0x111   : > { %v712_v56 = vpop.f32.mrb[2].mxu1 }
 0x112   : > { %v713_v57 = vpop.f32.mrb[3].mxu1 }
 0x12c   : > { %v667_v59 = vpop.f32.mrb[0].mxu0  ;;  %722 = sbr.rel (%p954_p7) target bundleno = 323 (0x143), region = 44 }
 0x12d   : > { %v709_v60 = vadd.f32 %v708_v54, %v667_v59  ;;  %v669_v62 = vpop.f32.mrb[1].mxu0 }
 0x12e   : > { %v711_v63 = vadd.f32 %v710_v55, %v669_v62  ;;  %v671_v0 = vpop.f32.mrb[2].mxu0 }
 0x12f   : > { %v715_v1 = vadd.f32 %v709_v60, %v330_v58  ;;  %v672_v2 = vpop.f32.mrb[3].mxu0 }
 0x130   : > { %v716_v3 = vadd.f32 %v711_v63, %v331_v61 }
 0x131   : > { %717 = vst [vmem:[#allocation2] sm:$0xff] %v715_v1 }
 0x132   : > { %718 = vst [vmem:[#allocation2 + $0x8] sm:$0xff] %v716_v3 }
 0x138   : > { %v723_v10 = vld [vmem:[#allocation2] sm:$0xff] }
 0x139   : > { %v724_v11 = vld [vmem:[#allocation2 + $0x8] sm:$0xff]  ;;  %v737_v16 = vmul.f32 %v730_v12, %v723_v10 }
 0x13a   : > { %v738_v17 = vmul.f32 %v734_v13, %v724_v11 }
 0x13b   : > { %v751_v18 = vadd.f32 %v744_v14, %v737_v16 }
 0x13c   : > { %v752_v19 = vadd.f32 %v748_v15, %v738_v17 }
 0x13d   : > { %v753_v20 = vmax.f32 %v751_v18, 0.0 }
 0x13e   : > { %v754_v21 = vmax.f32 %v752_v19, 0.0 }
 0x140   : > { %v961_v22 = vpack.c.bf16 %v754_v21, %v753_v20 }
 0x142   : > { %763 = vst [vmem:[%s1220_s4] sm:$0xff] %v961_v22 }
 0x143 PF: > { %s14_s17 = sadd.s32 1, %s1085_s17   ;;  %s1221_s15 = smov %s1081_s16 }
 0x144   : > { %p11_p8 = scmp.ge.s32.totalorder %s14_s17, 8   ;;  %s1222_s16 = smov %s1224_s18 }
 0x146   :  { %13 = sbr.rel (!%p11_p8) target bundleno = 2 (0x2), region = 83 }

// kernel: _lambda_.36
= control target key start
LH: loop header
LB: loop body
LE: loop exit
PB: predicated region body
PF: predicated region fallthrough
CT: control target
= control target key end

     0   :  { %s1394_s15 = smov 0   ;;  %s1396_s16 = smov 0   ;;  %s1666_s0 = inlined_call_operand.vmem [shape: bf16[8,2304], index: 0, kind: input, shape index: {}]   ;;  %s1667_s1 = inlined_call_operand.vmem [shape: bf16[2304,512], index: 1, kind: input, shape index: {}]   ;;  %s1668_s2 = inlined_call_operand.vmem [shape: f32[1,512], index: 2, kind: input, shape index: {}]   ;;  %s1669_s3 = inlined_call_operand.vmem [shape: f32[1,512], index: 3, kind: input, shape index: {}]   ;;  %s1670_s4 = inlined_call_operand.vmem [shape: bf16[8,512], index: 4, kind: output, shape index: {}]  }
   0x1   :  { %s1398_s17 = smov 0   ;;  %s1400_s18 = smov 0  }
   0x2   :  { %s1402_s19 = smov 0   ;;  %s1404_s20 = smov 0  }
   0x3   :  { %s1406_s21 = smov 0  }
   0x4 LB: > { %s26_s22 = sadd.s32 1, %s1357_s19  ;;  %s29_s23 = sadd.s32 1, %s1361_s20  ;;  %s1365_s21 = sphi %s1406_s21, %s14_s21   ;;  %s1361_s20 = sphi %s1404_s20, %s1676_s20   ;;  %s1357_s19 = sphi %s1402_s19, %s1675_s19   ;;  %s1353_s18 = sphi %s1400_s18, %s1674_s18   ;;  %s1349_s17 = sphi %s1398_s17, %s1673_s17   ;;  %s1345_s16 = sphi %s1396_s16, %s1672_s16   ;;  %s1341_s15 = sphi %s1394_s15, %s1671_s15  }
   0x5   : > { %p27_p0 = scmp.ge.s32.totalorder %s26_s22, 6  ;;  %p77_p1 = scmp.ne.s32.totalorder %s1345_s16, %s1341_s15 }
   0x6   : > { %p78_p2 = scmp.eq.s32.totalorder %s1365_s21, 0  ;;  %s70_s27 = sadd.s32 1, %s1345_s16 }
   0x7   : > { %s1678_s22 = smov (%p27_p0, %s26_s22), 0  ;;  %s1680_s23 = smov (!%p27_p0, %s29_s23), %s1361_s20 }
   0x8   : > { %p79_p3 = por %p78_p2, %p77_p1  ;;  %p31_p4 = scmp.ge.s32.totalorder %s1680_s23, 2 }
   0x9   : > { %s65_s24 = ssub.s32 %s1357_s19, %s1678_s22  ;;  %p1108_p6 = scmp.ge.s32.totalorder %s1365_s21, 12 }
   0xa   : > { %s1682_s23 = smov (%p31_p4, %s1680_s23), 0 }
   0xb   : > { %s66_s25 = ssub.s32 %s1361_s20, %s1682_s23  ;;  %183 = sbr.rel (%p1108_p6) target bundleno = 50 (0x32), region = 16 }
   0xc   : > { %s67_s26 = sor.u32 %s66_s25, %s65_s24 }
   0xd   : > { %p68_p5 = scmp.eq.s32.totalorder %s67_s26, 0 }
   0xf   : > { %s1445_s28 = scalar_select %p68_p5, %s1345_s16, %s70_s27  }
  0x12   : > { %199 = sbr.rel (!%p79_p3) target bundleno = 50 (0x32), region = 24  ;;  %s201_s29 = sand.u32 (%p79_p3), 1, %s1345_s16  }
  0x13   : > { %s1176_s30 = smul.u32 (%p79_p3), 384, %s201_s29  ;;  %s1109_s5 = sshll.u32 (%p79_p3), %s1361_s20, 1 }
  0x14   : > { %s1174_s6 = smul.u32 (%p79_p3), 192, %s1357_s19 }
  0x15   : > { %s1459_s12 = scalar_lea.vmem (%p79_p3), [#allocation3], %s1176_s30 }
  0x16   : > { %s207_s7 = sadd.s32 (%p79_p3), %s1174_s6, %s1109_s5 }
  0x17   : > { %s1111_s8 = sshll.u32 (%p79_p3), %s207_s7, 2 }
  0x18   : > { %s1454_s11 = scalar_lea.vmem (%p79_p3), %s1667_s1, %s1111_s8 }
  0x19   : > { %v331_v0 = vld [vmem:[%s1454_s11] sm:$0xff]  ;;  %v333_v1 = vld [vmem:[%s1454_s11 + $0x10] sm:$0xff] }
  0x1a   : > { %v335_v2 = vld [vmem:[%s1454_s11 + $0x20] sm:$0xff]  ;;  %332 = vst [vmem:[%s1459_s12] sm:$0xff] %v331_v0  ;;  %334 = vst [vmem:[%s1459_s12 + $0x8] sm:$0xff] %v333_v1  ;;  %v337_v3 = vld [vmem:[%s1454_s11 + $0x30] sm:$0xff] }
  0x1b   : > { %336 = vst [vmem:[%s1459_s12 + $0x10] sm:$0xff] %v335_v2  ;;  %v339_v4 = vld [vmem:[%s1454_s11 + $0x40] sm:$0xff]  ;;  %v341_v5 = vld [vmem:[%s1454_s11 + $0x50] sm:$0xff]  ;;  %338 = vst [vmem:[%s1459_s12 + $0x18] sm:$0xff] %v337_v3 }
  0x1c   : > { %340 = vst [vmem:[%s1459_s12 + $0x20] sm:$0xff] %v339_v4  ;;  %342 = vst [vmem:[%s1459_s12 + $0x28] sm:$0xff] %v341_v5  ;;  %v343_v6 = vld [vmem:[%s1454_s11 + $0x60] sm:$0xff]  ;;  %v345_v7 = vld [vmem:[%s1454_s11 + $0x70] sm:$0xff] }
  0x1d   : > { %v347_v8 = vld [vmem:[%s1454_s11 + $0x80] sm:$0xff]  ;;  %344 = vst [vmem:[%s1459_s12 + $0x30] sm:$0xff] %v343_v6  ;;  %346 = vst [vmem:[%s1459_s12 + $0x38] sm:$0xff] %v345_v7  ;;  %v349_v9 = vld [vmem:[%s1454_s11 + $0x90] sm:$0xff] }
  0x1e   : > { %348 = vst [vmem:[%s1459_s12 + $0x40] sm:$0xff] %v347_v8  ;;  %v351_v10 = vld [vmem:[%s1454_s11 + $0xa0] sm:$0xff]  ;;  %v353_v11 = vld [vmem:[%s1454_s11 + $0xb0] sm:$0xff]  ;;  %350 = vst [vmem:[%s1459_s12 + $0x48] sm:$0xff] %v349_v9 }
  0x1f   : > { %352 = vst [vmem:[%s1459_s12 + $0x50] sm:$0xff] %v351_v10  ;;  %354 = vst [vmem:[%s1459_s12 + $0x58] sm:$0xff] %v353_v11  ;;  %v355_v12 = vld [vmem:[%s1454_s11 + $0xc0] sm:$0xff]  ;;  %v357_v13 = vld [vmem:[%s1454_s11 + $0xd0] sm:$0xff] }
  0x20   : > { %v359_v14 = vld [vmem:[%s1454_s11 + $0xe0] sm:$0xff]  ;;  %356 = vst [vmem:[%s1459_s12 + $0x60] sm:$0xff] %v355_v12  ;;  %358 = vst [vmem:[%s1459_s12 + $0x68] sm:$0xff] %v357_v13  ;;  %v361_v15 = vld [vmem:[%s1454_s11 + $0xf0] sm:$0xff] }
  0x21   : > { %360 = vst [vmem:[%s1459_s12 + $0x70] sm:$0xff] %v359_v14  ;;  %v363_v16 = vld [vmem:[%s1454_s11 + $0x100] sm:$0xff]  ;;  %v365_v17 = vld [vmem:[%s1454_s11 + $0x110] sm:$0xff]  ;;  %362 = vst [vmem:[%s1459_s12 + $0x78] sm:$0xff] %v361_v15 }
  0x22   : > { %364 = vst [vmem:[%s1459_s12 + $0x80] sm:$0xff] %v363_v16  ;;  %366 = vst [vmem:[%s1459_s12 + $0x88] sm:$0xff] %v365_v17  ;;  %v367_v18 = vld [vmem:[%s1454_s11 + $0x120] sm:$0xff]  ;;  %v369_v19 = vld [vmem:[%s1454_s11 + $0x130] sm:$0xff] }
  0x23   : > { %v371_v20 = vld [vmem:[%s1454_s11 + $0x140] sm:$0xff]  ;;  %368 = vst [vmem:[%s1459_s12 + $0x90] sm:$0xff] %v367_v18  ;;  %370 = vst [vmem:[%s1459_s12 + $0x98] sm:$0xff] %v369_v19  ;;  %v373_v21 = vld [vmem:[%s1454_s11 + $0x150] sm:$0xff] }
  0x24   : > { %372 = vst [vmem:[%s1459_s12 + $0xa0] sm:$0xff] %v371_v20  ;;  %v375_v22 = vld [vmem:[%s1454_s11 + $0x160] sm:$0xff]  ;;  %v377_v23 = vld [vmem:[%s1454_s11 + $0x170] sm:$0xff]  ;;  %374 = vst [vmem:[%s1459_s12 + $0xa8] sm:$0xff] %v373_v21 }
  0x25   : > { %376 = vst [vmem:[%s1459_s12 + $0xb0] sm:$0xff] %v375_v22  ;;  %378 = vst [vmem:[%s1459_s12 + $0xb8] sm:$0xff] %v377_v23  ;;  %v379_v24 = vld [vmem:[%s1454_s11 + $0x180] sm:$0xff]  ;;  %v381_v25 = vld [vmem:[%s1454_s11 + $0x190] sm:$0xff] }
  0x26   : > { %v383_v26 = vld [vmem:[%s1454_s11 + $0x1a0] sm:$0xff]  ;;  %380 = vst [vmem:[%s1459_s12 + $0xc0] sm:$0xff] %v379_v24  ;;  %382 = vst [vmem:[%s1459_s12 + $0xc8] sm:$0xff] %v381_v25  ;;  %v385_v27 = vld [vmem:[%s1454_s11 + $0x1b0] sm:$0xff] }
  0x27   : > { %384 = vst [vmem:[%s1459_s12 + $0xd0] sm:$0xff] %v383_v26  ;;  %v387_v28 = vld [vmem:[%s1454_s11 + $0x1c0] sm:$0xff]  ;;  %v389_v29 = vld [vmem:[%s1454_s11 + $0x1d0] sm:$0xff]  ;;  %386 = vst [vmem:[%s1459_s12 + $0xd8] sm:$0xff] %v385_v27 }
  0x28   : > { %388 = vst [vmem:[%s1459_s12 + $0xe0] sm:$0xff] %v387_v28  ;;  %390 = vst [vmem:[%s1459_s12 + $0xe8] sm:$0xff] %v389_v29  ;;  %v391_v30 = vld [vmem:[%s1454_s11 + $0x1e0] sm:$0xff]  ;;  %v393_v31 = vld [vmem:[%s1454_s11 + $0x1f0] sm:$0xff] }
  0x29   : > { %v395_v32 = vld [vmem:[%s1454_s11 + $0x200] sm:$0xff]  ;;  %392 = vst [vmem:[%s1459_s12 + $0xf0] sm:$0xff] %v391_v30  ;;  %394 = vst [vmem:[%s1459_s12 + $0xf8] sm:$0xff] %v393_v31  ;;  %v397_v33 = vld [vmem:[%s1454_s11 + $0x210] sm:$0xff] }
  0x2a   : > { %396 = vst [vmem:[%s1459_s12 + $0x100] sm:$0xff] %v395_v32  ;;  %v399_v34 = vld [vmem:[%s1454_s11 + $0x220] sm:$0xff]  ;;  %v401_v35 = vld [vmem:[%s1454_s11 + $0x230] sm:$0xff]  ;;  %398 = vst [vmem:[%s1459_s12 + $0x108] sm:$0xff] %v397_v33 }
  0x2b   : > { %400 = vst [vmem:[%s1459_s12 + $0x110] sm:$0xff] %v399_v34  ;;  %402 = vst [vmem:[%s1459_s12 + $0x118] sm:$0xff] %v401_v35  ;;  %v403_v36 = vld [vmem:[%s1454_s11 + $0x240] sm:$0xff]  ;;  %v405_v37 = vld [vmem:[%s1454_s11 + $0x250] sm:$0xff] }
  0x2c   : > { %v407_v38 = vld [vmem:[%s1454_s11 + $0x260] sm:$0xff]  ;;  %404 = vst [vmem:[%s1459_s12 + $0x120] sm:$0xff] %v403_v36  ;;  %406 = vst [vmem:[%s1459_s12 + $0x128] sm:$0xff] %v405_v37  ;;  %v409_v39 = vld [vmem:[%s1454_s11 + $0x270] sm:$0xff] }
  0x2d   : > { %408 = vst [vmem:[%s1459_s12 + $0x130] sm:$0xff] %v407_v38  ;;  %v411_v40 = vld [vmem:[%s1454_s11 + $0x280] sm:$0xff]  ;;  %v413_v41 = vld [vmem:[%s1454_s11 + $0x290] sm:$0xff]  ;;  %410 = vst [vmem:[%s1459_s12 + $0x138] sm:$0xff] %v409_v39 }
  0x2e   : > { %412 = vst [vmem:[%s1459_s12 + $0x140] sm:$0xff] %v411_v40  ;;  %414 = vst [vmem:[%s1459_s12 + $0x148] sm:$0xff] %v413_v41  ;;  %v415_v42 = vld [vmem:[%s1454_s11 + $0x2a0] sm:$0xff]  ;;  %v417_v43 = vld [vmem:[%s1454_s11 + $0x2b0] sm:$0xff] }
  0x2f   : > { %v419_v44 = vld [vmem:[%s1454_s11 + $0x2c0] sm:$0xff]  ;;  %416 = vst [vmem:[%s1459_s12 + $0x150] sm:$0xff] %v415_v42  ;;  %418 = vst [vmem:[%s1459_s12 + $0x158] sm:$0xff] %v417_v43  ;;  %v421_v45 = vld [vmem:[%s1454_s11 + $0x2d0] sm:$0xff] }
  0x30   : > { %420 = vst [vmem:[%s1459_s12 + $0x160] sm:$0xff] %v419_v44  ;;  %v423_v46 = vld [vmem:[%s1454_s11 + $0x2e0] sm:$0xff]  ;;  %v425_v47 = vld [vmem:[%s1454_s11 + $0x2f0] sm:$0xff]  ;;  %422 = vst [vmem:[%s1459_s12 + $0x168] sm:$0xff] %v421_v45 }
  0x31   : > { %424 = vst [vmem:[%s1459_s12 + $0x170] sm:$0xff] %v423_v46  ;;  %426 = vst [vmem:[%s1459_s12 + $0x178] sm:$0xff] %v425_v47 }
  0x32 PF: > { %p1112_p7 = scmp.ge.s32.totalorder %s1365_s21, 1  ;;  %p447_p8 = scmp.lt.s32.totalorder %s1365_s21, 13 }
  0x34   : > { %p448_p9 = pnand %p1112_p7, %p447_p8 }
  0x35   : > { %s454_s13 = sand.u32 (!%p448_p9), 1, %s1341_s15   ;;  %s500_s14 = smul.u32 (!%p448_p9), 3, %s1349_s17 }
  0x36   : > { %451 = sbr.rel (%p448_p9) target bundleno = 370 (0x172), region = 70  ;;  %s1114_s25 = sshll.u32 (!%p448_p9), %s1353_s18, 1 }
  0x37   : > { %s1177_s24 = smul.u32 (!%p448_p9), 384, %s454_s13  ;;  %p503_p10 = scmp.lt.s32.totalorder (!%p448_p9), %s500_s14, 17 }
  0x38   : > { %p513_p11 = scmp.lt.s32.totalorder (!%p448_p9), %s1114_s25, 3  ;;  %p1118_p12 = scmp.ne.s32.totalorder (!%p448_p9), %s1349_s17, 0 }
  0x39   : > { %s1580_s13 = scalar_lea.vmem (!%p448_p9), [#allocation3], %s1177_s24 }
  0x3d   : > { %s1684_s14 = smov (!%p503_p10, %s500_s14), 17  ;;  %s1686_s25 = smov (!%p513_p11, %s1114_s25), 3 }
  0x3e   : > { %s1113_s26 = sshll.u32 %s1684_s14, 2  ;;  %s515_s15 = scalar_lea.vmem %s1668_s2, %s1686_s25  ;;  %v1367_v48 = vmov (!%p1118_p12), 0.0  }
  0x3f   : > { %s1564_s30 = scalar_lea.vmem %s1666_s0, %s1113_s26  ;;  %s520_s8 = scalar_lea.vmem %s1669_s3, %s1686_s25  ;;  %537 = vst [vmem:[#allocation2] sm:$0xff] (!%p1118_p12), %v1367_v48  ;;  %538 = vst [vmem:[#allocation2 + $0x8] sm:$0xff] (!%p1118_p12), %v1367_v48 }
  0x40   : > { %s1117_s9 = sshll.u32 %s1686_s25, 2  ;;  %536 = sbr.rel (%p1118_p12) target bundleno = 71 (0x47), region = 78 }
  0x41   : > { %s1578_s12 = scalar_lea.vmem %s1670_s4, %s1117_s9 }
  0x47 PF: > { %v1236_v49 = vld [vmem:[%s1580_s13 + $0x4] ss:$8 sps:$4 sm:$0xff]   ;;  %v1238_v50 = vld [vmem:[%s1580_s13] ss:$8 sps:$4 sm:$0xff]   ;;  %v1368_v51 = vmov 0   ;;  %v541_v18 = vld [vmem:[%s1564_s30] sm:$0xff] }
  0x48   : > { %915 = vmatprep.mubr.bf16.mxu1 %v1368_v51  ;;  %842 = vmatprep.subr.bf16.mxu0 %v1236_v49  ;;  %v1239_v52 = vld [vmem:[%s1580_s13 + $0x14] ss:$8 sps:$4 sm:$0xff]   ;;  %v1241_v53 = vld [vmem:[%s1580_s13 + $0x10] ss:$8 sps:$4 sm:$0xff]   ;;  %v1242_v54 = vld [vmem:[%s1580_s13 + $0x24] ss:$8 sps:$4 sm:$0xff]   ;;  %v1120_v19 = vcombine.high %v541_v18, %v541_v18  ;;  %v1119_v37 = vcombine.low %v541_v18, %v541_v18 }
  0x49   : > { %843 = vmatpush1.bf16.msra.mxu0 %v1238_v50  ;;  %v1244_v55 = vld [vmem:[%s1580_s13 + $0x20] ss:$8 sps:$4 sm:$0xff]   ;;  %v1245_v56 = vld [vmem:[%s1580_s13 + $0x34] ss:$8 sps:$4 sm:$0xff]   ;;  %v1247_v57 = vld [vmem:[%s1580_s13 + $0x30] ss:$8 sps:$4 sm:$0xff]  }
  0x4a   : > { %844 = vmatprep.subr.bf16.mxu0 %v1239_v52  ;;  %v1260_v58 = vld [vmem:[%s1580_s13 + $0x104] ss:$8 sps:$4 sm:$0xff]   ;;  %v1262_v59 = vld [vmem:[%s1580_s13 + $0x100] ss:$8 sps:$4 sm:$0xff]   ;;  %v1266_v61 = vld [vmem:[%s1580_s13 + $0x114] ss:$8 sps:$4 sm:$0xff]   ;;  %874 = vmatprep.mubr.bf16.mxu0 %v1120_v19 }
  0x4b   : > { %v1248_v60 = vld [vmem:[%s1580_s13 + $0x44] ss:$8 sps:$4 sm:$0xff]   ;;  %883 = vmatprep.subr.bf16.mxu1 %v1260_v58  ;;  %v1268_v62 = vld [vmem:[%s1580_s13 + $0x110] ss:$8 sps:$4 sm:$0xff]   ;;  %v1250_v63 = vld [vmem:[%s1580_s13 + $0x40] ss:$8 sps:$4 sm:$0xff]  }
  0x4c   : > { %884 = vmatpush1.bf16.msra.mxu1 %v1262_v59  ;;  %v1251_v0 = vld [vmem:[%s1580_s13 + $0x54] ss:$8 sps:$4 sm:$0xff]   ;;  %v1272_v1 = vld [vmem:[%s1580_s13 + $0x124] ss:$8 sps:$4 sm:$0xff]   ;;  %v1274_v2 = vld [vmem:[%s1580_s13 + $0x120] ss:$8 sps:$4 sm:$0xff]  }
  0x4d   : > { %845 = vmatpush1.bf16.msra.mxu0 %v1241_v53  ;;  %885 = vmatprep.subr.bf16.mxu1 %v1266_v61  ;;  %v1253_v3 = vld [vmem:[%s1580_s13 + $0x50] ss:$8 sps:$4 sm:$0xff]   ;;  %v1278_v4 = vld [vmem:[%s1580_s13 + $0x134] ss:$8 sps:$4 sm:$0xff]   ;;  %v1254_v5 = vld [vmem:[%s1580_s13 + $0x64] ss:$8 sps:$4 sm:$0xff]  }
  0x4e   : > { %846 = vmatprep.subr.bf16.mxu0 %v1242_v54  ;;  %v1280_v6 = vld [vmem:[%s1580_s13 + $0x130] ss:$8 sps:$4 sm:$0xff]   ;;  %v1256_v7 = vld [vmem:[%s1580_s13 + $0x60] ss:$8 sps:$4 sm:$0xff]   ;;  %v1284_v8 = vld [vmem:[%s1580_s13 + $0x144] ss:$8 sps:$4 sm:$0xff]  }
  0x4f   : > { %v1257_v9 = vld [vmem:[%s1580_s13 + $0x74] ss:$8 sps:$4 sm:$0xff]   ;;  %v1286_v10 = vld [vmem:[%s1580_s13 + $0x140] ss:$8 sps:$4 sm:$0xff]   ;;  %v1259_v11 = vld [vmem:[%s1580_s13 + $0x70] ss:$8 sps:$4 sm:$0xff]  }
  0x50   : > { %886 = vmatpush1.bf16.msra.mxu1 %v1268_v62  ;;  %v1290_v12 = vld [vmem:[%s1580_s13 + $0x154] ss:$8 sps:$4 sm:$0xff]   ;;  %v1263_v13 = vld [vmem:[%s1580_s13 + $0x84] ss:$8 sps:$4 sm:$0xff]   ;;  %v1292_v14 = vld [vmem:[%s1580_s13 + $0x150] ss:$8 sps:$4 sm:$0xff]  }
  0x51   : > { %847 = vmatpush1.bf16.msra.mxu0 %v1244_v55  ;;  %887 = vmatprep.subr.bf16.mxu1 %v1272_v1  ;;  %v1265_v15 = vld [vmem:[%s1580_s13 + $0x80] ss:$8 sps:$4 sm:$0xff]   ;;  %v1296_v16 = vld [vmem:[%s1580_s13 + $0x164] ss:$8 sps:$4 sm:$0xff]   ;;  %v1269_v17 = vld [vmem:[%s1580_s13 + $0x94] ss:$8 sps:$4 sm:$0xff]  }
  0x52   : > { %848 = vmatprep.subr.bf16.mxu0 %v1245_v56  ;;  %v1298_v20 = vld [vmem:[%s1580_s13 + $0x160] ss:$8 sps:$4 sm:$0xff]   ;;  %v1271_v21 = vld [vmem:[%s1580_s13 + $0x90] ss:$8 sps:$4 sm:$0xff]   ;;  %v1302_v22 = vld [vmem:[%s1580_s13 + $0x174] ss:$8 sps:$4 sm:$0xff]  }
  0x53   : > { %v1275_v23 = vld [vmem:[%s1580_s13 + $0xa4] ss:$8 sps:$4 sm:$0xff]   ;;  %v1304_v24 = vld [vmem:[%s1580_s13 + $0x170] ss:$8 sps:$4 sm:$0xff]   ;;  %v1277_v25 = vld [vmem:[%s1580_s13 + $0xa0] ss:$8 sps:$4 sm:$0xff]  }
  0x54   : > { %888 = vmatpush1.bf16.msra.mxu1 %v1274_v2  ;;  %v1281_v26 = vld [vmem:[%s1580_s13 + $0xb4] ss:$8 sps:$4 sm:$0xff]   ;;  %v1308_v27 = vld [vmem:[%s1564_s30 + $0x8] ss:$0 sps:$4 sm:$0xff]   ;;  %v1287_v29 = vld [vmem:[%s1580_s13 + $0xc4] ss:$8 sps:$4 sm:$0xff]  }
  0x55   : > { %849 = vmatpush1.bf16.msra.mxu0 %v1247_v57  ;;  %889 = vmatprep.subr.bf16.mxu1 %v1278_v4  ;;  %v1283_v28 = vld [vmem:[%s1580_s13 + $0xb0] ss:$8 sps:$4 sm:$0xff]   ;;  %v1289_v30 = vld [vmem:[%s1580_s13 + $0xc0] ss:$8 sps:$4 sm:$0xff]   ;;  %v1293_v31 = vld [vmem:[%s1580_s13 + $0xd4] ss:$8 sps:$4 sm:$0xff]  }
  0x56   : > { %850 = vmatprep.subr.bf16.mxu0 %v1248_v60  ;;  %v1295_v32 = vld [vmem:[%s1580_s13 + $0xd0] ss:$8 sps:$4 sm:$0xff]   ;;  %v1299_v33 = vld [vmem:[%s1580_s13 + $0xe4] ss:$8 sps:$4 sm:$0xff]   ;;  %v1301_v34 = vld [vmem:[%s1580_s13 + $0xe0] ss:$8 sps:$4 sm:$0xff]  }
  0x57   : > { %v1305_v35 = vld [vmem:[%s1580_s13 + $0xf4] ss:$8 sps:$4 sm:$0xff]   ;;  %v1307_v36 = vld [vmem:[%s1580_s13 + $0xf0] ss:$8 sps:$4 sm:$0xff]   ;;  %p1170_p13 = scmp.ne.s32.totalorder %s1349_s17, 5 }
  0x58   : > { %890 = vmatpush1.bf16.msra.mxu1 %v1280_v6  ;;  %v539_v42 = vld [vmem:[#allocation2] sm:$0xff]  ;;  %v540_v45 = vld [vmem:[#allocation2 + $0x8] sm:$0xff]  ;;  %v936_v52 = vlaneseq (!%p1170_p13) }
  0x59   : > { %851 = vmatpush1.bf16.msra.mxu0 %v1250_v63  ;;  %891 = vmatprep.subr.bf16.mxu1 %v1284_v8  ;;  %v934_v54 = vld [vmem:[%s515_s15] sm:$0x3] (!%p1170_p13) }
  0x5a   : > { %852 = vmatprep.subr.bf16.mxu0 %v1251_v0  ;;  %v937_v53 = vshrl.u32 (!%p1170_p13), %v936_v52, 7  ;;  %v948_v55 = vld [vmem:[%s520_s8] sm:$0x3] (!%p1170_p13) }
  0x5c   : > { %892 = vmatpush1.bf16.msra.mxu1 %v1286_v10  ;;  %v938_v56 = vsub.s32 (!%p1170_p13), 0, %v937_v53  ;;  %v942_v57 = vsub.s32 (!%p1170_p13), 1, %v937_v53 }
  0x5d   : > { %853 = vmatpush1.bf16.msra.mxu0 %v1253_v3  ;;  %893 = vmatprep.subr.bf16.mxu1 %v1290_v12 }
  0x5e   : > { %854 = vmatprep.subr.bf16.mxu0 %v1254_v5  ;;  %v939_v60 = vrot.slane (!%p1170_p13), %v934_v54, %v938_v56  ;;  %v943_v61 = vrot.slane (!%p1170_p13), %v934_v54, %v942_v57  ;;  %v953_v62 = vrot.slane (!%p1170_p13), %v948_v55, %v938_v56  ;;  %v957_v63 = vrot.slane (!%p1170_p13), %v948_v55, %v942_v57 }
  0x60   : > { %894 = vmatpush1.bf16.msra.mxu1 %v1292_v14 }
  0x61   : > { %855 = vmatpush1.bf16.msra.mxu0 %v1256_v7  ;;  %895 = vmatprep.subr.bf16.mxu1 %v1296_v16 }
  0x62   : > { %856 = vmatprep.subr.bf16.mxu0 %v1257_v9 }
  0x64   : > { %896 = vmatpush1.bf16.msra.mxu1 %v1298_v20 }
  0x65   : > { %857 = vmatpush1.bf16.msra.mxu0 %v1259_v11  ;;  %897 = vmatprep.subr.bf16.mxu1 %v1302_v22 }
  0x66   : > { %858 = vmatprep.subr.bf16.mxu0 %v1263_v13 }
  0x68   : > { %898 = vmatpush1.bf16.msra.mxu1 %v1304_v24 }
  0x69   : > { %859 = vmatpush1.bf16.msra.mxu0 %v1265_v15 }
  0x6a   : > { %860 = vmatprep.subr.bf16.mxu0 %v1269_v17 }
  0x6b   : > { %916 = vmatmul.mubr.bf16.vlgmr.msra.gmra.mrb[0].mxu1 %v1308_v27 }
  0x6d   : > { %861 = vmatpush1.bf16.msra.mxu0 %v1271_v21 }
  0x6e   : > { %862 = vmatprep.subr.bf16.mxu0 %v1275_v23 }
  0x71   : > { %863 = vmatpush1.bf16.msra.mxu0 %v1277_v25 }
  0x72   : > { %864 = vmatprep.subr.bf16.mxu0 %v1281_v26 }
  0x75   : > { %865 = vmatpush1.bf16.msra.mxu0 %v1283_v28 }
  0x76   : > { %866 = vmatprep.subr.bf16.mxu0 %v1287_v29 }
  0x79   : > { %867 = vmatpush1.bf16.msra.mxu0 %v1289_v30 }
  0x7a   : > { %868 = vmatprep.subr.bf16.mxu0 %v1293_v31 }
  0x7d   : > { %869 = vmatpush1.bf16.msra.mxu0 %v1295_v32 }
  0x7e   : > { %870 = vmatprep.subr.bf16.mxu0 %v1299_v33 }
  0x81   : > { %871 = vmatpush1.bf16.msra.mxu0 %v1301_v34 }
  0x82   : > { %872 = vmatprep.subr.bf16.mxu0 %v1305_v35 }
  0x85   : > { %873 = vmatpush1.bf16.msra.mxu0 %v1307_v36 }
  0x88   : > { %875 = vmatmul.mubr.bf16.vlgmr.msra.gmra.mrb[0].mxu0 %v1119_v37 }
 0x13e   : > { %v917_v38 = vpop.f32.mrb[0].mxu1 }
 0x13f   : > { %v919_v39 = vpop.f32.mrb[1].mxu1 }
 0x140   : > { %v921_v40 = vpop.f32.mrb[2].mxu1 }
 0x141   : > { %v922_v41 = vpop.f32.mrb[3].mxu1 }
 0x15b   : > { %v876_v43 = vpop.f32.mrb[0].mxu0  ;;  %931 = sbr.rel (%p1170_p13) target bundleno = 370 (0x172), region = 82 }
 0x15c   : > { %v918_v44 = vadd.f32 %v917_v38, %v876_v43  ;;  %v878_v46 = vpop.f32.mrb[1].mxu0 }
 0x15d   : > { %v920_v47 = vadd.f32 %v919_v39, %v878_v46  ;;  %v880_v48 = vpop.f32.mrb[2].mxu0 }
 0x15e   : > { %v924_v49 = vadd.f32 %v918_v44, %v539_v42  ;;  %v881_v50 = vpop.f32.mrb[3].mxu0 }
 0x15f   : > { %v925_v51 = vadd.f32 %v920_v47, %v540_v45 }
 0x160   : > { %926 = vst [vmem:[#allocation2] sm:$0xff] %v924_v49 }
 0x161   : > { %927 = vst [vmem:[#allocation2 + $0x8] sm:$0xff] %v925_v51 }
 0x167   : > { %v932_v58 = vld [vmem:[#allocation2] sm:$0xff] }
 0x168   : > { %v933_v59 = vld [vmem:[#allocation2 + $0x8] sm:$0xff]  ;;  %v946_v0 = vmul.f32 %v939_v60, %v932_v58 }
 0x169   : > { %v947_v1 = vmul.f32 %v943_v61, %v933_v59 }
 0x16a   : > { %v960_v2 = vadd.f32 %v953_v62, %v946_v0 }
 0x16b   : > { %v961_v3 = vadd.f32 %v957_v63, %v947_v1 }
 0x16c   : > { %v962_v4 = vmax.f32 %v960_v2, 0.0 }
 0x16d   : > { %v963_v5 = vmax.f32 %v961_v3, 0.0 }
 0x16f   : > { %v1175_v6 = vpack.c.bf16 %v963_v5, %v962_v4 }
 0x171   : > { %972 = vst [vmem:[%s1578_s12] sm:$0xff] %v1175_v6 }
 0x172 PF: > { %s14_s21 = sadd.s32 1, %s1365_s21   ;;  %s1671_s15 = smov %s1345_s16 }
 0x173   : > { %p11_p0 = scmp.ge.s32.totalorder %s14_s21, 14   ;;  %s1672_s16 = smov %s1445_s28 }
 0x174   : > { %s1673_s17 = smov %s1357_s19  ;;  %s1674_s18 = smov %s1361_s20 }
 0x175   : > { %s1675_s19 = smov %s1678_s22  ;;  %s1676_s20 = smov %s1682_s23 }
 0x176   :  { %13 = sbr.rel (!%p11_p0) target bundleno = 4 (0x4), region = 126 }

// kernel: _lambda_.37
= control target key start
LH: loop header
LB: loop body
LE: loop exit
PB: predicated region body
PF: predicated region fallthrough
CT: control target
= control target key end

     0   :  { %s1103_s15 = smov 0   ;;  %s1105_s16 = smov 0   ;;  %s1285_s0 = inlined_call_operand.vmem [shape: bf16[8,256], index: 0, kind: input, shape index: {}]   ;;  %s1286_s1 = inlined_call_operand.vmem [shape: bf16[256,512], index: 1, kind: input, shape index: {}]   ;;  %s1287_s2 = inlined_call_operand.vmem [shape: f32[1,512], index: 2, kind: input, shape index: {}]   ;;  %s1288_s3 = inlined_call_operand.vmem [shape: f32[1,512], index: 3, kind: input, shape index: {}]   ;;  %s1289_s4 = inlined_call_operand.vmem [shape: bf16[8,512], index: 4, kind: output, shape index: {}]  }
   0x1   :  { %s1107_s17 = smov 0   ;;  %s1109_s18 = smov 0  }
   0x2   :  { %s1111_s19 = smov 0  }
   0x3 LB: > { %s29_s20 = sadd.s32 1, %s1072_s18  ;;  %p77_p1 = scmp.ne.s32.totalorder %s1064_s16, %s1060_s15  ;;  %s1076_s19 = sphi %s1111_s19, %s14_s19   ;;  %s1072_s18 = sphi %s1109_s18, %s1293_s18   ;;  %s1068_s17 = sphi %s1107_s17, %s1292_s17   ;;  %s1064_s16 = sphi %s1105_s16, %s1291_s16   ;;  %s1060_s15 = sphi %s1103_s15, %s1290_s15  }
   0x4   : > { %p31_p0 = scmp.ge.s32.totalorder %s29_s20, 2  ;;  %p78_p2 = scmp.eq.s32.totalorder %s1076_s19, 0 }
   0x5   : > { %s70_s22 = sadd.s32 1, %s1064_s16  ;;  %p899_p5 = scmp.ge.s32.totalorder %s1076_s19, 2 }
   0x6   : > { %s1295_s20 = smov (%p31_p0, %s29_s20), 0  ;;  %p79_p3 = por %p78_p2, %p77_p1 }
   0x7   : > { %s66_s21 = ssub.s32 %s1072_s18, %s1295_s20  ;;  %196 = sbr.rel (%p899_p5) target bundleno = 34 (0x22), region = 20 }
   0x8   : > { %p68_p4 = scmp.eq.s32.totalorder %s66_s21, 0 }
   0xa   : > { %s1138_s23 = scalar_select %p68_p4, %s1064_s16, %s70_s22  }
   0xe   : > { %199 = sbr.rel (!%p79_p3) target bundleno = 34 (0x22), region = 24  ;;  %s201_s24 = sand.u32 (%p79_p3), 1, %s1064_s16  }
   0xf   : > { %s946_s25 = sshll.u32 (%p79_p3), %s1072_s18, 3  ;;  %s900_s26 = sshll.u32 (%p79_p3), %s201_s24, 8 }
  0x10   : > { %s1146_s29 = scalar_lea.vmem (%p79_p3), %s1286_s1, %s946_s25  ;;  %s1151_s30 = scalar_lea.vmem (%p79_p3), [#allocation3], %s900_s26 }
  0x11   : > { %v299_v0 = vld [vmem:[%s1146_s29] sm:$0xff] (%p79_p3)  ;;  %v301_v1 = vld [vmem:[%s1146_s29 + $0x10] sm:$0xff] (%p79_p3) }
  0x12   : > { %v303_v2 = vld [vmem:[%s1146_s29 + $0x20] sm:$0xff] (%p79_p3)  ;;  %300 = vst [vmem:[%s1151_s30] sm:$0xff] (%p79_p3), %v299_v0  ;;  %302 = vst [vmem:[%s1151_s30 + $0x8] sm:$0xff] (%p79_p3), %v301_v1  ;;  %v305_v3 = vld [vmem:[%s1146_s29 + $0x30] sm:$0xff] (%p79_p3) }
  0x13   : > { %304 = vst [vmem:[%s1151_s30 + $0x10] sm:$0xff] (%p79_p3), %v303_v2  ;;  %v307_v4 = vld [vmem:[%s1146_s29 + $0x40] sm:$0xff] (%p79_p3)  ;;  %v309_v5 = vld [vmem:[%s1146_s29 + $0x50] sm:$0xff] (%p79_p3)  ;;  %306 = vst [vmem:[%s1151_s30 + $0x18] sm:$0xff] (%p79_p3), %v305_v3 }
  0x14   : > { %308 = vst [vmem:[%s1151_s30 + $0x20] sm:$0xff] (%p79_p3), %v307_v4  ;;  %310 = vst [vmem:[%s1151_s30 + $0x28] sm:$0xff] (%p79_p3), %v309_v5  ;;  %v311_v6 = vld [vmem:[%s1146_s29 + $0x60] sm:$0xff] (%p79_p3)  ;;  %v313_v7 = vld [vmem:[%s1146_s29 + $0x70] sm:$0xff] (%p79_p3) }
  0x15   : > { %v315_v8 = vld [vmem:[%s1146_s29 + $0x80] sm:$0xff]  ;;  %312 = vst [vmem:[%s1151_s30 + $0x30] sm:$0xff] %v311_v6  ;;  %314 = vst [vmem:[%s1151_s30 + $0x38] sm:$0xff] %v313_v7  ;;  %v317_v9 = vld [vmem:[%s1146_s29 + $0x90] sm:$0xff] }
  0x16   : > { %316 = vst [vmem:[%s1151_s30 + $0x40] sm:$0xff] %v315_v8  ;;  %v319_v10 = vld [vmem:[%s1146_s29 + $0xa0] sm:$0xff]  ;;  %v321_v11 = vld [vmem:[%s1146_s29 + $0xb0] sm:$0xff]  ;;  %318 = vst [vmem:[%s1151_s30 + $0x48] sm:$0xff] %v317_v9 }
  0x17   : > { %320 = vst [vmem:[%s1151_s30 + $0x50] sm:$0xff] %v319_v10  ;;  %322 = vst [vmem:[%s1151_s30 + $0x58] sm:$0xff] %v321_v11  ;;  %v323_v12 = vld [vmem:[%s1146_s29 + $0xc0] sm:$0xff]  ;;  %v325_v13 = vld [vmem:[%s1146_s29 + $0xd0] sm:$0xff] }
  0x18   : > { %v327_v14 = vld [vmem:[%s1146_s29 + $0xe0] sm:$0xff]  ;;  %324 = vst [vmem:[%s1151_s30 + $0x60] sm:$0xff] %v323_v12  ;;  %326 = vst [vmem:[%s1151_s30 + $0x68] sm:$0xff] %v325_v13  ;;  %v329_v15 = vld [vmem:[%s1146_s29 + $0xf0] sm:$0xff] }
  0x19   : > { %328 = vst [vmem:[%s1151_s30 + $0x70] sm:$0xff] %v327_v14  ;;  %v331_v16 = vld [vmem:[%s1146_s29 + $0x100] sm:$0xff]  ;;  %v333_v17 = vld [vmem:[%s1146_s29 + $0x110] sm:$0xff]  ;;  %330 = vst [vmem:[%s1151_s30 + $0x78] sm:$0xff] %v329_v15 }
  0x1a   : > { %332 = vst [vmem:[%s1151_s30 + $0x80] sm:$0xff] %v331_v16  ;;  %334 = vst [vmem:[%s1151_s30 + $0x88] sm:$0xff] %v333_v17  ;;  %v335_v18 = vld [vmem:[%s1146_s29 + $0x120] sm:$0xff]  ;;  %v337_v19 = vld [vmem:[%s1146_s29 + $0x130] sm:$0xff] }
  0x1b   : > { %v339_v20 = vld [vmem:[%s1146_s29 + $0x140] sm:$0xff]  ;;  %336 = vst [vmem:[%s1151_s30 + $0x90] sm:$0xff] %v335_v18  ;;  %338 = vst [vmem:[%s1151_s30 + $0x98] sm:$0xff] %v337_v19  ;;  %v341_v21 = vld [vmem:[%s1146_s29 + $0x150] sm:$0xff] }
  0x1c   : > { %340 = vst [vmem:[%s1151_s30 + $0xa0] sm:$0xff] %v339_v20  ;;  %v343_v22 = vld [vmem:[%s1146_s29 + $0x160] sm:$0xff]  ;;  %v345_v23 = vld [vmem:[%s1146_s29 + $0x170] sm:$0xff]  ;;  %342 = vst [vmem:[%s1151_s30 + $0xa8] sm:$0xff] %v341_v21 }
  0x1d   : > { %344 = vst [vmem:[%s1151_s30 + $0xb0] sm:$0xff] %v343_v22  ;;  %346 = vst [vmem:[%s1151_s30 + $0xb8] sm:$0xff] %v345_v23  ;;  %v347_v24 = vld [vmem:[%s1146_s29 + $0x180] sm:$0xff]  ;;  %v349_v25 = vld [vmem:[%s1146_s29 + $0x190] sm:$0xff] }
  0x1e   : > { %v351_v26 = vld [vmem:[%s1146_s29 + $0x1a0] sm:$0xff]  ;;  %348 = vst [vmem:[%s1151_s30 + $0xc0] sm:$0xff] %v347_v24  ;;  %350 = vst [vmem:[%s1151_s30 + $0xc8] sm:$0xff] %v349_v25  ;;  %v353_v27 = vld [vmem:[%s1146_s29 + $0x1b0] sm:$0xff] }
  0x1f   : > { %352 = vst [vmem:[%s1151_s30 + $0xd0] sm:$0xff] %v351_v26  ;;  %v355_v28 = vld [vmem:[%s1146_s29 + $0x1c0] sm:$0xff]  ;;  %v357_v29 = vld [vmem:[%s1146_s29 + $0x1d0] sm:$0xff]  ;;  %354 = vst [vmem:[%s1151_s30 + $0xd8] sm:$0xff] %v353_v27 }
  0x20   : > { %356 = vst [vmem:[%s1151_s30 + $0xe0] sm:$0xff] %v355_v28  ;;  %358 = vst [vmem:[%s1151_s30 + $0xe8] sm:$0xff] %v357_v29  ;;  %v359_v30 = vld [vmem:[%s1146_s29 + $0x1e0] sm:$0xff]  ;;  %v361_v31 = vld [vmem:[%s1146_s29 + $0x1f0] sm:$0xff] }
  0x21   : > { %360 = vst [vmem:[%s1151_s30 + $0xf0] sm:$0xff] %v359_v30  ;;  %362 = vst [vmem:[%s1151_s30 + $0xf8] sm:$0xff] %v361_v31 }
  0x22 PF: > { %p903_p6 = scmp.ge.s32.totalorder %s1076_s19, 1  ;;  %p383_p7 = scmp.lt.s32.totalorder %s1076_s19, 3 }
  0x24   : > { %p384_p8 = pnand %p903_p6, %p383_p7 }
  0x25   : > { %s390_s5 = sand.u32 (!%p384_p8), 1, %s1060_s15   ;;  %v1220_v32 = vld [vmem:[%s1285_s0] sm:$0xff] (!%p384_p8)  ;;  %s905_s10 = sshll.u32 (!%p384_p8), %s1068_s17, 1  ;;  %v728_v3 = vlaneseq (!%p384_p8) }
  0x26   : > { %387 = sbr.rel (%p384_p8) target bundleno = 325 (0x145), region = 70  ;;  %s904_s8 = sshll.u32 (!%p384_p8), %s390_s5, 8  ;;  %v910_v33 = vcombine.high (!%p384_p8), %v1220_v32, %v1220_v32  ;;  %v909_v2 = vcombine.low (!%p384_p8), %v1220_v32, %v1220_v32 }
  0x27   : > { %s1224_s9 = scalar_lea.vmem (!%p384_p8), [#allocation3], %s904_s8  ;;  %p449_p9 = scmp.lt.s32.totalorder (!%p384_p8), %s905_s10, 3  ;;  %v729_v4 = vshrl.u32 (!%p384_p8), %v728_v3, 7 }
  0x28   : > { %v988_v34 = vld [vmem:[%s1224_s9 + $0x4] ss:$8 sps:$4 sm:$0xff] (!%p384_p8)   ;;  %708 = vmatprep.mubr.bf16.mxu0 (!%p384_p8), %v910_v33  ;;  %v990_v35 = vld [vmem:[%s1224_s9] ss:$8 sps:$4 sm:$0xff] (!%p384_p8)   ;;  %v991_v36 = vld [vmem:[%s1224_s9 + $0x14] ss:$8 sps:$4 sm:$0xff] (!%p384_p8)  }
  0x29   : > { %676 = vmatprep.subr.bf16.mxu0 (!%p384_p8), %v988_v34  ;;  %v993_v37 = vld [vmem:[%s1224_s9 + $0x10] ss:$8 sps:$4 sm:$0xff] (!%p384_p8)   ;;  %v994_v38 = vld [vmem:[%s1224_s9 + $0x24] ss:$8 sps:$4 sm:$0xff] (!%p384_p8)   ;;  %v996_v39 = vld [vmem:[%s1224_s9 + $0x20] ss:$8 sps:$4 sm:$0xff] (!%p384_p8)  }
  0x2a   : > { %677 = vmatpush1.bf16.msra.mxu0 (!%p384_p8), %v990_v35  ;;  %v997_v40 = vld [vmem:[%s1224_s9 + $0x34] ss:$8 sps:$4 sm:$0xff] (!%p384_p8)   ;;  %v999_v41 = vld [vmem:[%s1224_s9 + $0x30] ss:$8 sps:$4 sm:$0xff] (!%p384_p8)   ;;  %v1000_v42 = vld [vmem:[%s1224_s9 + $0x44] ss:$8 sps:$4 sm:$0xff] (!%p384_p8)  }
  0x2b   : > { %678 = vmatprep.subr.bf16.mxu0 (!%p384_p8), %v991_v36  ;;  %v1002_v43 = vld [vmem:[%s1224_s9 + $0x40] ss:$8 sps:$4 sm:$0xff] (!%p384_p8)   ;;  %v1003_v44 = vld [vmem:[%s1224_s9 + $0x54] ss:$8 sps:$4 sm:$0xff] (!%p384_p8)   ;;  %v1005_v45 = vld [vmem:[%s1224_s9 + $0x50] ss:$8 sps:$4 sm:$0xff] (!%p384_p8)  }
  0x2c   : > { %v1006_v46 = vld [vmem:[%s1224_s9 + $0x64] ss:$8 sps:$4 sm:$0xff] (!%p384_p8)   ;;  %v1008_v47 = vld [vmem:[%s1224_s9 + $0x60] ss:$8 sps:$4 sm:$0xff] (!%p384_p8)   ;;  %v1009_v48 = vld [vmem:[%s1224_s9 + $0x74] ss:$8 sps:$4 sm:$0xff] (!%p384_p8)  }
  0x2d   : > { %v1011_v49 = vld [vmem:[%s1224_s9 + $0x70] ss:$8 sps:$4 sm:$0xff]   ;;  %v1012_v50 = vld [vmem:[%s1224_s9 + $0x84] ss:$8 sps:$4 sm:$0xff]   ;;  %v1014_v51 = vld [vmem:[%s1224_s9 + $0x80] ss:$8 sps:$4 sm:$0xff]  }
  0x2e   : > { %679 = vmatpush1.bf16.msra.mxu0 %v993_v37  ;;  %v1015_v52 = vld [vmem:[%s1224_s9 + $0x94] ss:$8 sps:$4 sm:$0xff]   ;;  %v1017_v53 = vld [vmem:[%s1224_s9 + $0x90] ss:$8 sps:$4 sm:$0xff]   ;;  %v1018_v54 = vld [vmem:[%s1224_s9 + $0xa4] ss:$8 sps:$4 sm:$0xff]  }
  0x2f   : > { %680 = vmatprep.subr.bf16.mxu0 %v994_v38  ;;  %v1020_v55 = vld [vmem:[%s1224_s9 + $0xa0] ss:$8 sps:$4 sm:$0xff]   ;;  %v1021_v56 = vld [vmem:[%s1224_s9 + $0xb4] ss:$8 sps:$4 sm:$0xff]   ;;  %v1023_v57 = vld [vmem:[%s1224_s9 + $0xb0] ss:$8 sps:$4 sm:$0xff]  }
  0x30   : > { %v1024_v58 = vld [vmem:[%s1224_s9 + $0xc4] ss:$8 sps:$4 sm:$0xff]   ;;  %v1026_v59 = vld [vmem:[%s1224_s9 + $0xc0] ss:$8 sps:$4 sm:$0xff]   ;;  %v1027_v60 = vld [vmem:[%s1224_s9 + $0xd4] ss:$8 sps:$4 sm:$0xff]  }
  0x31   : > { %v1029_v61 = vld [vmem:[%s1224_s9 + $0xd0] ss:$8 sps:$4 sm:$0xff]   ;;  %v1030_v62 = vld [vmem:[%s1224_s9 + $0xe4] ss:$8 sps:$4 sm:$0xff]   ;;  %v1032_v63 = vld [vmem:[%s1224_s9 + $0xe0] ss:$8 sps:$4 sm:$0xff]  }
  0x32   : > { %681 = vmatpush1.bf16.msra.mxu0 %v996_v39  ;;  %v1033_v0 = vld [vmem:[%s1224_s9 + $0xf4] ss:$8 sps:$4 sm:$0xff]   ;;  %v1035_v1 = vld [vmem:[%s1224_s9 + $0xf0] ss:$8 sps:$4 sm:$0xff]   ;;  %s1297_s10 = smov (!%p449_p9, %s905_s10), 3  ;;  %v730_v5 = vsub.s32 0, %v729_v4 }
  0x33   : > { %682 = vmatprep.subr.bf16.mxu0 %v997_v40  ;;  %s451_s13 = scalar_lea.vmem %s1287_s2, %s1297_s10  ;;  %s456_s21 = scalar_lea.vmem %s1288_s3, %s1297_s10  ;;  %v734_v7 = vsub.s32 1, %v729_v4 }
  0x34   : > { %v726_v6 = vld [vmem:[%s451_s13] sm:$0x3]  ;;  %s908_s17 = sshll.u32 %s1297_s10, 2 }
  0x35   : > { %v740_v8 = vld [vmem:[%s456_s21] sm:$0x3]  ;;  %v731_v9 = vrot.slane %v726_v6, %v730_v5  ;;  %v735_v10 = vrot.slane %v726_v6, %v734_v7  ;;  %s466_s25 = scalar_lea.vmem %s1289_s4, %s908_s17 }
  0x36   : > { %683 = vmatpush1.bf16.msra.mxu0 %v999_v41  ;;  %v745_v11 = vrot.slane %v740_v8, %v730_v5  ;;  %v749_v13 = vrot.slane %v740_v8, %v734_v7 }
  0x37   : > { %684 = vmatprep.subr.bf16.mxu0 %v1000_v42 }
  0x3a   : > { %685 = vmatpush1.bf16.msra.mxu0 %v1002_v43 }
  0x3b   : > { %686 = vmatprep.subr.bf16.mxu0 %v1003_v44 }
  0x3e   : > { %687 = vmatpush1.bf16.msra.mxu0 %v1005_v45 }
  0x3f   : > { %688 = vmatprep.subr.bf16.mxu0 %v1006_v46 }
  0x42   : > { %689 = vmatpush1.bf16.msra.mxu0 %v1008_v47 }
  0x43   : > { %690 = vmatprep.subr.bf16.mxu0 %v1009_v48 }
  0x46   : > { %691 = vmatpush1.bf16.msra.mxu0 %v1011_v49 }
  0x47   : > { %692 = vmatprep.subr.bf16.mxu0 %v1012_v50 }
  0x4a   : > { %693 = vmatpush1.bf16.msra.mxu0 %v1014_v51 }
  0x4b   : > { %694 = vmatprep.subr.bf16.mxu0 %v1015_v52 }
  0x4e   : > { %695 = vmatpush1.bf16.msra.mxu0 %v1017_v53 }
  0x4f   : > { %696 = vmatprep.subr.bf16.mxu0 %v1018_v54 }
  0x52   : > { %697 = vmatpush1.bf16.msra.mxu0 %v1020_v55 }
  0x53   : > { %698 = vmatprep.subr.bf16.mxu0 %v1021_v56 }
  0x56   : > { %699 = vmatpush1.bf16.msra.mxu0 %v1023_v57 }
  0x57   : > { %700 = vmatprep.subr.bf16.mxu0 %v1024_v58 }
  0x5a   : > { %701 = vmatpush1.bf16.msra.mxu0 %v1026_v59 }
  0x5b   : > { %702 = vmatprep.subr.bf16.mxu0 %v1027_v60 }
  0x5e   : > { %703 = vmatpush1.bf16.msra.mxu0 %v1029_v61 }
  0x5f   : > { %704 = vmatprep.subr.bf16.mxu0 %v1030_v62 }
  0x62   : > { %705 = vmatpush1.bf16.msra.mxu0 %v1032_v63 }
  0x63   : > { %706 = vmatprep.subr.bf16.mxu0 %v1033_v0 }
  0x66   : > { %707 = vmatpush1.bf16.msra.mxu0 %v1035_v1 }
  0x69   : > { %709 = vmatmul.mubr.bf16.vlgmr.msra.gmra.mrb[0].mxu0 %v909_v2 }
 0x13c   : > { %v710_v12 = vpop.f32.mrb[0].mxu0 }
 0x13d   : > { %v738_v14 = vmul.f32 %v731_v9, %v710_v12  ;;  %v712_v15 = vpop.f32.mrb[1].mxu0 }
 0x13e   : > { %v739_v16 = vmul.f32 %v735_v10, %v712_v15  ;;  %v714_v17 = vpop.f32.mrb[2].mxu0 }
 0x13f   : > { %v752_v18 = vadd.f32 %v745_v11, %v738_v14  ;;  %v715_v19 = vpop.f32.mrb[3].mxu0 }
 0x140   : > { %v753_v20 = vadd.f32 %v749_v13, %v739_v16 }
 0x142   : > { %v947_v21 = vpack.c.bf16 %v753_v20, %v752_v18 }
 0x144   : > { %762 = vst [vmem:[%s466_s25] sm:$0xff] %v947_v21 }
 0x145 PF: > { %s14_s19 = sadd.s32 1, %s1076_s19   ;;  %s1290_s15 = smov %s1064_s16 }
 0x146   : > { %p11_p10 = scmp.ge.s32.totalorder %s14_s19, 4   ;;  %s1291_s16 = smov %s1138_s23 }
 0x147   : > { %s1292_s17 = smov %s1072_s18  ;;  %s1293_s18 = smov %s1295_s20 }
 0x148   :  { %13 = sbr.rel (!%p11_p10) target bundleno = 3 (0x3), region = 126 }

// kernel: _lambda_.38
= control target key start
LH: loop header
LB: loop body
LE: loop exit
PB: predicated region body
PF: predicated region fallthrough
CT: control target
= control target key end

     0   :  { %s1691_s18 = smov 0   ;;  %s1693_s19 = smov 0   ;;  %s2017_s0 = inlined_call_operand.vmem [shape: bf16[8,4608], index: 0, kind: input, shape index: {}]   ;;  %s2018_s1 = inlined_call_operand.vmem [shape: bf16[4608,512], index: 1, kind: input, shape index: {}]   ;;  %s2019_s2 = inlined_call_operand.vmem [shape: f32[1,512], index: 2, kind: input, shape index: {}]   ;;  %s2020_s3 = inlined_call_operand.vmem [shape: f32[1,512], index: 3, kind: input, shape index: {}]   ;;  %s2021_s4 = inlined_call_operand.vmem [shape: bf16[8,512], index: 4, kind: input, shape index: {}]   ;;  %s2022_s5 = inlined_call_operand.vmem [shape: bf16[8,512], index: 5, kind: output, shape index: {}]  }
   0x1   :  { %s1695_s20 = smov 0   ;;  %s1697_s21 = smov 0  }
   0x2   :  { %s1699_s22 = smov 0   ;;  %s1701_s23 = smov 0  }
   0x3   :  { %s1703_s24 = smov 0  }
   0x4 LB: > { %s27_s25 = sadd.s32 1, %s1650_s22  ;;  %s30_s26 = sadd.s32 1, %s1654_s23  ;;  %s1658_s24 = sphi %s1703_s24, %s15_s24   ;;  %s1654_s23 = sphi %s1701_s23, %s2028_s23   ;;  %s1650_s22 = sphi %s1699_s22, %s2027_s22   ;;  %s1646_s21 = sphi %s1697_s21, %s2026_s21   ;;  %s1642_s20 = sphi %s1695_s20, %s2025_s20   ;;  %s1638_s19 = sphi %s1693_s19, %s2024_s19   ;;  %s1634_s18 = sphi %s1691_s18, %s2023_s18  }
   0x5   : > { %p28_p0 = scmp.ge.s32.totalorder %s27_s25, 9  ;;  %p78_p1 = scmp.ne.s32.totalorder %s1638_s19, %s1634_s18 }
   0x6   : > { %p79_p2 = scmp.eq.s32.totalorder %s1658_s24, 0  ;;  %s71_s30 = sadd.s32 1, %s1638_s19 }
   0x7   : > { %s2030_s25 = smov (%p28_p0, %s27_s25), 0  ;;  %s2032_s26 = smov (!%p28_p0, %s30_s26), %s1654_s23 }
   0x8   : > { %p80_p3 = por %p79_p2, %p78_p1  ;;  %p32_p4 = scmp.ge.s32.totalorder %s2032_s26, 2 }
   0x9   : > { %s66_s27 = ssub.s32 %s1650_s22, %s2030_s25  ;;  %p1356_p6 = scmp.ge.s32.totalorder %s1658_s24, 18 }
   0xa   : > { %s2034_s26 = smov (%p32_p4, %s2032_s26), 0 }
   0xb   : > { %s67_s28 = ssub.s32 %s1654_s23, %s2034_s26  ;;  %212 = sbr.rel (%p1356_p6) target bundleno = 57 (0x39), region = 16 }
   0xc   : > { %s68_s29 = sor.u32 %s67_s28, %s66_s27 }
   0xd   : > { %p69_p5 = scmp.eq.s32.totalorder %s68_s29, 0 }
   0xf   : > { %s1742_s6 = scalar_select %p69_p5, %s1638_s19, %s71_s30  }
  0x12   : > { %228 = sbr.rel (!%p80_p3) target bundleno = 57 (0x39), region = 24  ;;  %s230_s7 = sand.u32 (%p80_p3), 1, %s1638_s19  }
  0x13   : > { %s1359_s8 = sshll.u32 (%p80_p3), %s1654_s23, 1  ;;  %s1357_s9 = sshll.u32 (%p80_p3), %s230_s7, 9 }
  0x14   : > { %s1445_s10 = sshll.u32 (%p80_p3), %s1650_s22, 8  ;;  %s1756_s16 = scalar_lea.vmem (%p80_p3), [#allocation3], %s1357_s9 }
  0x15   : > { %s236_s11 = sadd.s32 (%p80_p3), %s1445_s10, %s1359_s8 }
  0x16   : > { %s1361_s12 = sshll.u32 (%p80_p3), %s236_s11, 2 }
  0x17   : > { %s1751_s15 = scalar_lea.vmem (%p80_p3), %s2018_s1, %s1361_s12 }
  0x18   : > { %v392_v0 = vld [vmem:[%s1751_s15] sm:$0xff] (%p80_p3)  ;;  %v394_v1 = vld [vmem:[%s1751_s15 + $0x10] sm:$0xff] (%p80_p3) }
  0x19   : > { %v396_v2 = vld [vmem:[%s1751_s15 + $0x20] sm:$0xff]  ;;  %393 = vst [vmem:[%s1756_s16] sm:$0xff] %v392_v0  ;;  %395 = vst [vmem:[%s1756_s16 + $0x8] sm:$0xff] %v394_v1  ;;  %v398_v3 = vld [vmem:[%s1751_s15 + $0x30] sm:$0xff] }
  0x1a   : > { %397 = vst [vmem:[%s1756_s16 + $0x10] sm:$0xff] %v396_v2  ;;  %v400_v4 = vld [vmem:[%s1751_s15 + $0x40] sm:$0xff]  ;;  %v402_v5 = vld [vmem:[%s1751_s15 + $0x50] sm:$0xff]  ;;  %399 = vst [vmem:[%s1756_s16 + $0x18] sm:$0xff] %v398_v3 }
  0x1b   : > { %401 = vst [vmem:[%s1756_s16 + $0x20] sm:$0xff] %v400_v4  ;;  %403 = vst [vmem:[%s1756_s16 + $0x28] sm:$0xff] %v402_v5  ;;  %v404_v6 = vld [vmem:[%s1751_s15 + $0x60] sm:$0xff]  ;;  %v406_v7 = vld [vmem:[%s1751_s15 + $0x70] sm:$0xff] }
  0x1c   : > { %v408_v8 = vld [vmem:[%s1751_s15 + $0x80] sm:$0xff]  ;;  %405 = vst [vmem:[%s1756_s16 + $0x30] sm:$0xff] %v404_v6  ;;  %407 = vst [vmem:[%s1756_s16 + $0x38] sm:$0xff] %v406_v7  ;;  %v410_v9 = vld [vmem:[%s1751_s15 + $0x90] sm:$0xff] }
  0x1d   : > { %409 = vst [vmem:[%s1756_s16 + $0x40] sm:$0xff] %v408_v8  ;;  %v412_v10 = vld [vmem:[%s1751_s15 + $0xa0] sm:$0xff]  ;;  %v414_v11 = vld [vmem:[%s1751_s15 + $0xb0] sm:$0xff]  ;;  %411 = vst [vmem:[%s1756_s16 + $0x48] sm:$0xff] %v410_v9 }
  0x1e   : > { %413 = vst [vmem:[%s1756_s16 + $0x50] sm:$0xff] %v412_v10  ;;  %415 = vst [vmem:[%s1756_s16 + $0x58] sm:$0xff] %v414_v11  ;;  %v416_v12 = vld [vmem:[%s1751_s15 + $0xc0] sm:$0xff]  ;;  %v418_v13 = vld [vmem:[%s1751_s15 + $0xd0] sm:$0xff] }
  0x1f   : > { %v420_v14 = vld [vmem:[%s1751_s15 + $0xe0] sm:$0xff]  ;;  %417 = vst [vmem:[%s1756_s16 + $0x60] sm:$0xff] %v416_v12  ;;  %419 = vst [vmem:[%s1756_s16 + $0x68] sm:$0xff] %v418_v13  ;;  %v422_v15 = vld [vmem:[%s1751_s15 + $0xf0] sm:$0xff] }
  0x20   : > { %421 = vst [vmem:[%s1756_s16 + $0x70] sm:$0xff] %v420_v14  ;;  %v424_v16 = vld [vmem:[%s1751_s15 + $0x100] sm:$0xff]  ;;  %v426_v17 = vld [vmem:[%s1751_s15 + $0x110] sm:$0xff]  ;;  %423 = vst [vmem:[%s1756_s16 + $0x78] sm:$0xff] %v422_v15 }
  0x21   : > { %425 = vst [vmem:[%s1756_s16 + $0x80] sm:$0xff] %v424_v16  ;;  %427 = vst [vmem:[%s1756_s16 + $0x88] sm:$0xff] %v426_v17  ;;  %v428_v18 = vld [vmem:[%s1751_s15 + $0x120] sm:$0xff]  ;;  %v430_v19 = vld [vmem:[%s1751_s15 + $0x130] sm:$0xff] }
  0x22   : > { %v432_v20 = vld [vmem:[%s1751_s15 + $0x140] sm:$0xff]  ;;  %429 = vst [vmem:[%s1756_s16 + $0x90] sm:$0xff] %v428_v18  ;;  %431 = vst [vmem:[%s1756_s16 + $0x98] sm:$0xff] %v430_v19  ;;  %v434_v21 = vld [vmem:[%s1751_s15 + $0x150] sm:$0xff] }
  0x23   : > { %433 = vst [vmem:[%s1756_s16 + $0xa0] sm:$0xff] %v432_v20  ;;  %v436_v22 = vld [vmem:[%s1751_s15 + $0x160] sm:$0xff]  ;;  %v438_v23 = vld [vmem:[%s1751_s15 + $0x170] sm:$0xff]  ;;  %435 = vst [vmem:[%s1756_s16 + $0xa8] sm:$0xff] %v434_v21 }
  0x24   : > { %437 = vst [vmem:[%s1756_s16 + $0xb0] sm:$0xff] %v436_v22  ;;  %439 = vst [vmem:[%s1756_s16 + $0xb8] sm:$0xff] %v438_v23  ;;  %v440_v24 = vld [vmem:[%s1751_s15 + $0x180] sm:$0xff]  ;;  %v442_v25 = vld [vmem:[%s1751_s15 + $0x190] sm:$0xff] }
  0x25   : > { %v444_v26 = vld [vmem:[%s1751_s15 + $0x1a0] sm:$0xff]  ;;  %441 = vst [vmem:[%s1756_s16 + $0xc0] sm:$0xff] %v440_v24  ;;  %443 = vst [vmem:[%s1756_s16 + $0xc8] sm:$0xff] %v442_v25  ;;  %v446_v27 = vld [vmem:[%s1751_s15 + $0x1b0] sm:$0xff] }
  0x26   : > { %445 = vst [vmem:[%s1756_s16 + $0xd0] sm:$0xff] %v444_v26  ;;  %v448_v28 = vld [vmem:[%s1751_s15 + $0x1c0] sm:$0xff]  ;;  %v450_v29 = vld [vmem:[%s1751_s15 + $0x1d0] sm:$0xff]  ;;  %447 = vst [vmem:[%s1756_s16 + $0xd8] sm:$0xff] %v446_v27 }
  0x27   : > { %449 = vst [vmem:[%s1756_s16 + $0xe0] sm:$0xff] %v448_v28  ;;  %451 = vst [vmem:[%s1756_s16 + $0xe8] sm:$0xff] %v450_v29  ;;  %v452_v30 = vld [vmem:[%s1751_s15 + $0x1e0] sm:$0xff]  ;;  %v454_v31 = vld [vmem:[%s1751_s15 + $0x1f0] sm:$0xff] }
  0x28   : > { %v456_v32 = vld [vmem:[%s1751_s15 + $0x200] sm:$0xff]  ;;  %453 = vst [vmem:[%s1756_s16 + $0xf0] sm:$0xff] %v452_v30  ;;  %455 = vst [vmem:[%s1756_s16 + $0xf8] sm:$0xff] %v454_v31  ;;  %v458_v33 = vld [vmem:[%s1751_s15 + $0x210] sm:$0xff] }
  0x29   : > { %457 = vst [vmem:[%s1756_s16 + $0x100] sm:$0xff] %v456_v32  ;;  %v460_v34 = vld [vmem:[%s1751_s15 + $0x220] sm:$0xff]  ;;  %v462_v35 = vld [vmem:[%s1751_s15 + $0x230] sm:$0xff]  ;;  %459 = vst [vmem:[%s1756_s16 + $0x108] sm:$0xff] %v458_v33 }
  0x2a   : > { %461 = vst [vmem:[%s1756_s16 + $0x110] sm:$0xff] %v460_v34  ;;  %463 = vst [vmem:[%s1756_s16 + $0x118] sm:$0xff] %v462_v35  ;;  %v464_v36 = vld [vmem:[%s1751_s15 + $0x240] sm:$0xff]  ;;  %v466_v37 = vld [vmem:[%s1751_s15 + $0x250] sm:$0xff] }
  0x2b   : > { %v468_v38 = vld [vmem:[%s1751_s15 + $0x260] sm:$0xff]  ;;  %465 = vst [vmem:[%s1756_s16 + $0x120] sm:$0xff] %v464_v36  ;;  %467 = vst [vmem:[%s1756_s16 + $0x128] sm:$0xff] %v466_v37  ;;  %v470_v39 = vld [vmem:[%s1751_s15 + $0x270] sm:$0xff] }
  0x2c   : > { %469 = vst [vmem:[%s1756_s16 + $0x130] sm:$0xff] %v468_v38  ;;  %v472_v40 = vld [vmem:[%s1751_s15 + $0x280] sm:$0xff]  ;;  %v474_v41 = vld [vmem:[%s1751_s15 + $0x290] sm:$0xff]  ;;  %471 = vst [vmem:[%s1756_s16 + $0x138] sm:$0xff] %v470_v39 }
  0x2d   : > { %473 = vst [vmem:[%s1756_s16 + $0x140] sm:$0xff] %v472_v40  ;;  %475 = vst [vmem:[%s1756_s16 + $0x148] sm:$0xff] %v474_v41  ;;  %v476_v42 = vld [vmem:[%s1751_s15 + $0x2a0] sm:$0xff]  ;;  %v478_v43 = vld [vmem:[%s1751_s15 + $0x2b0] sm:$0xff] }
  0x2e   : > { %v480_v44 = vld [vmem:[%s1751_s15 + $0x2c0] sm:$0xff]  ;;  %477 = vst [vmem:[%s1756_s16 + $0x150] sm:$0xff] %v476_v42  ;;  %479 = vst [vmem:[%s1756_s16 + $0x158] sm:$0xff] %v478_v43  ;;  %v482_v45 = vld [vmem:[%s1751_s15 + $0x2d0] sm:$0xff] }
  0x2f   : > { %481 = vst [vmem:[%s1756_s16 + $0x160] sm:$0xff] %v480_v44  ;;  %v484_v46 = vld [vmem:[%s1751_s15 + $0x2e0] sm:$0xff]  ;;  %v486_v47 = vld [vmem:[%s1751_s15 + $0x2f0] sm:$0xff]  ;;  %483 = vst [vmem:[%s1756_s16 + $0x168] sm:$0xff] %v482_v45 }
  0x30   : > { %485 = vst [vmem:[%s1756_s16 + $0x170] sm:$0xff] %v484_v46  ;;  %487 = vst [vmem:[%s1756_s16 + $0x178] sm:$0xff] %v486_v47  ;;  %v488_v48 = vld [vmem:[%s1751_s15 + $0x300] sm:$0xff]  ;;  %v490_v49 = vld [vmem:[%s1751_s15 + $0x310] sm:$0xff] }
  0x31   : > { %v492_v50 = vld [vmem:[%s1751_s15 + $0x320] sm:$0xff]  ;;  %489 = vst [vmem:[%s1756_s16 + $0x180] sm:$0xff] %v488_v48  ;;  %491 = vst [vmem:[%s1756_s16 + $0x188] sm:$0xff] %v490_v49  ;;  %v494_v51 = vld [vmem:[%s1751_s15 + $0x330] sm:$0xff] }
  0x32   : > { %493 = vst [vmem:[%s1756_s16 + $0x190] sm:$0xff] %v492_v50  ;;  %v496_v52 = vld [vmem:[%s1751_s15 + $0x340] sm:$0xff]  ;;  %v498_v53 = vld [vmem:[%s1751_s15 + $0x350] sm:$0xff]  ;;  %495 = vst [vmem:[%s1756_s16 + $0x198] sm:$0xff] %v494_v51 }
  0x33   : > { %497 = vst [vmem:[%s1756_s16 + $0x1a0] sm:$0xff] %v496_v52  ;;  %499 = vst [vmem:[%s1756_s16 + $0x1a8] sm:$0xff] %v498_v53  ;;  %v500_v54 = vld [vmem:[%s1751_s15 + $0x360] sm:$0xff]  ;;  %v502_v55 = vld [vmem:[%s1751_s15 + $0x370] sm:$0xff] }
  0x34   : > { %v504_v56 = vld [vmem:[%s1751_s15 + $0x380] sm:$0xff]  ;;  %501 = vst [vmem:[%s1756_s16 + $0x1b0] sm:$0xff] %v500_v54  ;;  %503 = vst [vmem:[%s1756_s16 + $0x1b8] sm:$0xff] %v502_v55  ;;  %v506_v57 = vld [vmem:[%s1751_s15 + $0x390] sm:$0xff] }
  0x35   : > { %505 = vst [vmem:[%s1756_s16 + $0x1c0] sm:$0xff] %v504_v56  ;;  %v508_v58 = vld [vmem:[%s1751_s15 + $0x3a0] sm:$0xff]  ;;  %v510_v59 = vld [vmem:[%s1751_s15 + $0x3b0] sm:$0xff]  ;;  %507 = vst [vmem:[%s1756_s16 + $0x1c8] sm:$0xff] %v506_v57 }
  0x36   : > { %509 = vst [vmem:[%s1756_s16 + $0x1d0] sm:$0xff] %v508_v58  ;;  %511 = vst [vmem:[%s1756_s16 + $0x1d8] sm:$0xff] %v510_v59  ;;  %v512_v60 = vld [vmem:[%s1751_s15 + $0x3c0] sm:$0xff]  ;;  %v514_v61 = vld [vmem:[%s1751_s15 + $0x3d0] sm:$0xff] }
  0x37   : > { %v516_v62 = vld [vmem:[%s1751_s15 + $0x3e0] sm:$0xff]  ;;  %513 = vst [vmem:[%s1756_s16 + $0x1e0] sm:$0xff] %v512_v60  ;;  %515 = vst [vmem:[%s1756_s16 + $0x1e8] sm:$0xff] %v514_v61  ;;  %v518_v63 = vld [vmem:[%s1751_s15 + $0x3f0] sm:$0xff] }
  0x38   : > { %517 = vst [vmem:[%s1756_s16 + $0x1f0] sm:$0xff] %v516_v62  ;;  %519 = vst [vmem:[%s1756_s16 + $0x1f8] sm:$0xff] %v518_v63 }
  0x39 PF: > { %p1362_p7 = scmp.ge.s32.totalorder %s1658_s24, 1  ;;  %p553_p8 = scmp.lt.s32.totalorder %s1658_s24, 19 }
  0x3b   : > { %p554_p9 = pnand %p1362_p7, %p553_p8 }
  0x3c   : > { %s560_s17 = sand.u32 (!%p554_p9), 1, %s1634_s18   ;;  %s1364_s27 = sshll.u32 (!%p554_p9), %s1642_s20, 2 }
  0x3d   : > { %557 = sbr.rel (%p554_p9) target bundleno = 380 (0x17c), region = 74  ;;  %s1363_s28 = sshll.u32 (!%p554_p9), %s560_s17, 9 }
  0x3e   : > { %p620_p10 = scmp.lt.s32.totalorder (!%p554_p9), %s1364_s27, 35  ;;  %s1366_s29 = sshll.u32 (!%p554_p9), %s1646_s21, 1 }
  0x3f   : > { %p630_p11 = scmp.lt.s32.totalorder (!%p554_p9), %s1366_s29, 3  ;;  %s1914_s8 = scalar_lea.vmem (!%p554_p9), [#allocation3], %s1363_s28 }
  0x40   : > { %p1372_p12 = scmp.ne.s32.totalorder (!%p554_p9), %s1642_s20, 0 }
  0x44   : > { %s2036_s27 = smov (!%p620_p10, %s1364_s27), 35  ;;  %s2038_s29 = smov (!%p630_p11, %s1366_s29), 3 }
  0x45   : > { %s1365_s30 = sshll.u32 %s2036_s27, 2  ;;  %s632_s18 = scalar_lea.vmem %s2019_s2, %s2038_s29  ;;  %v1660_v0 = vmov (!%p1372_p12), 0.0  }
  0x46   : > { %s1891_s9 = scalar_lea.vmem %s2017_s0, %s1365_s30  ;;  %s637_s21 = scalar_lea.vmem %s2020_s3, %s2038_s29  ;;  %663 = vst [vmem:[#allocation2] sm:$0xff] (!%p1372_p12), %v1660_v0  ;;  %664 = vst [vmem:[#allocation2 + $0x8] sm:$0xff] (!%p1372_p12), %v1660_v0 }
  0x47   : > { %s1369_s14 = sshll.u32 %s2038_s29, 2  ;;  %662 = sbr.rel (%p1372_p12) target bundleno = 78 (0x4e), region = 82 }
  0x48   : > { %s1907_s17 = scalar_lea.vmem %s2021_s4, %s1369_s14  ;;  %s1912_s7 = scalar_lea.vmem %s2022_s5, %s1369_s14 }
  0x4e PF: > { %v1504_v1 = vld [vmem:[%s1914_s8 + $0x4] ss:$8 sps:$4 sm:$0xff]   ;;  %v1508_v3 = vld [vmem:[%s1914_s8] ss:$8 sps:$4 sm:$0xff]   ;;  %v1510_v5 = vld [vmem:[%s1914_s8 + $0x14] ss:$8 sps:$4 sm:$0xff]  }
  0x4f   : > { %v1506_v2 = vld [vmem:[%s1914_s8 + $0x104] ss:$8 sps:$4 sm:$0xff]   ;;  %1067 = vmatprep.subr.bf16.mxu0 %v1504_v1  ;;  %v1509_v4 = vld [vmem:[%s1914_s8 + $0x100] ss:$8 sps:$4 sm:$0xff]   ;;  %v1512_v6 = vld [vmem:[%s1914_s8 + $0x114] ss:$8 sps:$4 sm:$0xff]  }
  0x50   : > { %1108 = vmatprep.subr.bf16.mxu1 %v1506_v2  ;;  %1068 = vmatpush1.bf16.msra.mxu0 %v1508_v3  ;;  %v1514_v7 = vld [vmem:[%s1914_s8 + $0x10] ss:$8 sps:$4 sm:$0xff]   ;;  %v1516_v9 = vld [vmem:[%s1914_s8 + $0x24] ss:$8 sps:$4 sm:$0xff]   ;;  %v1520_v11 = vld [vmem:[%s1914_s8 + $0x20] ss:$8 sps:$4 sm:$0xff]  }
  0x51   : > { %1109 = vmatpush1.bf16.msra.mxu1 %v1509_v4  ;;  %1069 = vmatprep.subr.bf16.mxu0 %v1510_v5  ;;  %v1515_v8 = vld [vmem:[%s1914_s8 + $0x110] ss:$8 sps:$4 sm:$0xff]   ;;  %v1518_v10 = vld [vmem:[%s1914_s8 + $0x124] ss:$8 sps:$4 sm:$0xff]   ;;  %v1521_v12 = vld [vmem:[%s1914_s8 + $0x120] ss:$8 sps:$4 sm:$0xff]  }
  0x52   : > { %1110 = vmatprep.subr.bf16.mxu1 %v1512_v6  ;;  %v1522_v13 = vld [vmem:[%s1914_s8 + $0x34] ss:$8 sps:$4 sm:$0xff]   ;;  %v1526_v15 = vld [vmem:[%s1914_s8 + $0x30] ss:$8 sps:$4 sm:$0xff]   ;;  %v1528_v17 = vld [vmem:[%s1914_s8 + $0x44] ss:$8 sps:$4 sm:$0xff]  }
  0x53   : > { %v1524_v14 = vld [vmem:[%s1914_s8 + $0x134] ss:$8 sps:$4 sm:$0xff]   ;;  %v1527_v16 = vld [vmem:[%s1914_s8 + $0x130] ss:$8 sps:$4 sm:$0xff]   ;;  %v1530_v18 = vld [vmem:[%s1914_s8 + $0x144] ss:$8 sps:$4 sm:$0xff]  }
  0x54   : > { %1070 = vmatpush1.bf16.msra.mxu0 %v1514_v7  ;;  %v1532_v19 = vld [vmem:[%s1914_s8 + $0x40] ss:$8 sps:$4 sm:$0xff]   ;;  %v1534_v21 = vld [vmem:[%s1914_s8 + $0x54] ss:$8 sps:$4 sm:$0xff]   ;;  %v1538_v23 = vld [vmem:[%s1914_s8 + $0x50] ss:$8 sps:$4 sm:$0xff]  }
  0x55   : > { %1111 = vmatpush1.bf16.msra.mxu1 %v1515_v8  ;;  %1071 = vmatprep.subr.bf16.mxu0 %v1516_v9  ;;  %v1533_v20 = vld [vmem:[%s1914_s8 + $0x140] ss:$8 sps:$4 sm:$0xff]   ;;  %v1536_v22 = vld [vmem:[%s1914_s8 + $0x154] ss:$8 sps:$4 sm:$0xff]   ;;  %v1539_v24 = vld [vmem:[%s1914_s8 + $0x150] ss:$8 sps:$4 sm:$0xff]  }
  0x56   : > { %1112 = vmatprep.subr.bf16.mxu1 %v1518_v10  ;;  %v1540_v25 = vld [vmem:[%s1914_s8 + $0x64] ss:$8 sps:$4 sm:$0xff]   ;;  %v1544_v27 = vld [vmem:[%s1914_s8 + $0x60] ss:$8 sps:$4 sm:$0xff]   ;;  %v1546_v29 = vld [vmem:[%s1914_s8 + $0x74] ss:$8 sps:$4 sm:$0xff]  }
  0x57   : > { %v1542_v26 = vld [vmem:[%s1914_s8 + $0x164] ss:$8 sps:$4 sm:$0xff]   ;;  %v1545_v28 = vld [vmem:[%s1914_s8 + $0x160] ss:$8 sps:$4 sm:$0xff]   ;;  %v1548_v30 = vld [vmem:[%s1914_s8 + $0x174] ss:$8 sps:$4 sm:$0xff]  }
  0x58   : > { %1072 = vmatpush1.bf16.msra.mxu0 %v1520_v11  ;;  %v1550_v31 = vld [vmem:[%s1914_s8 + $0x70] ss:$8 sps:$4 sm:$0xff]   ;;  %v1552_v33 = vld [vmem:[%s1914_s8 + $0x84] ss:$8 sps:$4 sm:$0xff]   ;;  %v1556_v35 = vld [vmem:[%s1914_s8 + $0x80] ss:$8 sps:$4 sm:$0xff]  }
  0x59   : > { %1113 = vmatpush1.bf16.msra.mxu1 %v1521_v12  ;;  %1073 = vmatprep.subr.bf16.mxu0 %v1522_v13  ;;  %v1551_v32 = vld [vmem:[%s1914_s8 + $0x170] ss:$8 sps:$4 sm:$0xff]   ;;  %v1554_v34 = vld [vmem:[%s1914_s8 + $0x184] ss:$8 sps:$4 sm:$0xff]   ;;  %v1557_v36 = vld [vmem:[%s1914_s8 + $0x180] ss:$8 sps:$4 sm:$0xff]  }
  0x5a   : > { %1114 = vmatprep.subr.bf16.mxu1 %v1524_v14  ;;  %v1558_v37 = vld [vmem:[%s1914_s8 + $0x94] ss:$8 sps:$4 sm:$0xff]   ;;  %v1562_v39 = vld [vmem:[%s1914_s8 + $0x90] ss:$8 sps:$4 sm:$0xff]   ;;  %v1564_v41 = vld [vmem:[%s1914_s8 + $0xa4] ss:$8 sps:$4 sm:$0xff]  }
  0x5b   : > { %v1560_v38 = vld [vmem:[%s1914_s8 + $0x194] ss:$8 sps:$4 sm:$0xff]   ;;  %v1563_v40 = vld [vmem:[%s1914_s8 + $0x190] ss:$8 sps:$4 sm:$0xff]   ;;  %v1566_v42 = vld [vmem:[%s1914_s8 + $0x1a4] ss:$8 sps:$4 sm:$0xff]  }
  0x5c   : > { %1074 = vmatpush1.bf16.msra.mxu0 %v1526_v15  ;;  %v1568_v43 = vld [vmem:[%s1914_s8 + $0xa0] ss:$8 sps:$4 sm:$0xff]   ;;  %v1570_v45 = vld [vmem:[%s1914_s8 + $0xb4] ss:$8 sps:$4 sm:$0xff]   ;;  %v1574_v50 = vld [vmem:[%s1914_s8 + $0xb0] ss:$8 sps:$4 sm:$0xff]  }
  0x5d   : > { %1115 = vmatpush1.bf16.msra.mxu1 %v1527_v16  ;;  %1075 = vmatprep.subr.bf16.mxu0 %v1528_v17  ;;  %v1569_v44 = vld [vmem:[%s1914_s8 + $0x1a0] ss:$8 sps:$4 sm:$0xff]   ;;  %v1572_v46 = vld [vmem:[%s1914_s8 + $0x1b4] ss:$8 sps:$4 sm:$0xff]   ;;  %v1575_v51 = vld [vmem:[%s1914_s8 + $0x1b0] ss:$8 sps:$4 sm:$0xff]  }
  0x5e   : > { %1116 = vmatprep.subr.bf16.mxu1 %v1530_v18  ;;  %v667_v47 = vld [vmem:[%s1891_s9] sm:$0xff]  ;;  %v668_v49 = vld [vmem:[%s1891_s9 + $0x8] sm:$0xff]  ;;  %v1576_v53 = vld [vmem:[%s1914_s8 + $0xc4] ss:$8 sps:$4 sm:$0xff]   ;;  %p1441_p13 = scmp.ne.s32.totalorder %s1642_s20, 8 }
  0x5f   : > { %v1374_v48 = vcombine.high %v667_v47, %v667_v47  ;;  %v1376_v52 = vcombine.high %v668_v49, %v668_v49  ;;  %v1578_v54 = vld [vmem:[%s1914_s8 + $0x1c4] ss:$8 sps:$4 sm:$0xff]   ;;  %v1580_v55 = vld [vmem:[%s1914_s8 + $0xc0] ss:$8 sps:$4 sm:$0xff]   ;;  %v1582_v57 = vld [vmem:[%s1914_s8 + $0xd4] ss:$8 sps:$4 sm:$0xff]   ;;  %v1373_v5 = vcombine.low %v667_v47, %v667_v47  ;;  %v1375_v6 = vcombine.low %v668_v49, %v668_v49 }
  0x60   : > { %1076 = vmatpush1.bf16.msra.mxu0 %v1532_v19  ;;  %v1581_v56 = vld [vmem:[%s1914_s8 + $0x1c0] ss:$8 sps:$4 sm:$0xff]   ;;  %v1584_v58 = vld [vmem:[%s1914_s8 + $0x1d4] ss:$8 sps:$4 sm:$0xff]   ;;  %v1586_v59 = vld [vmem:[%s1914_s8 + $0xd0] ss:$8 sps:$4 sm:$0xff]  }
  0x61   : > { %1117 = vmatpush1.bf16.msra.mxu1 %v1533_v20  ;;  %1077 = vmatprep.subr.bf16.mxu0 %v1534_v21  ;;  %v1587_v60 = vld [vmem:[%s1914_s8 + $0x1d0] ss:$8 sps:$4 sm:$0xff]   ;;  %v1588_v61 = vld [vmem:[%s1914_s8 + $0xe4] ss:$8 sps:$4 sm:$0xff]   ;;  %v1592_v63 = vld [vmem:[%s1914_s8 + $0xe0] ss:$8 sps:$4 sm:$0xff]   ;;  %v1161_v21 = vlaneseq (!%p1441_p13) }
  0x62   : > { %1118 = vmatprep.subr.bf16.mxu1 %v1536_v22  ;;  %1099 = vmatprep.mubr.bf16.mxu0 %v1374_v48  ;;  %v1590_v62 = vld [vmem:[%s1914_s8 + $0x1e4] ss:$8 sps:$4 sm:$0xff]   ;;  %v1593_v0 = vld [vmem:[%s1914_s8 + $0x1e0] ss:$8 sps:$4 sm:$0xff]   ;;  %v1594_v1 = vld [vmem:[%s1914_s8 + $0xf4] ss:$8 sps:$4 sm:$0xff]  }
  0x63   : > { %1140 = vmatprep.mubr.bf16.mxu1 %v1376_v52  ;;  %v1596_v2 = vld [vmem:[%s1914_s8 + $0x1f4] ss:$8 sps:$4 sm:$0xff]   ;;  %v1598_v3 = vld [vmem:[%s1914_s8 + $0xf0] ss:$8 sps:$4 sm:$0xff]   ;;  %v1162_v22 = vshrl.u32 (!%p1441_p13), %v1161_v21, 7 }
  0x64   : > { %1078 = vmatpush1.bf16.msra.mxu0 %v1538_v23  ;;  %v1599_v4 = vld [vmem:[%s1914_s8 + $0x1f0] ss:$8 sps:$4 sm:$0xff]  }
  0x65   : > { %1119 = vmatpush1.bf16.msra.mxu1 %v1539_v24  ;;  %1079 = vmatprep.subr.bf16.mxu0 %v1540_v25  ;;  %v665_v8 = vld [vmem:[#allocation2] sm:$0xff]  ;;  %v666_v12 = vld [vmem:[#allocation2 + $0x8] sm:$0xff]  ;;  %v1163_v25 = vsub.s32 (!%p1441_p13), 0, %v1162_v22 }
  0x66   : > { %1120 = vmatprep.subr.bf16.mxu1 %v1542_v26  ;;  %v1159_v23 = vld [vmem:[%s632_s18] sm:$0x3] (!%p1441_p13)  ;;  %v1167_v26 = vsub.s32 (!%p1441_p13), 1, %v1162_v22 }
  0x67   : > { %v1173_v24 = vld [vmem:[%s637_s21] sm:$0x3] (!%p1441_p13) }
  0x68   : > { %1080 = vmatpush1.bf16.msra.mxu0 %v1544_v27 }
  0x69   : > { %1121 = vmatpush1.bf16.msra.mxu1 %v1545_v28  ;;  %1081 = vmatprep.subr.bf16.mxu0 %v1546_v29  ;;  %v1187_v29 = vld [vmem:[%s1907_s17] sm:$0xff] (!%p1441_p13) }
  0x6a   : > { %1122 = vmatprep.subr.bf16.mxu1 %v1548_v30  ;;  %v1164_v30 = vrot.slane (!%p1441_p13), %v1159_v23, %v1163_v25 }
  0x6c   : > { %1082 = vmatpush1.bf16.msra.mxu0 %v1550_v31  ;;  %v1168_v31 = vrot.slane (!%p1441_p13), %v1159_v23, %v1167_v26 }
  0x6d   : > { %1123 = vmatpush1.bf16.msra.mxu1 %v1551_v32  ;;  %1083 = vmatprep.subr.bf16.mxu0 %v1552_v33  ;;  %v1178_v32 = vrot.slane (!%p1441_p13), %v1173_v24, %v1163_v25  ;;  %v1182_v33 = vrot.slane (!%p1441_p13), %v1173_v24, %v1167_v26 }
  0x6e   : > { %1124 = vmatprep.subr.bf16.mxu1 %v1554_v34 }
  0x70   : > { %1084 = vmatpush1.bf16.msra.mxu0 %v1556_v35 }
  0x71   : > { %1125 = vmatpush1.bf16.msra.mxu1 %v1557_v36  ;;  %1085 = vmatprep.subr.bf16.mxu0 %v1558_v37  ;;  %v1188_v36 = vunpack.c.l.bf16 (!%p1441_p13), %v1187_v29  ;;  %v1189_v37 = vunpack.c.h.bf16 (!%p1441_p13), %v1187_v29 }
  0x72   : > { %1126 = vmatprep.subr.bf16.mxu1 %v1560_v38 }
  0x74   : > { %1086 = vmatpush1.bf16.msra.mxu0 %v1562_v39 }
  0x75   : > { %1127 = vmatpush1.bf16.msra.mxu1 %v1563_v40  ;;  %1087 = vmatprep.subr.bf16.mxu0 %v1564_v41 }
  0x76   : > { %1128 = vmatprep.subr.bf16.mxu1 %v1566_v42 }
  0x78   : > { %1088 = vmatpush1.bf16.msra.mxu0 %v1568_v43 }
  0x79   : > { %1129 = vmatpush1.bf16.msra.mxu1 %v1569_v44  ;;  %1089 = vmatprep.subr.bf16.mxu0 %v1570_v45 }
  0x7a   : > { %1130 = vmatprep.subr.bf16.mxu1 %v1572_v46 }
  0x7c   : > { %1090 = vmatpush1.bf16.msra.mxu0 %v1574_v50 }
  0x7d   : > { %1131 = vmatpush1.bf16.msra.mxu1 %v1575_v51  ;;  %1091 = vmatprep.subr.bf16.mxu0 %v1576_v53 }
  0x7e   : > { %1132 = vmatprep.subr.bf16.mxu1 %v1578_v54 }
  0x80   : > { %1092 = vmatpush1.bf16.msra.mxu0 %v1580_v55 }
  0x81   : > { %1133 = vmatpush1.bf16.msra.mxu1 %v1581_v56  ;;  %1093 = vmatprep.subr.bf16.mxu0 %v1582_v57 }
  0x82   : > { %1134 = vmatprep.subr.bf16.mxu1 %v1584_v58 }
  0x84   : > { %1094 = vmatpush1.bf16.msra.mxu0 %v1586_v59 }
  0x85   : > { %1135 = vmatpush1.bf16.msra.mxu1 %v1587_v60  ;;  %1095 = vmatprep.subr.bf16.mxu0 %v1588_v61 }
  0x86   : > { %1136 = vmatprep.subr.bf16.mxu1 %v1590_v62 }
  0x88   : > { %1096 = vmatpush1.bf16.msra.mxu0 %v1592_v63 }
  0x89   : > { %1137 = vmatpush1.bf16.msra.mxu1 %v1593_v0  ;;  %1097 = vmatprep.subr.bf16.mxu0 %v1594_v1 }
  0x8a   : > { %1138 = vmatprep.subr.bf16.mxu1 %v1596_v2 }
  0x8c   : > { %1098 = vmatpush1.bf16.msra.mxu0 %v1598_v3 }
  0x8d   : > { %1139 = vmatpush1.bf16.msra.mxu1 %v1599_v4 }
  0x8f   : > { %1100 = vmatmul.mubr.bf16.vlgmr.msra.gmra.mrb[0].mxu0 %v1373_v5 }
  0x90   : > { %1141 = vmatmul.mubr.bf16.vlgmr.msra.gmra.mrb[0].mxu1 %v1375_v6 }
 0x162   : > { %v1101_v7 = vpop.f32.mrb[0].mxu0 }
 0x163   : > { %v1142_v9 = vpop.f32.mrb[0].mxu1  ;;  %v1103_v11 = vpop.f32.mrb[1].mxu0  ;;  %1156 = sbr.rel (%p1441_p13) target bundleno = 380 (0x17c), region = 86 }
 0x164   : > { %v1143_v10 = vadd.f32 %v1142_v9, %v1101_v7  ;;  %v1144_v13 = vpop.f32.mrb[1].mxu1  ;;  %v1105_v15 = vpop.f32.mrb[2].mxu0 }
 0x165   : > { %v1145_v14 = vadd.f32 %v1144_v13, %v1103_v11  ;;  %v1146_v16 = vpop.f32.mrb[2].mxu1  ;;  %v1106_v18 = vpop.f32.mrb[3].mxu0 }
 0x166   : > { %v1149_v17 = vadd.f32 %v1143_v10, %v665_v8  ;;  %v1147_v19 = vpop.f32.mrb[3].mxu1 }
 0x167   : > { %v1150_v20 = vadd.f32 %v1145_v14, %v666_v12 }
 0x168   : > { %1151 = vst [vmem:[#allocation2] sm:$0xff] %v1149_v17 }
 0x169   : > { %1152 = vst [vmem:[#allocation2 + $0x8] sm:$0xff] %v1150_v20 }
 0x16f   : > { %v1157_v27 = vld [vmem:[#allocation2] sm:$0xff] }
 0x170   : > { %v1158_v28 = vld [vmem:[#allocation2 + $0x8] sm:$0xff]  ;;  %v1171_v34 = vmul.f32 %v1164_v30, %v1157_v27 }
 0x171   : > { %v1172_v35 = vmul.f32 %v1168_v31, %v1158_v28 }
 0x172   : > { %v1185_v38 = vadd.f32 %v1178_v32, %v1171_v34 }
 0x173   : > { %v1186_v39 = vadd.f32 %v1182_v33, %v1172_v35 }
 0x174   : > { %v1190_v40 = vadd.f32 %v1188_v36, %v1185_v38 }
 0x175   : > { %v1191_v41 = vadd.f32 %v1189_v37, %v1186_v39 }
 0x176   : > { %v1192_v42 = vmax.f32 %v1190_v40, 0.0 }
 0x177   : > { %v1193_v43 = vmax.f32 %v1191_v41, 0.0 }
 0x179   : > { %v1446_v44 = vpack.c.bf16 %v1193_v43, %v1192_v42 }
 0x17b   : > { %1202 = vst [vmem:[%s1912_s7] sm:$0xff] %v1446_v44 }
 0x17c PF: > { %s15_s24 = sadd.s32 1, %s1658_s24   ;;  %s2023_s18 = smov %s1638_s19 }
 0x17d   : > { %p12_p0 = scmp.ge.s32.totalorder %s15_s24, 20   ;;  %s2024_s19 = smov %s1742_s6 }
 0x17e   : > { %s2025_s20 = smov %s1650_s22  ;;  %s2026_s21 = smov %s1654_s23 }
 0x17f   : > { %s2027_s22 = smov %s2030_s25  ;;  %s2028_s23 = smov %s2034_s26 }
 0x180   :  { %14 = sbr.rel (!%p12_p0) target bundleno = 4 (0x4), region = 133 }

// kernel: _lambda_.39
= control target key start
LH: loop header
LB: loop body
LE: loop exit
PB: predicated region body
PF: predicated region fallthrough
CT: control target
= control target key end

     0   :  { %s1598_s15 = smov 0   ;;  %s1600_s16 = smov 0   ;;  %s1918_s0 = inlined_call_operand.vmem [shape: bf16[8,4608], index: 0, kind: input, shape index: {}]   ;;  %s1919_s1 = inlined_call_operand.vmem [shape: bf16[4608,512], index: 1, kind: input, shape index: {}]   ;;  %s1920_s2 = inlined_call_operand.vmem [shape: f32[1,512], index: 2, kind: input, shape index: {}]   ;;  %s1921_s3 = inlined_call_operand.vmem [shape: f32[1,512], index: 3, kind: input, shape index: {}]   ;;  %s1922_s4 = inlined_call_operand.vmem [shape: bf16[8,512], index: 4, kind: output, shape index: {}]  }
   0x1   :  { %s1602_s17 = smov 0   ;;  %s1604_s18 = smov 0  }
   0x2   :  { %s1606_s19 = smov 0   ;;  %s1608_s20 = smov 0  }
   0x3   :  { %s1610_s21 = smov 0  }
   0x4 LB: > { %s26_s22 = sadd.s32 1, %s1562_s19  ;;  %s29_s23 = sadd.s32 1, %s1566_s20  ;;  %s1570_s21 = sphi %s1610_s21, %s14_s21   ;;  %s1566_s20 = sphi %s1608_s20, %s1928_s20   ;;  %s1562_s19 = sphi %s1606_s19, %s1927_s19   ;;  %s1558_s18 = sphi %s1604_s18, %s1926_s18   ;;  %s1554_s17 = sphi %s1602_s17, %s1925_s17   ;;  %s1550_s16 = sphi %s1600_s16, %s1924_s16   ;;  %s1546_s15 = sphi %s1598_s15, %s1923_s15  }
   0x5   : > { %p27_p0 = scmp.ge.s32.totalorder %s26_s22, 9  ;;  %p77_p1 = scmp.ne.s32.totalorder %s1550_s16, %s1546_s15 }
   0x6   : > { %p78_p2 = scmp.eq.s32.totalorder %s1570_s21, 0  ;;  %s70_s27 = sadd.s32 1, %s1550_s16 }
   0x7   : > { %s1930_s22 = smov (%p27_p0, %s26_s22), 0  ;;  %s1932_s23 = smov (!%p27_p0, %s29_s23), %s1566_s20 }
   0x8   : > { %p79_p3 = por %p78_p2, %p77_p1  ;;  %p31_p4 = scmp.ge.s32.totalorder %s1932_s23, 2 }
   0x9   : > { %s65_s24 = ssub.s32 %s1562_s19, %s1930_s22  ;;  %p1270_p6 = scmp.ge.s32.totalorder %s1570_s21, 18 }
   0xa   : > { %s1934_s23 = smov (%p31_p4, %s1932_s23), 0 }
   0xb   : > { %s66_s25 = ssub.s32 %s1566_s20, %s1934_s23  ;;  %183 = sbr.rel (%p1270_p6) target bundleno = 57 (0x39), region = 16 }
   0xc   : > { %s67_s26 = sor.u32 %s66_s25, %s65_s24 }
   0xd   : > { %p68_p5 = scmp.eq.s32.totalorder %s67_s26, 0 }
   0xf   : > { %s1649_s28 = scalar_select %p68_p5, %s1550_s16, %s70_s27  }
  0x12   : > { %199 = sbr.rel (!%p79_p3) target bundleno = 57 (0x39), region = 24  ;;  %s201_s29 = sand.u32 (%p79_p3), 1, %s1550_s16  }
  0x13   : > { %s1273_s30 = sshll.u32 (%p79_p3), %s1566_s20, 1  ;;  %s1271_s5 = sshll.u32 (%p79_p3), %s201_s29, 9 }
  0x14   : > { %s1357_s6 = sshll.u32 (%p79_p3), %s1562_s19, 8  ;;  %s1663_s12 = scalar_lea.vmem (%p79_p3), [#allocation3], %s1271_s5 }
  0x15   : > { %s207_s7 = sadd.s32 (%p79_p3), %s1357_s6, %s1273_s30 }
  0x16   : > { %s1275_s8 = sshll.u32 (%p79_p3), %s207_s7, 2 }
  0x17   : > { %s1658_s11 = scalar_lea.vmem (%p79_p3), %s1919_s1, %s1275_s8 }
  0x18   : > { %v363_v0 = vld [vmem:[%s1658_s11] sm:$0xff] (%p79_p3)  ;;  %v365_v1 = vld [vmem:[%s1658_s11 + $0x10] sm:$0xff] (%p79_p3) }
  0x19   : > { %v367_v2 = vld [vmem:[%s1658_s11 + $0x20] sm:$0xff]  ;;  %364 = vst [vmem:[%s1663_s12] sm:$0xff] %v363_v0  ;;  %366 = vst [vmem:[%s1663_s12 + $0x8] sm:$0xff] %v365_v1  ;;  %v369_v3 = vld [vmem:[%s1658_s11 + $0x30] sm:$0xff] }
  0x1a   : > { %368 = vst [vmem:[%s1663_s12 + $0x10] sm:$0xff] %v367_v2  ;;  %v371_v4 = vld [vmem:[%s1658_s11 + $0x40] sm:$0xff]  ;;  %v373_v5 = vld [vmem:[%s1658_s11 + $0x50] sm:$0xff]  ;;  %370 = vst [vmem:[%s1663_s12 + $0x18] sm:$0xff] %v369_v3 }
  0x1b   : > { %372 = vst [vmem:[%s1663_s12 + $0x20] sm:$0xff] %v371_v4  ;;  %374 = vst [vmem:[%s1663_s12 + $0x28] sm:$0xff] %v373_v5  ;;  %v375_v6 = vld [vmem:[%s1658_s11 + $0x60] sm:$0xff]  ;;  %v377_v7 = vld [vmem:[%s1658_s11 + $0x70] sm:$0xff] }
  0x1c   : > { %v379_v8 = vld [vmem:[%s1658_s11 + $0x80] sm:$0xff]  ;;  %376 = vst [vmem:[%s1663_s12 + $0x30] sm:$0xff] %v375_v6  ;;  %378 = vst [vmem:[%s1663_s12 + $0x38] sm:$0xff] %v377_v7  ;;  %v381_v9 = vld [vmem:[%s1658_s11 + $0x90] sm:$0xff] }
  0x1d   : > { %380 = vst [vmem:[%s1663_s12 + $0x40] sm:$0xff] %v379_v8  ;;  %v383_v10 = vld [vmem:[%s1658_s11 + $0xa0] sm:$0xff]  ;;  %v385_v11 = vld [vmem:[%s1658_s11 + $0xb0] sm:$0xff]  ;;  %382 = vst [vmem:[%s1663_s12 + $0x48] sm:$0xff] %v381_v9 }
  0x1e   : > { %384 = vst [vmem:[%s1663_s12 + $0x50] sm:$0xff] %v383_v10  ;;  %386 = vst [vmem:[%s1663_s12 + $0x58] sm:$0xff] %v385_v11  ;;  %v387_v12 = vld [vmem:[%s1658_s11 + $0xc0] sm:$0xff]  ;;  %v389_v13 = vld [vmem:[%s1658_s11 + $0xd0] sm:$0xff] }
  0x1f   : > { %v391_v14 = vld [vmem:[%s1658_s11 + $0xe0] sm:$0xff]  ;;  %388 = vst [vmem:[%s1663_s12 + $0x60] sm:$0xff] %v387_v12  ;;  %390 = vst [vmem:[%s1663_s12 + $0x68] sm:$0xff] %v389_v13  ;;  %v393_v15 = vld [vmem:[%s1658_s11 + $0xf0] sm:$0xff] }
  0x20   : > { %392 = vst [vmem:[%s1663_s12 + $0x70] sm:$0xff] %v391_v14  ;;  %v395_v16 = vld [vmem:[%s1658_s11 + $0x100] sm:$0xff]  ;;  %v397_v17 = vld [vmem:[%s1658_s11 + $0x110] sm:$0xff]  ;;  %394 = vst [vmem:[%s1663_s12 + $0x78] sm:$0xff] %v393_v15 }
  0x21   : > { %396 = vst [vmem:[%s1663_s12 + $0x80] sm:$0xff] %v395_v16  ;;  %398 = vst [vmem:[%s1663_s12 + $0x88] sm:$0xff] %v397_v17  ;;  %v399_v18 = vld [vmem:[%s1658_s11 + $0x120] sm:$0xff]  ;;  %v401_v19 = vld [vmem:[%s1658_s11 + $0x130] sm:$0xff] }
  0x22   : > { %v403_v20 = vld [vmem:[%s1658_s11 + $0x140] sm:$0xff]  ;;  %400 = vst [vmem:[%s1663_s12 + $0x90] sm:$0xff] %v399_v18  ;;  %402 = vst [vmem:[%s1663_s12 + $0x98] sm:$0xff] %v401_v19  ;;  %v405_v21 = vld [vmem:[%s1658_s11 + $0x150] sm:$0xff] }
  0x23   : > { %404 = vst [vmem:[%s1663_s12 + $0xa0] sm:$0xff] %v403_v20  ;;  %v407_v22 = vld [vmem:[%s1658_s11 + $0x160] sm:$0xff]  ;;  %v409_v23 = vld [vmem:[%s1658_s11 + $0x170] sm:$0xff]  ;;  %406 = vst [vmem:[%s1663_s12 + $0xa8] sm:$0xff] %v405_v21 }
  0x24   : > { %408 = vst [vmem:[%s1663_s12 + $0xb0] sm:$0xff] %v407_v22  ;;  %410 = vst [vmem:[%s1663_s12 + $0xb8] sm:$0xff] %v409_v23  ;;  %v411_v24 = vld [vmem:[%s1658_s11 + $0x180] sm:$0xff]  ;;  %v413_v25 = vld [vmem:[%s1658_s11 + $0x190] sm:$0xff] }
  0x25   : > { %v415_v26 = vld [vmem:[%s1658_s11 + $0x1a0] sm:$0xff]  ;;  %412 = vst [vmem:[%s1663_s12 + $0xc0] sm:$0xff] %v411_v24  ;;  %414 = vst [vmem:[%s1663_s12 + $0xc8] sm:$0xff] %v413_v25  ;;  %v417_v27 = vld [vmem:[%s1658_s11 + $0x1b0] sm:$0xff] }
  0x26   : > { %416 = vst [vmem:[%s1663_s12 + $0xd0] sm:$0xff] %v415_v26  ;;  %v419_v28 = vld [vmem:[%s1658_s11 + $0x1c0] sm:$0xff]  ;;  %v421_v29 = vld [vmem:[%s1658_s11 + $0x1d0] sm:$0xff]  ;;  %418 = vst [vmem:[%s1663_s12 + $0xd8] sm:$0xff] %v417_v27 }
  0x27   : > { %420 = vst [vmem:[%s1663_s12 + $0xe0] sm:$0xff] %v419_v28  ;;  %422 = vst [vmem:[%s1663_s12 + $0xe8] sm:$0xff] %v421_v29  ;;  %v423_v30 = vld [vmem:[%s1658_s11 + $0x1e0] sm:$0xff]  ;;  %v425_v31 = vld [vmem:[%s1658_s11 + $0x1f0] sm:$0xff] }
  0x28   : > { %v427_v32 = vld [vmem:[%s1658_s11 + $0x200] sm:$0xff]  ;;  %424 = vst [vmem:[%s1663_s12 + $0xf0] sm:$0xff] %v423_v30  ;;  %426 = vst [vmem:[%s1663_s12 + $0xf8] sm:$0xff] %v425_v31  ;;  %v429_v33 = vld [vmem:[%s1658_s11 + $0x210] sm:$0xff] }
  0x29   : > { %428 = vst [vmem:[%s1663_s12 + $0x100] sm:$0xff] %v427_v32  ;;  %v431_v34 = vld [vmem:[%s1658_s11 + $0x220] sm:$0xff]  ;;  %v433_v35 = vld [vmem:[%s1658_s11 + $0x230] sm:$0xff]  ;;  %430 = vst [vmem:[%s1663_s12 + $0x108] sm:$0xff] %v429_v33 }
  0x2a   : > { %432 = vst [vmem:[%s1663_s12 + $0x110] sm:$0xff] %v431_v34  ;;  %434 = vst [vmem:[%s1663_s12 + $0x118] sm:$0xff] %v433_v35  ;;  %v435_v36 = vld [vmem:[%s1658_s11 + $0x240] sm:$0xff]  ;;  %v437_v37 = vld [vmem:[%s1658_s11 + $0x250] sm:$0xff] }
  0x2b   : > { %v439_v38 = vld [vmem:[%s1658_s11 + $0x260] sm:$0xff]  ;;  %436 = vst [vmem:[%s1663_s12 + $0x120] sm:$0xff] %v435_v36  ;;  %438 = vst [vmem:[%s1663_s12 + $0x128] sm:$0xff] %v437_v37  ;;  %v441_v39 = vld [vmem:[%s1658_s11 + $0x270] sm:$0xff] }
  0x2c   : > { %440 = vst [vmem:[%s1663_s12 + $0x130] sm:$0xff] %v439_v38  ;;  %v443_v40 = vld [vmem:[%s1658_s11 + $0x280] sm:$0xff]  ;;  %v445_v41 = vld [vmem:[%s1658_s11 + $0x290] sm:$0xff]  ;;  %442 = vst [vmem:[%s1663_s12 + $0x138] sm:$0xff] %v441_v39 }
  0x2d   : > { %444 = vst [vmem:[%s1663_s12 + $0x140] sm:$0xff] %v443_v40  ;;  %446 = vst [vmem:[%s1663_s12 + $0x148] sm:$0xff] %v445_v41  ;;  %v447_v42 = vld [vmem:[%s1658_s11 + $0x2a0] sm:$0xff]  ;;  %v449_v43 = vld [vmem:[%s1658_s11 + $0x2b0] sm:$0xff] }
  0x2e   : > { %v451_v44 = vld [vmem:[%s1658_s11 + $0x2c0] sm:$0xff]  ;;  %448 = vst [vmem:[%s1663_s12 + $0x150] sm:$0xff] %v447_v42  ;;  %450 = vst [vmem:[%s1663_s12 + $0x158] sm:$0xff] %v449_v43  ;;  %v453_v45 = vld [vmem:[%s1658_s11 + $0x2d0] sm:$0xff] }
  0x2f   : > { %452 = vst [vmem:[%s1663_s12 + $0x160] sm:$0xff] %v451_v44  ;;  %v455_v46 = vld [vmem:[%s1658_s11 + $0x2e0] sm:$0xff]  ;;  %v457_v47 = vld [vmem:[%s1658_s11 + $0x2f0] sm:$0xff]  ;;  %454 = vst [vmem:[%s1663_s12 + $0x168] sm:$0xff] %v453_v45 }
  0x30   : > { %456 = vst [vmem:[%s1663_s12 + $0x170] sm:$0xff] %v455_v46  ;;  %458 = vst [vmem:[%s1663_s12 + $0x178] sm:$0xff] %v457_v47  ;;  %v459_v48 = vld [vmem:[%s1658_s11 + $0x300] sm:$0xff]  ;;  %v461_v49 = vld [vmem:[%s1658_s11 + $0x310] sm:$0xff] }
  0x31   : > { %v463_v50 = vld [vmem:[%s1658_s11 + $0x320] sm:$0xff]  ;;  %460 = vst [vmem:[%s1663_s12 + $0x180] sm:$0xff] %v459_v48  ;;  %462 = vst [vmem:[%s1663_s12 + $0x188] sm:$0xff] %v461_v49  ;;  %v465_v51 = vld [vmem:[%s1658_s11 + $0x330] sm:$0xff] }
  0x32   : > { %464 = vst [vmem:[%s1663_s12 + $0x190] sm:$0xff] %v463_v50  ;;  %v467_v52 = vld [vmem:[%s1658_s11 + $0x340] sm:$0xff]  ;;  %v469_v53 = vld [vmem:[%s1658_s11 + $0x350] sm:$0xff]  ;;  %466 = vst [vmem:[%s1663_s12 + $0x198] sm:$0xff] %v465_v51 }
  0x33   : > { %468 = vst [vmem:[%s1663_s12 + $0x1a0] sm:$0xff] %v467_v52  ;;  %470 = vst [vmem:[%s1663_s12 + $0x1a8] sm:$0xff] %v469_v53  ;;  %v471_v54 = vld [vmem:[%s1658_s11 + $0x360] sm:$0xff]  ;;  %v473_v55 = vld [vmem:[%s1658_s11 + $0x370] sm:$0xff] }
  0x34   : > { %v475_v56 = vld [vmem:[%s1658_s11 + $0x380] sm:$0xff]  ;;  %472 = vst [vmem:[%s1663_s12 + $0x1b0] sm:$0xff] %v471_v54  ;;  %474 = vst [vmem:[%s1663_s12 + $0x1b8] sm:$0xff] %v473_v55  ;;  %v477_v57 = vld [vmem:[%s1658_s11 + $0x390] sm:$0xff] }
  0x35   : > { %476 = vst [vmem:[%s1663_s12 + $0x1c0] sm:$0xff] %v475_v56  ;;  %v479_v58 = vld [vmem:[%s1658_s11 + $0x3a0] sm:$0xff]  ;;  %v481_v59 = vld [vmem:[%s1658_s11 + $0x3b0] sm:$0xff]  ;;  %478 = vst [vmem:[%s1663_s12 + $0x1c8] sm:$0xff] %v477_v57 }
  0x36   : > { %480 = vst [vmem:[%s1663_s12 + $0x1d0] sm:$0xff] %v479_v58  ;;  %482 = vst [vmem:[%s1663_s12 + $0x1d8] sm:$0xff] %v481_v59  ;;  %v483_v60 = vld [vmem:[%s1658_s11 + $0x3c0] sm:$0xff]  ;;  %v485_v61 = vld [vmem:[%s1658_s11 + $0x3d0] sm:$0xff] }
  0x37   : > { %v487_v62 = vld [vmem:[%s1658_s11 + $0x3e0] sm:$0xff]  ;;  %484 = vst [vmem:[%s1663_s12 + $0x1e0] sm:$0xff] %v483_v60  ;;  %486 = vst [vmem:[%s1663_s12 + $0x1e8] sm:$0xff] %v485_v61  ;;  %v489_v63 = vld [vmem:[%s1658_s11 + $0x3f0] sm:$0xff] }
  0x38   : > { %488 = vst [vmem:[%s1663_s12 + $0x1f0] sm:$0xff] %v487_v62  ;;  %490 = vst [vmem:[%s1663_s12 + $0x1f8] sm:$0xff] %v489_v63 }
  0x39 PF: > { %p1276_p7 = scmp.ge.s32.totalorder %s1570_s21, 1  ;;  %p511_p8 = scmp.lt.s32.totalorder %s1570_s21, 19 }
  0x3b   : > { %p512_p9 = pnand %p1276_p7, %p511_p8 }
  0x3c   : > { %s518_s13 = sand.u32 (!%p512_p9), 1, %s1546_s15   ;;  %s1278_s14 = sshll.u32 (!%p512_p9), %s1554_s17, 2 }
  0x3d   : > { %515 = sbr.rel (%p512_p9) target bundleno = 378 (0x17a), region = 70  ;;  %s1277_s24 = sshll.u32 (!%p512_p9), %s518_s13, 9 }
  0x3e   : > { %p567_p10 = scmp.lt.s32.totalorder (!%p512_p9), %s1278_s14, 35  ;;  %s1280_s25 = sshll.u32 (!%p512_p9), %s1558_s18, 1 }
  0x3f   : > { %p577_p11 = scmp.lt.s32.totalorder (!%p512_p9), %s1280_s25, 3  ;;  %s1816_s13 = scalar_lea.vmem (!%p512_p9), [#allocation3], %s1277_s24 }
  0x40   : > { %p1284_p12 = scmp.ne.s32.totalorder (!%p512_p9), %s1554_s17, 0 }
  0x44   : > { %s1936_s14 = smov (!%p567_p10, %s1278_s14), 35  ;;  %s1938_s25 = smov (!%p577_p11, %s1280_s25), 3 }
  0x45   : > { %s1279_s26 = sshll.u32 %s1936_s14, 2  ;;  %s579_s15 = scalar_lea.vmem %s1920_s2, %s1938_s25  ;;  %v1572_v0 = vmov (!%p1284_p12), 0.0  }
  0x46   : > { %s1798_s30 = scalar_lea.vmem %s1918_s0, %s1279_s26  ;;  %s584_s18 = scalar_lea.vmem %s1921_s3, %s1938_s25  ;;  %600 = vst [vmem:[#allocation2] sm:$0xff] (!%p1284_p12), %v1572_v0  ;;  %601 = vst [vmem:[#allocation2 + $0x8] sm:$0xff] (!%p1284_p12), %v1572_v0 }
  0x47   : > { %s1283_s9 = sshll.u32 %s1938_s25, 2  ;;  %599 = sbr.rel (%p1284_p12) target bundleno = 78 (0x4e), region = 78 }
  0x48   : > { %s1814_s12 = scalar_lea.vmem %s1922_s4, %s1283_s9 }
  0x4e PF: > { %v1416_v1 = vld [vmem:[%s1816_s13 + $0x4] ss:$8 sps:$4 sm:$0xff]   ;;  %v1420_v3 = vld [vmem:[%s1816_s13] ss:$8 sps:$4 sm:$0xff]   ;;  %v1422_v5 = vld [vmem:[%s1816_s13 + $0x14] ss:$8 sps:$4 sm:$0xff]  }
  0x4f   : > { %v1418_v2 = vld [vmem:[%s1816_s13 + $0x104] ss:$8 sps:$4 sm:$0xff]   ;;  %1004 = vmatprep.subr.bf16.mxu0 %v1416_v1  ;;  %v1421_v4 = vld [vmem:[%s1816_s13 + $0x100] ss:$8 sps:$4 sm:$0xff]   ;;  %v1424_v6 = vld [vmem:[%s1816_s13 + $0x114] ss:$8 sps:$4 sm:$0xff]  }
  0x50   : > { %1045 = vmatprep.subr.bf16.mxu1 %v1418_v2  ;;  %1005 = vmatpush1.bf16.msra.mxu0 %v1420_v3  ;;  %v1426_v7 = vld [vmem:[%s1816_s13 + $0x10] ss:$8 sps:$4 sm:$0xff]   ;;  %v1428_v9 = vld [vmem:[%s1816_s13 + $0x24] ss:$8 sps:$4 sm:$0xff]   ;;  %v1432_v11 = vld [vmem:[%s1816_s13 + $0x20] ss:$8 sps:$4 sm:$0xff]  }
  0x51   : > { %1046 = vmatpush1.bf16.msra.mxu1 %v1421_v4  ;;  %1006 = vmatprep.subr.bf16.mxu0 %v1422_v5  ;;  %v1427_v8 = vld [vmem:[%s1816_s13 + $0x110] ss:$8 sps:$4 sm:$0xff]   ;;  %v1430_v10 = vld [vmem:[%s1816_s13 + $0x124] ss:$8 sps:$4 sm:$0xff]   ;;  %v1433_v12 = vld [vmem:[%s1816_s13 + $0x120] ss:$8 sps:$4 sm:$0xff]  }
  0x52   : > { %1047 = vmatprep.subr.bf16.mxu1 %v1424_v6  ;;  %v1434_v13 = vld [vmem:[%s1816_s13 + $0x34] ss:$8 sps:$4 sm:$0xff]   ;;  %v1438_v15 = vld [vmem:[%s1816_s13 + $0x30] ss:$8 sps:$4 sm:$0xff]   ;;  %v1440_v17 = vld [vmem:[%s1816_s13 + $0x44] ss:$8 sps:$4 sm:$0xff]  }
  0x53   : > { %v1436_v14 = vld [vmem:[%s1816_s13 + $0x134] ss:$8 sps:$4 sm:$0xff]   ;;  %v1439_v16 = vld [vmem:[%s1816_s13 + $0x130] ss:$8 sps:$4 sm:$0xff]   ;;  %v1442_v18 = vld [vmem:[%s1816_s13 + $0x144] ss:$8 sps:$4 sm:$0xff]  }
  0x54   : > { %1007 = vmatpush1.bf16.msra.mxu0 %v1426_v7  ;;  %v1444_v19 = vld [vmem:[%s1816_s13 + $0x40] ss:$8 sps:$4 sm:$0xff]   ;;  %v1446_v21 = vld [vmem:[%s1816_s13 + $0x54] ss:$8 sps:$4 sm:$0xff]   ;;  %v1450_v23 = vld [vmem:[%s1816_s13 + $0x50] ss:$8 sps:$4 sm:$0xff]  }
  0x55   : > { %1048 = vmatpush1.bf16.msra.mxu1 %v1427_v8  ;;  %1008 = vmatprep.subr.bf16.mxu0 %v1428_v9  ;;  %v1445_v20 = vld [vmem:[%s1816_s13 + $0x140] ss:$8 sps:$4 sm:$0xff]   ;;  %v1448_v22 = vld [vmem:[%s1816_s13 + $0x154] ss:$8 sps:$4 sm:$0xff]   ;;  %v1451_v24 = vld [vmem:[%s1816_s13 + $0x150] ss:$8 sps:$4 sm:$0xff]  }
  0x56   : > { %1049 = vmatprep.subr.bf16.mxu1 %v1430_v10  ;;  %v1452_v25 = vld [vmem:[%s1816_s13 + $0x64] ss:$8 sps:$4 sm:$0xff]   ;;  %v1456_v27 = vld [vmem:[%s1816_s13 + $0x60] ss:$8 sps:$4 sm:$0xff]   ;;  %v1458_v29 = vld [vmem:[%s1816_s13 + $0x74] ss:$8 sps:$4 sm:$0xff]  }
  0x57   : > { %v1454_v26 = vld [vmem:[%s1816_s13 + $0x164] ss:$8 sps:$4 sm:$0xff]   ;;  %v1457_v28 = vld [vmem:[%s1816_s13 + $0x160] ss:$8 sps:$4 sm:$0xff]   ;;  %v1460_v30 = vld [vmem:[%s1816_s13 + $0x174] ss:$8 sps:$4 sm:$0xff]  }
  0x58   : > { %1009 = vmatpush1.bf16.msra.mxu0 %v1432_v11  ;;  %v1462_v31 = vld [vmem:[%s1816_s13 + $0x70] ss:$8 sps:$4 sm:$0xff]   ;;  %v1464_v33 = vld [vmem:[%s1816_s13 + $0x84] ss:$8 sps:$4 sm:$0xff]   ;;  %v1468_v35 = vld [vmem:[%s1816_s13 + $0x80] ss:$8 sps:$4 sm:$0xff]  }
  0x59   : > { %1050 = vmatpush1.bf16.msra.mxu1 %v1433_v12  ;;  %1010 = vmatprep.subr.bf16.mxu0 %v1434_v13  ;;  %v1463_v32 = vld [vmem:[%s1816_s13 + $0x170] ss:$8 sps:$4 sm:$0xff]   ;;  %v1466_v34 = vld [vmem:[%s1816_s13 + $0x184] ss:$8 sps:$4 sm:$0xff]   ;;  %v1469_v36 = vld [vmem:[%s1816_s13 + $0x180] ss:$8 sps:$4 sm:$0xff]  }
  0x5a   : > { %1051 = vmatprep.subr.bf16.mxu1 %v1436_v14  ;;  %v1470_v37 = vld [vmem:[%s1816_s13 + $0x94] ss:$8 sps:$4 sm:$0xff]   ;;  %v1474_v39 = vld [vmem:[%s1816_s13 + $0x90] ss:$8 sps:$4 sm:$0xff]   ;;  %v1476_v41 = vld [vmem:[%s1816_s13 + $0xa4] ss:$8 sps:$4 sm:$0xff]  }
  0x5b   : > { %v1472_v38 = vld [vmem:[%s1816_s13 + $0x194] ss:$8 sps:$4 sm:$0xff]   ;;  %v1475_v40 = vld [vmem:[%s1816_s13 + $0x190] ss:$8 sps:$4 sm:$0xff]   ;;  %v1478_v42 = vld [vmem:[%s1816_s13 + $0x1a4] ss:$8 sps:$4 sm:$0xff]  }
  0x5c   : > { %1011 = vmatpush1.bf16.msra.mxu0 %v1438_v15  ;;  %v1480_v43 = vld [vmem:[%s1816_s13 + $0xa0] ss:$8 sps:$4 sm:$0xff]   ;;  %v1482_v45 = vld [vmem:[%s1816_s13 + $0xb4] ss:$8 sps:$4 sm:$0xff]   ;;  %v1486_v50 = vld [vmem:[%s1816_s13 + $0xb0] ss:$8 sps:$4 sm:$0xff]  }
  0x5d   : > { %1052 = vmatpush1.bf16.msra.mxu1 %v1439_v16  ;;  %1012 = vmatprep.subr.bf16.mxu0 %v1440_v17  ;;  %v1481_v44 = vld [vmem:[%s1816_s13 + $0x1a0] ss:$8 sps:$4 sm:$0xff]   ;;  %v1484_v46 = vld [vmem:[%s1816_s13 + $0x1b4] ss:$8 sps:$4 sm:$0xff]   ;;  %v1487_v51 = vld [vmem:[%s1816_s13 + $0x1b0] ss:$8 sps:$4 sm:$0xff]  }
  0x5e   : > { %1053 = vmatprep.subr.bf16.mxu1 %v1442_v18  ;;  %v604_v47 = vld [vmem:[%s1798_s30] sm:$0xff]  ;;  %v605_v49 = vld [vmem:[%s1798_s30 + $0x8] sm:$0xff]  ;;  %v1488_v53 = vld [vmem:[%s1816_s13 + $0xc4] ss:$8 sps:$4 sm:$0xff]   ;;  %p1353_p13 = scmp.ne.s32.totalorder %s1554_s17, 8 }
  0x5f   : > { %v1286_v48 = vcombine.high %v604_v47, %v604_v47  ;;  %v1288_v52 = vcombine.high %v605_v49, %v605_v49  ;;  %v1490_v54 = vld [vmem:[%s1816_s13 + $0x1c4] ss:$8 sps:$4 sm:$0xff]   ;;  %v1492_v55 = vld [vmem:[%s1816_s13 + $0xc0] ss:$8 sps:$4 sm:$0xff]   ;;  %v1494_v57 = vld [vmem:[%s1816_s13 + $0xd4] ss:$8 sps:$4 sm:$0xff]   ;;  %v1285_v5 = vcombine.low %v604_v47, %v604_v47  ;;  %v1287_v6 = vcombine.low %v605_v49, %v605_v49 }
  0x60   : > { %1013 = vmatpush1.bf16.msra.mxu0 %v1444_v19  ;;  %v1493_v56 = vld [vmem:[%s1816_s13 + $0x1c0] ss:$8 sps:$4 sm:$0xff]   ;;  %v1496_v58 = vld [vmem:[%s1816_s13 + $0x1d4] ss:$8 sps:$4 sm:$0xff]   ;;  %v1498_v59 = vld [vmem:[%s1816_s13 + $0xd0] ss:$8 sps:$4 sm:$0xff]  }
  0x61   : > { %1054 = vmatpush1.bf16.msra.mxu1 %v1445_v20  ;;  %1014 = vmatprep.subr.bf16.mxu0 %v1446_v21  ;;  %v1499_v60 = vld [vmem:[%s1816_s13 + $0x1d0] ss:$8 sps:$4 sm:$0xff]   ;;  %v1500_v61 = vld [vmem:[%s1816_s13 + $0xe4] ss:$8 sps:$4 sm:$0xff]   ;;  %v1504_v63 = vld [vmem:[%s1816_s13 + $0xe0] ss:$8 sps:$4 sm:$0xff]   ;;  %v1098_v21 = vlaneseq (!%p1353_p13) }
  0x62   : > { %1055 = vmatprep.subr.bf16.mxu1 %v1448_v22  ;;  %1036 = vmatprep.mubr.bf16.mxu0 %v1286_v48  ;;  %v1502_v62 = vld [vmem:[%s1816_s13 + $0x1e4] ss:$8 sps:$4 sm:$0xff]   ;;  %v1505_v0 = vld [vmem:[%s1816_s13 + $0x1e0] ss:$8 sps:$4 sm:$0xff]   ;;  %v1506_v1 = vld [vmem:[%s1816_s13 + $0xf4] ss:$8 sps:$4 sm:$0xff]  }
  0x63   : > { %1077 = vmatprep.mubr.bf16.mxu1 %v1288_v52  ;;  %v1508_v2 = vld [vmem:[%s1816_s13 + $0x1f4] ss:$8 sps:$4 sm:$0xff]   ;;  %v1510_v3 = vld [vmem:[%s1816_s13 + $0xf0] ss:$8 sps:$4 sm:$0xff]   ;;  %v1099_v22 = vshrl.u32 (!%p1353_p13), %v1098_v21, 7 }
  0x64   : > { %1015 = vmatpush1.bf16.msra.mxu0 %v1450_v23  ;;  %v1511_v4 = vld [vmem:[%s1816_s13 + $0x1f0] ss:$8 sps:$4 sm:$0xff]  }
  0x65   : > { %1056 = vmatpush1.bf16.msra.mxu1 %v1451_v24  ;;  %1016 = vmatprep.subr.bf16.mxu0 %v1452_v25  ;;  %v602_v8 = vld [vmem:[#allocation2] sm:$0xff]  ;;  %v603_v12 = vld [vmem:[#allocation2 + $0x8] sm:$0xff]  ;;  %v1100_v25 = vsub.s32 (!%p1353_p13), 0, %v1099_v22 }
  0x66   : > { %1057 = vmatprep.subr.bf16.mxu1 %v1454_v26  ;;  %v1096_v23 = vld [vmem:[%s579_s15] sm:$0x3] (!%p1353_p13)  ;;  %v1104_v26 = vsub.s32 (!%p1353_p13), 1, %v1099_v22 }
  0x67   : > { %v1110_v24 = vld [vmem:[%s584_s18] sm:$0x3] (!%p1353_p13) }
  0x68   : > { %1017 = vmatpush1.bf16.msra.mxu0 %v1456_v27 }
  0x69   : > { %1058 = vmatpush1.bf16.msra.mxu1 %v1457_v28  ;;  %1018 = vmatprep.subr.bf16.mxu0 %v1458_v29  ;;  %v1101_v29 = vrot.slane (!%p1353_p13), %v1096_v23, %v1100_v25 }
  0x6a   : > { %1059 = vmatprep.subr.bf16.mxu1 %v1460_v30  ;;  %v1105_v30 = vrot.slane (!%p1353_p13), %v1096_v23, %v1104_v26 }
  0x6c   : > { %1019 = vmatpush1.bf16.msra.mxu0 %v1462_v31  ;;  %v1115_v31 = vrot.slane (!%p1353_p13), %v1110_v24, %v1100_v25 }
  0x6d   : > { %1060 = vmatpush1.bf16.msra.mxu1 %v1463_v32  ;;  %1020 = vmatprep.subr.bf16.mxu0 %v1464_v33  ;;  %v1119_v32 = vrot.slane (!%p1353_p13), %v1110_v24, %v1104_v26 }
  0x6e   : > { %1061 = vmatprep.subr.bf16.mxu1 %v1466_v34 }
  0x70   : > { %1021 = vmatpush1.bf16.msra.mxu0 %v1468_v35 }
  0x71   : > { %1062 = vmatpush1.bf16.msra.mxu1 %v1469_v36  ;;  %1022 = vmatprep.subr.bf16.mxu0 %v1470_v37 }
  0x72   : > { %1063 = vmatprep.subr.bf16.mxu1 %v1472_v38 }
  0x74   : > { %1023 = vmatpush1.bf16.msra.mxu0 %v1474_v39 }
  0x75   : > { %1064 = vmatpush1.bf16.msra.mxu1 %v1475_v40  ;;  %1024 = vmatprep.subr.bf16.mxu0 %v1476_v41 }
  0x76   : > { %1065 = vmatprep.subr.bf16.mxu1 %v1478_v42 }
  0x78   : > { %1025 = vmatpush1.bf16.msra.mxu0 %v1480_v43 }
  0x79   : > { %1066 = vmatpush1.bf16.msra.mxu1 %v1481_v44  ;;  %1026 = vmatprep.subr.bf16.mxu0 %v1482_v45 }
  0x7a   : > { %1067 = vmatprep.subr.bf16.mxu1 %v1484_v46 }
  0x7c   : > { %1027 = vmatpush1.bf16.msra.mxu0 %v1486_v50 }
  0x7d   : > { %1068 = vmatpush1.bf16.msra.mxu1 %v1487_v51  ;;  %1028 = vmatprep.subr.bf16.mxu0 %v1488_v53 }
  0x7e   : > { %1069 = vmatprep.subr.bf16.mxu1 %v1490_v54 }
  0x80   : > { %1029 = vmatpush1.bf16.msra.mxu0 %v1492_v55 }
  0x81   : > { %1070 = vmatpush1.bf16.msra.mxu1 %v1493_v56  ;;  %1030 = vmatprep.subr.bf16.mxu0 %v1494_v57 }
  0x82   : > { %1071 = vmatprep.subr.bf16.mxu1 %v1496_v58 }
  0x84   : > { %1031 = vmatpush1.bf16.msra.mxu0 %v1498_v59 }
  0x85   : > { %1072 = vmatpush1.bf16.msra.mxu1 %v1499_v60  ;;  %1032 = vmatprep.subr.bf16.mxu0 %v1500_v61 }
  0x86   : > { %1073 = vmatprep.subr.bf16.mxu1 %v1502_v62 }
  0x88   : > { %1033 = vmatpush1.bf16.msra.mxu0 %v1504_v63 }
  0x89   : > { %1074 = vmatpush1.bf16.msra.mxu1 %v1505_v0  ;;  %1034 = vmatprep.subr.bf16.mxu0 %v1506_v1 }
  0x8a   : > { %1075 = vmatprep.subr.bf16.mxu1 %v1508_v2 }
  0x8c   : > { %1035 = vmatpush1.bf16.msra.mxu0 %v1510_v3 }
  0x8d   : > { %1076 = vmatpush1.bf16.msra.mxu1 %v1511_v4 }
  0x8f   : > { %1037 = vmatmul.mubr.bf16.vlgmr.msra.gmra.mrb[0].mxu0 %v1285_v5 }
  0x90   : > { %1078 = vmatmul.mubr.bf16.vlgmr.msra.gmra.mrb[0].mxu1 %v1287_v6 }
 0x162   : > { %v1038_v7 = vpop.f32.mrb[0].mxu0 }
 0x163   : > { %v1079_v9 = vpop.f32.mrb[0].mxu1  ;;  %v1040_v11 = vpop.f32.mrb[1].mxu0  ;;  %1093 = sbr.rel (%p1353_p13) target bundleno = 378 (0x17a), region = 82 }
 0x164   : > { %v1080_v10 = vadd.f32 %v1079_v9, %v1038_v7  ;;  %v1081_v13 = vpop.f32.mrb[1].mxu1  ;;  %v1042_v15 = vpop.f32.mrb[2].mxu0 }
 0x165   : > { %v1082_v14 = vadd.f32 %v1081_v13, %v1040_v11  ;;  %v1083_v16 = vpop.f32.mrb[2].mxu1  ;;  %v1043_v18 = vpop.f32.mrb[3].mxu0 }
 0x166   : > { %v1086_v17 = vadd.f32 %v1080_v10, %v602_v8  ;;  %v1084_v19 = vpop.f32.mrb[3].mxu1 }
 0x167   : > { %v1087_v20 = vadd.f32 %v1082_v14, %v603_v12 }
 0x168   : > { %1088 = vst [vmem:[#allocation2] sm:$0xff] %v1086_v17 }
 0x169   : > { %1089 = vst [vmem:[#allocation2 + $0x8] sm:$0xff] %v1087_v20 }
 0x16f   : > { %v1094_v27 = vld [vmem:[#allocation2] sm:$0xff] }
 0x170   : > { %v1095_v28 = vld [vmem:[#allocation2 + $0x8] sm:$0xff]  ;;  %v1108_v33 = vmul.f32 %v1101_v29, %v1094_v27 }
 0x171   : > { %v1109_v34 = vmul.f32 %v1105_v30, %v1095_v28 }
 0x172   : > { %v1122_v35 = vadd.f32 %v1115_v31, %v1108_v33 }
 0x173   : > { %v1123_v36 = vadd.f32 %v1119_v32, %v1109_v34 }
 0x174   : > { %v1124_v37 = vmax.f32 %v1122_v35, 0.0 }
 0x175   : > { %v1125_v38 = vmax.f32 %v1123_v36, 0.0 }
 0x177   : > { %v1358_v39 = vpack.c.bf16 %v1125_v38, %v1124_v37 }
 0x179   : > { %1134 = vst [vmem:[%s1814_s12] sm:$0xff] %v1358_v39 }
 0x17a PF: > { %s14_s21 = sadd.s32 1, %s1570_s21   ;;  %s1923_s15 = smov %s1550_s16 }
 0x17b   : > { %p11_p0 = scmp.ge.s32.totalorder %s14_s21, 20   ;;  %s1924_s16 = smov %s1649_s28 }
 0x17c   : > { %s1925_s17 = smov %s1562_s19  ;;  %s1926_s18 = smov %s1566_s20 }
 0x17d   : > { %s1927_s19 = smov %s1930_s22  ;;  %s1928_s20 = smov %s1934_s23 }
 0x17e   :  { %13 = sbr.rel (!%p11_p0) target bundleno = 4 (0x4), region = 126 }

// kernel: _lambda_.41
= control target key start
LH: loop header
LB: loop body
LE: loop exit
PB: predicated region body
PF: predicated region fallthrough
CT: control target
= control target key end

     0   :  { %v36_v38 = vlaneseq  ;;  %vm177_vm0 = vcmask 1041409   ;;  %s1402_s0 = inlined_call_operand.vmem [shape: bf16[2,1,512], index: 0, kind: input, shape index: {}]   ;;  %s1403_s1 = inlined_call_operand.vmem [shape: bf16[512,256], index: 1, kind: input, shape index: {}]   ;;  %s1404_s2 = inlined_call_operand.vmem [shape: f32[1,256], index: 2, kind: input, shape index: {}]   ;;  %s1405_s3 = inlined_call_operand.vmem [shape: bf16[256,128], index: 3, kind: input, shape index: {}]   ;;  %s1406_s4 = inlined_call_operand.vmem [shape: f32[1,128], index: 4, kind: input, shape index: {}]   ;;  %s1407_s5 = inlined_call_operand.vmem [shape: f32[1,128], index: 5, kind: input, shape index: {}]   ;;  %s1408_s6 = inlined_call_operand.vmem [shape: f32[1,128], index: 6, kind: input, shape index: {}]   ;;  %s1409_s7 = inlined_call_operand.hbm [shape: f32[2,128], index: 7, kind: output, shape index: {}]  }
   0x1   :  { %v940_v0 = vld [vmem:[%s1403_s1 + $0x4] ss:$8 sps:$4 sm:$0xff]   ;;  %v944_v2 = vld [vmem:[%s1403_s1] ss:$8 sps:$4 sm:$0xff]   ;;  %v946_v4 = vld [vmem:[%s1403_s1 + $0x14] ss:$8 sps:$4 sm:$0xff]  }
   0x2   :  { %v942_v1 = vld [vmem:[%s1403_s1 + $0x104] ss:$8 sps:$4 sm:$0xff]   ;;  %513 = vmatprep.subr.bf16.mxu1 %v940_v0  ;;  %v945_v3 = vld [vmem:[%s1403_s1 + $0x100] ss:$8 sps:$4 sm:$0xff]   ;;  %v948_v5 = vld [vmem:[%s1403_s1 + $0x114] ss:$8 sps:$4 sm:$0xff]  }
   0x3   :  { %554 = vmatprep.subr.bf16.mxu0 %v942_v1  ;;  %514 = vmatpush1.bf16.msra.mxu1 %v944_v2  ;;  %v950_v6 = vld [vmem:[%s1403_s1 + $0x10] ss:$8 sps:$4 sm:$0xff]   ;;  %v952_v8 = vld [vmem:[%s1403_s1 + $0x24] ss:$8 sps:$4 sm:$0xff]   ;;  %v956_v10 = vld [vmem:[%s1403_s1 + $0x20] ss:$8 sps:$4 sm:$0xff]  }
   0x4   :  { %555 = vmatpush1.bf16.msra.mxu0 %v945_v3  ;;  %515 = vmatprep.subr.bf16.mxu1 %v946_v4  ;;  %v951_v7 = vld [vmem:[%s1403_s1 + $0x110] ss:$8 sps:$4 sm:$0xff]   ;;  %v954_v9 = vld [vmem:[%s1403_s1 + $0x124] ss:$8 sps:$4 sm:$0xff]   ;;  %v957_v11 = vld [vmem:[%s1403_s1 + $0x120] ss:$8 sps:$4 sm:$0xff]  }
   0x5   :  { %556 = vmatprep.subr.bf16.mxu0 %v948_v5  ;;  %v958_v12 = vld [vmem:[%s1403_s1 + $0x34] ss:$8 sps:$4 sm:$0xff]   ;;  %v962_v14 = vld [vmem:[%s1403_s1 + $0x30] ss:$8 sps:$4 sm:$0xff]   ;;  %v964_v16 = vld [vmem:[%s1403_s1 + $0x44] ss:$8 sps:$4 sm:$0xff]  }
   0x6   :  { %v960_v13 = vld [vmem:[%s1403_s1 + $0x134] ss:$8 sps:$4 sm:$0xff]   ;;  %v963_v15 = vld [vmem:[%s1403_s1 + $0x130] ss:$8 sps:$4 sm:$0xff]   ;;  %v966_v17 = vld [vmem:[%s1403_s1 + $0x144] ss:$8 sps:$4 sm:$0xff]  }
   0x7   :  { %516 = vmatpush1.bf16.msra.mxu1 %v950_v6  ;;  %v968_v18 = vld [vmem:[%s1403_s1 + $0x40] ss:$8 sps:$4 sm:$0xff]   ;;  %v970_v20 = vld [vmem:[%s1403_s1 + $0x54] ss:$8 sps:$4 sm:$0xff]   ;;  %v974_v22 = vld [vmem:[%s1403_s1 + $0x50] ss:$8 sps:$4 sm:$0xff]  }
   0x8   :  { %557 = vmatpush1.bf16.msra.mxu0 %v951_v7  ;;  %517 = vmatprep.subr.bf16.mxu1 %v952_v8  ;;  %v969_v19 = vld [vmem:[%s1403_s1 + $0x140] ss:$8 sps:$4 sm:$0xff]   ;;  %v972_v21 = vld [vmem:[%s1403_s1 + $0x154] ss:$8 sps:$4 sm:$0xff]   ;;  %v975_v23 = vld [vmem:[%s1403_s1 + $0x150] ss:$8 sps:$4 sm:$0xff]  }
   0x9   :  { %558 = vmatprep.subr.bf16.mxu0 %v954_v9  ;;  %v976_v24 = vld [vmem:[%s1403_s1 + $0x64] ss:$8 sps:$4 sm:$0xff]   ;;  %v980_v26 = vld [vmem:[%s1403_s1 + $0x60] ss:$8 sps:$4 sm:$0xff]   ;;  %v982_v28 = vld [vmem:[%s1403_s1 + $0x74] ss:$8 sps:$4 sm:$0xff]  }
   0xa   :  { %v978_v25 = vld [vmem:[%s1403_s1 + $0x164] ss:$8 sps:$4 sm:$0xff]   ;;  %v981_v27 = vld [vmem:[%s1403_s1 + $0x160] ss:$8 sps:$4 sm:$0xff]   ;;  %v984_v29 = vld [vmem:[%s1403_s1 + $0x174] ss:$8 sps:$4 sm:$0xff]  }
   0xb   :  { %518 = vmatpush1.bf16.msra.mxu1 %v956_v10  ;;  %v986_v30 = vld [vmem:[%s1403_s1 + $0x70] ss:$8 sps:$4 sm:$0xff]   ;;  %v988_v32 = vld [vmem:[%s1403_s1 + $0x84] ss:$8 sps:$4 sm:$0xff]   ;;  %v992_v34 = vld [vmem:[%s1403_s1 + $0x80] ss:$8 sps:$4 sm:$0xff]  }
   0xc   :  { %559 = vmatpush1.bf16.msra.mxu0 %v957_v11  ;;  %519 = vmatprep.subr.bf16.mxu1 %v958_v12  ;;  %v987_v31 = vld [vmem:[%s1403_s1 + $0x170] ss:$8 sps:$4 sm:$0xff]   ;;  %v990_v33 = vld [vmem:[%s1403_s1 + $0x184] ss:$8 sps:$4 sm:$0xff]   ;;  %v993_v35 = vld [vmem:[%s1403_s1 + $0x180] ss:$8 sps:$4 sm:$0xff]  }
   0xd   :  { %560 = vmatprep.subr.bf16.mxu0 %v960_v13  ;;  %v994_v36 = vld [vmem:[%s1403_s1 + $0x94] ss:$8 sps:$4 sm:$0xff]   ;;  %v998_v39 = vld [vmem:[%s1403_s1 + $0x90] ss:$8 sps:$4 sm:$0xff]   ;;  %v1000_v41 = vld [vmem:[%s1403_s1 + $0xa4] ss:$8 sps:$4 sm:$0xff]  }
   0xe   :  { %v996_v37 = vld [vmem:[%s1403_s1 + $0x194] ss:$8 sps:$4 sm:$0xff]   ;;  %v999_v40 = vld [vmem:[%s1403_s1 + $0x190] ss:$8 sps:$4 sm:$0xff]   ;;  %v1002_v42 = vld [vmem:[%s1403_s1 + $0x1a4] ss:$8 sps:$4 sm:$0xff]  }
   0xf   :  { %520 = vmatpush1.bf16.msra.mxu1 %v962_v14  ;;  %v1245_v43 = vshrl.u32 %v36_v38, 7  ;;  %v1004_v44 = vld [vmem:[%s1403_s1 + $0xa0] ss:$8 sps:$4 sm:$0xff]   ;;  %v1006_v46 = vld [vmem:[%s1403_s1 + $0xb4] ss:$8 sps:$4 sm:$0xff]  }
  0x10   :  { %561 = vmatpush1.bf16.msra.mxu0 %v963_v15  ;;  %521 = vmatprep.subr.bf16.mxu1 %v964_v16  ;;  %v1005_v45 = vld [vmem:[%s1403_s1 + $0x1a0] ss:$8 sps:$4 sm:$0xff]   ;;  %v1008_v47 = vld [vmem:[%s1403_s1 + $0x1b4] ss:$8 sps:$4 sm:$0xff]   ;;  %v1010_v49 = vld [vmem:[%s1403_s1 + $0xb0] ss:$8 sps:$4 sm:$0xff]  }
  0x11   :  { %562 = vmatprep.subr.bf16.mxu0 %v966_v17  ;;  %v42_v48 = vsub.s32 2, %v1245_v43  ;;  %v910_v50 = vld [vmem:[%s1402_s0] sm:$0xff]   ;;  %v50_v51 = vsub.s32 6, %v1245_v43  ;;  %v1268_v52 = vsub.s32 0, %v1245_v43  ;;  %v46_v53 = vsub.s32 4, %v1245_v43 }
  0x12   :  { %v1011_v54 = vld [vmem:[%s1403_s1 + $0x1b0] ss:$8 sps:$4 sm:$0xff]   ;;  %v911_v55 = vunpack.c.l.bf16 %v910_v50  ;;  %v912_v56 = vunpack.c.h.bf16 %v910_v50  ;;  %v1012_v57 = vld [vmem:[%s1403_s1 + $0xc4] ss:$8 sps:$4 sm:$0xff]   ;;  %v1016_v62 = vld [vmem:[%s1403_s1 + $0xc0] ss:$8 sps:$4 sm:$0xff]  }
  0x13   :  { %522 = vmatpush1.bf16.msra.mxu1 %v968_v18  ;;  %v1014_v58 = vld [vmem:[%s1403_s1 + $0x1c4] ss:$8 sps:$4 sm:$0xff]   ;;  %v1017_v2 = vld [vmem:[%s1403_s1 + $0x1c0] ss:$8 sps:$4 sm:$0xff]   ;;  %v1018_v7 = vld [vmem:[%s1403_s1 + $0xd4] ss:$8 sps:$4 sm:$0xff]  }
  0x14   :  { %563 = vmatpush1.bf16.msra.mxu0 %v969_v19  ;;  %523 = vmatprep.subr.bf16.mxu1 %v970_v20  ;;  %v43_v59 = vrot.slane %v911_v55, %v42_v48  ;;  %v59_v60 = vrot.slane %v912_v56, %v42_v48  ;;  %v51_v61 = vrot.slane %v911_v55, %v50_v51  ;;  %v1020_v11 = vld [vmem:[%s1403_s1 + $0x1d4] ss:$8 sps:$4 sm:$0xff]   ;;  %v1022_v14 = vld [vmem:[%s1403_s1 + $0xd0] ss:$8 sps:$4 sm:$0xff]   ;;  %v1024_v19 = vld [vmem:[%s1403_s1 + $0xe4] ss:$8 sps:$4 sm:$0xff]  }
  0x15   :  { %564 = vmatprep.subr.bf16.mxu0 %v972_v21  ;;  %v67_v63 = vrot.slane %v912_v56, %v50_v51  ;;  %v39_v0 = vrot.slane %v911_v55, %v1268_v52  ;;  %v55_v1 = vrot.slane %v912_v56, %v1268_v52  ;;  %v63_v6 = vrot.slane %v912_v56, %v46_v53  ;;  %v1023_v15 = vld [vmem:[%s1403_s1 + $0x1d0] ss:$8 sps:$4 sm:$0xff]  }
  0x16   :  { %v77_v3 = vpack.c.bf16 %v43_v59, %v43_v59  ;;  %v81_v4 = vpack.c.bf16 %v59_v60, %v59_v60  ;;  %v79_v5 = vpack.c.bf16 %v51_v61, %v51_v61  ;;  %v47_v10 = vrot.slane %v911_v55, %v46_v53 }
  0x17   :  { %524 = vmatpush1.bf16.msra.mxu1 %v974_v22  ;;  %v83_v8 = vpack.c.bf16 %v67_v63, %v67_v63  ;;  %v80_v9 = vpack.c.bf16 %v55_v1, %v55_v1  ;;  %v82_v18 = vpack.c.bf16 %v63_v6, %v63_v6 }
  0x18   :  { %565 = vmatpush1.bf16.msra.mxu0 %v975_v23  ;;  %525 = vmatprep.subr.bf16.mxu1 %v976_v24  ;;  %v169_v12 = vunpack.c.l.b16 %v77_v3  ;;  %v173_v13 = vunpack.c.l.b16 %v81_v4  ;;  %v171_v16 = vunpack.c.l.b16 %v79_v5  ;;  %v76_v23 = vpack.c.bf16 %v39_v0, %v39_v0 }
  0x19   :  { %566 = vmatprep.subr.bf16.mxu0 %v978_v25  ;;  %v175_v17 = vunpack.c.l.b16 %v83_v8  ;;  %v172_v21 = vunpack.c.l.b16 %v80_v9  ;;  %v78_v24 = vpack.c.bf16 %v47_v10, %v47_v10  ;;  %v174_v25 = vunpack.c.l.b16 %v82_v18 }
  0x1a   :  { %v179_v20 = vrot.slane %v173_v13, 7 }
  0x1b   :  { %526 = vmatpush1.bf16.msra.mxu1 %v980_v26  ;;  %v183_v22 = vrot.slane %v175_v17, 7  ;;  %v1026_v26 = vld [vmem:[%s1403_s1 + $0x1e4] ss:$8 sps:$4 sm:$0xff]   ;;  %v170_v38 = vunpack.c.l.b16 %v78_v24 }
  0x1c   :  { %567 = vmatpush1.bf16.msra.mxu0 %v981_v27  ;;  %527 = vmatprep.subr.bf16.mxu1 %v982_v28  ;;  %v180_v27 = vsel %vm177_vm0, %v179_v20, %v169_v12  ;;  %v1028_v28 = vld [vmem:[%s1403_s1 + $0xe0] ss:$8 sps:$4 sm:$0xff]  }
  0x1d   :  { %568 = vmatprep.subr.bf16.mxu0 %v984_v29  ;;  %v1029_v29 = vld [vmem:[%s1403_s1 + $0x1e0] ss:$8 sps:$4 sm:$0xff]  }
  0x1f   :  { %528 = vmatpush1.bf16.msra.mxu1 %v986_v30  ;;  %v186_v30 = vpack.c.b16 %v180_v27, %v180_v27 }
  0x20   :  { %569 = vmatpush1.bf16.msra.mxu0 %v987_v31  ;;  %529 = vmatprep.subr.bf16.mxu1 %v988_v32  ;;  %v184_v31 = vsel %vm177_vm0, %v183_v22, %v171_v16  ;;  %v1030_v32 = vld [vmem:[%s1403_s1 + $0xf4] ss:$8 sps:$4 sm:$0xff]  }
  0x21   :  { %570 = vmatprep.subr.bf16.mxu0 %v990_v33  ;;  %v1032_v33 = vld [vmem:[%s1403_s1 + $0x1f4] ss:$8 sps:$4 sm:$0xff]   ;;  %545 = vmatprep.mubr.bf16.mxu1 %v186_v30 }
  0x23   :  { %530 = vmatpush1.bf16.msra.mxu1 %v992_v34  ;;  %v188_v34 = vpack.c.b16 %v184_v31, %v184_v31 }
  0x24   :  { %571 = vmatpush1.bf16.msra.mxu0 %v993_v35  ;;  %531 = vmatprep.subr.bf16.mxu1 %v994_v36  ;;  %v176_v35 = vrot.slane %v172_v21, 7  ;;  %v181_v36 = vrot.slane %v174_v25, 7 }
  0x25   :  { %572 = vmatprep.subr.bf16.mxu0 %v996_v37  ;;  %v168_v37 = vunpack.c.l.b16 %v76_v23  ;;  %586 = vmatprep.mubr.bf16.mxu0 %v188_v34 }
  0x27   :  { %532 = vmatpush1.bf16.msra.mxu1 %v998_v39 }
  0x28   :  { %573 = vmatpush1.bf16.msra.mxu0 %v999_v40  ;;  %533 = vmatprep.subr.bf16.mxu1 %v1000_v41 }
  0x29   :  { %574 = vmatprep.subr.bf16.mxu0 %v1002_v42 }
  0x2b   :  { %534 = vmatpush1.bf16.msra.mxu1 %v1004_v44 }
  0x2c   :  { %575 = vmatpush1.bf16.msra.mxu0 %v1005_v45  ;;  %535 = vmatprep.subr.bf16.mxu1 %v1006_v46 }
  0x2d   :  { %576 = vmatprep.subr.bf16.mxu0 %v1008_v47 }
  0x2f   :  { %536 = vmatpush1.bf16.msra.mxu1 %v1010_v49 }
  0x30   :  { %577 = vmatpush1.bf16.msra.mxu0 %v1011_v54  ;;  %537 = vmatprep.subr.bf16.mxu1 %v1012_v57 }
  0x31   :  { %578 = vmatprep.subr.bf16.mxu0 %v1014_v58 }
  0x33   :  { %538 = vmatpush1.bf16.msra.mxu1 %v1016_v62 }
  0x34   :  { %579 = vmatpush1.bf16.msra.mxu0 %v1017_v2  ;;  %539 = vmatprep.subr.bf16.mxu1 %v1018_v7 }
  0x35   :  { %580 = vmatprep.subr.bf16.mxu0 %v1020_v11 }
  0x37   :  { %540 = vmatpush1.bf16.msra.mxu1 %v1022_v14 }
  0x38   :  { %581 = vmatpush1.bf16.msra.mxu0 %v1023_v15  ;;  %541 = vmatprep.subr.bf16.mxu1 %v1024_v19 }
  0x39   :  { %582 = vmatprep.subr.bf16.mxu0 %v1026_v26 }
  0x3a   :  { %12 = vsyncpa [#allocation3], 0  ;;  %v1034_v39 = vld [vmem:[%s1403_s1 + $0xf0] ss:$8 sps:$4 sm:$0xff]   ;;  %v178_v41 = vsel %vm177_vm0, %v176_v35, %v168_v37  ;;  %v182_v42 = vsel %vm177_vm0, %v181_v36, %v170_v38  ;;  %v1036_v44 = vld [vmem:[%s1405_s3 + $0x40] sm:$0xff]   ;;  %v156_v0 = vsub.s32 1, %v1245_v43 }
  0x3b   :  { %542 = vmatpush1.bf16.msra.mxu1 %v1028_v28  ;;  %v1035_v40 = vld [vmem:[%s1403_s1 + $0x1f0] ss:$8 sps:$4 sm:$0xff]   ;;  %v185_v45 = vpack.c.b16 %v178_v41, %v178_v41  ;;  %v187_v46 = vpack.c.b16 %v182_v42, %v182_v42  ;;  %v1037_v47 = vld [vmem:[%s1405_s3] sm:$0xff]   ;;  %v1038_v48 = vld [vmem:[%s1405_s3 + $0x48] sm:$0xff]   ;;  %vm772_vm1 = vcmask 1041408   ;;  %s1078_s25 = smov [#allocation2]  }
  0x3c   :  { %583 = vmatpush1.bf16.msra.mxu0 %v1029_v29  ;;  %543 = vmatprep.subr.bf16.mxu1 %v1030_v32  ;;  %v1039_v49 = vld [vmem:[%s1405_s3 + $0x8] sm:$0xff]   ;;  %v1040_v50 = vld [vmem:[%s1405_s3 + $0x50] sm:$0xff]   ;;  %v1042_v53 = vld [vmem:[%s1405_s3 + $0x58] sm:$0xff]   ;;  %s818_s26 = sshll.u32 %s1078_s25, 4  ;;  %s819_s26 = int_to_ptr.vmem [resolvable:$true] %s818_s26 }
  0x3d   :  { %584 = vmatprep.subr.bf16.mxu0 %v1032_v33  ;;  %v1041_v51 = vld [vmem:[%s1405_s3 + $0x10] sm:$0xff]   ;;  %v1043_v54 = vld [vmem:[%s1405_s3 + $0x18] sm:$0xff]   ;;  %v1044_v55 = vld [vmem:[%s1405_s3 + $0x60] sm:$0xff]   ;;  %s1054_s27 = scalar_lea.vmem %s819_s26, 32  ;;  %p1059_p1 = scmp.lt.s32.totalorder %s819_s26, %s819_s26 }
  0x3e   :  { %v1045_v56 = vld [vmem:[%s1405_s3 + $0x20] sm:$0xff]   ;;  %v1046_v57 = vld [vmem:[%s1405_s3 + $0x68] sm:$0xff]   ;;  %v1048_v59 = vld [vmem:[%s1405_s3 + $0x70] sm:$0xff]   ;;  %p1055_p0 = scmp.ne.s32.totalorder %s819_s26, %s1054_s27  ;;  %p1060_p2 = scmp.lt.s32.totalorder %s1054_s27, %s1054_s27 }
  0x3f   :  { %544 = vmatpush1.bf16.msra.mxu1 %v1034_v39  ;;  %v1047_v58 = vld [vmem:[%s1405_s3 + $0x28] sm:$0xff]   ;;  %v1049_v60 = vld [vmem:[%s1405_s3 + $0x30] sm:$0xff]   ;;  %v1050_v61 = vld [vmem:[%s1405_s3 + $0x78] sm:$0xff]  }
  0x40   :  { %585 = vmatpush1.bf16.msra.mxu0 %v1035_v40  ;;  %913 = vmatprep.subr.bf16.mxu1 %v1036_v44  ;;  %v1051_v62 = vld [vmem:[%s1405_s3 + $0x38] sm:$0xff]   ;;  %v148_v63 = vld [vmem:[%s1404_s2] sm:$0x3]  ;;  %p1061_p3 = por %p1060_p2, %p1059_p1 }
  0x41   :  { %v153_v1 = vrot.slane %v148_v63, %v1268_v52  ;;  %v157_v2 = vrot.slane %v148_v63, %v156_v0  ;;  %v890_v52 = vld [vmem:[%s1406_s4] ss:$0 sm:$0xff] }
  0x42   :  { %546 = vmatmul.mubr.bf16.vlgmr.msra.gmra.mrb[0].mxu1 %v185_v45  ;;  %v907_v42 = vld [vmem:[%s1407_s5] ss:$0 sm:$0xff]  ;;  %p1062_p4 = pnand %p1061_p3, %p1055_p0 }
  0x43   :  { %587 = vmatmul.mubr.bf16.vlgmr.msra.gmra.mrb[0].mxu0 %v187_v46  ;;  %914 = vmatpush3.bf16.msra.mxu1 %v1037_v47  ;;  %v908_v45 = vld [vmem:[%s1408_s6] ss:$0 sm:$0xff] }
  0x44   :  { %915 = vmatprep.subr.bf16.mxu1 %v1038_v48 }
  0x47   :  { %916 = vmatpush3.bf16.msra.mxu1 %v1039_v49 }
  0x48   :  { %917 = vmatprep.subr.bf16.mxu1 %v1040_v50 }
  0x4b   :  { %918 = vmatpush3.bf16.msra.mxu1 %v1041_v51 }
  0x4c   :  { %919 = vmatprep.subr.bf16.mxu1 %v1042_v53 }
  0x4f   :  { %920 = vmatpush3.bf16.msra.mxu1 %v1043_v54 }
  0x50   :  { %921 = vmatprep.subr.bf16.mxu1 %v1044_v55 }
  0x53   :  { %922 = vmatpush3.bf16.msra.mxu1 %v1045_v56 }
  0x54   :  { %923 = vmatprep.subr.bf16.mxu1 %v1046_v57 }
  0x57   :  { %924 = vmatpush3.bf16.msra.mxu1 %v1047_v58 }
  0x58   :  { %925 = vmatprep.subr.bf16.mxu1 %v1048_v59 }
  0x5b   :  { %926 = vmatpush3.bf16.msra.mxu1 %v1049_v60 }
  0x5c   :  { %927 = vmatprep.subr.bf16.mxu1 %v1050_v61 }
  0x5f   :  { %928 = vmatpush3.bf16.msra.mxu1 %v1051_v62 }
 0x115   :  { %v547_v3 = vpop.f32.mrb[0].mxu1 }
 0x116   :  { %v588_v4 = vpop.f32.mrb[0].mxu0  ;;  %v548_v5 = vadd.f32 %v547_v3, %v153_v1  ;;  %v549_v6 = vpop.f32.mrb[1].mxu1 }
 0x117   :  { %v590_v7 = vpop.f32.mrb[1].mxu0  ;;  %v550_v8 = vadd.f32 %v549_v6, %v157_v2  ;;  %v551_v9 = vpop.f32.mrb[2].mxu1 }
 0x118   :  { %v592_v10 = vpop.f32.mrb[2].mxu0  ;;  %v589_v11 = vadd.f32 %v588_v4, %v548_v5  ;;  %v552_v12 = vpop.f32.mrb[3].mxu1 }
 0x119   :  { %v593_v13 = vpop.f32.mrb[3].mxu0  ;;  %v591_v14 = vadd.f32 %v590_v7, %v550_v8 }
 0x11a   :  { %v595_v16 = vpack.c.bf16 %v589_v11, %v589_v11 }
 0x11b   :  { %v596_v15 = vpack.c.bf16 %v591_v14, %v591_v14 }
 0x11d   :  { %764 = vmatprep.mubr.bf16.mxu1 %v596_v15 }
 0x11e   :  { %765 = vmatmul.mubr.bf16.vlgmr.msra.gmra.mrb[4].mxu1 %v595_v16 }
 0x1f1   :  { %v929_v43 = vpop.f32.mrb[4].mxu1 }
 0x1f2   :  { %v930_v17 = vpop.f32.mrb[5].mxu1 }
 0x1f3   :  { %v931_v18 = vadd.f32 %v930_v17, %v929_v43  ;;  %v932_v19 = vpop.f32.mrb[6].mxu1 }
 0x1f4   :  { %v933_v20 = vpop.f32.mrb[7].mxu1 }
 0x1f5   :  { %v767_v21 = vadd.f32 %v931_v18, %v890_v52 }
 0x1f7   :  { %v773_v22 = vsel %vm772_vm1, %v767_v21, 0.0 }
 0x1f8   :  { %v774_v23 = vrot.slane %v773_v22, 4 }
 0x1fa   :  { %v775_v24 = vadd.f32 %v774_v23, %v773_v22 }
 0x1fc   :  { %v776_v25 = vrot.slane %v775_v24, 2 }
 0x1fe   :  { %v777_v26 = vadd.f32 %v776_v25, %v775_v24 }
 0x200   :  { %v778_v27 = vrot.slane %v777_v26, 1 }
 0x202   :  { %v779_v28 = vadd.f32 %v778_v27, %v777_v26 }
 0x204   :  { %v781_v29 = vmul.f32 0.5, %v779_v28 }
 0x206   :  { %v782_v30 = vsub.f32 %v767_v21, %v781_v29 }
 0x208   :  { %v783_v31 = vmul.f32 %v782_v30, %v782_v30 }
 0x20a   :  { %v784_v32 = vsel %vm772_vm1, %v783_v31, 0.0 }
 0x20b   :  { %v785_v33 = vrot.slane %v784_v32, 4 }
 0x20d   :  { %v786_v34 = vadd.f32 %v785_v33, %v784_v32 }
 0x20f   :  { %v787_v35 = vrot.slane %v786_v34, 2 }
 0x211   :  { %v788_v36 = vadd.f32 %v787_v35, %v786_v34 }
 0x213   :  { %v789_v37 = vrot.slane %v788_v36, 1 }
 0x215   :  { %v790_v38 = vadd.f32 %v789_v37, %v788_v36 }
 0x217   :  { %v791_v39 = vmul.f32 0.5, %v790_v38 }
 0x219   :  { %v793_v40 = vadd.f32 1e-05, %v791_v39 }
 0x21b   :  { %1052 = vrsqrt.f32 %v793_v40 }
 0x225   :  { %v1053_v41 = vpop.eup %1052 }
 0x226   :  { %v795_v44 = vmul.f32 %v1053_v41, %v782_v30 }
 0x228   :  { %v802_v46 = vmul.f32 %v907_v42, %v795_v44 }
 0x22a   :  { %v810_v47 = vadd.f32 %v908_v45, %v802_v46 }
 0x22c   :  { %811 = vst [vmem:[#allocation2] sm:$0x3] %v810_v47 }
 0x22d   :  { %1065 = shalt.err (!%p1062_p4)
}
 0x22e   :  { %s1066_s29 = scalar_lea.hbm %s1409_s7, 32 }
 0x22f   :  { %p1067_p5 = scmp.ne.s32.totalorder %s1409_s7, %s1066_s29  ;;  %p1070_p6 = scmp.lt.u32.totalorder %s1066_s29, %s1409_s7 }
 0x231   :  { %p1072_p7 = pnand %p1070_p6, %p1067_p5 }
 0x233   :  { %1075 = shalt.err (!%p1072_p7)
}
 0x234   :  { %821 = dma.vmem_to_hbm [thread:$0]  %s819_s26, 32, %s1409_s7, [#allocation3]  }
 0x235   :  { %1076 = dma.done.wait [#allocation3], 32  }
 0x236   :  { %1077 = vsyncadd [#allocation3], 4294967264 }
 0x237   :  { %825 = vsyncpa [#allocation3], 1 }

</bundles_post_ra>
